<compile_context>
chip_gen: v7x
topology: tpu7x:2x2x1
jax: 0.10.0
libtpu: 0.0.40
codegen_flags: <defaults>
</compile_context>

<pallas_src>
import math
import functools

import jax
import jax.numpy as jnp
from jax.experimental import pallas as pl
from jax.experimental.pallas import tpu as pltpu

EMBED_DIM = 32
NUM_HEADS = 4
FFN_DIM = 64
NUM_LEVELS = 4
NUM_ENC_LAYERS = 2
NUM_DEC_LAYERS = 2
NUM_QUERIES = 10


# ----------------------------------------------------------------------------
# In-kernel helpers (traced inline inside the fused kernel)
# ----------------------------------------------------------------------------
def _layer_norm_2d(x, g, b, eps=1e-5):
    mu = jnp.mean(x, axis=-1, keepdims=True)
    var = jnp.mean((x - mu) ** 2, axis=-1, keepdims=True)
    return (x - mu) * jax.lax.rsqrt(var + eps) * g + b


def _dot_nt(a, b):
    # (M, D) x (N, D) -> (M, N), contraction over the last dim of both.
    return jax.lax.dot_general(a, b, (((1,), (1,)), ((), ())),
                               preferred_element_type=jnp.float32)


def _mha_2d(q, k, v, w_o, b_o, neg_bias, num_heads, scale):
    """Multi-head attention on 2-D tiles with one merged output projection.

    q: (Lq, C) projected queries, k/v: (Lk, C) projected keys/values,
    w_o: (C, C), b_o: (1, C), neg_bias: (Lq, Lk) additive mask (hoisted,
    pre-broadcast) or None.
    """
    C = q.shape[-1]
    D = C // num_heads
    heads = []
    for h in range(num_heads):
        qh = q[:, h * D:(h + 1) * D]
        kh = k[:, h * D:(h + 1) * D]
        vh = v[:, h * D:(h + 1) * D]
        s = _dot_nt(qh, kh) * scale                       # (Lq, Lk)
        if neg_bias is not None:
            s = s + neg_bias                              # hoisted mask bias
        m = jnp.max(s, axis=-1, keepdims=True)
        p = jnp.exp(s - m)
        p = p / jnp.sum(p, axis=-1, keepdims=True)        # exact divide
        heads.append(jnp.dot(p, vh, preferred_element_type=jnp.float32))
    # merged output projection: one (Lq, C) x (C, C) matmul
    o = jnp.concatenate(heads, axis=-1)                   # (Lq, C)
    return jnp.dot(o, w_o, preferred_element_type=jnp.float32) + b_o


# ----------------------------------------------------------------------------
# Fused encoder+decoder kernel: grid = (batch, num_enc_layers + num_dec_layers)
# ----------------------------------------------------------------------------
def _fused_transformer_kernel(
        # per-batch activations / masks
        feat_ref, pos_ref, maskf_ref, q_ref, qpos_ref,
        # reference-point projection
        ref_w_ref, ref_b_ref,
        # encoder stacked weights (LE, ...)
        e_wqkv, e_bqkv, e_wo, e_bo, e_ln1g, e_ln1b,
        e_w1, e_b1, e_w2, e_b2, e_ln2g, e_ln2b,
        # decoder stacked weights (LD, ...)
        d_sa_wqkv, d_sa_bqkv, d_sa_wo, d_sa_bo, d_ln1g, d_ln1b,
        d_ca_wq, d_ca_bq, d_ca_wkv, d_ca_bkv, d_ca_wo, d_ca_bo,
        d_ln2g, d_ln2b, d_w1, d_b1, d_w2, d_b2, d_ln3g, d_ln3b,
        # outputs
        inter_ref, refpts_ref,
        # VMEM scratch (carried across the layer sweep of one batch element)
        mem_ref, dec_ref,
        *, num_heads, num_enc_layers, num_queries):
    l = pl.program_id(1)
    Sp = feat_ref.shape[1]
    NQp = q_ref.shape[1]
    C = feat_ref.shape[-1]
    scale = 1.0 / math.sqrt(C // num_heads)

    # ---------------- encoder phase -----------------------------------------
    @pl.when(l == 0)
    def _init_encoder():
        mem_ref[...] = feat_ref[0]

    @pl.when(l < num_enc_layers)
    def _encoder_layer():
        le = l                                           # encoder layer index
        x = mem_ref[...]                                 # (Sp, C) carried act.
        pos = pos_ref[0]                                 # (Sp, C)
        # hoisted, pre-broadcast additive key-padding mask (1.0 = padded)
        neg = jnp.broadcast_to(maskf_ref[0] * (-1e9), (Sp, Sp))

        w_qkv = e_wqkv[le]                               # (C, 3C)
        b_qkv = e_bqkv[le]                               # (1, 3C)
        xp = x + pos                                     # q/k carry pos embed
        qk = jnp.dot(xp, w_qkv[:, :2 * C],
                     preferred_element_type=jnp.float32) + b_qkv[:, :2 * C]
        v = jnp.dot(x, w_qkv[:, 2 * C:],
                    preferred_element_type=jnp.float32) + b_qkv[:, 2 * C:]
        attn = _mha_2d(qk[:, :C], qk[:, C:], v, e_wo[le], e_bo[le],
                       neg, num_heads, scale)
        x1 = _layer_norm_2d(x + attn, e_ln1g[le], e_ln1b[le])

        h = jnp.maximum(jnp.dot(x1, e_w1[le],
                                preferred_element_type=jnp.float32)
                        + e_b1[le], 0.0)
        h = jnp.dot(h, e_w2[le],
                    preferred_element_type=jnp.float32) + e_b2[le]
        mem_ref[...] = _layer_norm_2d(x1 + h, e_ln2g[le], e_ln2b[le])

    # ---------------- decoder phase ------------------------------------------
    @pl.when(l == num_enc_layers)
    def _init_decoder():
        dec_ref[...] = q_ref[0]
        # reference_points = sigmoid(Linear(query_pos))  (fused, once)
        r = jax.nn.sigmoid(
            jnp.dot(qpos_ref[0], ref_w_ref[...],
                    preferred_element_type=jnp.float32) + ref_b_ref[...])
        refpts_ref[0] = r.astype(refpts_ref.dtype)

    @pl.when(l >= num_enc_layers)
    def _decoder_layer():
        ld = l - num_enc_layers                          # decoder layer index
        x = dec_ref[...]                                 # (NQp, C) carried act.
        qp = qpos_ref[0]                                 # (NQp, C)
        mem = mem_ref[...]                               # (Sp, C) enc. memory

        # padded queries (>= num_queries) masked as self-attention keys
        q_ids = jax.lax.broadcasted_iota(jnp.int32, (1, NQp), 1)
        neg_self = jnp.broadcast_to(
            jnp.where(q_ids >= num_queries, -1e9, 0.0).astype(jnp.float32),
            (NQp, NQp))
        neg_cross = jnp.broadcast_to(maskf_ref[0] * (-1e9), (NQp, Sp))

        # ---- self-attention: q = k = x + query_pos, v = x -------------------
        sa_wqkv = d_sa_wqkv[ld]
        sa_bqkv = d_sa_bqkv[ld]
        xq = x + qp
        qk = jnp.dot(xq, sa_wqkv[:, :2 * C],
                     preferred_element_type=jnp.float32) + sa_bqkv[:, :2 * C]
        v = jnp.dot(x, sa_wqkv[:, 2 * C:],
                    preferred_element_type=jnp.float32) + sa_bqkv[:, 2 * C:]
        sa = _mha_2d(qk[:, :C], qk[:, C:], v, d_sa_wo[ld], d_sa_bo[ld],
                     neg_self, num_heads, scale)
        x1 = _layer_norm_2d(x + sa, d_ln1g[ld], d_ln1b[ld])

        # ---- cross-attention: q = x1 + query_pos, k = v = memory ------------
        q2 = jnp.dot(x1 + qp, d_ca_wq[ld],
                     preferred_element_type=jnp.float32) + d_ca_bq[ld]
        kv = jnp.dot(mem, d_ca_wkv[ld],
                     preferred_element_type=jnp.float32) + d_ca_bkv[ld]
        ca = _mha_2d(q2, kv[:, :C], kv[:, C:], d_ca_wo[ld], d_ca_bo[ld],
                     neg_cross, num_heads, scale)
        x2 = _layer_norm_2d(x1 + ca, d_ln2g[ld], d_ln2b[ld])

        # ---- FFN -------------------------------------------------------------
        h = jnp.maximum(jnp.dot(x2, d_w1[ld],
                                preferred_element_type=jnp.float32)
                        + d_b1[ld], 0.0)
        h = jnp.dot(h, d_w2[ld],
                    preferred_element_type=jnp.float32) + d_b2[ld]
        x3 = _layer_norm_2d(x2 + h, d_ln3g[ld], d_ln3b[ld])

        dec_ref[...] = x3
        inter_ref[0, 0] = x3.astype(inter_ref.dtype)


def _fused_forward(params, feat_pad, pos_pad, maskf, query, query_pos):
    B, Sp, C = feat_pad.shape
    NQp = query.shape[1]
    enc = params["encoder"]
    dec = params["decoder"]
    LE = enc["w_qkv"].shape[0]
    LD = dec["sa_wqkv"].shape[0]
    F = enc["ffn_w1"].shape[-1]
    L_total = LE + LD

    bmap3 = lambda b, l: (b, 0, 0)          # per-batch block, constant along l
    const2 = lambda b, l: (0, 0)            # whole array, one DMA total
    const3 = lambda b, l: (0, 0, 0)         # whole stacked weight, one DMA

    in_specs = [
        pl.BlockSpec((1, Sp, C), bmap3),            # feat
        pl.BlockSpec((1, Sp, C), bmap3),            # lvl pos embed
        pl.BlockSpec((1, 1, Sp), bmap3),            # key padding mask (float)
        pl.BlockSpec((1, NQp, C), bmap3),           # query (init)
        pl.BlockSpec((1, NQp, C), bmap3),           # query_pos
        pl.BlockSpec((C, 2), const2),               # reference-point weight
        pl.BlockSpec((1, 2), const2),               # reference-point bias
        # encoder weights: whole (LE, ...) blocks, VMEM-resident for all steps
        pl.BlockSpec((LE, C, 3 * C), const3),       # w_qkv
        pl.BlockSpec((LE, 1, 3 * C), const3),       # b_qkv
        pl.BlockSpec((LE, C, C), const3),           # w_o
        pl.BlockSpec((LE, 1, C), const3),           # b_o
        pl.BlockSpec((LE, 1, C), const3),           # ln1_g
        pl.BlockSpec((LE, 1, C), const3),           # ln1_b
        pl.BlockSpec((LE, C, F), const3),           # ffn_w1
        pl.BlockSpec((LE, 1, F), const3),           # ffn_b1
        pl.BlockSpec((LE, F, C), const3),           # ffn_w2
        pl.BlockSpec((LE, 1, C), const3),           # ffn_b2
        pl.BlockSpec((LE, 1, C), const3),           # ln2_g
        pl.BlockSpec((LE, 1, C), const3),           # ln2_b
        # decoder weights: whole (LD, ...) blocks, VMEM-resident for all steps
        pl.BlockSpec((LD, C, 3 * C), const3),       # sa_wqkv
        pl.BlockSpec((LD, 1, 3 * C), const3),       # sa_bqkv
        pl.BlockSpec((LD, C, C), const3),           # sa_wo
        pl.BlockSpec((LD, 1, C), const3),           # sa_bo
        pl.BlockSpec((LD, 1, C), const3),           # ln1_g
        pl.BlockSpec((LD, 1, C), const3),           # ln1_b
        pl.BlockSpec((LD, C, C), const3),           # ca_wq
        pl.BlockSpec((LD, 1, C), const3),           # ca_bq
        pl.BlockSpec((LD, C, 2 * C), const3),       # ca_wkv
        pl.BlockSpec((LD, 1, 2 * C), const3),       # ca_bkv
        pl.BlockSpec((LD, C, C), const3),           # ca_wo
        pl.BlockSpec((LD, 1, C), const3),           # ca_bo
        pl.BlockSpec((LD, 1, C), const3),           # ln2_g
        pl.BlockSpec((LD, 1, C), const3),           # ln2_b
        pl.BlockSpec((LD, C, F), const3),           # ffn_w1
        pl.BlockSpec((LD, 1, F), const3),           # ffn_b1
        pl.BlockSpec((LD, F, C), const3),           # ffn_w2
        pl.BlockSpec((LD, 1, C), const3),           # ffn_b2
        pl.BlockSpec((LD, 1, C), const3),           # ln3_g
        pl.BlockSpec((LD, 1, C), const3),           # ln3_b
    ]
    out_specs = [
        # intermediate decoder states; block index only advances in the decoder
        # phase (encoder steps never write this buffer).
        pl.BlockSpec((1, 1, NQp, C),
                     lambda b, l: (jnp.maximum(l - LE, 0), b, 0, 0)),
        pl.BlockSpec((1, NQp, 2), bmap3),           # reference points
    ]
    out_shape = [
        jax.ShapeDtypeStruct((LD, B, NQp, C), jnp.float32),
        jax.ShapeDtypeStruct((B, NQp, 2), jnp.float32),
    ]

    kernel = functools.partial(_fused_transformer_kernel,
                               num_heads=NUM_HEADS,
                               num_enc_layers=LE,
                               num_queries=NUM_QUERIES)

    inter_states, ref_points = pl.pallas_call(
        kernel,
        grid=(B, L_total),
        in_specs=in_specs,
        out_specs=out_specs,
        out_shape=out_shape,
        scratch_shapes=[pltpu.VMEM((Sp, C), jnp.float32),    # encoder memory
                        pltpu.VMEM((NQp, C), jnp.float32)],  # decoder carry
        compiler_params=pltpu.CompilerParams(
            dimension_semantics=("parallel", "arbitrary")),
    )(feat_pad, pos_pad, maskf, query, query_pos,
      params["ref_w"], params["ref_b"].reshape(1, 2),
      enc["w_qkv"], enc["b_qkv"], enc["w_o"], enc["b_o"],
      enc["ln1_g"], enc["ln1_b"],
      enc["ffn_w1"], enc["ffn_b1"], enc["ffn_w2"], enc["ffn_b2"],
      enc["ln2_g"], enc["ln2_b"],
      dec["sa_wqkv"], dec["sa_bqkv"], dec["sa_wo"], dec["sa_bo"],
      dec["ln1_g"], dec["ln1_b"],
      dec["ca_wq"], dec["ca_bq"], dec["ca_wkv"], dec["ca_bkv"],
      dec["ca_wo"], dec["ca_bo"],
      dec["ln2_g"], dec["ln2_b"],
      dec["ffn_w1"], dec["ffn_b1"], dec["ffn_w2"], dec["ffn_b2"],
      dec["ln3_g"], dec["ln3_b"])
    return inter_states, ref_points


# ----------------------------------------------------------------------------
# Parameter init (deterministic, stacked per-layer weights)
# ----------------------------------------------------------------------------
def init_params(key):
    keys = iter(jax.random.split(key, 64))
    C, F = EMBED_DIM, FFN_DIM
    LE, LD = NUM_ENC_LAYERS, NUM_DEC_LAYERS

    def xavier(shape):
        fan_in, fan_out = shape[-2], shape[-1]
        limit = math.sqrt(6.0 / (fan_in + fan_out))
        return jax.random.uniform(next(keys), shape, jnp.float32, -limit, limit)

    ones = lambda shape: jnp.ones(shape, jnp.float32)
    zeros = lambda shape: jnp.zeros(shape, jnp.float32)

    encoder = dict(
        w_qkv=xavier((LE, C, 3 * C)), b_qkv=zeros((LE, 1, 3 * C)),
        w_o=xavier((LE, C, C)), b_o=zeros((LE, 1, C)),
        ln1_g=ones((LE, 1, C)), ln1_b=zeros((LE, 1, C)),
        ffn_w1=xavier((LE, C, F)), ffn_b1=zeros((LE, 1, F)),
        ffn_w2=xavier((LE, F, C)), ffn_b2=zeros((LE, 1, C)),
        ln2_g=ones((LE, 1, C)), ln2_b=zeros((LE, 1, C)),
    )
    decoder = dict(
        sa_wqkv=xavier((LD, C, 3 * C)), sa_bqkv=zeros((LD, 1, 3 * C)),
        sa_wo=xavier((LD, C, C)), sa_bo=zeros((LD, 1, C)),
        ln1_g=ones((LD, 1, C)), ln1_b=zeros((LD, 1, C)),
        ca_wq=xavier((LD, C, C)), ca_bq=zeros((LD, 1, C)),
        ca_wkv=xavier((LD, C, 2 * C)), ca_bkv=zeros((LD, 1, 2 * C)),
        ca_wo=xavier((LD, C, C)), ca_bo=zeros((LD, 1, C)),
        ln2_g=ones((LD, 1, C)), ln2_b=zeros((LD, 1, C)),
        ffn_w1=xavier((LD, C, F)), ffn_b1=zeros((LD, 1, F)),
        ffn_w2=xavier((LD, F, C)), ffn_b2=zeros((LD, 1, C)),
        ln3_g=ones((LD, 1, C)), ln3_b=zeros((LD, 1, C)),
    )
    return dict(
        level_embeds=jax.random.normal(next(keys), (NUM_LEVELS, C), jnp.float32),
        ref_w=jax.random.normal(next(keys), (C, 2), jnp.float32)
        * math.sqrt(2.0 / (C + 2)),
        ref_b=zeros((2,)),
        encoder=encoder,
        decoder=decoder,
    )


# ----------------------------------------------------------------------------
# Glue (flatten / valid ratios / reference points) + full forward
# ----------------------------------------------------------------------------
def get_valid_ratio(mask):
    _, H, W = mask.shape
    valid_H = jnp.sum(~mask[:, :, 0], axis=1).astype(jnp.float32)
    valid_W = jnp.sum(~mask[:, 0, :], axis=1).astype(jnp.float32)
    return jnp.stack([valid_W / W, valid_H / H], axis=-1)


def get_reference_points(spatial_shapes, valid_ratios):
    ref_list = []
    for lvl, (H, W) in enumerate(spatial_shapes):
        ref_y, ref_x = jnp.meshgrid(
            jnp.linspace(0.5, H - 0.5, H, dtype=jnp.float32),
            jnp.linspace(0.5, W - 0.5, W, dtype=jnp.float32),
            indexing="ij",
        )
        ref_y = ref_y.reshape(-1)[None] / (valid_ratios[:, None, lvl, 1] * H)
        ref_x = ref_x.reshape(-1)[None] / (valid_ratios[:, None, lvl, 0] * W)
        ref_list.append(jnp.stack((ref_x, ref_y), axis=-1))
    reference_points = jnp.concatenate(ref_list, axis=1)
    return reference_points[:, :, None] * valid_ratios[:, None]


def deformable_detr_transformer_forward(params, multi_level_feats,
                                        multi_level_masks,
                                        multi_level_pos_embeds, query_embed):
    feat_list, mask_list, pos_list, spatial_shapes = [], [], [], []
    for lvl, (feat, mask, pos) in enumerate(zip(multi_level_feats,
                                                multi_level_masks,
                                                multi_level_pos_embeds)):
        bs, c, h, w = feat.shape
        spatial_shapes.append((h, w))
        feat_list.append(feat.reshape(bs, c, h * w).transpose(0, 2, 1))
        pos_t = pos.reshape(bs, c, h * w).transpose(0, 2, 1)
        # level embed add is plain jnp '+' -> fused by XLA (no kernel launch)
        pos_list.append(pos_t + params["level_embeds"][lvl][None, None, :])
        mask_list.append(mask.reshape(bs, h * w))

    feat_flat = jnp.concatenate(feat_list, axis=1)       # (B, S, C)
    pos_flat = jnp.concatenate(pos_list, axis=1)         # (B, S, C)
    mask_flat = jnp.concatenate(mask_list, axis=1)       # (B, S) bool

    B, S, C = feat_flat.shape
    Sp = ((S + 127) // 128) * 128                        # lane-dense token dim
    pad = Sp - S
    feat_pad = jnp.pad(feat_flat, ((0, 0), (0, pad), (0, 0)))
    pos_pad = jnp.pad(pos_flat, ((0, 0), (0, pad), (0, 0)))
    maskf = jnp.pad(mask_flat.astype(jnp.float32),
                    ((0, 0), (0, pad)), constant_values=1.0).reshape(B, 1, Sp)

    # bookkeeping mirrored from the PyTorch forward; only consumed by the
    # deformable sampling which is substituted here (see module TODO).
    valid_ratios = jnp.stack([get_valid_ratio(m) for m in multi_level_masks],
                             axis=1)
    enc_reference_points = get_reference_points(spatial_shapes, valid_ratios)
    hw = [h * w for h, w in spatial_shapes]
    level_start_index = jnp.concatenate(
        [jnp.zeros((1,), jnp.int32), jnp.cumsum(jnp.asarray(hw, jnp.int32))[:-1]])
    del enc_reference_points, level_start_index

    # as_two_stage == False path
    query_pos, query = jnp.split(query_embed, 2, axis=1)       # each (NQ, C)
    NQ = query.shape[0]
    NQp = ((NQ + 7) // 8) * 8                                  # 10 -> 16
    padq = NQp - NQ
    query = jnp.pad(query, ((0, padq), (0, 0)))
    query_pos = jnp.pad(query_pos, ((0, padq), (0, 0)))
    query = jnp.broadcast_to(query[None], (B, NQp, C))
    query_pos = jnp.broadcast_to(query_pos[None], (B, NQp, C))

    inter_states_p, ref_points_p = _fused_forward(
        params, feat_pad, pos_pad, maskf, query, query_pos)

    inter_states = inter_states_p[:, :, :NQ, :]
    init_reference_out = ref_points_p[:, :NQ, :]

    # no iterative bbox refinement (decoder.bbox_embed is None here), so the
    # per-layer reference points are unchanged.
    inter_references = jnp.broadcast_to(
        init_reference_out[None],
        (NUM_DEC_LAYERS,) + init_reference_out.shape)

    return inter_states, init_reference_out, inter_references, None, None, None


# ----------------------------------------------------------------------------
if __name__ == "__main__":
    key = jax.random.PRNGKey(0)
    pkey, ikey = jax.random.split(key)

    B = 2
    level_shapes = [(8, 8), (4, 4), (2, 2), (1, 1)]   # S = 64 + 16 + 4 + 1 = 85
    params = init_params(pkey)

    fkeys = jax.random.split(ikey, 2 * len(level_shapes) + 1)
    feats, poss, masks = [], [], []
    for i, (h, w) in enumerate(level_shapes):
        feats.append(jax.random.normal(fkeys[2 * i], (B, EMBED_DIM, h, w),
                                       jnp.float32))
        poss.append(jax.random.normal(fkeys[2 * i + 1], (B, EMBED_DIM, h, w),
                                      jnp.float32))
        m = jnp.zeros((B, h, w), bool)
        pad_h, pad_w = h // 4, w // 4
        if pad_h > 0:
            m = m.at[1, h - pad_h:, :].set(True)
        if pad_w > 0:
            m = m.at[1, :, w - pad_w:].set(True)
        masks.append(m)
    query_embed = jax.random.normal(fkeys[-1], (NUM_QUERIES, 2 * EMBED_DIM),
                                    jnp.float32)

    fwd = jax.jit(deformable_detr_transformer_forward)
    out = fwd(params, feats, masks, poss, query_embed)
    inter_states, init_ref, inter_refs = out[0], out[1], out[2]
    jax.block_until_ready(inter_states)
    jax.block_until_ready(init_ref)
    jax.block_until_ready(inter_refs)

    assert inter_states.shape == (NUM_DEC_LAYERS, B, NUM_QUERIES, EMBED_DIM)
    assert init_ref.shape == (B, NUM_QUERIES, 2)
    assert inter_refs.shape == (NUM_DEC_LAYERS, B, NUM_QUERIES, 2)
    assert bool(jnp.all(jnp.isfinite(inter_states)))
    assert bool(jnp.all(jnp.isfinite(init_ref)))
    print("KERNEL_OK")
</pallas_src>

<mosaic_0001>
module attributes {stable_mosaic.version = 11 : i64} {
  func.func @_fused_transformer_kernel(%arg0: i32, %arg1: i32, %arg2: memref<1x128x32xf32, #tpu.memory_space<vmem>>, %arg3: memref<1x128x32xf32, #tpu.memory_space<vmem>>, %arg4: memref<1x1x128xf32, #tpu.memory_space<vmem>>, %arg5: memref<1x16x32xf32, #tpu.memory_space<vmem>>, %arg6: memref<1x16x32xf32, #tpu.memory_space<vmem>>, %arg7: memref<32x2xf32, #tpu.memory_space<vmem>>, %arg8: memref<1x2xf32, #tpu.memory_space<vmem>>, %arg9: memref<2x32x96xf32, #tpu.memory_space<vmem>>, %arg10: memref<2x1x96xf32, #tpu.memory_space<vmem>>, %arg11: memref<2x32x32xf32, #tpu.memory_space<vmem>>, %arg12: memref<2x1x32xf32, #tpu.memory_space<vmem>>, %arg13: memref<2x1x32xf32, #tpu.memory_space<vmem>>, %arg14: memref<2x1x32xf32, #tpu.memory_space<vmem>>, %arg15: memref<2x32x64xf32, #tpu.memory_space<vmem>>, %arg16: memref<2x1x64xf32, #tpu.memory_space<vmem>>, %arg17: memref<2x64x32xf32, #tpu.memory_space<vmem>>, %arg18: memref<2x1x32xf32, #tpu.memory_space<vmem>>, %arg19: memref<2x1x32xf32, #tpu.memory_space<vmem>>, %arg20: memref<2x1x32xf32, #tpu.memory_space<vmem>>, %arg21: memref<2x32x96xf32, #tpu.memory_space<vmem>>, %arg22: memref<2x1x96xf32, #tpu.memory_space<vmem>>, %arg23: memref<2x32x32xf32, #tpu.memory_space<vmem>>, %arg24: memref<2x1x32xf32, #tpu.memory_space<vmem>>, %arg25: memref<2x1x32xf32, #tpu.memory_space<vmem>>, %arg26: memref<2x1x32xf32, #tpu.memory_space<vmem>>, %arg27: memref<2x32x32xf32, #tpu.memory_space<vmem>>, %arg28: memref<2x1x32xf32, #tpu.memory_space<vmem>>, %arg29: memref<2x32x64xf32, #tpu.memory_space<vmem>>, %arg30: memref<2x1x64xf32, #tpu.memory_space<vmem>>, %arg31: memref<2x32x32xf32, #tpu.memory_space<vmem>>, %arg32: memref<2x1x32xf32, #tpu.memory_space<vmem>>, %arg33: memref<2x1x32xf32, #tpu.memory_space<vmem>>, %arg34: memref<2x1x32xf32, #tpu.memory_space<vmem>>, %arg35: memref<2x32x64xf32, #tpu.memory_space<vmem>>, %arg36: memref<2x1x64xf32, #tpu.memory_space<vmem>>, %arg37: memref<2x64x32xf32, #tpu.memory_space<vmem>>, %arg38: memref<2x1x32xf32, #tpu.memory_space<vmem>>, %arg39: memref<2x1x32xf32, #tpu.memory_space<vmem>>, %arg40: memref<2x1x32xf32, #tpu.memory_space<vmem>>, %arg41: memref<1x1x16x32xf32, #tpu.memory_space<vmem>>, %arg42: memref<1x16x2xf32, #tpu.memory_space<vmem>>, %arg43: memref<128x32xf32, #tpu.memory_space<vmem>>, %arg44: memref<16x32xf32, #tpu.memory_space<vmem>>) attributes {dimension_semantics = [#tpu.dimension_semantics<parallel>, #tpu.dimension_semantics<arbitrary>], iteration_bounds = array<i64: 2, 4>, scalar_prefetch = 0 : i64, scratch_operands = 2 : i64, tpu.core_type = #tpu.core_type<tc>, window_params = [{transform_indices = @transform_0, window_bounds = array<i64: 1, 128, 32>}, {transform_indices = @transform_1, window_bounds = array<i64: 1, 128, 32>}, {transform_indices = @transform_2, window_bounds = array<i64: 1, 1, 128>}, {transform_indices = @transform_3, window_bounds = array<i64: 1, 16, 32>}, {transform_indices = @transform_4, window_bounds = array<i64: 1, 16, 32>}, {pipeline_mode = #tpu.pipeline_mode<synchronous>, transform_indices = @transform_5, window_bounds = array<i64: 32, 2>}, {pipeline_mode = #tpu.pipeline_mode<synchronous>, transform_indices = @transform_6, window_bounds = array<i64: 1, 2>}, {pipeline_mode = #tpu.pipeline_mode<synchronous>, transform_indices = @transform_7, window_bounds = array<i64: 2, 32, 96>}, {pipeline_mode = #tpu.pipeline_mode<synchronous>, transform_indices = @transform_8, window_bounds = array<i64: 2, 1, 96>}, {pipeline_mode = #tpu.pipeline_mode<synchronous>, transform_indices = @transform_9, window_bounds = array<i64: 2, 32, 32>}, {pipeline_mode = #tpu.pipeline_mode<synchronous>, transform_indices = @transform_10, window_bounds = array<i64: 2, 1, 32>}, {pipeline_mode = #tpu.pipeline_mode<synchronous>, transform_indices = @transform_11, window_bounds = array<i64: 2, 1, 32>}, {pipeline_mode = #tpu.pipeline_mode<synchronous>, transform_indices = @transform_12, window_bounds = array<i64: 2, 1, 32>}, {pipeline_mode = #tpu.pipeline_mode<synchronous>, transform_indices = @transform_13, window_bounds = array<i64: 2, 32, 64>}, {pipeline_mode = #tpu.pipeline_mode<synchronous>, transform_indices = @transform_14, window_bounds = array<i64: 2, 1, 64>}, {pipeline_mode = #tpu.pipeline_mode<synchronous>, transform_indices = @transform_15, window_bounds = array<i64: 2, 64, 32>}, {pipeline_mode = #tpu.pipeline_mode<synchronous>, transform_indices = @transform_16, window_bounds = array<i64: 2, 1, 32>}, {pipeline_mode = #tpu.pipeline_mode<synchronous>, transform_indices = @transform_17, window_bounds = array<i64: 2, 1, 32>}, {pipeline_mode = #tpu.pipeline_mode<synchronous>, transform_indices = @transform_18, window_bounds = array<i64: 2, 1, 32>}, {pipeline_mode = #tpu.pipeline_mode<synchronous>, transform_indices = @transform_19, window_bounds = array<i64: 2, 32, 96>}, {pipeline_mode = #tpu.pipeline_mode<synchronous>, transform_indices = @transform_20, window_bounds = array<i64: 2, 1, 96>}, {pipeline_mode = #tpu.pipeline_mode<synchronous>, transform_indices = @transform_21, window_bounds = array<i64: 2, 32, 32>}, {pipeline_mode = #tpu.pipeline_mode<synchronous>, transform_indices = @transform_22, window_bounds = array<i64: 2, 1, 32>}, {pipeline_mode = #tpu.pipeline_mode<synchronous>, transform_indices = @transform_23, window_bounds = array<i64: 2, 1, 32>}, {pipeline_mode = #tpu.pipeline_mode<synchronous>, transform_indices = @transform_24, window_bounds = array<i64: 2, 1, 32>}, {pipeline_mode = #tpu.pipeline_mode<synchronous>, transform_indices = @transform_25, window_bounds = array<i64: 2, 32, 32>}, {pipeline_mode = #tpu.pipeline_mode<synchronous>, transform_indices = @transform_26, window_bounds = array<i64: 2, 1, 32>}, {pipeline_mode = #tpu.pipeline_mode<synchronous>, transform_indices = @transform_27, window_bounds = array<i64: 2, 32, 64>}, {pipeline_mode = #tpu.pipeline_mode<synchronous>, transform_indices = @transform_28, window_bounds = array<i64: 2, 1, 64>}, {pipeline_mode = #tpu.pipeline_mode<synchronous>, transform_indices = @transform_29, window_bounds = array<i64: 2, 32, 32>}, {pipeline_mode = #tpu.pipeline_mode<synchronous>, transform_indices = @transform_30, window_bounds = array<i64: 2, 1, 32>}, {pipeline_mode = #tpu.pipeline_mode<synchronous>, transform_indices = @transform_31, window_bounds = array<i64: 2, 1, 32>}, {pipeline_mode = #tpu.pipeline_mode<synchronous>, transform_indices = @transform_32, window_bounds = array<i64: 2, 1, 32>}, {pipeline_mode = #tpu.pipeline_mode<synchronous>, transform_indices = @transform_33, window_bounds = array<i64: 2, 32, 64>}, {pipeline_mode = #tpu.pipeline_mode<synchronous>, transform_indices = @transform_34, window_bounds = array<i64: 2, 1, 64>}, {pipeline_mode = #tpu.pipeline_mode<synchronous>, transform_indices = @transform_35, window_bounds = array<i64: 2, 64, 32>}, {pipeline_mode = #tpu.pipeline_mode<synchronous>, transform_indices = @transform_36, window_bounds = array<i64: 2, 1, 32>}, {pipeline_mode = #tpu.pipeline_mode<synchronous>, transform_indices = @transform_37, window_bounds = array<i64: 2, 1, 32>}, {pipeline_mode = #tpu.pipeline_mode<synchronous>, transform_indices = @transform_38, window_bounds = array<i64: 2, 1, 32>}, {transform_indices = @transform_39, window_bounds = array<i64: 1, 1, 16, 32>}, {transform_indices = @transform_40, window_bounds = array<i64: 1, 16, 2>}]} {
    %c0_i32 = arith.constant 0 : i32
    %0 = arith.cmpi eq, %arg1, %c0_i32 : i32
    %1 = arith.extui %0 : i1 to i32
    %c0_i32_0 = arith.constant 0 : i32
    %2 = arith.cmpi ne, %1, %c0_i32_0 : i32
    scf.if %2 {
      %c0 = arith.constant 0 : index
      %c0_6 = arith.constant 0 : index
      %c0_7 = arith.constant 0 : index
      %12 = vector.load %arg2[%c0, %c0_6, %c0_7] : memref<1x128x32xf32, #tpu.memory_space<vmem>>, vector<1x128x32xf32>
      %13 = vector.shape_cast %12 : vector<1x128x32xf32> to vector<128x32xf32>
      %c0_8 = arith.constant 0 : index
      %c0_9 = arith.constant 0 : index
      %14 = vector.load %arg43[%c0_8, %c0_9] : memref<128x32xf32, #tpu.memory_space<vmem>>, vector<128x32xf32>
      tpu.vector_store %arg43[%c0_8, %c0_9], %13 {strides = array<i32>} : memref<128x32xf32, #tpu.memory_space<vmem>>, vector<128x32xf32>,
    } else {
    }
    %c2_i32 = arith.constant 2 : i32
    %3 = arith.cmpi slt, %arg1, %c2_i32 : i32
    %4 = arith.extui %3 : i1 to i32
    %c0_i32_1 = arith.constant 0 : i32
    %5 = arith.cmpi ne, %4, %c0_i32_1 : i32
    scf.if %5 {
      %c0 = arith.constant 0 : index
      %c0_6 = arith.constant 0 : index
      %12 = vector.load %arg43[%c0, %c0_6] : memref<128x32xf32, #tpu.memory_space<vmem>>, vector<128x32xf32>
      %c0_7 = arith.constant 0 : index
      %c0_8 = arith.constant 0 : index
      %c0_9 = arith.constant 0 : index
      %13 = vector.load %arg3[%c0_7, %c0_8, %c0_9] : memref<1x128x32xf32, #tpu.memory_space<vmem>>, vector<1x128x32xf32>
      %14 = vector.shape_cast %13 : vector<1x128x32xf32> to vector<128x32xf32>
      %c0_10 = arith.constant 0 : index
      %c0_11 = arith.constant 0 : index
      %c0_12 = arith.constant 0 : index
      %15 = vector.load %arg4[%c0_10, %c0_11, %c0_12] : memref<1x1x128xf32, #tpu.memory_space<vmem>>, vector<1x1x128xf32>
      %16 = vector.shape_cast %15 : vector<1x1x128xf32> to vector<1x128xf32>
      %cst = arith.constant -1.000000e+09 : f32
      %17 = vector.broadcast %cst : f32 to vector<1x128xf32>
      %18 = arith.mulf %16, %17 : vector<1x128xf32>
      %19 = vector.shape_cast %18 : vector<1x128xf32> to vector<1x128xf32>
      %20 = vector.broadcast %19 : vector<1x128xf32> to vector<128x128xf32>
      %21 = arith.index_cast %arg1 : i32 to index
      %c0_13 = arith.constant 0 : index
      %c0_14 = arith.constant 0 : index
      %22 = vector.load %arg9[%21, %c0_13, %c0_14] : memref<2x32x96xf32, #tpu.memory_space<vmem>>, vector<1x32x96xf32>
      %23 = vector.shape_cast %22 : vector<1x32x96xf32> to vector<32x96xf32>
      %24 = arith.index_cast %arg1 : i32 to index
      %c0_15 = arith.constant 0 : index
      %c0_16 = arith.constant 0 : index
      %25 = vector.load %arg10[%24, %c0_15, %c0_16] : memref<2x1x96xf32, #tpu.memory_space<vmem>>, vector<1x1x96xf32>
      %26 = vector.shape_cast %25 : vector<1x1x96xf32> to vector<1x96xf32>
      %27 = arith.addf %12, %14 : vector<128x32xf32>
      %28 = vector.extract_strided_slice %23 {offsets = [0, 0], sizes = [32, 64], strides = [1, 1]} : vector<32x96xf32> to vector<32x64xf32>
      %cst_17 = arith.constant dense<0.000000e+00> : vector<128x64xf32>
      %29 = tpu.matmul %27, %28, %cst_17 {dimension_numbers = #tpu.dot_dimension_numbers<[1], [0], [0], [1], [0, 0, 1, 1], [], []>} : vector<128x32xf32>, vector<32x64xf32>, vector<128x64xf32> -> vector<128x64xf32>
      %30 = vector.extract_strided_slice %26 {offsets = [0, 0], sizes = [1, 64], strides = [1, 1]} : vector<1x96xf32> to vector<1x64xf32>
      %31 = vector.broadcast %30 : vector<1x64xf32> to vector<128x64xf32>
      %32 = arith.addf %29, %31 : vector<128x64xf32>
      %33 = vector.extract_strided_slice %23 {offsets = [0, 64], sizes = [32, 32], strides = [1, 1]} : vector<32x96xf32> to vector<32x32xf32>
      %cst_18 = arith.constant dense<0.000000e+00> : vector<128x32xf32>
      %34 = tpu.matmul %12, %33, %cst_18 {dimension_numbers = #tpu.dot_dimension_numbers<[1], [0], [0], [1], [0, 0, 1, 1], [], []>} : vector<128x32xf32>, vector<32x32xf32>, vector<128x32xf32> -> vector<128x32xf32>
      %35 = vector.extract_strided_slice %26 {offsets = [0, 64], sizes = [1, 32], strides = [1, 1]} : vector<1x96xf32> to vector<1x32xf32>
      %36 = vector.broadcast %35 : vector<1x32xf32> to vector<128x32xf32>
      %37 = arith.addf %34, %36 : vector<128x32xf32>
      %38 = vector.extract_strided_slice %32 {offsets = [0, 0], sizes = [128, 32], strides = [1, 1]} : vector<128x64xf32> to vector<128x32xf32>
      %39 = vector.extract_strided_slice %32 {offsets = [0, 32], sizes = [128, 32], strides = [1, 1]} : vector<128x64xf32> to vector<128x32xf32>
      %40 = arith.index_cast %arg1 : i32 to index
      %c0_19 = arith.constant 0 : index
      %c0_20 = arith.constant 0 : index
      %41 = vector.load %arg11[%40, %c0_19, %c0_20] : memref<2x32x32xf32, #tpu.memory_space<vmem>>, vector<1x32x32xf32>
      %42 = vector.shape_cast %41 : vector<1x32x32xf32> to vector<32x32xf32>
      %43 = arith.index_cast %arg1 : i32 to index
      %c0_21 = arith.constant 0 : index
      %c0_22 = arith.constant 0 : index
      %44 = vector.load %arg12[%43, %c0_21, %c0_22] : memref<2x1x32xf32, #tpu.memory_space<vmem>>, vector<1x1x32xf32>
      %45 = vector.shape_cast %44 : vector<1x1x32xf32> to vector<1x32xf32>
      %46 = vector.extract_strided_slice %38 {offsets = [0, 0], sizes = [128, 8], strides = [1, 1]} : vector<128x32xf32> to vector<128x8xf32>
      %47 = vector.extract_strided_slice %39 {offsets = [0, 0], sizes = [128, 8], strides = [1, 1]} : vector<128x32xf32> to vector<128x8xf32>
      %48 = vector.extract_strided_slice %37 {offsets = [0, 0], sizes = [128, 8], strides = [1, 1]} : vector<128x32xf32> to vector<128x8xf32>
      %cst_23 = arith.constant dense<0.000000e+00> : vector<128x128xf32>
      %49 = tpu.matmul %46, %47, %cst_23 {dimension_numbers = #tpu.dot_dimension_numbers<[1], [1], [0], [0], [0, 0, 1, 0], [], []>} : vector<128x8xf32>, vector<128x8xf32>, vector<128x128xf32> -> vector<128x128xf32>
      %cst_24 = arith.constant 0.353553385 : f32
      %50 = vector.broadcast %cst_24 : f32 to vector<128x128xf32>
      %51 = arith.mulf %49, %50 : vector<128x128xf32>
      %52 = arith.addf %51, %20 : vector<128x128xf32>
      %cst_25 = arith.constant dense<0xFF800000> : vector<128xf32>
      %53 = vector.multi_reduction <maximumf>, %52, %cst_25 [1] : vector<128x128xf32> to vector<128xf32>
      %54 = vector.shape_cast %53 : vector<128xf32> to vector<128x1xf32>
      %55 = vector.broadcast %54 : vector<128x1xf32> to vector<128x128xf32>
      %56 = arith.subf %52, %55 : vector<128x128xf32>
      %57 = math.exp %56 : vector<128x128xf32>
      %cst_26 = arith.constant dense<0.000000e+00> : vector<128xf32>
      %58 = vector.multi_reduction <add>, %57, %cst_26 [1] : vector<128x128xf32> to vector<128xf32>
      %59 = vector.shape_cast %58 : vector<128xf32> to vector<128x1xf32>
      %60 = vector.broadcast %59 : vector<128x1xf32> to vector<128x128xf32>
      %61 = arith.divf %57, %60 : vector<128x128xf32>
      %cst_27 = arith.constant dense<0.000000e+00> : vector<128x8xf32>
      %62 = tpu.matmul %61, %48, %cst_27 {dimension_numbers = #tpu.dot_dimension_numbers<[1], [0], [0], [1], [0, 0, 1, 1], [], []>} : vector<128x128xf32>, vector<128x8xf32>, vector<128x8xf32> -> vector<128x8xf32>
      %63 = vector.extract_strided_slice %38 {offsets = [0, 8], sizes = [128, 8], strides = [1, 1]} : vector<128x32xf32> to vector<128x8xf32>
      %64 = vector.extract_strided_slice %39 {offsets = [0, 8], sizes = [128, 8], strides = [1, 1]} : vector<128x32xf32> to vector<128x8xf32>
      %65 = vector.extract_strided_slice %37 {offsets = [0, 8], sizes = [128, 8], strides = [1, 1]} : vector<128x32xf32> to vector<128x8xf32>
      %cst_28 = arith.constant dense<0.000000e+00> : vector<128x128xf32>
      %66 = tpu.matmul %63, %64, %cst_28 {dimension_numbers = #tpu.dot_dimension_numbers<[1], [1], [0], [0], [0, 0, 1, 0], [], []>} : vector<128x8xf32>, vector<128x8xf32>, vector<128x128xf32> -> vector<128x128xf32>
      %cst_29 = arith.constant 0.353553385 : f32
      %67 = vector.broadcast %cst_29 : f32 to vector<128x128xf32>
      %68 = arith.mulf %66, %67 : vector<128x128xf32>
      %69 = arith.addf %68, %20 : vector<128x128xf32>
      %cst_30 = arith.constant dense<0xFF800000> : vector<128xf32>
      %70 = vector.multi_reduction <maximumf>, %69, %cst_30 [1] : vector<128x128xf32> to vector<128xf32>
      %71 = vector.shape_cast %70 : vector<128xf32> to vector<128x1xf32>
      %72 = vector.broadcast %71 : vector<128x1xf32> to vector<128x128xf32>
      %73 = arith.subf %69, %72 : vector<128x128xf32>
      %74 = math.exp %73 : vector<128x128xf32>
      %cst_31 = arith.constant dense<0.000000e+00> : vector<128xf32>
      %75 = vector.multi_reduction <add>, %74, %cst_31 [1] : vector<128x128xf32> to vector<128xf32>
      %76 = vector.shape_cast %75 : vector<128xf32> to vector<128x1xf32>
      %77 = vector.broadcast %76 : vector<128x1xf32> to vector<128x128xf32>
      %78 = arith.divf %74, %77 : vector<128x128xf32>
      %cst_32 = arith.constant dense<0.000000e+00> : vector<128x8xf32>
      %79 = tpu.matmul %78, %65, %cst_32 {dimension_numbers = #tpu.dot_dimension_numbers<[1], [0], [0], [1], [0, 0, 1, 1], [], []>} : vector<128x128xf32>, vector<128x8xf32>, vector<128x8xf32> -> vector<128x8xf32>
      %80 = vector.extract_strided_slice %38 {offsets = [0, 16], sizes = [128, 8], strides = [1, 1]} : vector<128x32xf32> to vector<128x8xf32>
      %81 = vector.extract_strided_slice %39 {offsets = [0, 16], sizes = [128, 8], strides = [1, 1]} : vector<128x32xf32> to vector<128x8xf32>
      %82 = vector.extract_strided_slice %37 {offsets = [0, 16], sizes = [128, 8], strides = [1, 1]} : vector<128x32xf32> to vector<128x8xf32>
      %cst_33 = arith.constant dense<0.000000e+00> : vector<128x128xf32>
      %83 = tpu.matmul %80, %81, %cst_33 {dimension_numbers = #tpu.dot_dimension_numbers<[1], [1], [0], [0], [0, 0, 1, 0], [], []>} : vector<128x8xf32>, vector<128x8xf32>, vector<128x128xf32> -> vector<128x128xf32>
      %cst_34 = arith.constant 0.353553385 : f32
      %84 = vector.broadcast %cst_34 : f32 to vector<128x128xf32>
      %85 = arith.mulf %83, %84 : vector<128x128xf32>
      %86 = arith.addf %85, %20 : vector<128x128xf32>
      %cst_35 = arith.constant dense<0xFF800000> : vector<128xf32>
      %87 = vector.multi_reduction <maximumf>, %86, %cst_35 [1] : vector<128x128xf32> to vector<128xf32>
      %88 = vector.shape_cast %87 : vector<128xf32> to vector<128x1xf32>
      %89 = vector.broadcast %88 : vector<128x1xf32> to vector<128x128xf32>
      %90 = arith.subf %86, %89 : vector<128x128xf32>
      %91 = math.exp %90 : vector<128x128xf32>
      %cst_36 = arith.constant dense<0.000000e+00> : vector<128xf32>
      %92 = vector.multi_reduction <add>, %91, %cst_36 [1] : vector<128x128xf32> to vector<128xf32>
      %93 = vector.shape_cast %92 : vector<128xf32> to vector<128x1xf32>
      %94 = vector.broadcast %93 : vector<128x1xf32> to vector<128x128xf32>
      %95 = arith.divf %91, %94 : vector<128x128xf32>
      %cst_37 = arith.constant dense<0.000000e+00> : vector<128x8xf32>
      %96 = tpu.matmul %95, %82, %cst_37 {dimension_numbers = #tpu.dot_dimension_numbers<[1], [0], [0], [1], [0, 0, 1, 1], [], []>} : vector<128x128xf32>, vector<128x8xf32>, vector<128x8xf32> -> vector<128x8xf32>
      %97 = vector.extract_strided_slice %38 {offsets = [0, 24], sizes = [128, 8], strides = [1, 1]} : vector<128x32xf32> to vector<128x8xf32>
      %98 = vector.extract_strided_slice %39 {offsets = [0, 24], sizes = [128, 8], strides = [1, 1]} : vector<128x32xf32> to vector<128x8xf32>
      %99 = vector.extract_strided_slice %37 {offsets = [0, 24], sizes = [128, 8], strides = [1, 1]} : vector<128x32xf32> to vector<128x8xf32>
      %cst_38 = arith.constant dense<0.000000e+00> : vector<128x128xf32>
      %100 = tpu.matmul %97, %98, %cst_38 {dimension_numbers = #tpu.dot_dimension_numbers<[1], [1], [0], [0], [0, 0, 1, 0], [], []>} : vector<128x8xf32>, vector<128x8xf32>, vector<128x128xf32> -> vector<128x128xf32>
      %cst_39 = arith.constant 0.353553385 : f32
      %101 = vector.broadcast %cst_39 : f32 to vector<128x128xf32>
      %102 = arith.mulf %100, %101 : vector<128x128xf32>
      %103 = arith.addf %102, %20 : vector<128x128xf32>
      %cst_40 = arith.constant dense<0xFF800000> : vector<128xf32>
      %104 = vector.multi_reduction <maximumf>, %103, %cst_40 [1] : vector<128x128xf32> to vector<128xf32>
      %105 = vector.shape_cast %104 : vector<128xf32> to vector<128x1xf32>
      %106 = vector.broadcast %105 : vector<128x1xf32> to vector<128x128xf32>
      %107 = arith.subf %103, %106 : vector<128x128xf32>
      %108 = math.exp %107 : vector<128x128xf32>
      %cst_41 = arith.constant dense<0.000000e+00> : vector<128xf32>
      %109 = vector.multi_reduction <add>, %108, %cst_41 [1] : vector<128x128xf32> to vector<128xf32>
      %110 = vector.shape_cast %109 : vector<128xf32> to vector<128x1xf32>
      %111 = vector.broadcast %110 : vector<128x1xf32> to vector<128x128xf32>
      %112 = arith.divf %108, %111 : vector<128x128xf32>
      %cst_42 = arith.constant dense<0.000000e+00> : vector<128x8xf32>
      %113 = tpu.matmul %112, %99, %cst_42 {dimension_numbers = #tpu.dot_dimension_numbers<[1], [0], [0], [1], [0, 0, 1, 1], [], []>} : vector<128x128xf32>, vector<128x8xf32>, vector<128x8xf32> -> vector<128x8xf32>
      %114 = tpu.concatenate %62, %79, %96, %113 in 1 : vector<128x8xf32>, vector<128x8xf32>, vector<128x8xf32>, vector<128x8xf32> -> vector<128x32xf32>
      %cst_43 = arith.constant dense<0.000000e+00> : vector<128x32xf32>
      %115 = tpu.matmul %114, %42, %cst_43 {dimension_numbers = #tpu.dot_dimension_numbers<[1], [0], [0], [1], [0, 0, 1, 1], [], []>} : vector<128x32xf32>, vector<32x32xf32>, vector<128x32xf32> -> vector<128x32xf32>
      %116 = vector.broadcast %45 : vector<1x32xf32> to vector<128x32xf32>
      %117 = arith.addf %115, %116 : vector<128x32xf32>
      %118 = arith.addf %12, %117 : vector<128x32xf32>
      %119 = arith.index_cast %arg1 : i32 to index
      %c0_44 = arith.constant 0 : index
      %c0_45 = arith.constant 0 : index
      %120 = vector.load %arg13[%119, %c0_44, %c0_45] : memref<2x1x32xf32, #tpu.memory_space<vmem>>, vector<1x1x32xf32>
      %121 = vector.shape_cast %120 : vector<1x1x32xf32> to vector<1x32xf32>
      %122 = arith.index_cast %arg1 : i32 to index
      %c0_46 = arith.constant 0 : index
      %c0_47 = arith.constant 0 : index
      %123 = vector.load %arg14[%122, %c0_46, %c0_47] : memref<2x1x32xf32, #tpu.memory_space<vmem>>, vector<1x1x32xf32>
      %124 = vector.shape_cast %123 : vector<1x1x32xf32> to vector<1x32xf32>
      %cst_48 = arith.constant dense<0.000000e+00> : vector<128xf32>
      %125 = vector.multi_reduction <add>, %118, %cst_48 [1] : vector<128x32xf32> to vector<128xf32>
      %126 = vector.shape_cast %125 : vector<128xf32> to vector<128x1xf32>
      %cst_49 = arith.constant 3.200000e+01 : f32
      %127 = vector.broadcast %cst_49 : f32 to vector<128x1xf32>
      %128 = arith.divf %126, %127 : vector<128x1xf32>
      %129 = vector.broadcast %128 : vector<128x1xf32> to vector<128x32xf32>
      %130 = arith.subf %118, %129 : vector<128x32xf32>
      %131 = arith.mulf %130, %130 : vector<128x32xf32>
      %cst_50 = arith.constant dense<0.000000e+00> : vector<128xf32>
      %132 = vector.multi_reduction <add>, %131, %cst_50 [1] : vector<128x32xf32> to vector<128xf32>
      %133 = vector.shape_cast %132 : vector<128xf32> to vector<128x1xf32>
      %cst_51 = arith.constant 3.200000e+01 : f32
      %134 = vector.broadcast %cst_51 : f32 to vector<128x1xf32>
      %135 = arith.divf %133, %134 : vector<128x1xf32>
      %136 = vector.broadcast %128 : vector<128x1xf32> to vector<128x32xf32>
      %137 = arith.subf %118, %136 : vector<128x32xf32>
      %cst_52 = arith.constant 9.99999974E-6 : f32
      %138 = vector.broadcast %cst_52 : f32 to vector<128x1xf32>
      %139 = arith.addf %135, %138 : vector<128x1xf32>
      %140 = math.rsqrt %139 : vector<128x1xf32>
      %141 = vector.broadcast %140 : vector<128x1xf32> to vector<128x32xf32>
      %142 = arith.mulf %137, %141 : vector<128x32xf32>
      %143 = vector.broadcast %121 : vector<1x32xf32> to vector<128x32xf32>
      %144 = arith.mulf %142, %143 : vector<128x32xf32>
      %145 = vector.broadcast %124 : vector<1x32xf32> to vector<128x32xf32>
      %146 = arith.addf %144, %145 : vector<128x32xf32>
      %147 = arith.index_cast %arg1 : i32 to index
      %c0_53 = arith.constant 0 : index
      %c0_54 = arith.constant 0 : index
      %148 = vector.load %arg15[%147, %c0_53, %c0_54] : memref<2x32x64xf32, #tpu.memory_space<vmem>>, vector<1x32x64xf32>
      %149 = vector.shape_cast %148 : vector<1x32x64xf32> to vector<32x64xf32>
      %cst_55 = arith.constant dense<0.000000e+00> : vector<128x64xf32>
      %150 = tpu.matmul %146, %149, %cst_55 {dimension_numbers = #tpu.dot_dimension_numbers<[1], [0], [0], [1], [0, 0, 1, 1], [], []>} : vector<128x32xf32>, vector<32x64xf32>, vector<128x64xf32> -> vector<128x64xf32>
      %151 = arith.index_cast %arg1 : i32 to index
      %c0_56 = arith.constant 0 : index
      %c0_57 = arith.constant 0 : index
      %152 = vector.load %arg16[%151, %c0_56, %c0_57] : memref<2x1x64xf32, #tpu.memory_space<vmem>>, vector<1x1x64xf32>
      %153 = vector.shape_cast %152 : vector<1x1x64xf32> to vector<1x64xf32>
      %154 = vector.broadcast %153 : vector<1x64xf32> to vector<128x64xf32>
      %155 = arith.addf %150, %154 : vector<128x64xf32>
      %cst_58 = arith.constant 0.000000e+00 : f32
      %156 = vector.broadcast %cst_58 : f32 to vector<128x64xf32>
      %157 = arith.maximumf %155, %156 : vector<128x64xf32>
      %158 = arith.index_cast %arg1 : i32 to index
      %c0_59 = arith.constant 0 : index
      %c0_60 = arith.constant 0 : index
      %159 = vector.load %arg17[%158, %c0_59, %c0_60] : memref<2x64x32xf32, #tpu.memory_space<vmem>>, vector<1x64x32xf32>
      %160 = vector.shape_cast %159 : vector<1x64x32xf32> to vector<64x32xf32>
      %cst_61 = arith.constant dense<0.000000e+00> : vector<128x32xf32>
      %161 = tpu.matmul %157, %160, %cst_61 {dimension_numbers = #tpu.dot_dimension_numbers<[1], [0], [0], [1], [0, 0, 1, 1], [], []>} : vector<128x64xf32>, vector<64x32xf32>, vector<128x32xf32> -> vector<128x32xf32>
      %162 = arith.index_cast %arg1 : i32 to index
      %c0_62 = arith.constant 0 : index
      %c0_63 = arith.constant 0 : index
      %163 = vector.load %arg18[%162, %c0_62, %c0_63] : memref<2x1x32xf32, #tpu.memory_space<vmem>>, vector<1x1x32xf32>
      %164 = vector.shape_cast %163 : vector<1x1x32xf32> to vector<1x32xf32>
      %165 = vector.broadcast %164 : vector<1x32xf32> to vector<128x32xf32>
      %166 = arith.addf %161, %165 : vector<128x32xf32>
      %167 = arith.addf %146, %166 : vector<128x32xf32>
      %168 = arith.index_cast %arg1 : i32 to index
      %c0_64 = arith.constant 0 : index
      %c0_65 = arith.constant 0 : index
      %169 = vector.load %arg19[%168, %c0_64, %c0_65] : memref<2x1x32xf32, #tpu.memory_space<vmem>>, vector<1x1x32xf32>
      %170 = vector.shape_cast %169 : vector<1x1x32xf32> to vector<1x32xf32>
      %171 = arith.index_cast %arg1 : i32 to index
      %c0_66 = arith.constant 0 : index
      %c0_67 = arith.constant 0 : index
      %172 = vector.load %arg20[%171, %c0_66, %c0_67] : memref<2x1x32xf32, #tpu.memory_space<vmem>>, vector<1x1x32xf32>
      %173 = vector.shape_cast %172 : vector<1x1x32xf32> to vector<1x32xf32>
      %cst_68 = arith.constant dense<0.000000e+00> : vector<128xf32>
      %174 = vector.multi_reduction <add>, %167, %cst_68 [1] : vector<128x32xf32> to vector<128xf32>
      %175 = vector.shape_cast %174 : vector<128xf32> to vector<128x1xf32>
      %cst_69 = arith.constant 3.200000e+01 : f32
      %176 = vector.broadcast %cst_69 : f32 to vector<128x1xf32>
      %177 = arith.divf %175, %176 : vector<128x1xf32>
      %178 = vector.broadcast %177 : vector<128x1xf32> to vector<128x32xf32>
      %179 = arith.subf %167, %178 : vector<128x32xf32>
      %180 = arith.mulf %179, %179 : vector<128x32xf32>
      %cst_70 = arith.constant dense<0.000000e+00> : vector<128xf32>
      %181 = vector.multi_reduction <add>, %180, %cst_70 [1] : vector<128x32xf32> to vector<128xf32>
      %182 = vector.shape_cast %181 : vector<128xf32> to vector<128x1xf32>
      %cst_71 = arith.constant 3.200000e+01 : f32
      %183 = vector.broadcast %cst_71 : f32 to vector<128x1xf32>
      %184 = arith.divf %182, %183 : vector<128x1xf32>
      %185 = vector.broadcast %177 : vector<128x1xf32> to vector<128x32xf32>
      %186 = arith.subf %167, %185 : vector<128x32xf32>
      %cst_72 = arith.constant 9.99999974E-6 : f32
      %187 = vector.broadcast %cst_72 : f32 to vector<128x1xf32>
      %188 = arith.addf %184, %187 : vector<128x1xf32>
      %189 = math.rsqrt %188 : vector<128x1xf32>
      %190 = vector.broadcast %189 : vector<128x1xf32> to vector<128x32xf32>
      %191 = arith.mulf %186, %190 : vector<128x32xf32>
      %192 = vector.broadcast %170 : vector<1x32xf32> to vector<128x32xf32>
      %193 = arith.mulf %191, %192 : vector<128x32xf32>
      %194 = vector.broadcast %173 : vector<1x32xf32> to vector<128x32xf32>
      %195 = arith.addf %193, %194 : vector<128x32xf32>
      %c0_73 = arith.constant 0 : index
      %c0_74 = arith.constant 0 : index
      %196 = vector.load %arg43[%c0_73, %c0_74] : memref<128x32xf32, #tpu.memory_space<vmem>>, vector<128x32xf32>
      tpu.vector_store %arg43[%c0_73, %c0_74], %195 {strides = array<i32>} : memref<128x32xf32, #tpu.memory_space<vmem>>, vector<128x32xf32>,
    } else {
    }
    %c2_i32_2 = arith.constant 2 : i32
    %6 = arith.cmpi eq, %arg1, %c2_i32_2 : i32
    %7 = arith.extui %6 : i1 to i32
    %c0_i32_3 = arith.constant 0 : i32
    %8 = arith.cmpi ne, %7, %c0_i32_3 : i32
    scf.if %8 {
      %c0 = arith.constant 0 : index
      %c0_6 = arith.constant 0 : index
      %c0_7 = arith.constant 0 : index
      %12 = vector.load %arg5[%c0, %c0_6, %c0_7] : memref<1x16x32xf32, #tpu.memory_space<vmem>>, vector<1x16x32xf32>
      %13 = vector.shape_cast %12 : vector<1x16x32xf32> to vector<16x32xf32>
      %c0_8 = arith.constant 0 : index
      %c0_9 = arith.constant 0 : index
      %14 = vector.load %arg44[%c0_8, %c0_9] : memref<16x32xf32, #tpu.memory_space<vmem>>, vector<16x32xf32>
      tpu.vector_store %arg44[%c0_8, %c0_9], %13 {strides = array<i32>} : memref<16x32xf32, #tpu.memory_space<vmem>>, vector<16x32xf32>,
      %c0_10 = arith.constant 0 : index
      %c0_11 = arith.constant 0 : index
      %c0_12 = arith.constant 0 : index
      %15 = vector.load %arg6[%c0_10, %c0_11, %c0_12] : memref<1x16x32xf32, #tpu.memory_space<vmem>>, vector<1x16x32xf32>
      %16 = vector.shape_cast %15 : vector<1x16x32xf32> to vector<16x32xf32>
      %c0_13 = arith.constant 0 : index
      %c0_14 = arith.constant 0 : index
      %17 = vector.load %arg7[%c0_13, %c0_14] : memref<32x2xf32, #tpu.memory_space<vmem>>, vector<32x2xf32>
      %cst = arith.constant dense<0.000000e+00> : vector<16x2xf32>
      %18 = tpu.matmul %16, %17, %cst {dimension_numbers = #tpu.dot_dimension_numbers<[1], [0], [0], [1], [0, 0, 1, 1], [], []>} : vector<16x32xf32>, vector<32x2xf32>, vector<16x2xf32> -> vector<16x2xf32>
      %c0_15 = arith.constant 0 : index
      %c0_16 = arith.constant 0 : index
      %19 = vector.load %arg8[%c0_15, %c0_16] : memref<1x2xf32, #tpu.memory_space<vmem>>, vector<1x2xf32>
      %20 = vector.broadcast %19 : vector<1x2xf32> to vector<16x2xf32>
      %21 = arith.addf %18, %20 : vector<16x2xf32>
      %22 = arith.negf %21 : vector<16x2xf32>
      %23 = math.exp %22 : vector<16x2xf32>
      %cst_17 = arith.constant 1.000000e+00 : f32
      %24 = vector.broadcast %cst_17 : f32 to vector<16x2xf32>
      %25 = arith.addf %24, %23 : vector<16x2xf32>
      %26 = arith.divf %24, %25 : vector<16x2xf32>
      %c0_18 = arith.constant 0 : index
      %c0_19 = arith.constant 0 : index
      %c0_20 = arith.constant 0 : index
      %27 = vector.load %arg42[%c0_18, %c0_19, %c0_20] : memref<1x16x2xf32, #tpu.memory_space<vmem>>, vector<1x16x2xf32>
      %28 = vector.shape_cast %27 : vector<1x16x2xf32> to vector<16x2xf32>
      %29 = vector.shape_cast %26 : vector<16x2xf32> to vector<1x16x2xf32>
      tpu.vector_store %arg42[%c0_18, %c0_19, %c0_20], %29 {strides = array<i32>} : memref<1x16x2xf32, #tpu.memory_space<vmem>>, vector<1x16x2xf32>,
    } else {
    }
    %c2_i32_4 = arith.constant 2 : i32
    %9 = arith.cmpi sge, %arg1, %c2_i32_4 : i32
    %10 = arith.extui %9 : i1 to i32
    %c0_i32_5 = arith.constant 0 : i32
    %11 = arith.cmpi ne, %10, %c0_i32_5 : i32
    scf.if %11 {
      %c2_i32_6 = arith.constant 2 : i32
      %12 = arith.subi %arg1, %c2_i32_6 : i32
      %c0 = arith.constant 0 : index
      %c0_7 = arith.constant 0 : index
      %13 = vector.load %arg44[%c0, %c0_7] : memref<16x32xf32, #tpu.memory_space<vmem>>, vector<16x32xf32>
      %c0_8 = arith.constant 0 : index
      %c0_9 = arith.constant 0 : index
      %c0_10 = arith.constant 0 : index
      %14 = vector.load %arg6[%c0_8, %c0_9, %c0_10] : memref<1x16x32xf32, #tpu.memory_space<vmem>>, vector<1x16x32xf32>
      %15 = vector.shape_cast %14 : vector<1x16x32xf32> to vector<16x32xf32>
      %c0_11 = arith.constant 0 : index
      %c0_12 = arith.constant 0 : index
      %16 = vector.load %arg43[%c0_11, %c0_12] : memref<128x32xf32, #tpu.memory_space<vmem>>, vector<128x32xf32>
      %17 = tpu.iota {dimensions = array<i32: 1>} : vector<1x16xi32>
      %c10_i32 = arith.constant 10 : i32
      %18 = vector.broadcast %c10_i32 : i32 to vector<1x16xi32>
      %19 = arith.cmpi sge, %17, %18 : vector<1x16xi32>
      %cst = arith.constant -1.000000e+09 : f32
      %cst_13 = arith.constant 0.000000e+00 : f32
      %20 = vector.broadcast %cst : f32 to vector<1x16xf32>
      %21 = vector.broadcast %cst_13 : f32 to vector<1x16xf32>
      %22 = arith.select %19, %20, %21 : vector<1x16xi1>, vector<1x16xf32>
      %23 = vector.shape_cast %22 : vector<1x16xf32> to vector<1x16xf32>
      %24 = vector.broadcast %23 : vector<1x16xf32> to vector<16x16xf32>
      %c0_14 = arith.constant 0 : index
      %c0_15 = arith.constant 0 : index
      %c0_16 = arith.constant 0 : index
      %25 = vector.load %arg4[%c0_14, %c0_15, %c0_16] : memref<1x1x128xf32, #tpu.memory_space<vmem>>, vector<1x1x128xf32>
      %26 = vector.shape_cast %25 : vector<1x1x128xf32> to vector<1x128xf32>
      %cst_17 = arith.constant -1.000000e+09 : f32
      %27 = vector.broadcast %cst_17 : f32 to vector<1x128xf32>
      %28 = arith.mulf %26, %27 : vector<1x128xf32>
      %29 = vector.shape_cast %28 : vector<1x128xf32> to vector<1x128xf32>
      %30 = vector.broadcast %29 : vector<1x128xf32> to vector<16x128xf32>
      %31 = arith.index_cast %12 : i32 to index
      %c0_18 = arith.constant 0 : index
      %c0_19 = arith.constant 0 : index
      %32 = vector.load %arg21[%31, %c0_18, %c0_19] : memref<2x32x96xf32, #tpu.memory_space<vmem>>, vector<1x32x96xf32>
      %33 = vector.shape_cast %32 : vector<1x32x96xf32> to vector<32x96xf32>
      %34 = arith.index_cast %12 : i32 to index
      %c0_20 = arith.constant 0 : index
      %c0_21 = arith.constant 0 : index
      %35 = vector.load %arg22[%34, %c0_20, %c0_21] : memref<2x1x96xf32, #tpu.memory_space<vmem>>, vector<1x1x96xf32>
      %36 = vector.shape_cast %35 : vector<1x1x96xf32> to vector<1x96xf32>
      %37 = arith.addf %13, %15 : vector<16x32xf32>
      %38 = vector.extract_strided_slice %33 {offsets = [0, 0], sizes = [32, 64], strides = [1, 1]} : vector<32x96xf32> to vector<32x64xf32>
      %cst_22 = arith.constant dense<0.000000e+00> : vector<16x64xf32>
      %39 = tpu.matmul %37, %38, %cst_22 {dimension_numbers = #tpu.dot_dimension_numbers<[1], [0], [0], [1], [0, 0, 1, 1], [], []>} : vector<16x32xf32>, vector<32x64xf32>, vector<16x64xf32> -> vector<16x64xf32>
      %40 = vector.extract_strided_slice %36 {offsets = [0, 0], sizes = [1, 64], strides = [1, 1]} : vector<1x96xf32> to vector<1x64xf32>
      %41 = vector.broadcast %40 : vector<1x64xf32> to vector<16x64xf32>
      %42 = arith.addf %39, %41 : vector<16x64xf32>
      %43 = vector.extract_strided_slice %33 {offsets = [0, 64], sizes = [32, 32], strides = [1, 1]} : vector<32x96xf32> to vector<32x32xf32>
      %cst_23 = arith.constant dense<0.000000e+00> : vector<16x32xf32>
      %44 = tpu.matmul %13, %43, %cst_23 {dimension_numbers = #tpu.dot_dimension_numbers<[1], [0], [0], [1], [0, 0, 1, 1], [], []>} : vector<16x32xf32>, vector<32x32xf32>, vector<16x32xf32> -> vector<16x32xf32>
      %45 = vector.extract_strided_slice %36 {offsets = [0, 64], sizes = [1, 32], strides = [1, 1]} : vector<1x96xf32> to vector<1x32xf32>
      %46 = vector.broadcast %45 : vector<1x32xf32> to vector<16x32xf32>
      %47 = arith.addf %44, %46 : vector<16x32xf32>
      %48 = vector.extract_strided_slice %42 {offsets = [0, 0], sizes = [16, 32], strides = [1, 1]} : vector<16x64xf32> to vector<16x32xf32>
      %49 = vector.extract_strided_slice %42 {offsets = [0, 32], sizes = [16, 32], strides = [1, 1]} : vector<16x64xf32> to vector<16x32xf32>
      %50 = arith.index_cast %12 : i32 to index
      %c0_24 = arith.constant 0 : index
      %c0_25 = arith.constant 0 : index
      %51 = vector.load %arg23[%50, %c0_24, %c0_25] : memref<2x32x32xf32, #tpu.memory_space<vmem>>, vector<1x32x32xf32>
      %52 = vector.shape_cast %51 : vector<1x32x32xf32> to vector<32x32xf32>
      %53 = arith.index_cast %12 : i32 to index
      %c0_26 = arith.constant 0 : index
      %c0_27 = arith.constant 0 : index
      %54 = vector.load %arg24[%53, %c0_26, %c0_27] : memref<2x1x32xf32, #tpu.memory_space<vmem>>, vector<1x1x32xf32>
      %55 = vector.shape_cast %54 : vector<1x1x32xf32> to vector<1x32xf32>
      %56 = vector.extract_strided_slice %48 {offsets = [0, 0], sizes = [16, 8], strides = [1, 1]} : vector<16x32xf32> to vector<16x8xf32>
      %57 = vector.extract_strided_slice %49 {offsets = [0, 0], sizes = [16, 8], strides = [1, 1]} : vector<16x32xf32> to vector<16x8xf32>
      %58 = vector.extract_strided_slice %47 {offsets = [0, 0], sizes = [16, 8], strides = [1, 1]} : vector<16x32xf32> to vector<16x8xf32>
      %cst_28 = arith.constant dense<0.000000e+00> : vector<16x16xf32>
      %59 = tpu.matmul %56, %57, %cst_28 {dimension_numbers = #tpu.dot_dimension_numbers<[1], [1], [0], [0], [0, 0, 1, 0], [], []>} : vector<16x8xf32>, vector<16x8xf32>, vector<16x16xf32> -> vector<16x16xf32>
      %cst_29 = arith.constant 0.353553385 : f32
      %60 = vector.broadcast %cst_29 : f32 to vector<16x16xf32>
      %61 = arith.mulf %59, %60 : vector<16x16xf32>
      %62 = arith.addf %61, %24 : vector<16x16xf32>
      %cst_30 = arith.constant dense<0xFF800000> : vector<16xf32>
      %63 = vector.multi_reduction <maximumf>, %62, %cst_30 [1] : vector<16x16xf32> to vector<16xf32>
      %64 = vector.shape_cast %63 : vector<16xf32> to vector<16x1xf32>
      %65 = vector.broadcast %64 : vector<16x1xf32> to vector<16x16xf32>
      %66 = arith.subf %62, %65 : vector<16x16xf32>
      %67 = math.exp %66 : vector<16x16xf32>
      %cst_31 = arith.constant dense<0.000000e+00> : vector<16xf32>
      %68 = vector.multi_reduction <add>, %67, %cst_31 [1] : vector<16x16xf32> to vector<16xf32>
      %69 = vector.shape_cast %68 : vector<16xf32> to vector<16x1xf32>
      %70 = vector.broadcast %69 : vector<16x1xf32> to vector<16x16xf32>
      %71 = arith.divf %67, %70 : vector<16x16xf32>
      %cst_32 = arith.constant dense<0.000000e+00> : vector<16x8xf32>
      %72 = tpu.matmul %71, %58, %cst_32 {dimension_numbers = #tpu.dot_dimension_numbers<[1], [0], [0], [1], [0, 0, 1, 1], [], []>} : vector<16x16xf32>, vector<16x8xf32>, vector<16x8xf32> -> vector<16x8xf32>
      %73 = vector.extract_strided_slice %48 {offsets = [0, 8], sizes = [16, 8], strides = [1, 1]} : vector<16x32xf32> to vector<16x8xf32>
      %74 = vector.extract_strided_slice %49 {offsets = [0, 8], sizes = [16, 8], strides = [1, 1]} : vector<16x32xf32> to vector<16x8xf32>
      %75 = vector.extract_strided_slice %47 {offsets = [0, 8], sizes = [16, 8], strides = [1, 1]} : vector<16x32xf32> to vector<16x8xf32>
      %cst_33 = arith.constant dense<0.000000e+00> : vector<16x16xf32>
      %76 = tpu.matmul %73, %74, %cst_33 {dimension_numbers = #tpu.dot_dimension_numbers<[1], [1], [0], [0], [0, 0, 1, 0], [], []>} : vector<16x8xf32>, vector<16x8xf32>, vector<16x16xf32> -> vector<16x16xf32>
      %cst_34 = arith.constant 0.353553385 : f32
      %77 = vector.broadcast %cst_34 : f32 to vector<16x16xf32>
      %78 = arith.mulf %76, %77 : vector<16x16xf32>
      %79 = arith.addf %78, %24 : vector<16x16xf32>
      %cst_35 = arith.constant dense<0xFF800000> : vector<16xf32>
      %80 = vector.multi_reduction <maximumf>, %79, %cst_35 [1] : vector<16x16xf32> to vector<16xf32>
      %81 = vector.shape_cast %80 : vector<16xf32> to vector<16x1xf32>
      %82 = vector.broadcast %81 : vector<16x1xf32> to vector<16x16xf32>
      %83 = arith.subf %79, %82 : vector<16x16xf32>
      %84 = math.exp %83 : vector<16x16xf32>
      %cst_36 = arith.constant dense<0.000000e+00> : vector<16xf32>
      %85 = vector.multi_reduction <add>, %84, %cst_36 [1] : vector<16x16xf32> to vector<16xf32>
      %86 = vector.shape_cast %85 : vector<16xf32> to vector<16x1xf32>
      %87 = vector.broadcast %86 : vector<16x1xf32> to vector<16x16xf32>
      %88 = arith.divf %84, %87 : vector<16x16xf32>
      %cst_37 = arith.constant dense<0.000000e+00> : vector<16x8xf32>
      %89 = tpu.matmul %88, %75, %cst_37 {dimension_numbers = #tpu.dot_dimension_numbers<[1], [0], [0], [1], [0, 0, 1, 1], [], []>} : vector<16x16xf32>, vector<16x8xf32>, vector<16x8xf32> -> vector<16x8xf32>
      %90 = vector.extract_strided_slice %48 {offsets = [0, 16], sizes = [16, 8], strides = [1, 1]} : vector<16x32xf32> to vector<16x8xf32>
      %91 = vector.extract_strided_slice %49 {offsets = [0, 16], sizes = [16, 8], strides = [1, 1]} : vector<16x32xf32> to vector<16x8xf32>
      %92 = vector.extract_strided_slice %47 {offsets = [0, 16], sizes = [16, 8], strides = [1, 1]} : vector<16x32xf32> to vector<16x8xf32>
      %cst_38 = arith.constant dense<0.000000e+00> : vector<16x16xf32>
      %93 = tpu.matmul %90, %91, %cst_38 {dimension_numbers = #tpu.dot_dimension_numbers<[1], [1], [0], [0], [0, 0, 1, 0], [], []>} : vector<16x8xf32>, vector<16x8xf32>, vector<16x16xf32> -> vector<16x16xf32>
      %cst_39 = arith.constant 0.353553385 : f32
      %94 = vector.broadcast %cst_39 : f32 to vector<16x16xf32>
      %95 = arith.mulf %93, %94 : vector<16x16xf32>
      %96 = arith.addf %95, %24 : vector<16x16xf32>
      %cst_40 = arith.constant dense<0xFF800000> : vector<16xf32>
      %97 = vector.multi_reduction <maximumf>, %96, %cst_40 [1] : vector<16x16xf32> to vector<16xf32>
      %98 = vector.shape_cast %97 : vector<16xf32> to vector<16x1xf32>
      %99 = vector.broadcast %98 : vector<16x1xf32> to vector<16x16xf32>
      %100 = arith.subf %96, %99 : vector<16x16xf32>
      %101 = math.exp %100 : vector<16x16xf32>
      %cst_41 = arith.constant dense<0.000000e+00> : vector<16xf32>
      %102 = vector.multi_reduction <add>, %101, %cst_41 [1] : vector<16x16xf32> to vector<16xf32>
      %103 = vector.shape_cast %102 : vector<16xf32> to vector<16x1xf32>
      %104 = vector.broadcast %103 : vector<16x1xf32> to vector<16x16xf32>
      %105 = arith.divf %101, %104 : vector<16x16xf32>
      %cst_42 = arith.constant dense<0.000000e+00> : vector<16x8xf32>
      %106 = tpu.matmul %105, %92, %cst_42 {dimension_numbers = #tpu.dot_dimension_numbers<[1], [0], [0], [1], [0, 0, 1, 1], [], []>} : vector<16x16xf32>, vector<16x8xf32>, vector<16x8xf32> -> vector<16x8xf32>
      %107 = vector.extract_strided_slice %48 {offsets = [0, 24], sizes = [16, 8], strides = [1, 1]} : vector<16x32xf32> to vector<16x8xf32>
      %108 = vector.extract_strided_slice %49 {offsets = [0, 24], sizes = [16, 8], strides = [1, 1]} : vector<16x32xf32> to vector<16x8xf32>
      %109 = vector.extract_strided_slice %47 {offsets = [0, 24], sizes = [16, 8], strides = [1, 1]} : vector<16x32xf32> to vector<16x8xf32>
      %cst_43 = arith.constant dense<0.000000e+00> : vector<16x16xf32>
      %110 = tpu.matmul %107, %108, %cst_43 {dimension_numbers = #tpu.dot_dimension_numbers<[1], [1], [0], [0], [0, 0, 1, 0], [], []>} : vector<16x8xf32>, vector<16x8xf32>, vector<16x16xf32> -> vector<16x16xf32>
      %cst_44 = arith.constant 0.353553385 : f32
      %111 = vector.broadcast %cst_44 : f32 to vector<16x16xf32>
      %112 = arith.mulf %110, %111 : vector<16x16xf32>
      %113 = arith.addf %112, %24 : vector<16x16xf32>
      %cst_45 = arith.constant dense<0xFF800000> : vector<16xf32>
      %114 = vector.multi_reduction <maximumf>, %113, %cst_45 [1] : vector<16x16xf32> to vector<16xf32>
      %115 = vector.shape_cast %114 : vector<16xf32> to vector<16x1xf32>
      %116 = vector.broadcast %115 : vector<16x1xf32> to vector<16x16xf32>
      %117 = arith.subf %113, %116 : vector<16x16xf32>
      %118 = math.exp %117 : vector<16x16xf32>
      %cst_46 = arith.constant dense<0.000000e+00> : vector<16xf32>
      %119 = vector.multi_reduction <add>, %118, %cst_46 [1] : vector<16x16xf32> to vector<16xf32>
      %120 = vector.shape_cast %119 : vector<16xf32> to vector<16x1xf32>
      %121 = vector.broadcast %120 : vector<16x1xf32> to vector<16x16xf32>
      %122 = arith.divf %118, %121 : vector<16x16xf32>
      %cst_47 = arith.constant dense<0.000000e+00> : vector<16x8xf32>
      %123 = tpu.matmul %122, %109, %cst_47 {dimension_numbers = #tpu.dot_dimension_numbers<[1], [0], [0], [1], [0, 0, 1, 1], [], []>} : vector<16x16xf32>, vector<16x8xf32>, vector<16x8xf32> -> vector<16x8xf32>
      %124 = tpu.concatenate %72, %89, %106, %123 in 1 : vector<16x8xf32>, vector<16x8xf32>, vector<16x8xf32>, vector<16x8xf32> -> vector<16x32xf32>
      %cst_48 = arith.constant dense<0.000000e+00> : vector<16x32xf32>
      %125 = tpu.matmul %124, %52, %cst_48 {dimension_numbers = #tpu.dot_dimension_numbers<[1], [0], [0], [1], [0, 0, 1, 1], [], []>} : vector<16x32xf32>, vector<32x32xf32>, vector<16x32xf32> -> vector<16x32xf32>
      %126 = vector.broadcast %55 : vector<1x32xf32> to vector<16x32xf32>
      %127 = arith.addf %125, %126 : vector<16x32xf32>
      %128 = arith.addf %13, %127 : vector<16x32xf32>
      %129 = arith.index_cast %12 : i32 to index
      %c0_49 = arith.constant 0 : index
      %c0_50 = arith.constant 0 : index
      %130 = vector.load %arg25[%129, %c0_49, %c0_50] : memref<2x1x32xf32, #tpu.memory_space<vmem>>, vector<1x1x32xf32>
      %131 = vector.shape_cast %130 : vector<1x1x32xf32> to vector<1x32xf32>
      %132 = arith.index_cast %12 : i32 to index
      %c0_51 = arith.constant 0 : index
      %c0_52 = arith.constant 0 : index
      %133 = vector.load %arg26[%132, %c0_51, %c0_52] : memref<2x1x32xf32, #tpu.memory_space<vmem>>, vector<1x1x32xf32>
      %134 = vector.shape_cast %133 : vector<1x1x32xf32> to vector<1x32xf32>
      %cst_53 = arith.constant dense<0.000000e+00> : vector<16xf32>
      %135 = vector.multi_reduction <add>, %128, %cst_53 [1] : vector<16x32xf32> to vector<16xf32>
      %136 = vector.shape_cast %135 : vector<16xf32> to vector<16x1xf32>
      %cst_54 = arith.constant 3.200000e+01 : f32
      %137 = vector.broadcast %cst_54 : f32 to vector<16x1xf32>
      %138 = arith.divf %136, %137 : vector<16x1xf32>
      %139 = vector.broadcast %138 : vector<16x1xf32> to vector<16x32xf32>
      %140 = arith.subf %128, %139 : vector<16x32xf32>
      %141 = arith.mulf %140, %140 : vector<16x32xf32>
      %cst_55 = arith.constant dense<0.000000e+00> : vector<16xf32>
      %142 = vector.multi_reduction <add>, %141, %cst_55 [1] : vector<16x32xf32> to vector<16xf32>
      %143 = vector.shape_cast %142 : vector<16xf32> to vector<16x1xf32>
      %cst_56 = arith.constant 3.200000e+01 : f32
      %144 = vector.broadcast %cst_56 : f32 to vector<16x1xf32>
      %145 = arith.divf %143, %144 : vector<16x1xf32>
      %146 = vector.broadcast %138 : vector<16x1xf32> to vector<16x32xf32>
      %147 = arith.subf %128, %146 : vector<16x32xf32>
      %cst_57 = arith.constant 9.99999974E-6 : f32
      %148 = vector.broadcast %cst_57 : f32 to vector<16x1xf32>
      %149 = arith.addf %145, %148 : vector<16x1xf32>
      %150 = math.rsqrt %149 : vector<16x1xf32>
      %151 = vector.broadcast %150 : vector<16x1xf32> to vector<16x32xf32>
      %152 = arith.mulf %147, %151 : vector<16x32xf32>
      %153 = vector.broadcast %131 : vector<1x32xf32> to vector<16x32xf32>
      %154 = arith.mulf %152, %153 : vector<16x32xf32>
      %155 = vector.broadcast %134 : vector<1x32xf32> to vector<16x32xf32>
      %156 = arith.addf %154, %155 : vector<16x32xf32>
      %157 = arith.addf %156, %15 : vector<16x32xf32>
      %158 = arith.index_cast %12 : i32 to index
      %c0_58 = arith.constant 0 : index
      %c0_59 = arith.constant 0 : index
      %159 = vector.load %arg27[%158, %c0_58, %c0_59] : memref<2x32x32xf32, #tpu.memory_space<vmem>>, vector<1x32x32xf32>
      %160 = vector.shape_cast %159 : vector<1x32x32xf32> to vector<32x32xf32>
      %cst_60 = arith.constant dense<0.000000e+00> : vector<16x32xf32>
      %161 = tpu.matmul %157, %160, %cst_60 {dimension_numbers = #tpu.dot_dimension_numbers<[1], [0], [0], [1], [0, 0, 1, 1], [], []>} : vector<16x32xf32>, vector<32x32xf32>, vector<16x32xf32> -> vector<16x32xf32>
      %162 = arith.index_cast %12 : i32 to index
      %c0_61 = arith.constant 0 : index
      %c0_62 = arith.constant 0 : index
      %163 = vector.load %arg28[%162, %c0_61, %c0_62] : memref<2x1x32xf32, #tpu.memory_space<vmem>>, vector<1x1x32xf32>
      %164 = vector.shape_cast %163 : vector<1x1x32xf32> to vector<1x32xf32>
      %165 = vector.broadcast %164 : vector<1x32xf32> to vector<16x32xf32>
      %166 = arith.addf %161, %165 : vector<16x32xf32>
      %167 = arith.index_cast %12 : i32 to index
      %c0_63 = arith.constant 0 : index
      %c0_64 = arith.constant 0 : index
      %168 = vector.load %arg29[%167, %c0_63, %c0_64] : memref<2x32x64xf32, #tpu.memory_space<vmem>>, vector<1x32x64xf32>
      %169 = vector.shape_cast %168 : vector<1x32x64xf32> to vector<32x64xf32>
      %cst_65 = arith.constant dense<0.000000e+00> : vector<128x64xf32>
      %170 = tpu.matmul %16, %169, %cst_65 {dimension_numbers = #tpu.dot_dimension_numbers<[1], [0], [0], [1], [0, 0, 1, 1], [], []>} : vector<128x32xf32>, vector<32x64xf32>, vector<128x64xf32> -> vector<128x64xf32>
      %171 = arith.index_cast %12 : i32 to index
      %c0_66 = arith.constant 0 : index
      %c0_67 = arith.constant 0 : index
      %172 = vector.load %arg30[%171, %c0_66, %c0_67] : memref<2x1x64xf32, #tpu.memory_space<vmem>>, vector<1x1x64xf32>
      %173 = vector.shape_cast %172 : vector<1x1x64xf32> to vector<1x64xf32>
      %174 = vector.broadcast %173 : vector<1x64xf32> to vector<128x64xf32>
      %175 = arith.addf %170, %174 : vector<128x64xf32>
      %176 = vector.extract_strided_slice %175 {offsets = [0, 0], sizes = [128, 32], strides = [1, 1]} : vector<128x64xf32> to vector<128x32xf32>
      %177 = vector.extract_strided_slice %175 {offsets = [0, 32], sizes = [128, 32], strides = [1, 1]} : vector<128x64xf32> to vector<128x32xf32>
      %178 = arith.index_cast %12 : i32 to index
      %c0_68 = arith.constant 0 : index
      %c0_69 = arith.constant 0 : index
      %179 = vector.load %arg31[%178, %c0_68, %c0_69] : memref<2x32x32xf32, #tpu.memory_space<vmem>>, vector<1x32x32xf32>
      %180 = vector.shape_cast %179 : vector<1x32x32xf32> to vector<32x32xf32>
      %181 = arith.index_cast %12 : i32 to index
      %c0_70 = arith.constant 0 : index
      %c0_71 = arith.constant 0 : index
      %182 = vector.load %arg32[%181, %c0_70, %c0_71] : memref<2x1x32xf32, #tpu.memory_space<vmem>>, vector<1x1x32xf32>
      %183 = vector.shape_cast %182 : vector<1x1x32xf32> to vector<1x32xf32>
      %184 = vector.extract_strided_slice %166 {offsets = [0, 0], sizes = [16, 8], strides = [1, 1]} : vector<16x32xf32> to vector<16x8xf32>
      %185 = vector.extract_strided_slice %176 {offsets = [0, 0], sizes = [128, 8], strides = [1, 1]} : vector<128x32xf32> to vector<128x8xf32>
      %186 = vector.extract_strided_slice %177 {offsets = [0, 0], sizes = [128, 8], strides = [1, 1]} : vector<128x32xf32> to vector<128x8xf32>
      %cst_72 = arith.constant dense<0.000000e+00> : vector<16x128xf32>
      %187 = tpu.matmul %184, %185, %cst_72 {dimension_numbers = #tpu.dot_dimension_numbers<[1], [1], [0], [0], [0, 0, 1, 0], [], []>} : vector<16x8xf32>, vector<128x8xf32>, vector<16x128xf32> -> vector<16x128xf32>
      %cst_73 = arith.constant 0.353553385 : f32
      %188 = vector.broadcast %cst_73 : f32 to vector<16x128xf32>
      %189 = arith.mulf %187, %188 : vector<16x128xf32>
      %190 = arith.addf %189, %30 : vector<16x128xf32>
      %cst_74 = arith.constant dense<0xFF800000> : vector<16xf32>
      %191 = vector.multi_reduction <maximumf>, %190, %cst_74 [1] : vector<16x128xf32> to vector<16xf32>
      %192 = vector.shape_cast %191 : vector<16xf32> to vector<16x1xf32>
      %193 = vector.broadcast %192 : vector<16x1xf32> to vector<16x128xf32>
      %194 = arith.subf %190, %193 : vector<16x128xf32>
      %195 = math.exp %194 : vector<16x128xf32>
      %cst_75 = arith.constant dense<0.000000e+00> : vector<16xf32>
      %196 = vector.multi_reduction <add>, %195, %cst_75 [1] : vector<16x128xf32> to vector<16xf32>
      %197 = vector.shape_cast %196 : vector<16xf32> to vector<16x1xf32>
      %198 = vector.broadcast %197 : vector<16x1xf32> to vector<16x128xf32>
      %199 = arith.divf %195, %198 : vector<16x128xf32>
      %cst_76 = arith.constant dense<0.000000e+00> : vector<16x8xf32>
      %200 = tpu.matmul %199, %186, %cst_76 {dimension_numbers = #tpu.dot_dimension_numbers<[1], [0], [0], [1], [0, 0, 1, 1], [], []>} : vector<16x128xf32>, vector<128x8xf32>, vector<16x8xf32> -> vector<16x8xf32>
      %201 = vector.extract_strided_slice %166 {offsets = [0, 8], sizes = [16, 8], strides = [1, 1]} : vector<16x32xf32> to vector<16x8xf32>
      %202 = vector.extract_strided_slice %176 {offsets = [0, 8], sizes = [128, 8], strides = [1, 1]} : vector<128x32xf32> to vector<128x8xf32>
      %203 = vector.extract_strided_slice %177 {offsets = [0, 8], sizes = [128, 8], strides = [1, 1]} : vector<128x32xf32> to vector<128x8xf32>
      %cst_77 = arith.constant dense<0.000000e+00> : vector<16x128xf32>
      %204 = tpu.matmul %201, %202, %cst_77 {dimension_numbers = #tpu.dot_dimension_numbers<[1], [1], [0], [0], [0, 0, 1, 0], [], []>} : vector<16x8xf32>, vector<128x8xf32>, vector<16x128xf32> -> vector<16x128xf32>
      %cst_78 = arith.constant 0.353553385 : f32
      %205 = vector.broadcast %cst_78 : f32 to vector<16x128xf32>
      %206 = arith.mulf %204, %205 : vector<16x128xf32>
      %207 = arith.addf %206, %30 : vector<16x128xf32>
      %cst_79 = arith.constant dense<0xFF800000> : vector<16xf32>
      %208 = vector.multi_reduction <maximumf>, %207, %cst_79 [1] : vector<16x128xf32> to vector<16xf32>
      %209 = vector.shape_cast %208 : vector<16xf32> to vector<16x1xf32>
      %210 = vector.broadcast %209 : vector<16x1xf32> to vector<16x128xf32>
      %211 = arith.subf %207, %210 : vector<16x128xf32>
      %212 = math.exp %211 : vector<16x128xf32>
      %cst_80 = arith.constant dense<0.000000e+00> : vector<16xf32>
      %213 = vector.multi_reduction <add>, %212, %cst_80 [1] : vector<16x128xf32> to vector<16xf32>
      %214 = vector.shape_cast %213 : vector<16xf32> to vector<16x1xf32>
      %215 = vector.broadcast %214 : vector<16x1xf32> to vector<16x128xf32>
      %216 = arith.divf %212, %215 : vector<16x128xf32>
      %cst_81 = arith.constant dense<0.000000e+00> : vector<16x8xf32>
      %217 = tpu.matmul %216, %203, %cst_81 {dimension_numbers = #tpu.dot_dimension_numbers<[1], [0], [0], [1], [0, 0, 1, 1], [], []>} : vector<16x128xf32>, vector<128x8xf32>, vector<16x8xf32> -> vector<16x8xf32>
      %218 = vector.extract_strided_slice %166 {offsets = [0, 16], sizes = [16, 8], strides = [1, 1]} : vector<16x32xf32> to vector<16x8xf32>
      %219 = vector.extract_strided_slice %176 {offsets = [0, 16], sizes = [128, 8], strides = [1, 1]} : vector<128x32xf32> to vector<128x8xf32>
      %220 = vector.extract_strided_slice %177 {offsets = [0, 16], sizes = [128, 8], strides = [1, 1]} : vector<128x32xf32> to vector<128x8xf32>
      %cst_82 = arith.constant dense<0.000000e+00> : vector<16x128xf32>
      %221 = tpu.matmul %218, %219, %cst_82 {dimension_numbers = #tpu.dot_dimension_numbers<[1], [1], [0], [0], [0, 0, 1, 0], [], []>} : vector<16x8xf32>, vector<128x8xf32>, vector<16x128xf32> -> vector<16x128xf32>
      %cst_83 = arith.constant 0.353553385 : f32
      %222 = vector.broadcast %cst_83 : f32 to vector<16x128xf32>
      %223 = arith.mulf %221, %222 : vector<16x128xf32>
      %224 = arith.addf %223, %30 : vector<16x128xf32>
      %cst_84 = arith.constant dense<0xFF800000> : vector<16xf32>
      %225 = vector.multi_reduction <maximumf>, %224, %cst_84 [1] : vector<16x128xf32> to vector<16xf32>
      %226 = vector.shape_cast %225 : vector<16xf32> to vector<16x1xf32>
      %227 = vector.broadcast %226 : vector<16x1xf32> to vector<16x128xf32>
      %228 = arith.subf %224, %227 : vector<16x128xf32>
      %229 = math.exp %228 : vector<16x128xf32>
      %cst_85 = arith.constant dense<0.000000e+00> : vector<16xf32>
      %230 = vector.multi_reduction <add>, %229, %cst_85 [1] : vector<16x128xf32> to vector<16xf32>
      %231 = vector.shape_cast %230 : vector<16xf32> to vector<16x1xf32>
      %232 = vector.broadcast %231 : vector<16x1xf32> to vector<16x128xf32>
      %233 = arith.divf %229, %232 : vector<16x128xf32>
      %cst_86 = arith.constant dense<0.000000e+00> : vector<16x8xf32>
      %234 = tpu.matmul %233, %220, %cst_86 {dimension_numbers = #tpu.dot_dimension_numbers<[1], [0], [0], [1], [0, 0, 1, 1], [], []>} : vector<16x128xf32>, vector<128x8xf32>, vector<16x8xf32> -> vector<16x8xf32>
      %235 = vector.extract_strided_slice %166 {offsets = [0, 24], sizes = [16, 8], strides = [1, 1]} : vector<16x32xf32> to vector<16x8xf32>
      %236 = vector.extract_strided_slice %176 {offsets = [0, 24], sizes = [128, 8], strides = [1, 1]} : vector<128x32xf32> to vector<128x8xf32>
      %237 = vector.extract_strided_slice %177 {offsets = [0, 24], sizes = [128, 8], strides = [1, 1]} : vector<128x32xf32> to vector<128x8xf32>
      %cst_87 = arith.constant dense<0.000000e+00> : vector<16x128xf32>
      %238 = tpu.matmul %235, %236, %cst_87 {dimension_numbers = #tpu.dot_dimension_numbers<[1], [1], [0], [0], [0, 0, 1, 0], [], []>} : vector<16x8xf32>, vector<128x8xf32>, vector<16x128xf32> -> vector<16x128xf32>
      %cst_88 = arith.constant 0.353553385 : f32
      %239 = vector.broadcast %cst_88 : f32 to vector<16x128xf32>
      %240 = arith.mulf %238, %239 : vector<16x128xf32>
      %241 = arith.addf %240, %30 : vector<16x128xf32>
      %cst_89 = arith.constant dense<0xFF800000> : vector<16xf32>
      %242 = vector.multi_reduction <maximumf>, %241, %cst_89 [1] : vector<16x128xf32> to vector<16xf32>
      %243 = vector.shape_cast %242 : vector<16xf32> to vector<16x1xf32>
      %244 = vector.broadcast %243 : vector<16x1xf32> to vector<16x128xf32>
      %245 = arith.subf %241, %244 : vector<16x128xf32>
      %246 = math.exp %245 : vector<16x128xf32>
      %cst_90 = arith.constant dense<0.000000e+00> : vector<16xf32>
      %247 = vector.multi_reduction <add>, %246, %cst_90 [1] : vector<16x128xf32> to vector<16xf32>
      %248 = vector.shape_cast %247 : vector<16xf32> to vector<16x1xf32>
      %249 = vector.broadcast %248 : vector<16x1xf32> to vector<16x128xf32>
      %250 = arith.divf %246, %249 : vector<16x128xf32>
      %cst_91 = arith.constant dense<0.000000e+00> : vector<16x8xf32>
      %251 = tpu.matmul %250, %237, %cst_91 {dimension_numbers = #tpu.dot_dimension_numbers<[1], [0], [0], [1], [0, 0, 1, 1], [], []>} : vector<16x128xf32>, vector<128x8xf32>, vector<16x8xf32> -> vector<16x8xf32>
      %252 = tpu.concatenate %200, %217, %234, %251 in 1 : vector<16x8xf32>, vector<16x8xf32>, vector<16x8xf32>, vector<16x8xf32> -> vector<16x32xf32>
      %cst_92 = arith.constant dense<0.000000e+00> : vector<16x32xf32>
      %253 = tpu.matmul %252, %180, %cst_92 {dimension_numbers = #tpu.dot_dimension_numbers<[1], [0], [0], [1], [0, 0, 1, 1], [], []>} : vector<16x32xf32>, vector<32x32xf32>, vector<16x32xf32> -> vector<16x32xf32>
      %254 = vector.broadcast %183 : vector<1x32xf32> to vector<16x32xf32>
      %255 = arith.addf %253, %254 : vector<16x32xf32>
      %256 = arith.addf %156, %255 : vector<16x32xf32>
      %257 = arith.index_cast %12 : i32 to index
      %c0_93 = arith.constant 0 : index
      %c0_94 = arith.constant 0 : index
      %258 = vector.load %arg33[%257, %c0_93, %c0_94] : memref<2x1x32xf32, #tpu.memory_space<vmem>>, vector<1x1x32xf32>
      %259 = vector.shape_cast %258 : vector<1x1x32xf32> to vector<1x32xf32>
      %260 = arith.index_cast %12 : i32 to index
      %c0_95 = arith.constant 0 : index
      %c0_96 = arith.constant 0 : index
      %261 = vector.load %arg34[%260, %c0_95, %c0_96] : memref<2x1x32xf32, #tpu.memory_space<vmem>>, vector<1x1x32xf32>
      %262 = vector.shape_cast %261 : vector<1x1x32xf32> to vector<1x32xf32>
      %cst_97 = arith.constant dense<0.000000e+00> : vector<16xf32>
      %263 = vector.multi_reduction <add>, %256, %cst_97 [1] : vector<16x32xf32> to vector<16xf32>
      %264 = vector.shape_cast %263 : vector<16xf32> to vector<16x1xf32>
      %cst_98 = arith.constant 3.200000e+01 : f32
      %265 = vector.broadcast %cst_98 : f32 to vector<16x1xf32>
      %266 = arith.divf %264, %265 : vector<16x1xf32>
      %267 = vector.broadcast %266 : vector<16x1xf32> to vector<16x32xf32>
      %268 = arith.subf %256, %267 : vector<16x32xf32>
      %269 = arith.mulf %268, %268 : vector<16x32xf32>
      %cst_99 = arith.constant dense<0.000000e+00> : vector<16xf32>
      %270 = vector.multi_reduction <add>, %269, %cst_99 [1] : vector<16x32xf32> to vector<16xf32>
      %271 = vector.shape_cast %270 : vector<16xf32> to vector<16x1xf32>
      %cst_100 = arith.constant 3.200000e+01 : f32
      %272 = vector.broadcast %cst_100 : f32 to vector<16x1xf32>
      %273 = arith.divf %271, %272 : vector<16x1xf32>
      %274 = vector.broadcast %266 : vector<16x1xf32> to vector<16x32xf32>
      %275 = arith.subf %256, %274 : vector<16x32xf32>
      %cst_101 = arith.constant 9.99999974E-6 : f32
      %276 = vector.broadcast %cst_101 : f32 to vector<16x1xf32>
      %277 = arith.addf %273, %276 : vector<16x1xf32>
      %278 = math.rsqrt %277 : vector<16x1xf32>
      %279 = vector.broadcast %278 : vector<16x1xf32> to vector<16x32xf32>
      %280 = arith.mulf %275, %279 : vector<16x32xf32>
      %281 = vector.broadcast %259 : vector<1x32xf32> to vector<16x32xf32>
      %282 = arith.mulf %280, %281 : vector<16x32xf32>
      %283 = vector.broadcast %262 : vector<1x32xf32> to vector<16x32xf32>
      %284 = arith.addf %282, %283 : vector<16x32xf32>
      %285 = arith.index_cast %12 : i32 to index
      %c0_102 = arith.constant 0 : index
      %c0_103 = arith.constant 0 : index
      %286 = vector.load %arg35[%285, %c0_102, %c0_103] : memref<2x32x64xf32, #tpu.memory_space<vmem>>, vector<1x32x64xf32>
      %287 = vector.shape_cast %286 : vector<1x32x64xf32> to vector<32x64xf32>
      %cst_104 = arith.constant dense<0.000000e+00> : vector<16x64xf32>
      %288 = tpu.matmul %284, %287, %cst_104 {dimension_numbers = #tpu.dot_dimension_numbers<[1], [0], [0], [1], [0, 0, 1, 1], [], []>} : vector<16x32xf32>, vector<32x64xf32>, vector<16x64xf32> -> vector<16x64xf32>
      %289 = arith.index_cast %12 : i32 to index
      %c0_105 = arith.constant 0 : index
      %c0_106 = arith.constant 0 : index
      %290 = vector.load %arg36[%289, %c0_105, %c0_106] : memref<2x1x64xf32, #tpu.memory_space<vmem>>, vector<1x1x64xf32>
      %291 = vector.shape_cast %290 : vector<1x1x64xf32> to vector<1x64xf32>
      %292 = vector.broadcast %291 : vector<1x64xf32> to vector<16x64xf32>
      %293 = arith.addf %288, %292 : vector<16x64xf32>
      %cst_107 = arith.constant 0.000000e+00 : f32
      %294 = vector.broadcast %cst_107 : f32 to vector<16x64xf32>
      %295 = arith.maximumf %293, %294 : vector<16x64xf32>
      %296 = arith.index_cast %12 : i32 to index
      %c0_108 = arith.constant 0 : index
      %c0_109 = arith.constant 0 : index
      %297 = vector.load %arg37[%296, %c0_108, %c0_109] : memref<2x64x32xf32, #tpu.memory_space<vmem>>, vector<1x64x32xf32>
      %298 = vector.shape_cast %297 : vector<1x64x32xf32> to vector<64x32xf32>
      %cst_110 = arith.constant dense<0.000000e+00> : vector<16x32xf32>
      %299 = tpu.matmul %295, %298, %cst_110 {dimension_numbers = #tpu.dot_dimension_numbers<[1], [0], [0], [1], [0, 0, 1, 1], [], []>} : vector<16x64xf32>, vector<64x32xf32>, vector<16x32xf32> -> vector<16x32xf32>
      %300 = arith.index_cast %12 : i32 to index
      %c0_111 = arith.constant 0 : index
      %c0_112 = arith.constant 0 : index
      %301 = vector.load %arg38[%300, %c0_111, %c0_112] : memref<2x1x32xf32, #tpu.memory_space<vmem>>, vector<1x1x32xf32>
      %302 = vector.shape_cast %301 : vector<1x1x32xf32> to vector<1x32xf32>
      %303 = vector.broadcast %302 : vector<1x32xf32> to vector<16x32xf32>
      %304 = arith.addf %299, %303 : vector<16x32xf32>
      %305 = arith.addf %284, %304 : vector<16x32xf32>
      %306 = arith.index_cast %12 : i32 to index
      %c0_113 = arith.constant 0 : index
      %c0_114 = arith.constant 0 : index
      %307 = vector.load %arg39[%306, %c0_113, %c0_114] : memref<2x1x32xf32, #tpu.memory_space<vmem>>, vector<1x1x32xf32>
      %308 = vector.shape_cast %307 : vector<1x1x32xf32> to vector<1x32xf32>
      %309 = arith.index_cast %12 : i32 to index
      %c0_115 = arith.constant 0 : index
      %c0_116 = arith.constant 0 : index
      %310 = vector.load %arg40[%309, %c0_115, %c0_116] : memref<2x1x32xf32, #tpu.memory_space<vmem>>, vector<1x1x32xf32>
      %311 = vector.shape_cast %310 : vector<1x1x32xf32> to vector<1x32xf32>
      %cst_117 = arith.constant dense<0.000000e+00> : vector<16xf32>
      %312 = vector.multi_reduction <add>, %305, %cst_117 [1] : vector<16x32xf32> to vector<16xf32>
      %313 = vector.shape_cast %312 : vector<16xf32> to vector<16x1xf32>
      %cst_118 = arith.constant 3.200000e+01 : f32
      %314 = vector.broadcast %cst_118 : f32 to vector<16x1xf32>
      %315 = arith.divf %313, %314 : vector<16x1xf32>
      %316 = vector.broadcast %315 : vector<16x1xf32> to vector<16x32xf32>
      %317 = arith.subf %305, %316 : vector<16x32xf32>
      %318 = arith.mulf %317, %317 : vector<16x32xf32>
      %cst_119 = arith.constant dense<0.000000e+00> : vector<16xf32>
      %319 = vector.multi_reduction <add>, %318, %cst_119 [1] : vector<16x32xf32> to vector<16xf32>
      %320 = vector.shape_cast %319 : vector<16xf32> to vector<16x1xf32>
      %cst_120 = arith.constant 3.200000e+01 : f32
      %321 = vector.broadcast %cst_120 : f32 to vector<16x1xf32>
      %322 = arith.divf %320, %321 : vector<16x1xf32>
      %323 = vector.broadcast %315 : vector<16x1xf32> to vector<16x32xf32>
      %324 = arith.subf %305, %323 : vector<16x32xf32>
      %cst_121 = arith.constant 9.99999974E-6 : f32
      %325 = vector.broadcast %cst_121 : f32 to vector<16x1xf32>
      %326 = arith.addf %322, %325 : vector<16x1xf32>
      %327 = math.rsqrt %326 : vector<16x1xf32>
      %328 = vector.broadcast %327 : vector<16x1xf32> to vector<16x32xf32>
      %329 = arith.mulf %324, %328 : vector<16x32xf32>
      %330 = vector.broadcast %308 : vector<1x32xf32> to vector<16x32xf32>
      %331 = arith.mulf %329, %330 : vector<16x32xf32>
      %332 = vector.broadcast %311 : vector<1x32xf32> to vector<16x32xf32>
      %333 = arith.addf %331, %332 : vector<16x32xf32>
      %c0_122 = arith.constant 0 : index
      %c0_123 = arith.constant 0 : index
      %334 = vector.load %arg44[%c0_122, %c0_123] : memref<16x32xf32, #tpu.memory_space<vmem>>, vector<16x32xf32>
      tpu.vector_store %arg44[%c0_122, %c0_123], %333 {strides = array<i32>} : memref<16x32xf32, #tpu.memory_space<vmem>>, vector<16x32xf32>,
      %c0_124 = arith.constant 0 : index
      %c0_125 = arith.constant 0 : index
      %c0_126 = arith.constant 0 : index
      %c0_127 = arith.constant 0 : index
      %335 = vector.load %arg41[%c0_124, %c0_125, %c0_126, %c0_127] : memref<1x1x16x32xf32, #tpu.memory_space<vmem>>, vector<1x1x16x32xf32>
      %336 = vector.shape_cast %335 : vector<1x1x16x32xf32> to vector<16x32xf32>
      %337 = vector.shape_cast %333 : vector<16x32xf32> to vector<1x1x16x32xf32>
      tpu.vector_store %arg41[%c0_124, %c0_125, %c0_126, %c0_127], %337 {strides = array<i32>} : memref<1x1x16x32xf32, #tpu.memory_space<vmem>>, vector<1x1x16x32xf32>,
    } else {
    }
    return
  }
  func.func @transform_0(%arg0: i32, %arg1: i32) -> (i32, i32, i32) {
    %c0_i32 = arith.constant 0 : i32
    %c0_i32_0 = arith.constant 0 : i32
    %c0_i32_1 = arith.constant 0 : i32
    return %arg0, %c0_i32, %c0_i32_0 : i32, i32, i32
  }
  func.func @transform_1(%arg0: i32, %arg1: i32) -> (i32, i32, i32) {
    %c0_i32 = arith.constant 0 : i32
    %c0_i32_0 = arith.constant 0 : i32
    %c0_i32_1 = arith.constant 0 : i32
    return %arg0, %c0_i32, %c0_i32_0 : i32, i32, i32
  }
  func.func @transform_2(%arg0: i32, %arg1: i32) -> (i32, i32, i32) {
    %c0_i32 = arith.constant 0 : i32
    %c0_i32_0 = arith.constant 0 : i32
    %c0_i32_1 = arith.constant 0 : i32
    return %arg0, %c0_i32, %c0_i32_0 : i32, i32, i32
  }
  func.func @transform_3(%arg0: i32, %arg1: i32) -> (i32, i32, i32) {
    %c0_i32 = arith.constant 0 : i32
    %c0_i32_0 = arith.constant 0 : i32
    %c0_i32_1 = arith.constant 0 : i32
    return %arg0, %c0_i32, %c0_i32_0 : i32, i32, i32
  }
  func.func @transform_4(%arg0: i32, %arg1: i32) -> (i32, i32, i32) {
    %c0_i32 = arith.constant 0 : i32
    %c0_i32_0 = arith.constant 0 : i32
    %c0_i32_1 = arith.constant 0 : i32
    return %arg0, %c0_i32, %c0_i32_0 : i32, i32, i32
  }
  func.func @transform_5(%arg0: i32, %arg1: i32) -> (i32, i32) {
    %c0_i32 = arith.constant 0 : i32
    %c0_i32_0 = arith.constant 0 : i32
    %c0_i32_1 = arith.constant 0 : i32
    return %c0_i32, %c0_i32_0 : i32, i32
  }
  func.func @transform_6(%arg0: i32, %arg1: i32) -> (i32, i32) {
    %c0_i32 = arith.constant 0 : i32
    %c0_i32_0 = arith.constant 0 : i32
    %c0_i32_1 = arith.constant 0 : i32
    return %c0_i32, %c0_i32_0 : i32, i32
  }
  func.func @transform_7(%arg0: i32, %arg1: i32) -> (i32, i32, i32) {
    %c0_i32 = arith.constant 0 : i32
    %c0_i32_0 = arith.constant 0 : i32
    %c0_i32_1 = arith.constant 0 : i32
    %c0_i32_2 = arith.constant 0 : i32
    return %c0_i32, %c0_i32_0, %c0_i32_1 : i32, i32, i32
  }
  func.func @transform_8(%arg0: i32, %arg1: i32) -> (i32, i32, i32) {
    %c0_i32 = arith.constant 0 : i32
    %c0_i32_0 = arith.constant 0 : i32
    %c0_i32_1 = arith.constant 0 : i32
    %c0_i32_2 = arith.constant 0 : i32
    return %c0_i32, %c0_i32_0, %c0_i32_1 : i32, i32, i32
  }
  func.func @transform_9(%arg0: i32, %arg1: i32) -> (i32, i32, i32) {
    %c0_i32 = arith.constant 0 : i32
    %c0_i32_0 = arith.constant 0 : i32
    %c0_i32_1 = arith.constant 0 : i32
    %c0_i32_2 = arith.constant 0 : i32
    return %c0_i32, %c0_i32_0, %c0_i32_1 : i32, i32, i32
  }
  func.func @transform_10(%arg0: i32, %arg1: i32) -> (i32, i32, i32) {
    %c0_i32 = arith.constant 0 : i32
    %c0_i32_0 = arith.constant 0 : i32
    %c0_i32_1 = arith.constant 0 : i32
    %c0_i32_2 = arith.constant 0 : i32
    return %c0_i32, %c0_i32_0, %c0_i32_1 : i32, i32, i32
  }
  func.func @transform_11(%arg0: i32, %arg1: i32) -> (i32, i32, i32) {
    %c0_i32 = arith.constant 0 : i32
    %c0_i32_0 = arith.constant 0 : i32
    %c0_i32_1 = arith.constant 0 : i32
    %c0_i32_2 = arith.constant 0 : i32
    return %c0_i32, %c0_i32_0, %c0_i32_1 : i32, i32, i32
  }
  func.func @transform_12(%arg0: i32, %arg1: i32) -> (i32, i32, i32) {
    %c0_i32 = arith.constant 0 : i32
    %c0_i32_0 = arith.constant 0 : i32
    %c0_i32_1 = arith.constant 0 : i32
    %c0_i32_2 = arith.constant 0 : i32
    return %c0_i32, %c0_i32_0, %c0_i32_1 : i32, i32, i32
  }
  func.func @transform_13(%arg0: i32, %arg1: i32) -> (i32, i32, i32) {
    %c0_i32 = arith.constant 0 : i32
    %c0_i32_0 = arith.constant 0 : i32
    %c0_i32_1 = arith.constant 0 : i32
    %c0_i32_2 = arith.constant 0 : i32
    return %c0_i32, %c0_i32_0, %c0_i32_1 : i32, i32, i32
  }
  func.func @transform_14(%arg0: i32, %arg1: i32) -> (i32, i32, i32) {
    %c0_i32 = arith.constant 0 : i32
    %c0_i32_0 = arith.constant 0 : i32
    %c0_i32_1 = arith.constant 0 : i32
    %c0_i32_2 = arith.constant 0 : i32
    return %c0_i32, %c0_i32_0, %c0_i32_1 : i32, i32, i32
  }
  func.func @transform_15(%arg0: i32, %arg1: i32) -> (i32, i32, i32) {
    %c0_i32 = arith.constant 0 : i32
    %c0_i32_0 = arith.constant 0 : i32
    %c0_i32_1 = arith.constant 0 : i32
    %c0_i32_2 = arith.constant 0 : i32
    return %c0_i32, %c0_i32_0, %c0_i32_1 : i32, i32, i32
  }
  func.func @transform_16(%arg0: i32, %arg1: i32) -> (i32, i32, i32) {
    %c0_i32 = arith.constant 0 : i32
    %c0_i32_0 = arith.constant 0 : i32
    %c0_i32_1 = arith.constant 0 : i32
    %c0_i32_2 = arith.constant 0 : i32
    return %c0_i32, %c0_i32_0, %c0_i32_1 : i32, i32, i32
  }
  func.func @transform_17(%arg0: i32, %arg1: i32) -> (i32, i32, i32) {
    %c0_i32 = arith.constant 0 : i32
    %c0_i32_0 = arith.constant 0 : i32
    %c0_i32_1 = arith.constant 0 : i32
    %c0_i32_2 = arith.constant 0 : i32
    return %c0_i32, %c0_i32_0, %c0_i32_1 : i32, i32, i32
  }
  func.func @transform_18(%arg0: i32, %arg1: i32) -> (i32, i32, i32) {
    %c0_i32 = arith.constant 0 : i32
    %c0_i32_0 = arith.constant 0 : i32
    %c0_i32_1 = arith.constant 0 : i32
    %c0_i32_2 = arith.constant 0 : i32
    return %c0_i32, %c0_i32_0, %c0_i32_1 : i32, i32, i32
  }
  func.func @transform_19(%arg0: i32, %arg1: i32) -> (i32, i32, i32) {
    %c0_i32 = arith.constant 0 : i32
    %c0_i32_0 = arith.constant 0 : i32
    %c0_i32_1 = arith.constant 0 : i32
    %c0_i32_2 = arith.constant 0 : i32
    return %c0_i32, %c0_i32_0, %c0_i32_1 : i32, i32, i32
  }
  func.func @transform_20(%arg0: i32, %arg1: i32) -> (i32, i32, i32) {
    %c0_i32 = arith.constant 0 : i32
    %c0_i32_0 = arith.constant 0 : i32
    %c0_i32_1 = arith.constant 0 : i32
    %c0_i32_2 = arith.constant 0 : i32
    return %c0_i32, %c0_i32_0, %c0_i32_1 : i32, i32, i32
  }
  func.func @transform_21(%arg0: i32, %arg1: i32) -> (i32, i32, i32) {
    %c0_i32 = arith.constant 0 : i32
    %c0_i32_0 = arith.constant 0 : i32
    %c0_i32_1 = arith.constant 0 : i32
    %c0_i32_2 = arith.constant 0 : i32
    return %c0_i32, %c0_i32_0, %c0_i32_1 : i32, i32, i32
  }
  func.func @transform_22(%arg0: i32, %arg1: i32) -> (i32, i32, i32) {
    %c0_i32 = arith.constant 0 : i32
    %c0_i32_0 = arith.constant 0 : i32
    %c0_i32_1 = arith.constant 0 : i32
    %c0_i32_2 = arith.constant 0 : i32
    return %c0_i32, %c0_i32_0, %c0_i32_1 : i32, i32, i32
  }
  func.func @transform_23(%arg0: i32, %arg1: i32) -> (i32, i32, i32) {
    %c0_i32 = arith.constant 0 : i32
    %c0_i32_0 = arith.constant 0 : i32
    %c0_i32_1 = arith.constant 0 : i32
    %c0_i32_2 = arith.constant 0 : i32
    return %c0_i32, %c0_i32_0, %c0_i32_1 : i32, i32, i32
  }
  func.func @transform_24(%arg0: i32, %arg1: i32) -> (i32, i32, i32) {
    %c0_i32 = arith.constant 0 : i32
    %c0_i32_0 = arith.constant 0 : i32
    %c0_i32_1 = arith.constant 0 : i32
    %c0_i32_2 = arith.constant 0 : i32
    return %c0_i32, %c0_i32_0, %c0_i32_1 : i32, i32, i32
  }
  func.func @transform_25(%arg0: i32, %arg1: i32) -> (i32, i32, i32) {
    %c0_i32 = arith.constant 0 : i32
    %c0_i32_0 = arith.constant 0 : i32
    %c0_i32_1 = arith.constant 0 : i32
    %c0_i32_2 = arith.constant 0 : i32
    return %c0_i32, %c0_i32_0, %c0_i32_1 : i32, i32, i32
  }
  func.func @transform_26(%arg0: i32, %arg1: i32) -> (i32, i32, i32) {
    %c0_i32 = arith.constant 0 : i32
    %c0_i32_0 = arith.constant 0 : i32
    %c0_i32_1 = arith.constant 0 : i32
    %c0_i32_2 = arith.constant 0 : i32
    return %c0_i32, %c0_i32_0, %c0_i32_1 : i32, i32, i32
  }
  func.func @transform_27(%arg0: i32, %arg1: i32) -> (i32, i32, i32) {
    %c0_i32 = arith.constant 0 : i32
    %c0_i32_0 = arith.constant 0 : i32
    %c0_i32_1 = arith.constant 0 : i32
    %c0_i32_2 = arith.constant 0 : i32
    return %c0_i32, %c0_i32_0, %c0_i32_1 : i32, i32, i32
  }
  func.func @transform_28(%arg0: i32, %arg1: i32) -> (i32, i32, i32) {
    %c0_i32 = arith.constant 0 : i32
    %c0_i32_0 = arith.constant 0 : i32
    %c0_i32_1 = arith.constant 0 : i32
    %c0_i32_2 = arith.constant 0 : i32
    return %c0_i32, %c0_i32_0, %c0_i32_1 : i32, i32, i32
  }
  func.func @transform_29(%arg0: i32, %arg1: i32) -> (i32, i32, i32) {
    %c0_i32 = arith.constant 0 : i32
    %c0_i32_0 = arith.constant 0 : i32
    %c0_i32_1 = arith.constant 0 : i32
    %c0_i32_2 = arith.constant 0 : i32
    return %c0_i32, %c0_i32_0, %c0_i32_1 : i32, i32, i32
  }
  func.func @transform_30(%arg0: i32, %arg1: i32) -> (i32, i32, i32) {
    %c0_i32 = arith.constant 0 : i32
    %c0_i32_0 = arith.constant 0 : i32
    %c0_i32_1 = arith.constant 0 : i32
    %c0_i32_2 = arith.constant 0 : i32
    return %c0_i32, %c0_i32_0, %c0_i32_1 : i32, i32, i32
  }
  func.func @transform_31(%arg0: i32, %arg1: i32) -> (i32, i32, i32) {
    %c0_i32 = arith.constant 0 : i32
    %c0_i32_0 = arith.constant 0 : i32
    %c0_i32_1 = arith.constant 0 : i32
    %c0_i32_2 = arith.constant 0 : i32
    return %c0_i32, %c0_i32_0, %c0_i32_1 : i32, i32, i32
  }
  func.func @transform_32(%arg0: i32, %arg1: i32) -> (i32, i32, i32) {
    %c0_i32 = arith.constant 0 : i32
    %c0_i32_0 = arith.constant 0 : i32
    %c0_i32_1 = arith.constant 0 : i32
    %c0_i32_2 = arith.constant 0 : i32
    return %c0_i32, %c0_i32_0, %c0_i32_1 : i32, i32, i32
  }
  func.func @transform_33(%arg0: i32, %arg1: i32) -> (i32, i32, i32) {
    %c0_i32 = arith.constant 0 : i32
    %c0_i32_0 = arith.constant 0 : i32
    %c0_i32_1 = arith.constant 0 : i32
    %c0_i32_2 = arith.constant 0 : i32
    return %c0_i32, %c0_i32_0, %c0_i32_1 : i32, i32, i32
  }
  func.func @transform_34(%arg0: i32, %arg1: i32) -> (i32, i32, i32) {
    %c0_i32 = arith.constant 0 : i32
    %c0_i32_0 = arith.constant 0 : i32
    %c0_i32_1 = arith.constant 0 : i32
    %c0_i32_2 = arith.constant 0 : i32
    return %c0_i32, %c0_i32_0, %c0_i32_1 : i32, i32, i32
  }
  func.func @transform_35(%arg0: i32, %arg1: i32) -> (i32, i32, i32) {
    %c0_i32 = arith.constant 0 : i32
    %c0_i32_0 = arith.constant 0 : i32
    %c0_i32_1 = arith.constant 0 : i32
    %c0_i32_2 = arith.constant 0 : i32
    return %c0_i32, %c0_i32_0, %c0_i32_1 : i32, i32, i32
  }
  func.func @transform_36(%arg0: i32, %arg1: i32) -> (i32, i32, i32) {
    %c0_i32 = arith.constant 0 : i32
    %c0_i32_0 = arith.constant 0 : i32
    %c0_i32_1 = arith.constant 0 : i32
    %c0_i32_2 = arith.constant 0 : i32
    return %c0_i32, %c0_i32_0, %c0_i32_1 : i32, i32, i32
  }
  func.func @transform_37(%arg0: i32, %arg1: i32) -> (i32, i32, i32) {
    %c0_i32 = arith.constant 0 : i32
    %c0_i32_0 = arith.constant 0 : i32
    %c0_i32_1 = arith.constant 0 : i32
    %c0_i32_2 = arith.constant 0 : i32
    return %c0_i32, %c0_i32_0, %c0_i32_1 : i32, i32, i32
  }
  func.func @transform_38(%arg0: i32, %arg1: i32) -> (i32, i32, i32) {
    %c0_i32 = arith.constant 0 : i32
    %c0_i32_0 = arith.constant 0 : i32
    %c0_i32_1 = arith.constant 0 : i32
    %c0_i32_2 = arith.constant 0 : i32
    return %c0_i32, %c0_i32_0, %c0_i32_1 : i32, i32, i32
  }
  func.func @transform_39(%arg0: i32, %arg1: i32) -> (i32, i32, i32, i32) {
    %c2_i32 = arith.constant 2 : i32
    %0 = arith.subi %arg1, %c2_i32 : i32
    %c0_i32 = arith.constant 0 : i32
    %1 = arith.maxsi %0, %c0_i32 : i32
    %c0_i32_0 = arith.constant 0 : i32
    %c0_i32_1 = arith.constant 0 : i32
    %c0_i32_2 = arith.constant 0 : i32
    return %1, %arg0, %c0_i32_0, %c0_i32_1 : i32, i32, i32, i32
  }
  func.func @transform_40(%arg0: i32, %arg1: i32) -> (i32, i32, i32) {
    %c0_i32 = arith.constant 0 : i32
    %c0_i32_0 = arith.constant 0 : i32
    %c0_i32_1 = arith.constant 0 : i32
    return %arg0, %c0_i32, %c0_i32_0 : i32, i32, i32
  }
}

</mosaic_0001>

<bundles_post_ra>
// kernel: deformable_detr_transformer_forward.1
= control target key start
LH: loop header
LB: loop body
LE: loop exit
PB: predicated region body
PF: predicated region fallthrough
CT: control target
= control target key end

     0   :  { %s13448_s6 = smov 1   ;;  %s13449_s10 = smov 2   ;;  %s16649_s0 = inlined_call_operand.smem [shape: u32[41], index: -1, kind: input, shape index: {}] }
   0x1   :  { %s13520_s5 = sld [smem:[%s16649_s0]]   ;;  %s13450_s14 = smov 3  }
   0x2   :  { %s13525_s9 = sld [smem:[%s16649_s0 + %s13448_s6]]   ;;  %s13451_s18 = smov 4  }
   0x3   :  { %s13530_s13 = sld [smem:[%s16649_s0 + %s13449_s10]]   ;;  %s13452_s22 = smov 5  }
   0x4   :  { %s13535_s17 = sld [smem:[%s16649_s0 + %s13450_s14]]   ;;  %s13453_s26 = smov 6  }
   0x5   :  { %s13540_s21 = sld [smem:[%s16649_s0 + %s13451_s18]]   ;;  %s13454_s30 = smov 7  }
   0x6   :  { %s13545_s25 = sld [smem:[%s16649_s0 + %s13452_s22]]   ;;  %s13455_s4 = smov 8  }
   0x7   :  { %s13550_s29 = sld [smem:[%s16649_s0 + %s13453_s26]]   ;;  %s13456_s10 = smov 9  }
   0x8   :  { %s13555_s3 = sld [smem:[%s16649_s0 + %s13454_s30]]   ;;  %s13457_s15 = smov 10  }
   0x9   :  { %s13560_s8 = sld [smem:[%s16649_s0 + %s13455_s4]]   ;;  %s13458_s20 = smov 11  }
   0xa   :  { %s13565_s14 = sld [smem:[%s16649_s0 + %s13456_s10]]   ;;  %s13459_s26 = smov 12  }
   0xb   :  { %s13570_s19 = sld [smem:[%s16649_s0 + %s13457_s15]]   ;;  %s13460_s1 = smov 13  }
   0xc   :  { %16683 = sst [smem:[#allocation7_spill]] %s13545_s25  ;;  %s13461_s7 = smov 14  }
   0xd   :  { %16684 = sst [smem:[#allocation8_spill]] %s13550_s29  ;;  %s13462_s15 = smov 15  }
   0xe   :  { %s13575_s24 = sld [smem:[%s16649_s0 + %s13458_s20]]   ;;  %s13463_s22 = smov 16  }
   0xf   :  { %s13580_s30 = sld [smem:[%s16649_s0 + %s13459_s26]]   ;;  %s13464_s28 = smov 17  }
  0x10   :  { %s13585_s6 = sld [smem:[%s16649_s0 + %s13460_s1]]  }
  0x11   :  { %s13590_s12 = sld [smem:[%s16649_s0 + %s13461_s7]]   ;;  %s13465_s7 = smov 18  }
  0x12   :  { %s13595_s20 = sld [smem:[%s16649_s0 + %s13462_s15]]   ;;  %s13466_s15 = smov 19  }
  0x13   :  { %s13600_s27 = sld [smem:[%s16649_s0 + %s13463_s22]]   ;;  %s13467_s22 = smov 20  }
  0x14   :  { %s13605_s4 = sld [smem:[%s16649_s0 + %s13464_s28]]   ;;  %s13468_s28 = smov 21  }
  0x15   :  { %s13610_s25 = sld [smem:[%s16649_s0 + %s13465_s7]]   ;;  %s13469_s7 = smov 22  }
  0x17   :  { %16685 = sst [smem:[#allocation9_spill]] %s13590_s12 }
  0x18   :  { %s13615_s12 = sld [smem:[%s16649_s0 + %s13466_s15]]   ;;  %s13470_s15 = smov 23  }
  0x19   :  { %16686 = sst [smem:[#allocation10_spill]] %s13600_s27 }
  0x1a   :  { %16687 = sst [smem:[#allocation11_spill]] %s13605_s4 }
  0x1b   :  { %16688 = sst [smem:[#allocation12_spill]] %s13610_s25 }
  0x1c   :  { %s13620_s27 = sld [smem:[%s16649_s0 + %s13467_s22]]   ;;  %s13471_s22 = smov 24  }
  0x1d   :  { %s13625_s4 = sld [smem:[%s16649_s0 + %s13468_s28]]   ;;  %s13472_s28 = smov 25  }
  0x1e   :  { %16689 = sst [smem:[#allocation13_spill]] %s13615_s12 }
  0x1f   :  { %s13630_s25 = sld [smem:[%s16649_s0 + %s13469_s7]]   ;;  %s13473_s7 = smov 26  }
  0x20   :  { %s13635_s12 = sld [smem:[%s16649_s0 + %s13470_s15]]   ;;  %s13474_s15 = smov 27  }
  0x22   :  { %16690 = sst [smem:[#allocation14_spill]] %s13620_s27 }
  0x23   :  { %16691 = sst [smem:[#allocation15_spill]] %s13625_s4 }
  0x24   :  { %s13640_s27 = sld [smem:[%s16649_s0 + %s13471_s22]]   ;;  %s13475_s22 = smov 28  }
  0x25   :  { %16692 = sst [smem:[#allocation16_spill]] %s13630_s25 }
  0x26   :  { %16693 = sst [smem:[#allocation17_spill]] %s13635_s12 }
  0x27   :  { %s13645_s4 = sld [smem:[%s16649_s0 + %s13472_s28]]   ;;  %s13476_s28 = smov 29  }
  0x28   :  { %s13650_s25 = sld [smem:[%s16649_s0 + %s13473_s7]]   ;;  %s13477_s7 = smov 30  }
  0x29   :  { %s13655_s12 = sld [smem:[%s16649_s0 + %s13474_s15]]   ;;  %s13478_s15 = smov 31  }
  0x2a   :  { %16694 = sst [smem:[#allocation18_spill]] %s13640_s27 }
  0x2b   :  { %s13660_s27 = sld [smem:[%s16649_s0 + %s13475_s22]]   ;;  %s13479_s22 = smov 32  }
  0x2d   :  { %16695 = sst [smem:[#allocation19_spill]] %s13645_s4 }
  0x2e   :  { %16696 = sst [smem:[#allocation20_spill]] %s13650_s25 }
  0x2f   :  { %16697 = sst [smem:[#allocation21_spill]] %s13655_s12 }
  0x30   :  { %s13665_s4 = sld [smem:[%s16649_s0 + %s13476_s28]]   ;;  %s13480_s28 = smov 33  }
  0x31   :  { %16698 = sst [smem:[#allocation22_spill]] %s13660_s27 }
  0x32   :  { %s13670_s25 = sld [smem:[%s16649_s0 + %s13477_s7]]   ;;  %s13481_s7 = smov 34  }
  0x33   :  { %s13675_s12 = sld [smem:[%s16649_s0 + %s13478_s15]]   ;;  %s13482_s15 = smov 35  }
  0x34   :  { %s13680_s27 = sld [smem:[%s16649_s0 + %s13479_s22]]   ;;  %s13483_s22 = smov 36  }
  0x36   :  { %16699 = sst [smem:[#allocation23_spill]] %s13665_s4 }
  0x37   :  { %s13685_s4 = sld [smem:[%s16649_s0 + %s13480_s28]]   ;;  %s13484_s28 = smov 37  }
  0x38   :  { %16700 = sst [smem:[#allocation24_spill]] %s13670_s25 }
  0x39   :  { %16701 = sst [smem:[#allocation25_spill]] %s13675_s12 }
  0x3a   :  { %16702 = sst [smem:[#allocation26_spill]] %s13680_s27 }
  0x3b   :  { %s13690_s25 = sld [smem:[%s16649_s0 + %s13481_s7]]   ;;  %s13485_s7 = smov 38  }
  0x3c   :  { %s13695_s12 = sld [smem:[%s16649_s0 + %s13482_s15]]   ;;  %s13486_s15 = smov 39  }
  0x3d   :  { %16703 = sst [smem:[#allocation27_spill]] %s13685_s4 }
  0x3e   :  { %s13700_s27 = sld [smem:[%s16649_s0 + %s13483_s22]]   ;;  %s13487_s22 = smov 40  }
  0x3f   :  { %s13705_s4 = sld [smem:[%s16649_s0 + %s13484_s28]]  }
  0x41   :  { %16704 = sst [smem:[#allocation28_spill]] %s13690_s25 }
  0x42   :  { %16705 = sst [smem:[#allocation29_spill]] %s13695_s12 }
  0x43   :  { %s13710_s25 = sld [smem:[%s16649_s0 + %s13485_s7]]  }
  0x44   :  { %16706 = sst [smem:[#allocation30_spill]] %s13700_s27 }
  0x45   :  { %16707 = sst [smem:[#allocation31_spill]] %s13705_s4 }
  0x46   :  { %s13715_s12 = sld [smem:[%s16649_s0 + %s13486_s15]]  }
  0x47   :  { %s13720_s27 = sld [smem:[%s16649_s0 + %s13487_s22]]  }
  0x49   :  { %16708 = sst [smem:[#allocation32_spill]] %s13710_s25 }
  0x4a   :  { %87 = vsyncpa [#allocation5], 0  ;;  %s13722_s28 = smov 0   ;;  %s13724_s1 = smov 0  }
  0x4b   :  { %s13726_s2 = smov 0   ;;  %s13728_s7 = smov 0  }
  0x4c   :  { %s13730_s10 = smov 0  }
  0x4d LB: > { %s16709_s29 = sld [smem:[#allocation8_spill]]  ;;  %16710 = sst [smem:[#allocation33_spill]] %s13438_s2  ;;  %s13430_s28 = sphi %s13722_s28, %s16843_s28   ;;  %s13446_s10 = sphi %s13730_s10, %s93_s10   ;;  %s13442_s7 = sphi %s13728_s7, %s16846_s7   ;;  %s13438_s2 = sphi %s13726_s2, %s16845_s2   ;;  %s13434_s1 = sphi %s13724_s1, %s16844_s1  }
  0x4e   : > { %16711 = sst [smem:[#allocation34_spill]] %s13442_s7  ;;  %s9309_s0 = sadd.s32 4294967295, %s13446_s10  }
  0x4f   : > { %16712 = sst [smem:[#allocation35_spill]] %s13446_s10  ;;  %s102_s11 = sadd.s32 1, %s13438_s2 }
  0x50   : > { %p103_p0 = scmp.ge.s32.totalorder %s102_s11, 4  ;;  %s105_s15 = sadd.s32 1, %s13442_s7 }
  0x51   : > { %p9313_p1 = scmp.ge.s32.totalorder %s13446_s10, 1  ;;  %p1014_p2 = scmp.lt.s32.totalorder %s13446_s10, 9 }
  0x52   : > { %s16848_s11 = smov (%p103_p0, %s102_s11), 0  ;;  %s16850_s15 = smov (!%p103_p0, %s105_s15), %s13442_s7 }
  0x53   : > { %16713 = sst [smem:[#allocation36_spill]] %s16848_s11  ;;  %p13755_p3 = pnand %p9313_p1, %p1014_p2 }
  0x54   : > { %p107_p4 = scmp.ge.s32.totalorder %s16850_s15, 2  ;;  %p13759_p5 = scmp.eq.s32.totalorder %s9309_s0, 0 }
  0x55   : > { %s16714_s16 = scalar_select %p13755_p3, 1, 0 }
  0x56   : > { %s16715_s18 = scalar_select %p13759_p5, 1, 0 }
  0x57   : > { %p12231_p6 = pneg %p13755_p3  ;;  %s16852_s15 = smov (%p107_p4, %s16850_s15), 0 }
  0x58   : > { %16716 = sst [smem:[#allocation37_spill]] %s16852_s15  ;;  %s13488_s22 = smov [#allocation4]  }
  0x59   : > { %s1030_s23 = sshll.u32 %s13488_s22, 4  ;;  %p13769_p7 = pnand %p13759_p5, %p12231_p6  ;;  %s1031_s23 = int_to_ptr.vmem [resolvable:$true] %s1030_s23 }
  0x5a   : > { %s13376_s11 = scalar_lea.hbm %s16709_s29, 16 }
  0x5b   : > { %p13377_p8 = scmp.ne.s32.totalorder %s16709_s29, %s13376_s11  ;;  %p13378_p9 = pneg %p13769_p7 }
  0x5c   : > { %p13383_p12 = scmp.lt.u32.totalorder %s13376_s11, %s16709_s29 }
  0x5d   : > { %p13379_p10 = pnand %p13378_p9, %p13377_p8 }
  0x5f   : > { %p13380_p11 = pneg %p13379_p10 }
  0x61   : > { %p13385_p13 = pnand %p13383_p12, %p13380_p11 }
  0x63   : > { %13388 = shalt.err (!%p13385_p13)
}
  0x64   : > { %s13389_s0 = scalar_lea.vmem %s1031_s23, 16  ;;  %s13396_s22 = scalar_lea.vmem %s1031_s23, 32 }
  0x65   : > { %p13390_p0 = scmp.ne.s32.totalorder %s1031_s23, %s13389_s0  ;;  %p13397_p4 = scmp.lt.s32.totalorder %s1031_s23, %s1031_s23 }
  0x66   : > { %p13398_p6 = scmp.lt.s32.totalorder %s13396_s22, %s13389_s0 }
  0x67   : > { %p13392_p1 = pnand %p13390_p0, %p13378_p9 }
  0x68   : > { %p13399_p5 = por %p13398_p6, %p13397_p4 }
  0x69   : > { %p13393_p2 = pneg %p13392_p1 }
  0x6b   : > { %p13400_p3 = pnand %p13399_p5, %p13393_p2 }
  0x6d   : > { %13403 = shalt.err (!%p13400_p3)
}
  0x6e   : > { %12234 = dma.hbm_to_vmem [thread:$0]  (!%p13769_p7), %s16709_s29, 16, %s1031_s23, [#allocation5]  }
  0x6f   : > { %p16718_p8 = scmp.ne.s32.totalorder %s16714_s16, 0 }
  0x71   : > { %1177 = sbr.rel (%p16718_p8) target bundleno = 11938 (0x2ea2), region = 176 }
  0x78   : > { %p16719_p10 = scmp.ne.s32.totalorder %s16715_s18, 0 }
  0x7a   : > { %13425 = dma.done.wait (%p16719_p10), [#allocation5], 16  }
  0x7b   : > { %13427 = vsyncadd (%p16719_p10), [#allocation5], 4294967280  ;;  %p1305_p3 = scmp.lt.s32.totalorder %s13434_s1, 1  ;;  %s13789_s11 = sadd.s32 4294967294, %s13430_s28 }
  0x7c   : > { %16720 = sst [smem:[#allocation38_spill]] %s13789_s11  ;;  %p1329_p5 = scmp.gt.s32.totalorder %s13789_s11, 0 }
  0x7d   : > { %p9327_p7 = scmp.lt.s32.totalorder %s13789_s11, 1  ;;  %s16854_s1 = smov (!%p1305_p3, %s13434_s1), 1 }
  0x7e   : > { %s1330_s16 = scalar_select %p1329_p5, %s13789_s11, 0 }
  0x7f   : > { %s9708_s18 = sshll.u32 %s16854_s1, 7  ;;  %s13796_s23 = scalar_lea.vmem %s13530_s13, %s16854_s1 }
  0x80   : > { %s13799_s26 = scalar_lea.vmem %s13520_s5, %s9708_s18  ;;  %s13802_s0 = scalar_lea.vmem %s13525_s9, %s9708_s18 }
  0x81   : > { %s9710_s22 = sshll.u32 %s16854_s1, 4  ;;  %s9332_s29 = sshll.u32 %s16854_s1, 1 }
  0x82   : > { %s13805_s15 = scalar_lea.vmem %s13535_s17, %s9710_s22  ;;  %s13808_s7 = scalar_lea.vmem %s13540_s21, %s9710_s22 }
  0x83   : > { %s16856_s16 = smov (!%p9327_p7, %s1330_s16), 1  ;;  %s13811_s2 = scalar_lea.vmem %s13720_s27, %s9710_s22 }
  0x84   : > { %s9333_s10 = sshll.u32 %s16856_s16, 2  ;;  %p9337_p9 = scmp.ne.s32.totalorder %s13430_s28, 0 }
  0x85   : > { %s1337_s25 = sadd.s32 %s9333_s10, %s9332_s29  ;;  %v1352_v0 = vld [vmem:[%s13799_s26] sm:$0xff] (!%p9337_p9)  ;;  %vm1368_vm0 = vcmask (!%p9337_p9), 261120   ;;  %v1353_v1 = vld [vmem:[%s13799_s26 + $0x8] sm:$0xff] (!%p9337_p9)  ;;  %v1354_v2 = vld [vmem:[%s13799_s26 + $0x10] sm:$0xff] (!%p9337_p9) }
  0x86   : > { %s9334_s4 = sshll.u32 %s1337_s25, 3  ;;  %1351 = sbr.rel (%p9337_p9) target bundleno = 142 (0x8e), region = 184  ;;  %1369 = vst.msk [vmem:[#allocation2] sm:$0xff] (!%p9337_p9), %vm1368_vm0, %v1352_v0  ;;  %1370 = vst.msk [vmem:[#allocation2 + $0x8] sm:$0xff] (!%p9337_p9), %vm1368_vm0, %v1353_v1  ;;  %v1355_v3 = vld [vmem:[%s13799_s26 + $0x18] sm:$0xff] (!%p9337_p9)  ;;  %v1356_v4 = vld [vmem:[%s13799_s26 + $0x20] sm:$0xff] (!%p9337_p9) }
  0x87   : > { %s13814_s11 = scalar_lea.vmem %s13715_s12, %s9334_s4  ;;  %1371 = vst.msk [vmem:[#allocation2 + $0x10] sm:$0xff] (!%p9337_p9), %vm1368_vm0, %v1354_v2  ;;  %v1357_v5 = vld [vmem:[%s13799_s26 + $0x28] sm:$0xff] (!%p9337_p9)  ;;  %1372 = vst.msk [vmem:[#allocation2 + $0x18] sm:$0xff] (!%p9337_p9), %vm1368_vm0, %v1355_v3  ;;  %v1358_v6 = vld [vmem:[%s13799_s26 + $0x30] sm:$0xff] (!%p9337_p9) }
  0x88   : > { %1373 = vst.msk [vmem:[#allocation2 + $0x20] sm:$0xff] (!%p9337_p9), %vm1368_vm0, %v1356_v4  ;;  %1374 = vst.msk [vmem:[#allocation2 + $0x28] sm:$0xff] (!%p9337_p9), %vm1368_vm0, %v1357_v5  ;;  %v1359_v7 = vld [vmem:[%s13799_s26 + $0x38] sm:$0xff] (!%p9337_p9)  ;;  %v1360_v8 = vld [vmem:[%s13799_s26 + $0x40] sm:$0xff] (!%p9337_p9) }
  0x89   : > { %1375 = vst.msk [vmem:[#allocation2 + $0x30] sm:$0xff] (!%p9337_p9), %vm1368_vm0, %v1358_v6  ;;  %1376 = vst.msk [vmem:[#allocation2 + $0x38] sm:$0xff] (!%p9337_p9), %vm1368_vm0, %v1359_v7  ;;  %v1361_v9 = vld [vmem:[%s13799_s26 + $0x48] sm:$0xff] (!%p9337_p9)  ;;  %v1362_v10 = vld [vmem:[%s13799_s26 + $0x50] sm:$0xff] (!%p9337_p9) }
  0x8a   : > { %1377 = vst.msk [vmem:[#allocation2 + $0x40] sm:$0xff] (!%p9337_p9), %vm1368_vm0, %v1360_v8  ;;  %v1363_v11 = vld [vmem:[%s13799_s26 + $0x58] sm:$0xff] (!%p9337_p9)  ;;  %1378 = vst.msk [vmem:[#allocation2 + $0x48] sm:$0xff] (!%p9337_p9), %vm1368_vm0, %v1361_v9  ;;  %v1364_v12 = vld [vmem:[%s13799_s26 + $0x60] sm:$0xff] (!%p9337_p9) }
  0x8b   : > { %1379 = vst.msk [vmem:[#allocation2 + $0x50] sm:$0xff] (!%p9337_p9), %vm1368_vm0, %v1362_v10  ;;  %1380 = vst.msk [vmem:[#allocation2 + $0x58] sm:$0xff] (!%p9337_p9), %vm1368_vm0, %v1363_v11  ;;  %v1365_v13 = vld [vmem:[%s13799_s26 + $0x68] sm:$0xff] (!%p9337_p9)  ;;  %v1366_v14 = vld [vmem:[%s13799_s26 + $0x70] sm:$0xff] (!%p9337_p9) }
  0x8c   : > { %1381 = vst.msk [vmem:[#allocation2 + $0x60] sm:$0xff] (!%p9337_p9), %vm1368_vm0, %v1364_v12  ;;  %1382 = vst.msk [vmem:[#allocation2 + $0x68] sm:$0xff] (!%p9337_p9), %vm1368_vm0, %v1365_v13  ;;  %v1367_v15 = vld [vmem:[%s13799_s26 + $0x78] sm:$0xff] (!%p9337_p9) }
  0x8d   : > { %1383 = vst.msk [vmem:[#allocation2 + $0x70] sm:$0xff] %vm1368_vm0, %v1366_v14  ;;  %1384 = vst.msk [vmem:[#allocation2 + $0x78] sm:$0xff] %vm1368_vm0, %v1367_v15 }
  0x8e PF: > { %p9338_p11 = scmp.ge.s32.totalorder %s13430_s28, 2 }
  0x90   : > { %1388 = sbr.rel (%p9338_p11) target bundleno = 4669 (0x123d), region = 188 }
  0x97   : > { %s13851_s25 = sshll.u32 %s13430_s28, 5  ;;  %v1389_v16 = vld [vmem:[#allocation2] sm:$0xff]  ;;  %vm1459_vm1 = vcmask 261120   ;;  %v13872_v26 = vld [vmem:[#allocation2 + $0x8] sm:$0xff]  ;;  %v13875_v28 = vld [vmem:[#allocation2 + $0x10] sm:$0xff]  ;;  %s1435_s4 = scalar_lea.vmem %s13560_s8, %s13430_s28  ;;  %vm1920_vm2 = vcmask 64512  }
  0x98   : > { %v1405_v17 = vld [vmem:[%s13802_s0] sm:$0xff]  ;;  %s1430_s29 = scalar_lea.vmem %s13555_s3, %s13851_s25  ;;  %10363 = vmatprep.mubr.msk.f32.mxu1 %vm1459_vm1, %v1389_v16  ;;  %v1406_v27 = vld [vmem:[%s13802_s0 + $0x8] sm:$0xff]  ;;  %v1407_v29 = vld [vmem:[%s13802_s0 + $0x10] sm:$0xff]  ;;  %s13489_s1 = smov 96   ;;  %vm4601_vm4 = vcmask 130048   ;;  %vm4618_vm5 = vcmask 195584  }
  0x99   : > { %v1437_v18 = vadd.f32 %v1405_v17, %v1389_v16  ;;  %v13857_v19 = vld [vmem:[%s1430_s29] sm:$0xff]  ;;  %v13859_v20 = vld [vmem:[%s1430_s29 + $0x8] sm:$0xff]  ;;  %v13861_v21 = vld [vmem:[%s1430_s29 + $0x10] sm:$0xff]  ;;  %v1438_v30 = vadd.f32 %v1406_v27, %v13872_v26  ;;  %v1439_v31 = vadd.f32 %v1407_v29, %v13875_v28  ;;  %s13490_s10 = smov 64   ;;  %s13491_s16 = smov 88   ;;  %vm5347_vm6 = vcmask 523264  }
  0x9a   : > { %v12381_v22 = vpack.i.bf16 %v13859_v20, %v13857_v19  ;;  %v11403_v23 = vpack.c.bf16 %v13859_v20, %v13857_v19  ;;  %v13867_v24 = vld [vmem:[%s1430_s29 + $0x18] sm:$0xff]  ;;  %v13883_v34 = vld [vmem:[#allocation2 + $0x20] sm:$0xff]  ;;  %v13890_v38 = vld [vmem:[#allocation2 + $0x28] sm:$0xff]  ;;  %s13492_s18 = smov 120   ;;  %s13493_s26 = smov 80  }
  0x9b   : > { %10331 = vmatprep.mubr.msk.f32.mxu0 %vm1459_vm1, %v1437_v18  ;;  %v11407_v25 = vpack.c.bf16 %v13867_v24, %v13861_v21  ;;  %v13880_v32 = vld [vmem:[#allocation2 + $0x18] sm:$0xff]  ;;  %v1409_v35 = vld [vmem:[%s13802_s0 + $0x20] sm:$0xff]  ;;  %v1410_v39 = vld [vmem:[%s13802_s0 + $0x28] sm:$0xff]  ;;  %s13495_s22 = smov 72   ;;  %s13496_s29 = smov 104  }
  0x9c   : > { %11404 = vmatprep.subr.bf16.mxu0 %v11403_v23  ;;  %v1408_v33 = vld [vmem:[%s13802_s0 + $0x18] sm:$0xff]  ;;  %v1441_v37 = vadd.f32 %v1409_v35, %v13883_v34  ;;  %v13893_v40 = vld [vmem:[#allocation2 + $0x30] sm:$0xff]  ;;  %v1442_v42 = vadd.f32 %v1410_v39, %v13890_v38  ;;  %v13903_v46 = vld [vmem:[#allocation2 + $0x40] sm:$0xff] }
  0x9d   : > { %11406 = vmatpush3.bf16.msra.mxu0 %v11403_v23  ;;  %v1440_v36 = vadd.f32 %v1408_v33, %v13880_v32  ;;  %v1411_v41 = vld [vmem:[%s13802_s0 + $0x30] sm:$0xff]  ;;  %v13900_v44 = vld [vmem:[#allocation2 + $0x38] sm:$0xff]  ;;  %v1413_v47 = vld [vmem:[%s13802_s0 + $0x40] sm:$0xff] }
  0x9e   : > { %11408 = vmatprep.subr.bf16.mxu0 %v11407_v25  ;;  %v1443_v43 = vadd.f32 %v1411_v41, %v13893_v40  ;;  %v1412_v45 = vld [vmem:[%s13802_s0 + $0x38] sm:$0xff]  ;;  %v1445_v49 = vadd.f32 %v1413_v47, %v13903_v46  ;;  %v13910_v50 = vld [vmem:[#allocation2 + $0x48] sm:$0xff]  ;;  %v13913_v52 = vld [vmem:[#allocation2 + $0x50] sm:$0xff] }
  0x9f   : > { %v1444_v48 = vadd.f32 %v1412_v45, %v13900_v44  ;;  %v1414_v51 = vld [vmem:[%s13802_s0 + $0x48] sm:$0xff]  ;;  %v1415_v53 = vld [vmem:[%s13802_s0 + $0x50] sm:$0xff]  ;;  %v13920_v56 = vld [vmem:[#allocation2 + $0x58] sm:$0xff] }
  0xa0   : > { %v1446_v54 = vadd.f32 %v1414_v51, %v13910_v50  ;;  %v1447_v55 = vadd.f32 %v1415_v53, %v13913_v52  ;;  %v1416_v57 = vld [vmem:[%s13802_s0 + $0x58] sm:$0xff]  ;;  %v13923_v58 = vld [vmem:[#allocation2 + $0x60] sm:$0xff]  ;;  %v13930_v62 = vld [vmem:[#allocation2 + $0x68] sm:$0xff] }
  0xa1   : > { %11410 = vmatpush3.bf16.msra.mxu0 %v11407_v25  ;;  %v1417_v59 = vld [vmem:[%s13802_s0 + $0x60] sm:$0xff]  ;;  %v1448_v60 = vadd.f32 %v1416_v57, %v13920_v56  ;;  %v1418_v63 = vld [vmem:[%s13802_s0 + $0x68] sm:$0xff]  ;;  %v13933_v0 = vld [vmem:[#allocation2 + $0x70] sm:$0xff] }
  0xa2   : > { %v1449_v61 = vadd.f32 %v1417_v59, %v13923_v58  ;;  %v1419_v1 = vld [vmem:[%s13802_s0 + $0x70] sm:$0xff]  ;;  %v1450_v2 = vadd.f32 %v1418_v63, %v13930_v62  ;;  %v13940_v4 = vld [vmem:[#allocation2 + $0x78] sm:$0xff]  ;;  %v9340_v7 = vld [vmem:[%s1435_s4] ss:$0 sm:$0xff]  ;;  %s13497_s4 = smov 8  }
  0xa3   : > { %v1451_v3 = vadd.f32 %v1419_v1, %v13933_v0  ;;  %v1420_v5 = vld [vmem:[%s13802_s0 + $0x78] sm:$0xff]  ;;  %vm14040_vm3 = vmpackc.low %vm1920_vm2, %vm1920_vm2  ;;  %s13494_s0 = smov 112  }
  0xa4   : > { %10332 = vmatmul.mubr.msk.f32.vlgmr.msra.gmra.mrb[0].mxu0 %vm1459_vm1, %v1438_v30  ;;  %v1452_v6 = vadd.f32 %v1420_v5, %v13940_v4 }
  0xa5   : > { %10334 = vmatprep.mubr.msk.f32.mxu0 %vm1459_vm1, %v1439_v31 }
  0xa8   : > { %10335 = vmatmul.mubr.msk.f32.gmra.mrb[2].mxu0 %vm1459_vm1, %v1440_v36 }
  0xa9   : > { %10337 = vmatprep.mubr.msk.f32.mxu0 %vm1459_vm1, %v1441_v37 }
  0xac   : > { %10338 = vmatmul.mubr.msk.f32.gmra.mrb[4].mxu0 %vm1459_vm1, %v1442_v42 }
  0xad   : > { %10340 = vmatprep.mubr.msk.f32.mxu0 %vm1459_vm1, %v1443_v43 }
  0xb0   : > { %10341 = vmatmul.mubr.msk.f32.gmra.mrb[6].mxu0 %vm1459_vm1, %v1444_v48 }
  0xb1   : > { %10343 = vmatprep.mubr.msk.f32.mxu0 %vm1459_vm1, %v1445_v49 }
  0xb4   : > { %10344 = vmatmul.mubr.msk.f32.gmra.mrb[8].mxu0 %vm1459_vm1, %v1446_v54 }
  0xb5   : > { %10346 = vmatprep.mubr.msk.f32.mxu0 %vm1459_vm1, %v1447_v55 }
  0xb8   : > { %10347 = vmatmul.mubr.msk.f32.gmra.mrb[10].mxu0 %vm1459_vm1, %v1448_v60 }
  0xb9   : > { %10349 = vmatprep.mubr.msk.f32.mxu0 %vm1459_vm1, %v1449_v61 }
  0xbc   : > { %10350 = vmatmul.mubr.msk.f32.gmra.mrb[12].mxu0 %vm1459_vm1, %v1450_v2 }
  0xbd   : > { %10352 = vmatprep.mubr.msk.f32.mxu0 %vm1459_vm1, %v1451_v3  ;;  %v12386_v3 = vpack.i.bf16 %v13867_v24, %v13861_v21 }
  0xc0   : > { %10353 = vmatmul.mubr.msk.f32.gmra.mrb[14].mxu0 %vm1459_vm1, %v1452_v6 }
 0x177   : > { %v10333_v8 = vpop.f32.mrb[0].mxu0 }
 0x178   : > { %v13949_v9 = vadd.f32 %v10333_v8, %v9340_v7  ;;  %v1574_v10 = vpop.f32.mrb[1].mxu0 }
 0x179   : > { %v13951_v11 = vadd.f32 %v9340_v7, %v1574_v10  ;;  %v16725_v10 = vmov 0 }
 0x17a   : > { %v16726_v10 = vsel %vm14040_vm3, 4294967295, %v16725_v10 }
 0x17b   : > { %10419 = vmatprep.mubr.msk.f32.mxu0 %vm1920_vm2, %v13951_v11  ;;  %v13957_v12 = vpack.i.bf16 %v13949_v9, %v13951_v11  ;;  %v10336_v13 = vpop.f32.mrb[2].mxu0  ;;  %16727 = vst [vmem:[#allocation43_spill] sm:$0xff] %v16726_v10 }
 0x17c   : > { %v13959_v14 = vadd.f32 %v10336_v13, %v9340_v7  ;;  %v1584_v15 = vpop.f32.mrb[3].mxu0 }
 0x17d   : > { %12342 = vrot.lane.b32.xlu0 %v13957_v12, %s13489_s1  ;;  %v13963_v16 = vadd.f32 %v9340_v7, %v1584_v15 }
 0x17f   : > { %v13967_v17 = vpack.i.bf16 %v13959_v14, %v13963_v16  ;;  %v10339_v18 = vpop.f32.mrb[4].mxu0 }
 0x180   : > { %v13969_v23 = vadd.f32 %v10339_v18, %v9340_v7  ;;  %v1594_v25 = vpop.f32.mrb[5].mxu0 }
 0x181   : > { %16721 = vst [vmem:[#allocation39_spill] sm:$0xff] %v13967_v17  ;;  %12347 = vrot.lane.b32.xlu0 %v13967_v17, %s13489_s1  ;;  %v13973_v27 = vadd.f32 %v9340_v7, %v1594_v25 }
 0x183   : > { %v10342_v29 = vpop.f32.mrb[6].mxu0  ;;  %v13977_v30 = vpack.i.bf16 %v13969_v23, %v13973_v27 }
 0x184   : > { %v13979_v31 = vadd.f32 %v10342_v29, %v9340_v7  ;;  %v1604_v33 = vpop.f32.mrb[7].mxu0 }
 0x185   : > { %16722 = vst [vmem:[#allocation40_spill] sm:$0xff] %v13977_v30  ;;  %v13981_v35 = vadd.f32 %v9340_v7, %v1604_v33  ;;  %12352 = vrot.lane.b32.xlu1 %v13977_v30, %s13489_s1 }
 0x187   : > { %v10345_v36 = vpop.f32.mrb[8].mxu0  ;;  %v13987_v37 = vpack.i.bf16 %v13979_v31, %v13981_v35 }
 0x188   : > { %v13989_v39 = vadd.f32 %v10345_v36, %v9340_v7  ;;  %v1614_v41 = vpop.f32.mrb[9].mxu0 }
 0x189   : > { %16723 = vst [vmem:[#allocation41_spill] sm:$0xff] %v13987_v37  ;;  %v13991_v42 = vadd.f32 %v9340_v7, %v1614_v41  ;;  %12357 = vrot.lane.b32.xlu1 %v13987_v37, %s13489_s1 }
 0x18b   : > { %v10348_v43 = vpop.f32.mrb[10].mxu0  ;;  %v13997_v45 = vpack.i.bf16 %v13989_v39, %v13991_v42 }
 0x18c   : > { %v13999_v47 = vadd.f32 %v10348_v43, %v9340_v7  ;;  %v1624_v48 = vpop.f32.mrb[11].mxu0 }
 0x18d   : > { %16724 = vst [vmem:[#allocation42_spill] sm:$0xff] %v13997_v45  ;;  %v14001_v49 = vadd.f32 %v9340_v7, %v1624_v48  ;;  %12362 = vrot.lane.b32.xlu0 %v13997_v45, %s13489_s1 }
 0x18f   : > { %v10351_v51 = vpop.f32.mrb[12].mxu0  ;;  %v14007_v53 = vpack.i.bf16 %v13999_v47, %v14001_v49 }
 0x190   : > { %v14009_v54 = vadd.f32 %v10351_v51, %v9340_v7  ;;  %v1634_v55 = vpop.f32.mrb[13].mxu0 }
 0x191   : > { %v14011_v57 = vadd.f32 %v9340_v7, %v1634_v55  ;;  %12367 = vrot.lane.b32.xlu1 %v14007_v53, %s13489_s1 }
 0x193   : > { %v10354_v59 = vpop.f32.mrb[14].mxu0  ;;  %v14017_v60 = vpack.i.bf16 %v14009_v54, %v14011_v57 }
 0x194   : > { %v14019_v61 = vadd.f32 %v10354_v59, %v9340_v7  ;;  %v1644_v63 = vpop.f32.mrb[15].mxu0 }
 0x195   : > { %v14021_v1 = vadd.f32 %v9340_v7, %v1644_v63  ;;  %12372 = vrot.lane.b32.xlu0 %v14017_v60, %s13489_s1 }
 0x197   : > { %v14027_v2 = vpack.i.bf16 %v14019_v61, %v14021_v1 }
 0x199   : > { %12377 = vrot.lane.b32.xlu1 %v14027_v2, %s13489_s1  ;;  %12382 = vrot.lane.b32.xlu0 %v12381_v22, %s13490_s10  ;;  %s13498_s1 = smov 16  }
 0x19d   : > { %12387 = vrot.lane.b32.xlu1 %v12386_v3, %s13490_s10  ;;  %12392 = vrot.lane.b32.xlu0 %v13957_v12, %s13491_s16 }
 0x1a1   : > { %1669 = vrot.lane.b32.xlu1 %v9340_v7, %s13490_s10  ;;  %s1865_s10 = scalar_lea.vmem %s13565_s14, %s13851_s25 }
 0x1ef   : > { %v12343_v5 = vpop.permute.xlu0 %12342 }
 0x1f0   : > { %v12345_v6 = vunpack.i.h.bf16 %v12343_v5  ;;  %v12344_v8 = vunpack.i.l.bf16 %v12343_v5 }
 0x1f2   : > { %v11419_v19 = vpack.c.bf16 %v12345_v6, %v12344_v8 }
 0x1f3   : > { %v12348_v20 = vpop.permute.xlu0 %12347 }
 0x1f4   : > { %11421 = vmatprep.subr.msk.bf16.mxu0 %vm14040_vm3, %v11419_v19  ;;  %v12350_v21 = vunpack.i.h.bf16 %v12348_v20  ;;  %v12349_v22 = vunpack.i.l.bf16 %v12348_v20 }
 0x1f5   : > { %11424 = vmatpush3.bf16.xpose.msk.msra.mxu0 %vm14040_vm3, %v11419_v19 }
 0x1f6   : > { %v11425_v24 = vpack.c.bf16 %v12350_v21, %v12349_v22 }
 0x1f7   : > { %v12353_v7 = vpop.permute.xlu1 %12352 }
 0x1f8   : > { %11427 = vmatprep.subr.msk.bf16.mxu0 %vm14040_vm3, %v11425_v24  ;;  %v12355_v13 = vunpack.i.h.bf16 %v12353_v7  ;;  %v12354_v15 = vunpack.i.l.bf16 %v12353_v7 }
 0x1fa   : > { %v11431_v18 = vpack.c.bf16 %v12355_v13, %v12354_v15 }
 0x1fb   : > { %v12358_v25 = vpop.permute.xlu1 %12357 }
 0x1fc   : > { %v12360_v29 = vunpack.i.h.bf16 %v12358_v25  ;;  %v12359_v33 = vunpack.i.l.bf16 %v12358_v25 }
 0x1fd   : > { %11430 = vmatpush3.bf16.xpose.msk.msra.mxu0 %vm14040_vm3, %v11425_v24 }
 0x1fe   : > { %11433 = vmatprep.subr.msk.bf16.mxu0 %vm14040_vm3, %v11431_v18  ;;  %v11437_v41 = vpack.c.bf16 %v12360_v29, %v12359_v33 }
 0x1ff   : > { %v12363_v36 = vpop.permute.xlu0 %12362 }
 0x200   : > { %v12365_v48 = vunpack.i.h.bf16 %v12363_v36  ;;  %v12364_v51 = vunpack.i.l.bf16 %v12363_v36 }
 0x202   : > { %v11443_v59 = vpack.c.bf16 %v12365_v48, %v12364_v51 }
 0x203   : > { %v12368_v43 = vpop.permute.xlu1 %12367 }
 0x204   : > { %v12370_v8 = vunpack.i.h.bf16 %v12368_v43  ;;  %v12369_v19 = vunpack.i.l.bf16 %v12368_v43 }
 0x205   : > { %11436 = vmatpush3.bf16.xpose.msk.msra.mxu0 %vm14040_vm3, %v11431_v18 }
 0x206   : > { %11439 = vmatprep.subr.msk.bf16.mxu0 %vm14040_vm3, %v11437_v41  ;;  %v11449_v7 = vpack.c.bf16 %v12370_v8, %v12369_v19 }
 0x207   : > { %v12373_v55 = vpop.permute.xlu0 %12372 }
 0x208   : > { %v12375_v15 = vunpack.i.h.bf16 %v12373_v55  ;;  %v12374_v18 = vunpack.i.l.bf16 %v12373_v55 }
 0x20a   : > { %v11455_v25 = vpack.c.bf16 %v12375_v15, %v12374_v18  ;;  %v1421_v15 = vld [vmem:[%s13796_s23] sm:$0x1] }
 0x20b   : > { %v12378_v63 = vpop.permute.xlu1 %12377  ;;  %v12383_v3 = vpop.permute.xlu0 %12382 }
 0x20c   : > { %v12385_v5 = vunpack.i.h.bf16 %v12383_v3  ;;  %v12384_v6 = vunpack.i.l.bf16 %v12383_v3  ;;  %v12380_v29 = vunpack.i.h.bf16 %v12378_v63  ;;  %v12379_v33 = vunpack.i.l.bf16 %v12378_v63 }
 0x20d   : > { %11442 = vmatpush3.bf16.xpose.msk.msra.mxu0 %vm14040_vm3, %v11437_v41 }
 0x20e   : > { %v11411_v20 = vpack.c.bf16 %v12385_v5, %v12384_v6  ;;  %11445 = vmatprep.subr.msk.bf16.mxu0 %vm14040_vm3, %v11443_v59  ;;  %v1424_v5 = vlaneseq }
 0x20f   : > { %v12388_v21 = vpop.permute.xlu1 %12387 }
 0x210   : > { %v12390_v22 = vunpack.i.h.bf16 %v12388_v21  ;;  %v12389_v24 = vunpack.i.l.bf16 %v12388_v21  ;;  %11412 = vmatprep.subr.bf16.mxu1 %v11411_v20 }
 0x211   : > { %11414 = vmatpush3.bf16.msra.mxu1 %v11411_v20 }
 0x212   : > { %v11415_v13 = vpack.c.bf16 %v12390_v22, %v12389_v24  ;;  %v1425_v24 = vshrl.u32 %v1424_v5, 7 }
 0x214   : > { %11416 = vmatprep.subr.bf16.mxu1 %v11415_v13 }
 0x215   : > { %11418 = vmatpush3.bf16.msra.mxu1 %v11415_v13  ;;  %11448 = vmatpush3.bf16.xpose.msk.msra.mxu0 %vm14040_vm3, %v11443_v59 }
 0x216   : > { %11451 = vmatprep.subr.msk.bf16.mxu0 %vm14040_vm3, %v11449_v7 }
 0x218   : > { %10364 = vmatmul.mubr.msk.f32.vlgmr.msra.gmra.mrb[0].mxu1 %vm1459_vm1, %v13872_v26  ;;  %v11461_v26 = vpack.c.bf16 %v12380_v29, %v12379_v33 }
 0x219   : > { %10366 = vmatprep.mubr.msk.f32.mxu1 %vm1459_vm1, %v13875_v28  ;;  %v14136_v28 = vpop.permute.xlu1 %1669 }
 0x21c   : > { %10367 = vmatmul.mubr.msk.f32.gmra.mrb[2].mxu1 %vm1459_vm1, %v13880_v32 }
 0x21d   : > { %11454 = vmatpush3.bf16.xpose.msk.msra.mxu0 %vm14040_vm3, %v11449_v7  ;;  %10369 = vmatprep.mubr.msk.f32.mxu1 %vm1459_vm1, %v13883_v34 }
 0x21e   : > { %11457 = vmatprep.subr.msk.bf16.mxu0 %vm14040_vm3, %v11455_v25 }
 0x220   : > { %10370 = vmatmul.mubr.msk.f32.gmra.mrb[4].mxu1 %vm1459_vm1, %v13890_v38 }
 0x221   : > { %10372 = vmatprep.mubr.msk.f32.mxu1 %vm1459_vm1, %v13893_v40 }
 0x224   : > { %10373 = vmatmul.mubr.msk.f32.gmra.mrb[6].mxu1 %vm1459_vm1, %v13900_v44 }
 0x225   : > { %11460 = vmatpush3.bf16.xpose.msk.msra.mxu0 %vm14040_vm3, %v11455_v25  ;;  %10375 = vmatprep.mubr.msk.f32.mxu1 %vm1459_vm1, %v13903_v46 }
 0x226   : > { %11463 = vmatprep.subr.msk.bf16.mxu0 %vm14040_vm3, %v11461_v26 }
 0x228   : > { %10376 = vmatmul.mubr.msk.f32.gmra.mrb[8].mxu1 %vm1459_vm1, %v13910_v50 }
 0x229   : > { %10378 = vmatprep.mubr.msk.f32.mxu1 %vm1459_vm1, %v13913_v52 }
 0x22c   : > { %10379 = vmatmul.mubr.msk.f32.gmra.mrb[10].mxu1 %vm1459_vm1, %v13920_v56 }
 0x22d   : > { %11466 = vmatpush3.bf16.xpose.msk.msra.mxu0 %vm14040_vm3, %v11461_v26  ;;  %10381 = vmatprep.mubr.msk.f32.mxu1 %vm1459_vm1, %v13923_v58  ;;  %v1422_v26 = vmul.f32 -1e+09, %v1421_v15 }
 0x230   : > { %10382 = vmatmul.mubr.msk.f32.gmra.mrb[12].mxu1 %vm1459_vm1, %v13930_v62 }
 0x231   : > { %10384 = vmatprep.mubr.msk.f32.mxu1 %vm1459_vm1, %v13933_v0 }
 0x234   : > { %10385 = vmatmul.mubr.msk.f32.gmra.mrb[14].mxu1 %vm1459_vm1, %v13940_v4  ;;  %10420 = vmatmul.mubr.msk.f32.vlgmr.msra.gmra.mrb[16].mxu0 %vm1920_vm2, %v13949_v9 }
 0x235   : > { %10422 = vmatprep.mubr.msk.f32.mxu0 %vm1920_vm2, %v13963_v16 }
 0x238   : > { %10423 = vmatmul.mubr.msk.f32.gmra.mrb[18].mxu0 %vm1920_vm2, %v13959_v14 }
 0x239   : > { %10425 = vmatprep.mubr.msk.f32.mxu0 %vm1920_vm2, %v13973_v27 }
 0x23c   : > { %10426 = vmatmul.mubr.msk.f32.gmra.mrb[20].mxu0 %vm1920_vm2, %v13969_v23 }
 0x23d   : > { %10428 = vmatprep.mubr.msk.f32.mxu0 %vm1920_vm2, %v13981_v35 }
 0x240   : > { %10429 = vmatmul.mubr.msk.f32.gmra.mrb[22].mxu0 %vm1920_vm2, %v13979_v31 }
 0x241   : > { %10431 = vmatprep.mubr.msk.f32.mxu0 %vm1920_vm2, %v13991_v42 }
 0x244   : > { %10432 = vmatmul.mubr.msk.f32.gmra.mrb[24].mxu0 %vm1920_vm2, %v13989_v39 }
 0x245   : > { %10434 = vmatprep.mubr.msk.f32.mxu0 %vm1920_vm2, %v14001_v49 }
 0x248   : > { %10435 = vmatmul.mubr.msk.f32.gmra.mrb[26].mxu0 %vm1920_vm2, %v13999_v47 }
 0x249   : > { %10437 = vmatprep.mubr.msk.f32.mxu0 %vm1920_vm2, %v14011_v57 }
 0x24c   : > { %10438 = vmatmul.mubr.msk.f32.gmra.mrb[28].mxu0 %vm1920_vm2, %v14009_v54 }
 0x24d   : > { %10440 = vmatprep.mubr.msk.f32.mxu0 %vm1920_vm2, %v14021_v1 }
 0x250   : > { %10441 = vmatmul.mubr.msk.f32.gmra.mrb[30].mxu0 %vm1920_vm2, %v14019_v61 }
 0x2eb   : > { %v10365_v32 = vpop.f32.mrb[0].mxu1 }
 0x2ec   : > { %v1786_v34 = vpop.f32.mrb[1].mxu1  ;;  %v1792_v38 = vadd.f32 %v10365_v32, %v14136_v28  ;;  %v1426_v32 = vsub.s32 0, %v1425_v24 }
 0x2ed   : > { %v1787_v40 = vadd.f32 %v1786_v34, %v14136_v28 }
 0x2ef   : > { %v10368_v44 = vpop.f32.mrb[2].mxu1  ;;  %v11467_v46 = vpack.c.bf16 %v1792_v38, %v1787_v40  ;;  %v14140_v50 = vpack.i.bf16 %v1792_v38, %v1787_v40 }
 0x2f0   : > { %v1802_v52 = vadd.f32 %v10368_v44, %v14136_v28  ;;  %v1796_v56 = vpop.f32.mrb[3].mxu1 }
 0x2f1   : > { %v1797_v58 = vadd.f32 %v1796_v56, %v14136_v28  ;;  %11468 = vmatprep.subr.bf16.mxu1 %v11467_v46  ;;  %v12393_v56 = vpop.permute.xlu0 %12392 }
 0x2f2   : > { %11470 = vmatpush3.bf16.msra.mxu1 %v11467_v46 }
 0x2f3   : > { %v10371_v62 = vpop.f32.mrb[4].mxu1  ;;  %v11471_v0 = vpack.c.bf16 %v1802_v52, %v1797_v58  ;;  %v14144_v4 = vpack.i.bf16 %v1802_v52, %v1797_v58  ;;  %v14165_v58 = vrot.slane %v1422_v26, %v1426_v32 }
 0x2f4   : > { %v1812_v36 = vadd.f32 %v10371_v62, %v14136_v28  ;;  %v1806_v41 = vpop.f32.mrb[5].mxu1 }
 0x2f5   : > { %v1807_v43 = vadd.f32 %v1806_v41, %v14136_v28  ;;  %11472 = vmatprep.subr.bf16.mxu1 %v11471_v0  ;;  %16728 = vst [vmem:[#allocation44_spill] sm:$0xff] %v14165_v58 }
 0x2f6   : > { %11474 = vmatpush3.bf16.msra.mxu1 %v11471_v0 }
 0x2f7   : > { %v10374_v48 = vpop.f32.mrb[6].mxu1  ;;  %v11475_v51 = vpack.c.bf16 %v1812_v36, %v1807_v43  ;;  %v14148_v55 = vpack.i.bf16 %v1812_v36, %v1807_v43 }
 0x2f8   : > { %v1822_v59 = vadd.f32 %v10374_v48, %v14136_v28  ;;  %v1816_v63 = vpop.f32.mrb[7].mxu1 }
 0x2f9   : > { %v1817_v3 = vadd.f32 %v1816_v63, %v14136_v28  ;;  %11476 = vmatprep.subr.bf16.mxu1 %v11475_v51  ;;  %v12395_v63 = vunpack.i.h.bf16 %v12393_v56 }
 0x2fa   : > { %11478 = vmatpush3.bf16.msra.mxu1 %v11475_v51 }
 0x2fb   : > { %v10377_v6 = vpop.f32.mrb[8].mxu1  ;;  %v11479_v8 = vpack.c.bf16 %v1822_v59, %v1817_v3  ;;  %v14152_v19 = vpack.i.bf16 %v1822_v59, %v1817_v3  ;;  %v12394_v3 = vunpack.i.l.bf16 %v12393_v56 }
 0x2fc   : > { %v1832_v20 = vadd.f32 %v10377_v6, %v14136_v28  ;;  %v1826_v21 = vpop.f32.mrb[9].mxu1 }
 0x2fd   : > { %v1827_v22 = vadd.f32 %v1826_v21, %v14136_v28  ;;  %11480 = vmatprep.subr.bf16.mxu1 %v11479_v8 }
 0x2fe   : > { %11482 = vmatpush3.bf16.msra.mxu1 %v11479_v8 }
 0x2ff   : > { %v10380_v7 = vpop.f32.mrb[10].mxu1  ;;  %v11483_v13 = vpack.c.bf16 %v1832_v20, %v1827_v22  ;;  %v14157_v18 = vpack.i.bf16 %v1832_v20, %v1827_v22 }
 0x300   : > { %v1842_v25 = vadd.f32 %v10380_v7, %v14136_v28  ;;  %v1836_v29 = vpop.f32.mrb[11].mxu1 }
 0x301   : > { %v1837_v33 = vadd.f32 %v1836_v29, %v14136_v28  ;;  %11484 = vmatprep.subr.bf16.mxu1 %v11483_v13 }
 0x302   : > { %11486 = vmatpush3.bf16.msra.mxu1 %v11483_v13  ;;  %v14180_v13 = vpack.c.bf16 %v12395_v63, %v12394_v3 }
 0x303   : > { %v10383_v34 = vpop.f32.mrb[12].mxu1  ;;  %v11487_v38 = vpack.c.bf16 %v1842_v25, %v1837_v33  ;;  %v14161_v40 = vpack.i.bf16 %v1842_v25, %v1837_v33 }
 0x304   : > { %v1852_v44 = vadd.f32 %v10383_v34, %v14136_v28  ;;  %v1846_v46 = vpop.f32.mrb[13].mxu1 }
 0x305   : > { %v1847_v52 = vadd.f32 %v1846_v46, %v14136_v28  ;;  %11488 = vmatprep.subr.bf16.mxu1 %v11487_v38 }
 0x306   : > { %11490 = vmatpush3.bf16.msra.mxu1 %v11487_v38 }
 0x307   : > { %v10386_v62 = vpop.f32.mrb[14].mxu1  ;;  %v10421_v0 = vpop.f32.mrb[16].mxu0  ;;  %v11491_v36 = vpack.c.bf16 %v1852_v44, %v1847_v52  ;;  %v14167_v41 = vpack.i.bf16 %v1852_v44, %v1847_v52 }
 0x308   : > { %v1862_v43 = vadd.f32 %v10386_v62, %v14136_v28  ;;  %v2131_v48 = vmul.f32 0.35355338, %v10421_v0  ;;  %v1856_v51 = vpop.f32.mrb[15].mxu1  ;;  %v2051_v59 = vpop.f32.mrb[17].mxu0 }
 0x309   : > { %v1857_v5 = vadd.f32 %v1856_v51, %v14136_v28  ;;  %v2130_v6 = vmul.f32 0.35355338, %v2051_v59  ;;  %11492 = vmatprep.subr.bf16.mxu1 %v11491_v36 }
 0x30a   : > { %11494 = vmatpush3.bf16.msra.mxu1 %v11491_v36  ;;  %v14172_v8 = vadd.f32 %v2131_v48, %v14165_v58 }
 0x30b   : > { %v10424_v20 = vpop.f32.mrb[18].mxu0  ;;  %v11495_v21 = vpack.c.bf16 %v1862_v43, %v1857_v5  ;;  %v14175_v22 = vadd.f32 %v2130_v6, %v14165_v58  ;;  %v14177_v24 = vpack.i.bf16 %v1862_v43, %v1857_v5 }
 0x30c   : > { %2164 = vmax.xlane.f32.xlu1 %v14172_v8  ;;  %v2061_v7 = vpop.f32.mrb[19].mxu0  ;;  %v2133_v62 = vmul.f32 0.35355338, %v10424_v20 }
 0x30d   : > { %16729 = vst [vmem:[#allocation45_spill] sm:$0xff] %v14177_v24  ;;  %11496 = vmatprep.subr.bf16.mxu1 %v11495_v21  ;;  %2162 = vmax.xlane.f32.xlu0 %v14175_v22  ;;  %v2132_v43 = vmul.f32 0.35355338, %v2061_v7 }
 0x30e   : > { %11498 = vmatpush3.bf16.msra.mxu1 %v11495_v21  ;;  %v2149_v48 = vadd.f32 %v2133_v62, %v14165_v58 }
 0x30f   : > { %v10427_v28 = vpop.f32.mrb[20].mxu0  ;;  %11501 = vmatprep.subr.msk.bf16.mxu1 %vm14040_vm3, %v14180_v13  ;;  %v2148_v3 = vadd.f32 %v2132_v43, %v14165_v58 }
 0x310   : > { %v2071_v15 = vpop.f32.mrb[21].mxu0  ;;  %v2135_v63 = vmul.f32 0.35355338, %v10427_v28 }
 0x311   : > { %v2134_v56 = vmul.f32 0.35355338, %v2071_v15 }
 0x312   : > { %v2151_v21 = vadd.f32 %v2135_v63, %v14165_v58 }
 0x313   : > { %v10430_v25 = vpop.f32.mrb[22].mxu0  ;;  %v14191_v36 = vadd.f32 %v2134_v56, %v14165_v58 }
 0x314   : > { %v2081_v29 = vpop.f32.mrb[23].mxu0  ;;  %v2137_v20 = vmul.f32 0.35355338, %v10430_v25 }
 0x315   : > { %v2136_v0 = vmul.f32 0.35355338, %v2081_v29 }
 0x316   : > { %v2153_v28 = vadd.f32 %v2137_v20, %v14165_v58 }
 0x317   : > { %v10433_v33 = vpop.f32.mrb[24].mxu0  ;;  %v14196_v59 = vadd.f32 %v2136_v0, %v14165_v58 }
 0x318   : > { %v2091_v26 = vpop.f32.mrb[25].mxu0  ;;  %v2139_v29 = vmul.f32 0.35355338, %v10433_v33 }
 0x319   : > { %v2138_v51 = vmul.f32 0.35355338, %v2091_v26 }
 0x31a   : > { %v14211_v25 = vadd.f32 %v2139_v29, %v14165_v58 }
 0x31b   : > { %v10436_v32 = vpop.f32.mrb[26].mxu0  ;;  %v14201_v6 = vadd.f32 %v2138_v51, %v14165_v58 }
 0x31c   : > { %v2101_v34 = vpop.f32.mrb[27].mxu0  ;;  %v2141_v56 = vmul.f32 0.35355338, %v10436_v32 }
 0x31d   : > { %12397 = vrot.lane.b32.xlu1 %v13967_v17, %s13491_s16  ;;  %v2140_v5 = vmul.f32 0.35355338, %v2101_v34 }
 0x31e   : > { %v14219_v62 = vadd.f32 %v2141_v56, %v14165_v58 }
 0x31f   : > { %v10439_v38 = vpop.f32.mrb[28].mxu0  ;;  %v2156_v15 = vadd.f32 %v2140_v5, %v14165_v58 }
 0x320   : > { %v2111_v44 = vpop.f32.mrb[29].mxu0  ;;  %v2143_v33 = vmul.f32 0.35355338, %v10439_v38 }
 0x321   : > { %v2142_v7 = vmul.f32 0.35355338, %v2111_v44 }
 0x322   : > { %v14224_v32 = vadd.f32 %v2143_v33, %v14165_v58 }
 0x323   : > { %12402 = vrot.lane.b32.xlu0 %v13977_v30, %s13491_s16  ;;  %v10442_v46 = vpop.f32.mrb[30].mxu0  ;;  %v14208_v34 = vadd.f32 %v2142_v7, %v14165_v58 }
 0x324   : > { %v2121_v52 = vpop.f32.mrb[31].mxu0 }
 0x325   : > { %v2144_v26 = vmul.f32 0.35355338, %v2121_v52  ;;  %v2145_v52 = vmul.f32 0.35355338, %v10442_v46 }
 0x327   : > { %v14216_v44 = vadd.f32 %v2144_v26, %v14165_v58  ;;  %v14228_v0 = vadd.f32 %v2145_v52, %v14165_v58 }
 0x341   : > { %2170 = vmax.xlane.f32.xlu1 %v14191_v36 }
 0x342   : > { %2168 = vmax.xlane.f32.xlu0 %v2149_v48 }
 0x345   : > { %2174 = vmax.xlane.f32.xlu1 %v14196_v59 }
 0x346   : > { %2166 = vmax.xlane.f32.xlu0 %v2148_v3 }
 0x349   : > { %2178 = vmax.xlane.f32.xlu1 %v14201_v6 }
 0x34a   : > { %2172 = vmax.xlane.f32.xlu0 %v2151_v21 }
 0x34d   : > { %2182 = vmax.xlane.f32.xlu1 %v2156_v15 }
 0x34e   : > { %2176 = vmax.xlane.f32.xlu0 %v2153_v28 }
 0x351   : > { %2186 = vmax.xlane.f32.xlu1 %v14208_v34 }
 0x352   : > { %2180 = vmax.xlane.f32.xlu0 %v14211_v25 }
 0x355   : > { %2190 = vmax.xlane.f32.xlu1 %v14216_v44 }
 0x356   : > { %2184 = vmax.xlane.f32.xlu0 %v14219_v62 }
 0x35a   : > { %2188 = vmax.xlane.f32.xlu0 %v14224_v32 }
 0x35e   : > { %2192 = vmax.xlane.f32.xlu0 %v14228_v0 }
 0x366   : > { %12407 = vrot.lane.b32.xlu1 %v13987_v37, %s13491_s16 }
 0x399   : > { %v2165_v38 = vpop.xlane.xlu1 %2164 }
 0x39a   : > { %v2195_v43 = vsub.f32 %v14172_v8, %v2165_v38  ;;  %v2163_v51 = vpop.xlane.xlu0 %2162 }
 0x39b   : > { %v2194_v63 = vsub.f32 %v14175_v22, %v2163_v51 }
 0x39c   : > { %v2212_v46 = vmul.f32 1.442695, %v2195_v43 }
 0x39d   : > { %v2210_v5 = vmul.f32 1.442695, %v2194_v63  ;;  %v14243_v29 = vpop.permute.xlu1 %12397 }
 0x39e   : > { %12631 = vpow2.f32 %v2212_v46  ;;  %v14245_v8 = vpop.permute.xlu0 %12402 }
 0x39f   : > { %12633 = vpow2.f32 %v2210_v5  ;;  %16730 = vst [vmem:[#allocation46_spill] sm:$0xff] %v14245_v8 }
 0x3a8   : > { %v14235_v20 = vpop.eup %12631 }
 0x3a9   : > { %2244 = vadd.xlane.f32.xlu0 %v14235_v20  ;;  %v14238_v7 = vpop.eup %12633 }
 0x3ad   : > { %2242 = vadd.xlane.f32.xlu0 %v14238_v7 }
 0x3c3   : > { %12412 = vrot.lane.b32.xlu0 %v13997_v45, %s13491_s16 }
 0x3ce   : > { %v2171_v22 = vpop.xlane.xlu1 %2170 }
 0x3cf   : > { %v2169_v26 = vpop.xlane.xlu0 %2168  ;;  %v2198_v5 = vsub.f32 %v14191_v36, %v2171_v22 }
 0x3d0   : > { %v2197_v56 = vsub.f32 %v2149_v48, %v2169_v26 }
 0x3d1   : > { %v2218_v8 = vmul.f32 1.442695, %v2198_v5 }
 0x3d2   : > { %v2175_v33 = vpop.xlane.xlu1 %2174  ;;  %v2216_v52 = vmul.f32 1.442695, %v2197_v56 }
 0x3d3   : > { %v2167_v38 = vpop.xlane.xlu0 %2166 }
 0x3d4   : > { %v2196_v43 = vsub.f32 %v2148_v3, %v2167_v38  ;;  %12635 = vpow2.f32 %v2216_v52  ;;  %v2200_v3 = vsub.f32 %v14196_v59, %v2175_v33 }
 0x3d6   : > { %v2214_v51 = vmul.f32 1.442695, %v2196_v43  ;;  %v2179_v63 = vpop.xlane.xlu1 %2178 }
 0x3d7   : > { %v2173_v46 = vpop.xlane.xlu0 %2172  ;;  %v2202_v36 = vsub.f32 %v14201_v6, %v2179_v63 }
 0x3d8   : > { %12637 = vpow2.f32 %v2214_v51  ;;  %v2199_v37 = vsub.f32 %v2151_v21, %v2173_v46 }
 0x3d9   : > { %v2226_v22 = vmul.f32 1.442695, %v2202_v36 }
 0x3da   : > { %v2220_v45 = vmul.f32 1.442695, %v2199_v37  ;;  %v2183_v30 = vpop.xlane.xlu1 %2182 }
 0x3db   : > { %v2204_v58 = vsub.f32 %v2156_v15, %v2183_v30  ;;  %v2177_v17 = vpop.xlane.xlu0 %2176 }
 0x3dc   : > { %12639 = vpow2.f32 %v2220_v45  ;;  %v2201_v10 = vsub.f32 %v2153_v28, %v2177_v17  ;;  %v2222_v45 = vmul.f32 1.442695, %v2200_v3 }
 0x3dd   : > { %v2230_v48 = vmul.f32 1.442695, %v2204_v58 }
 0x3de   : > { %v2224_v56 = vmul.f32 1.442695, %v2201_v10  ;;  %v14249_v52 = vpop.eup %12635  ;;  %v2187_v17 = vpop.xlane.xlu1 %2186 }
 0x3df   : > { %12641 = vpow2.f32 %v2230_v48  ;;  %v2181_v26 = vpop.xlane.xlu0 %2180  ;;  %v2206_v21 = vsub.f32 %v14208_v34, %v2187_v17 }
 0x3e0   : > { %12643 = vpow2.f32 %v2218_v8  ;;  %v2203_v37 = vsub.f32 %v14211_v25, %v2181_v26 }
 0x3e1   : > { %12645 = vpow2.f32 %v2224_v56  ;;  %v2234_v6 = vmul.f32 1.442695, %v2206_v21  ;;  %v12399_v21 = vunpack.i.l.bf16 %v14243_v29 }
 0x3e2   : > { %v14251_v38 = vpop.eup %12637  ;;  %2248 = vadd.xlane.f32.xlu0 %v14249_v52  ;;  %v2228_v59 = vmul.f32 1.442695, %v2203_v37  ;;  %12647 = vpow2.f32 %v2222_v45  ;;  %v2191_v63 = vpop.xlane.xlu1 %2190 }
 0x3e3   : > { %v2185_v30 = vpop.xlane.xlu0 %2184  ;;  %2246 = vadd.xlane.f32.xlu1 %v14251_v38  ;;  %v2208_v5 = vsub.f32 %v14216_v44, %v2191_v63 }
 0x3e4   : > { %12649 = vpow2.f32 %v2228_v59  ;;  %v2205_v33 = vsub.f32 %v14219_v62, %v2185_v30 }
 0x3e5   : > { %v2238_v3 = vmul.f32 1.442695, %v2208_v5 }
 0x3e6   : > { %v14256_v58 = vpop.eup %12639  ;;  %v2232_v34 = vmul.f32 1.442695, %v2205_v33  ;;  %v16733_v33 = vld [vmem:[#allocation39_spill] sm:$0xff] }
 0x3e7   : > { %v2189_v10 = vpop.xlane.xlu0 %2188  ;;  %2252 = vadd.xlane.f32.xlu1 %v14256_v58 }
 0x3e8   : > { %v2207_v15 = vsub.f32 %v14224_v32, %v2189_v10  ;;  %v12400_v10 = vunpack.i.h.bf16 %v14243_v29 }
 0x3e9   : > { %v14262_v28 = vpop.eup %12641 }
 0x3ea   : > { %v14264_v25 = vpop.eup %12643  ;;  %v2236_v8 = vmul.f32 1.442695, %v2207_v15  ;;  %2262 = vadd.xlane.f32.xlu0 %v14262_v28 }
 0x3eb   : > { %2250 = vadd.xlane.f32.xlu1 %v14264_v25  ;;  %v2193_v43 = vpop.xlane.xlu0 %2192  ;;  %v14269_v51 = vpop.eup %12645 }
 0x3ec   : > { %12651 = vpow2.f32 %v2236_v8  ;;  %v2209_v32 = vsub.f32 %v14228_v0, %v2193_v43  ;;  %v14273_v46 = vpop.eup %12647 }
 0x3ed   : > { %12653 = vpow2.f32 %v2226_v22  ;;  %v11505_v22 = vpack.c.bf16 %v12400_v10, %v12399_v21 }
 0x3ee   : > { %12655 = vpow2.f32 %v2234_v6  ;;  %v2240_v62 = vmul.f32 1.442695, %v2209_v32  ;;  %v14277_v48 = vpop.eup %12649 }
 0x3ef   : > { %2256 = vadd.xlane.f32.xlu1 %v14269_v51  ;;  %12657 = vpow2.f32 %v2232_v34  ;;  %v12408_v34 = vpop.permute.xlu1 %12407 }
 0x3f0   : > { %12659 = vpow2.f32 %v2240_v62  ;;  %v12410_v32 = vunpack.i.h.bf16 %v12408_v34 }
 0x3f1   : > { %12661 = vpow2.f32 %v2238_v3 }
 0x3f3   : > { %2254 = vadd.xlane.f32.xlu1 %v14273_v46 }
 0x3f6   : > { %v14279_v26 = vpop.eup %12651 }
 0x3f7   : > { %2268 = vadd.xlane.f32.xlu0 %v14279_v26  ;;  %2260 = vadd.xlane.f32.xlu1 %v14277_v48  ;;  %v14283_v0 = vpop.eup %12653 }
 0x3f8   : > { %v14285_v56 = vpop.eup %12655 }
 0x3f9   : > { %v14289_v44 = vpop.eup %12657 }
 0x3fa   : > { %v14292_v37 = vpop.eup %12659 }
 0x3fb   : > { %2266 = vadd.xlane.f32.xlu0 %v14285_v56  ;;  %2258 = vadd.xlane.f32.xlu1 %v14283_v0  ;;  %v14295_v30 = vpop.eup %12661 }
 0x3ff   : > { %2264 = vadd.xlane.f32.xlu1 %v14289_v44 }
 0x403   : > { %2272 = vadd.xlane.f32.xlu1 %v14292_v37 }
 0x407   : > { %2270 = vadd.xlane.f32.xlu1 %v14295_v30 }
 0x411   : > { %12422 = vrot.lane.b32.xlu0 %v14017_v60, %s13491_s16 }
 0x415   : > { %12427 = vrot.lane.b32.xlu0 %v14027_v2, %s13491_s16 }
 0x418   : > { %12417 = vrot.lane.b32.xlu1 %v14007_v53, %s13491_s16  ;;  %s13499_s16 = smov 24  }
 0x419   : > { %2451 = vrot.lane.b32.xlu0 %v13951_v11, %s13492_s18 }
 0x41c   : > { %2455 = vrot.lane.b32.xlu1 %v13963_v16, %s13492_s18 }
 0x41d   : > { %2453 = vrot.lane.b32.xlu0 %v13949_v9, %s13492_s18 }
 0x420   : > { %2459 = vrot.lane.b32.xlu1 %v13973_v27, %s13492_s18 }
 0x421   : > { %2457 = vrot.lane.b32.xlu0 %v13959_v14, %s13492_s18 }
 0x424   : > { %2463 = vrot.lane.b32.xlu1 %v13981_v35, %s13492_s18 }
 0x425   : > { %2461 = vrot.lane.b32.xlu0 %v13969_v23, %s13492_s18 }
 0x428   : > { %2467 = vrot.lane.b32.xlu1 %v13991_v42, %s13492_s18 }
 0x429   : > { %2465 = vrot.lane.b32.xlu0 %v13979_v31, %s13492_s18 }
 0x42c   : > { %2471 = vrot.lane.b32.xlu1 %v14001_v49, %s13492_s18 }
 0x42d   : > { %2469 = vrot.lane.b32.xlu0 %v13989_v39, %s13492_s18 }
 0x430   : > { %2475 = vrot.lane.b32.xlu1 %v14011_v57, %s13492_s18 }
 0x431   : > { %2473 = vrot.lane.b32.xlu0 %v13999_v47, %s13492_s18 }
 0x434   : > { %2479 = vrot.lane.b32.xlu1 %v14021_v1, %s13492_s18 }
 0x435   : > { %2477 = vrot.lane.b32.xlu0 %v14009_v54, %s13492_s18 }
 0x436   : > { %v2245_v45 = vpop.xlane.xlu0 %2244 }
 0x437   : > { %12663 = vrcp.f32 %v2245_v45 }
 0x438   : > { %12437 = vrot.lane.b32.xlu1 %v14144_v4, %s13492_s18 }
 0x439   : > { %2481 = vrot.lane.b32.xlu0 %v14019_v61, %s13492_s18 }
 0x43a   : > { %v2243_v17 = vpop.xlane.xlu0 %2242 }
 0x43b   : > { %12665 = vrcp.f32 %v2243_v17 }
 0x43c   : > { %12442 = vrot.lane.b32.xlu1 %v14148_v55, %s13492_s18 }
 0x43d   : > { %12432 = vrot.lane.b32.xlu0 %v14140_v50, %s13492_s18 }
 0x43e   : > { %v12413_v5 = vpop.permute.xlu0 %12412 }
 0x43f   : > { %v12415_v62 = vunpack.i.h.bf16 %v12413_v5  ;;  %v12414_v3 = vunpack.i.l.bf16 %v12413_v5 }
 0x440   : > { %12447 = vrot.lane.b32.xlu1 %v14152_v19, %s13492_s18 }
 0x441   : > { %12452 = vrot.lane.b32.xlu0 %v14157_v18, %s13492_s18  ;;  %v12664_v36 = vpop.eup %12663  ;;  %v11523_v45 = vpack.c.bf16 %v12415_v62, %v12414_v3 }
 0x442   : > { %v2277_v8 = vmul.f32 %v12664_v36, %v14235_v20 }
 0x444   : > { %12457 = vrot.lane.b32.xlu1 %v14161_v40, %s13492_s18 }
 0x445   : > { %v12666_v59 = vpop.eup %12665  ;;  %12462 = vrot.lane.b32.xlu0 %v14167_v41, %s13492_s18 }
 0x446   : > { %v2275_v15 = vmul.f32 %v12666_v59, %v14238_v7  ;;  %v16732_v7 = vld [vmem:[#allocation46_spill] sm:$0xff] }
 0x447   : > { %v12405_v29 = vunpack.i.h.bf16 %v16732_v7  ;;  %v12404_v20 = vunpack.i.l.bf16 %v16732_v7 }
 0x448   : > { %10475 = vmatprep.mubr.f32.mxu1 %v2275_v15  ;;  %12472 = vrot.lane.b32.xlu1 %v13957_v12, %s13493_s26 }
 0x449   : > { %12467 = vrot.lane.b32.xlu0 %v14177_v24, %s13492_s18  ;;  %10476 = vmatmul.mubr.f32.vlgmr.msra.gmra.mrb[16].mxu1 %v2277_v8  ;;  %v11511_v43 = vpack.c.bf16 %v12405_v29, %v12404_v20  ;;  %s1870_s18 = scalar_lea.vmem %s13570_s19, %s13430_s28 }
 0x44a   : > { %11504 = vmatpush3.bf16.xpose.msk.msra.mxu1 %vm14040_vm3, %v14180_v13  ;;  %v12409_v13 = vunpack.i.l.bf16 %v12408_v34 }
 0x44b   : > { %11507 = vmatprep.subr.msk.bf16.mxu1 %vm14040_vm3, %v11505_v22 }
 0x44c   : > { %v11517_v63 = vpack.c.bf16 %v12410_v32, %v12409_v13 }
 0x44d   : > { %12477 = vrot.lane.b32.xlu0 %v16733_v33, %s13493_s26 }
 0x452   : > { %11510 = vmatpush3.bf16.xpose.msk.msra.mxu1 %vm14040_vm3, %v11505_v22 }
 0x453   : > { %11513 = vmatprep.subr.msk.bf16.mxu1 %vm14040_vm3, %v11511_v43 }
 0x45a   : > { %11516 = vmatpush3.bf16.xpose.msk.msra.mxu1 %vm14040_vm3, %v11511_v43 }
 0x45b   : > { %11519 = vmatprep.subr.msk.bf16.mxu1 %vm14040_vm3, %v11517_v63 }
 0x462   : > { %11522 = vmatpush3.bf16.xpose.msk.msra.mxu1 %vm14040_vm3, %v11517_v63 }
 0x463   : > { %11525 = vmatprep.subr.msk.bf16.mxu1 %vm14040_vm3, %v11523_v45 }
 0x46a   : > { %11528 = vmatpush3.bf16.xpose.msk.msra.mxu1 %vm14040_vm3, %v11523_v45 }
 0x46f   : > { %v2249_v17 = vpop.xlane.xlu0 %2248 }
 0x470   : > { %12667 = vrcp.f32 %v2249_v17  ;;  %v2247_v36 = vpop.xlane.xlu1 %2246 }
 0x471   : > { %12669 = vrcp.f32 %v2247_v36 }
 0x474   : > { %v2253_v59 = vpop.xlane.xlu1 %2252 }
 0x475   : > { %12671 = vrcp.f32 %v2253_v59 }
 0x477   : > { %v2263_v29 = vpop.xlane.xlu0 %2262 }
 0x478   : > { %v2251_v10 = vpop.xlane.xlu1 %2250 }
 0x479   : > { %12673 = vrcp.f32 %v2251_v10 }
 0x47a   : > { %v12668_v21 = vpop.eup %12667 }
 0x47b   : > { %v12670_v15 = vpop.eup %12669  ;;  %v2281_v7 = vmul.f32 %v12668_v21, %v14249_v52 }
 0x47c   : > { %v2257_v8 = vpop.xlane.xlu1 %2256  ;;  %v2279_v22 = vmul.f32 %v12670_v15, %v14251_v38 }
 0x47d   : > { %12675 = vrcp.f32 %v2257_v8 }
 0x47e   : > { %10478 = vmatprep.mubr.f32.mxu1 %v2279_v22 }
 0x47f   : > { %10479 = vmatmul.mubr.f32.gmra.mrb[18].mxu1 %v2281_v7  ;;  %v12672_v43 = vpop.eup %12671 }
 0x480   : > { %v2255_v20 = vpop.xlane.xlu1 %2254  ;;  %v2285_v5 = vmul.f32 %v12672_v43, %v14256_v58 }
 0x481   : > { %12677 = vrcp.f32 %v2255_v20 }
 0x482   : > { %12679 = vrcp.f32 %v2263_v29 }
 0x483   : > { %v12674_v34 = vpop.eup %12673 }
 0x484   : > { %v2269_v32 = vpop.xlane.xlu0 %2268  ;;  %v2261_v13 = vpop.xlane.xlu1 %2260  ;;  %v2283_v63 = vmul.f32 %v12674_v34, %v14264_v25 }
 0x485   : > { %12681 = vrcp.f32 %v2261_v13 }
 0x486   : > { %10481 = vmatprep.mubr.f32.mxu1 %v2283_v63 }
 0x487   : > { %10482 = vmatmul.mubr.f32.gmra.mrb[20].mxu1 %v2285_v5  ;;  %v12676_v52 = vpop.eup %12675 }
 0x488   : > { %v2267_v38 = vpop.xlane.xlu0 %2266  ;;  %v2259_v62 = vpop.xlane.xlu1 %2258  ;;  %v2289_v59 = vmul.f32 %v12676_v52, %v14269_v51 }
 0x489   : > { %12683 = vrcp.f32 %v2259_v62 }
 0x48b   : > { %v12678_v3 = vpop.eup %12677 }
 0x48c   : > { %v12423_v45 = vpop.permute.xlu0 %12422  ;;  %v2265_v17 = vpop.xlane.xlu1 %2264  ;;  %v2287_v36 = vmul.f32 %v12678_v3, %v14273_v46 }
 0x48d   : > { %12685 = vrcp.f32 %v2265_v17  ;;  %v12680_v10 = vpop.eup %12679  ;;  %v12425_v13 = vunpack.i.h.bf16 %v12423_v45  ;;  %v12424_v63 = vunpack.i.l.bf16 %v12423_v45 }
 0x48e   : > { %12687 = vrcp.f32 %v2267_v38  ;;  %10484 = vmatprep.mubr.f32.mxu1 %v2287_v36  ;;  %v2295_v51 = vmul.f32 %v12680_v10, %v14262_v28 }
 0x48f   : > { %10485 = vmatmul.mubr.f32.gmra.mrb[22].mxu1 %v2289_v59  ;;  %12689 = vrcp.f32 %v2269_v32  ;;  %v12682_v21 = vpop.eup %12681  ;;  %v11535_v17 = vpack.c.bf16 %v12425_v13, %v12424_v63 }
 0x490   : > { %v12428_v58 = vpop.permute.xlu0 %12427  ;;  %v2273_v25 = vpop.xlane.xlu1 %2272  ;;  %v2293_v46 = vmul.f32 %v12682_v21, %v14277_v48 }
 0x491   : > { %12691 = vrcp.f32 %v2273_v25  ;;  %v12430_v25 = vunpack.i.h.bf16 %v12428_v58  ;;  %v12429_v10 = vunpack.i.l.bf16 %v12428_v58 }
 0x493   : > { %v12684_v15 = vpop.eup %12683 }
 0x494   : > { %v2452_v8 = vpop.permute.xlu0 %2451  ;;  %v2271_v22 = vpop.xlane.xlu1 %2270  ;;  %v2291_v7 = vmul.f32 %v12684_v15, %v14283_v0 }
 0x495   : > { %12693 = vrcp.f32 %v2271_v22 }
 0x496   : > { %10487 = vmatprep.mubr.f32.mxu1 %v2291_v7  ;;  %v11541_v7 = vpack.c.bf16 %v12430_v25, %v12429_v10 }
 0x497   : > { %v12686_v29 = vpop.eup %12685  ;;  %10488 = vmatmul.mubr.f32.gmra.mrb[24].mxu1 %v2293_v46 }
 0x498   : > { %v12688_v20 = vpop.eup %12687  ;;  %v2454_v43 = vpop.permute.xlu0 %2453  ;;  %v2297_v32 = vmul.f32 %v12686_v29, %v14289_v44  ;;  %10490 = vmatprep.mubr.f32.mxu1 %v2295_v51 }
 0x499   : > { %v12418_v34 = vpop.permute.xlu1 %12417  ;;  %v12690_v62 = vpop.eup %12689  ;;  %v2299_v0 = vmul.f32 %v12688_v20, %v14285_v56 }
 0x49a   : > { %v12420_v5 = vunpack.i.h.bf16 %v12418_v34  ;;  %v12419_v38 = vunpack.i.l.bf16 %v12418_v34  ;;  %v2301_v44 = vmul.f32 %v12690_v62, %v14279_v26 }
 0x49b   : > { %10491 = vmatmul.mubr.f32.gmra.mrb[26].mxu1 %v2297_v32  ;;  %v12692_v28 = vpop.eup %12691 }
 0x49c   : > { %v11529_v52 = vpack.c.bf16 %v12420_v5, %v12419_v38  ;;  %v2458_v48 = vpop.permute.xlu0 %2457  ;;  %10493 = vmatprep.mubr.f32.mxu1 %v2299_v0  ;;  %v2305_v21 = vmul.f32 %v12692_v28, %v14292_v37 }
 0x49d   : > { %v2456_v3 = vpop.permute.xlu1 %2455 }
 0x49e   : > { %11531 = vmatprep.subr.msk.bf16.mxu1 %vm14040_vm3, %v11529_v52 }
 0x49f   : > { %11534 = vmatpush3.bf16.xpose.msk.msra.mxu1 %vm14040_vm3, %v11529_v52  ;;  %v12694_v45 = vpop.eup %12693 }
 0x4a0   : > { %11537 = vmatprep.subr.msk.bf16.mxu1 %vm14040_vm3, %v11535_v17  ;;  %10494 = vmatmul.mubr.f32.gmra.mrb[28].mxu1 %v2301_v44  ;;  %v2462_v56 = vpop.permute.xlu0 %2461  ;;  %v2303_v59 = vmul.f32 %v12694_v45, %v14295_v30 }
 0x4a1   : > { %v2460_v36 = vpop.permute.xlu1 %2459 }
 0x4a2   : > { %10496 = vmatprep.mubr.f32.mxu1 %v2303_v59 }
 0x4a4   : > { %10497 = vmatmul.mubr.f32.gmra.mrb[30].mxu1 %v2305_v21  ;;  %v2466_v15 = vpop.permute.xlu0 %2465 }
 0x4a5   : > { %v2464_v22 = vpop.permute.xlu1 %2463  ;;  %10531 = vmatprep.mubr.msk.f32.mxu1 %vm1920_vm2, %v2452_v8 }
 0x4a7   : > { %11540 = vmatpush3.bf16.xpose.msk.msra.mxu1 %vm14040_vm3, %v11535_v17 }
 0x4a8   : > { %11543 = vmatprep.subr.msk.bf16.mxu1 %vm14040_vm3, %v11541_v7  ;;  %v2470_v26 = vpop.permute.xlu0 %2469 }
 0x4a9   : > { %v2468_v46 = vpop.permute.xlu1 %2467 }
 0x4ac   : > { %v2474_v30 = vpop.permute.xlu0 %2473 }
 0x4ad   : > { %v2472_v29 = vpop.permute.xlu1 %2471 }
 0x4af   : > { %11546 = vmatpush3.bf16.xpose.msk.msra.mxu1 %vm14040_vm3, %v11541_v7 }
 0x4b0   : > { %v2478_v37 = vpop.permute.xlu0 %2477 }
 0x4b1   : > { %v2476_v58 = vpop.permute.xlu1 %2475 }
 0x4b4   : > { %v2482_v51 = vpop.permute.xlu0 %2481 }
 0x4b5   : > { %v2480_v20 = vpop.permute.xlu1 %2479 }
 0x4b6   : > { %10532 = vmatmul.mubr.msk.f32.vlgmr.msra.gmra.mrb[32].mxu1 %vm1920_vm2, %v2454_v43 }
 0x4b7   : > { %10534 = vmatprep.mubr.msk.f32.mxu1 %vm1920_vm2, %v2456_v3 }
 0x4b8   : > { %v12433_v8 = vpop.permute.xlu0 %12432 }
 0x4b9   : > { %v12438_v34 = vpop.permute.xlu1 %12437  ;;  %v12435_v32 = vunpack.i.h.bf16 %v12433_v8  ;;  %v12434_v13 = vunpack.i.l.bf16 %v12433_v8 }
 0x4ba   : > { %v12440_v63 = vunpack.i.h.bf16 %v12438_v34  ;;  %v12439_v5 = vunpack.i.l.bf16 %v12438_v34  ;;  %10535 = vmatmul.mubr.msk.f32.gmra.mrb[34].mxu1 %vm1920_vm2, %v2458_v48 }
 0x4bb   : > { %10537 = vmatprep.mubr.msk.f32.mxu1 %vm1920_vm2, %v2460_v36  ;;  %v11547_v38 = vpack.c.bf16 %v12435_v32, %v12434_v13 }
 0x4bc   : > { %v11551_v43 = vpack.c.bf16 %v12440_v63, %v12439_v5  ;;  %v12453_v44 = vpop.permute.xlu0 %12452 }
 0x4bd   : > { %v12443_v62 = vpop.permute.xlu1 %12442  ;;  %11548 = vmatprep.subr.bf16.mxu0 %v11547_v38  ;;  %v12455_v45 = vunpack.i.h.bf16 %v12453_v44  ;;  %v12454_v36 = vunpack.i.l.bf16 %v12453_v44 }
 0x4be   : > { %v12445_v52 = vunpack.i.h.bf16 %v12443_v62  ;;  %v12444_v0 = vunpack.i.l.bf16 %v12443_v62  ;;  %10538 = vmatmul.mubr.msk.f32.gmra.mrb[36].mxu1 %vm1920_vm2, %v2462_v56  ;;  %11550 = vmatpush3.bf16.msra.mxu0 %v11547_v38 }
 0x4bf   : > { %10540 = vmatprep.mubr.msk.f32.mxu1 %vm1920_vm2, %v2464_v22  ;;  %11552 = vmatprep.subr.bf16.mxu0 %v11551_v43 }
 0x4c0   : > { %v11555_v48 = vpack.c.bf16 %v12445_v52, %v12444_v0  ;;  %v12463_v25 = vpop.permute.xlu0 %12462 }
 0x4c1   : > { %v12448_v3 = vpop.permute.xlu1 %12447  ;;  %v12465_v22 = vunpack.i.h.bf16 %v12463_v25  ;;  %v12464_v7 = vunpack.i.l.bf16 %v12463_v25 }
 0x4c2   : > { %v12450_v17 = vunpack.i.h.bf16 %v12448_v3  ;;  %v12449_v28 = vunpack.i.l.bf16 %v12448_v3  ;;  %10541 = vmatmul.mubr.msk.f32.gmra.mrb[38].mxu1 %vm1920_vm2, %v2466_v15  ;;  %11554 = vmatpush3.bf16.msra.mxu0 %v11551_v43  ;;  %v11563_v15 = vpack.c.bf16 %v12455_v45, %v12454_v36 }
 0x4c3   : > { %10543 = vmatprep.mubr.msk.f32.mxu1 %vm1920_vm2, %v2468_v46  ;;  %11556 = vmatprep.subr.bf16.mxu0 %v11555_v48 }
 0x4c4   : > { %v11559_v56 = vpack.c.bf16 %v12450_v17, %v12449_v28  ;;  %v12468_v46 = vpop.permute.xlu0 %12467 }
 0x4c5   : > { %v12458_v59 = vpop.permute.xlu1 %12457  ;;  %v12469_v8 = vunpack.i.l.bf16 %v12468_v46 }
 0x4c6   : > { %10544 = vmatmul.mubr.msk.f32.gmra.mrb[40].mxu1 %vm1920_vm2, %v2470_v26  ;;  %11558 = vmatpush3.bf16.msra.mxu0 %v11555_v48  ;;  %v12460_v10 = vunpack.i.h.bf16 %v12458_v59  ;;  %v12459_v21 = vunpack.i.l.bf16 %v12458_v59 }
 0x4c7   : > { %10546 = vmatprep.mubr.msk.f32.mxu1 %vm1920_vm2, %v2472_v29  ;;  %11560 = vmatprep.subr.bf16.mxu0 %v11559_v56  ;;  %v12470_v29 = vunpack.i.h.bf16 %v12468_v46 }
 0x4c8   : > { %v11567_v26 = vpack.c.bf16 %v12460_v10, %v12459_v21  ;;  %v16750_v21 = vld [vmem:[#allocation44_spill] sm:$0xff] }
 0x4c9   : > { %v12473_v34 = vpop.permute.xlu1 %12472  ;;  %v11575_v13 = vpack.c.bf16 %v12470_v29, %v12469_v8 }
 0x4ca   : > { %10547 = vmatmul.mubr.msk.f32.gmra.mrb[42].mxu1 %vm1920_vm2, %v2474_v30  ;;  %11562 = vmatpush3.bf16.msra.mxu0 %v11559_v56  ;;  %v11571_v30 = vpack.c.bf16 %v12465_v22, %v12464_v7  ;;  %v12474_v32 = vunpack.i.l.bf16 %v12473_v34 }
 0x4cb   : > { %10549 = vmatprep.mubr.msk.f32.mxu1 %vm1920_vm2, %v2476_v58  ;;  %11564 = vmatprep.subr.bf16.mxu0 %v11563_v15  ;;  %v12475_v58 = vunpack.i.h.bf16 %v12473_v34 }
 0x4ce   : > { %10550 = vmatmul.mubr.msk.f32.gmra.mrb[44].mxu1 %vm1920_vm2, %v2478_v37  ;;  %11566 = vmatpush3.bf16.msra.mxu0 %v11563_v15  ;;  %v14423_v37 = vpack.c.bf16 %v12475_v58, %v12474_v32 }
 0x4cf   : > { %10552 = vmatprep.mubr.msk.f32.mxu1 %vm1920_vm2, %v2480_v20  ;;  %11568 = vmatprep.subr.bf16.mxu0 %v11567_v26 }
 0x4d2   : > { %10553 = vmatmul.mubr.msk.f32.gmra.mrb[46].mxu1 %vm1920_vm2, %v2482_v51  ;;  %11570 = vmatpush3.bf16.msra.mxu0 %v11567_v26 }
 0x4d3   : > { %11572 = vmatprep.subr.bf16.mxu0 %v11571_v30 }
 0x4d6   : > { %11574 = vmatpush3.bf16.msra.mxu0 %v11571_v30 }
 0x4d7   : > { %11576 = vmatprep.subr.bf16.mxu0 %v11575_v13 }
 0x4da   : > { %11578 = vmatpush3.bf16.msra.mxu0 %v11575_v13 }
 0x4db   : > { %11581 = vmatprep.subr.msk.bf16.mxu0 %vm14040_vm3, %v14423_v37 }
 0x51c   : > { %v14428_v20 = vpop.f32.mrb[16].mxu1 }
 0x51d   : > { %16734 = vst [vmem:[#allocation46_spill] sm:$0xff] %v14428_v20  ;;  %v14430_v63 = vpop.f32.mrb[17].mxu1  ;;  %v16753_v20 = vld [vmem:[#allocation42_spill] sm:$0xff] }
 0x51e   : > { %16735 = vst [vmem:[#allocation47_spill] sm:$0xff] %v14430_v63 }
 0x552   : > { %v14432_v51 = vpop.f32.mrb[18].mxu1 }
 0x553   : > { %16736 = vst [vmem:[#allocation48_spill] sm:$0xff] %v14432_v51  ;;  %v14434_v5 = vpop.f32.mrb[19].mxu1 }
 0x554   : > { %16737 = vst [vmem:[#allocation49_spill] sm:$0xff] %v14434_v5 }
 0x55a   : > { %v14436_v38 = vpop.f32.mrb[20].mxu1 }
 0x55b   : > { %16738 = vst [vmem:[#allocation50_spill] sm:$0xff] %v14436_v38  ;;  %v14438_v62 = vpop.f32.mrb[21].mxu1 }
 0x55c   : > { %16739 = vst [vmem:[#allocation51_spill] sm:$0xff] %v14438_v62 }
 0x562   : > { %v14440_v52 = vpop.f32.mrb[22].mxu1 }
 0x563   : > { %16740 = vst [vmem:[#allocation52_spill] sm:$0xff] %v14440_v52  ;;  %v14442_v0 = vpop.f32.mrb[23].mxu1 }
 0x564   : > { %16741 = vst [vmem:[#allocation53_spill] sm:$0xff] %v14442_v0 }
 0x56a   : > { %v14444_v43 = vpop.f32.mrb[24].mxu1 }
 0x56b   : > { %16742 = vst [vmem:[#allocation54_spill] sm:$0xff] %v14444_v43  ;;  %v14446_v3 = vpop.f32.mrb[25].mxu1 }
 0x56c   : > { %16743 = vst [vmem:[#allocation55_spill] sm:$0xff] %v14446_v3 }
 0x56e   : > { %v14448_v17 = vpop.f32.mrb[26].mxu1 }
 0x56f   : > { %16744 = vst [vmem:[#allocation56_spill] sm:$0xff] %v14448_v17  ;;  %v14450_v28 = vpop.f32.mrb[27].mxu1 }
 0x570   : > { %16745 = vst [vmem:[#allocation57_spill] sm:$0xff] %v14450_v28 }
 0x573   : > { %v14452_v48 = vpop.f32.mrb[28].mxu1 }
 0x574   : > { %16746 = vst [vmem:[#allocation58_spill] sm:$0xff] %v14452_v48  ;;  %v14454_v44 = vpop.f32.mrb[29].mxu1 }
 0x575   : > { %16747 = vst [vmem:[#allocation59_spill] sm:$0xff] %v14454_v44 }
 0x577   : > { %v14456_v45 = vpop.f32.mrb[30].mxu1 }
 0x578   : > { %16748 = vst [vmem:[#allocation60_spill] sm:$0xff] %v14456_v45  ;;  %v14458_v36 = vpop.f32.mrb[31].mxu1 }
 0x579   : > { %16749 = vst [vmem:[#allocation61_spill] sm:$0xff] %v14458_v36 }
 0x589   : > { %v10533_v56 = vpop.f32.mrb[32].mxu1 }
 0x58a   : > { %v2725_v59 = vmul.f32 0.35355338, %v10533_v56  ;;  %v2645_v25 = vpop.f32.mrb[33].mxu1 }
 0x58b   : > { %v2724_v10 = vmul.f32 0.35355338, %v2645_v25 }
 0x58c   : > { %v14461_v15 = vadd.f32 %v2725_v59, %v16750_v21 }
 0x58d   : > { %v10536_v22 = vpop.f32.mrb[34].mxu1  ;;  %v14464_v7 = vadd.f32 %v2724_v10, %v16750_v21 }
 0x58e   : > { %v2727_v26 = vmul.f32 0.35355338, %v10536_v22  ;;  %2758 = vmax.xlane.f32.xlu0 %v14461_v15  ;;  %v2655_v46 = vpop.f32.mrb[35].mxu1 }
 0x58f   : > { %2756 = vmax.xlane.f32.xlu1 %v14464_v7 }
 0x590   : > { %v14469_v29 = vadd.f32 %v2727_v26, %v16750_v21 }
 0x591   : > { %v10539_v8 = vpop.f32.mrb[36].mxu1 }
 0x592   : > { %v2729_v30 = vmul.f32 0.35355338, %v10539_v8  ;;  %v2665_v34 = vpop.f32.mrb[37].mxu1 }
 0x593   : > { %2762 = vmax.xlane.f32.xlu1 %v14469_v29  ;;  %v2728_v52 = vmul.f32 0.35355338, %v2665_v34 }
 0x594   : > { %v14473_v58 = vadd.f32 %v2729_v30, %v16750_v21 }
 0x595   : > { %v10542_v32 = vpop.f32.mrb[38].mxu1  ;;  %v2744_v38 = vadd.f32 %v2728_v52, %v16750_v21 }
 0x596   : > { %v2731_v13 = vmul.f32 0.35355338, %v10542_v32  ;;  %v2675_v56 = vpop.f32.mrb[39].mxu1 }
 0x597   : > { %2766 = vmax.xlane.f32.xlu1 %v14473_v58 }
 0x598   : > { %v14477_v59 = vadd.f32 %v2731_v13, %v16750_v21 }
 0x599   : > { %v10545_v25 = vpop.f32.mrb[40].mxu1 }
 0x59a   : > { %v2733_v10 = vmul.f32 0.35355338, %v10545_v25  ;;  %v2685_v22 = vpop.f32.mrb[41].mxu1  ;;  %v16751_v25 = vld [vmem:[#allocation40_spill] sm:$0xff] }
 0x59b   : > { %2770 = vmax.xlane.f32.xlu1 %v14477_v59 }
 0x59c   : > { %v14481_v26 = vadd.f32 %v2733_v10, %v16750_v21 }
 0x59d   : > { %v10548_v8 = vpop.f32.mrb[42].mxu1 }
 0x59e   : > { %v2735_v45 = vmul.f32 0.35355338, %v10548_v8  ;;  %v2695_v30 = vpop.f32.mrb[43].mxu1 }
 0x59f   : > { %2774 = vmax.xlane.f32.xlu1 %v14481_v26 }
 0x5a0   : > { %v14485_v32 = vadd.f32 %v2735_v45, %v16750_v21  ;;  %v2726_v45 = vmul.f32 0.35355338, %v2655_v46 }
 0x5a1   : > { %v10551_v48 = vpop.f32.mrb[44].mxu1 }
 0x5a2   : > { %v2737_v17 = vmul.f32 0.35355338, %v10551_v48  ;;  %v2705_v13 = vpop.f32.mrb[45].mxu1  ;;  %v16752_v48 = vld [vmem:[#allocation41_spill] sm:$0xff]  ;;  %v2742_v0 = vadd.f32 %v2726_v45, %v16750_v21 }
 0x5a3   : > { %2778 = vmax.xlane.f32.xlu1 %v14485_v32  ;;  %v2736_v5 = vmul.f32 0.35355338, %v2705_v13 }
 0x5a4   : > { %12482 = vrot.lane.b32.xlu0 %v16751_v25, %s13493_s26  ;;  %v14491_v28 = vadd.f32 %v2737_v17, %v16750_v21  ;;  %v2730_v17 = vmul.f32 0.35355338, %v2675_v56 }
 0x5a5   : > { %v10554_v10 = vpop.f32.mrb[46].mxu1  ;;  %v14509_v56 = vadd.f32 %v2736_v5, %v16750_v21 }
 0x5a6   : > { %v2739_v43 = vmul.f32 0.35355338, %v10554_v10  ;;  %v2715_v8 = vpop.f32.mrb[47].mxu1  ;;  %v2732_v10 = vmul.f32 0.35355338, %v2685_v22  ;;  %v2746_v62 = vadd.f32 %v2730_v17, %v16750_v21  ;;  %v14516_v22 = vpop.permute.xlu0 %12477 }
 0x5a7   : > { %2782 = vmax.xlane.f32.xlu1 %v14491_v28  ;;  %v2738_v34 = vmul.f32 0.35355338, %v2715_v8 }
 0x5a8   : > { %v14495_v3 = vadd.f32 %v2739_v43, %v16750_v21  ;;  %v2734_v43 = vmul.f32 0.35355338, %v2695_v30  ;;  %v14504_v51 = vadd.f32 %v2732_v10, %v16750_v21 }
 0x5a9   : > { %v14513_v52 = vadd.f32 %v2738_v34, %v16750_v21 }
 0x5aa   : > { %v2750_v46 = vadd.f32 %v2734_v43, %v16750_v21 }
 0x5ab   : > { %2786 = vmax.xlane.f32.xlu1 %v14495_v3 }
 0x5bc   : > { %12487 = vrot.lane.b32.xlu1 %v16752_v48, %s13493_s26 }
 0x5c3   : > { %2760 = vmax.xlane.f32.xlu0 %v2742_v0 }
 0x5c7   : > { %2764 = vmax.xlane.f32.xlu0 %v2744_v38 }
 0x5cb   : > { %2768 = vmax.xlane.f32.xlu0 %v2746_v62 }
 0x5cf   : > { %2772 = vmax.xlane.f32.xlu0 %v14504_v51 }
 0x5d3   : > { %2776 = vmax.xlane.f32.xlu0 %v2750_v46 }
 0x5d7   : > { %2780 = vmax.xlane.f32.xlu0 %v14509_v56 }
 0x5db   : > { %2784 = vmax.xlane.f32.xlu0 %v14513_v52 }
 0x61b   : > { %v2759_v30 = vpop.xlane.xlu0 %2758 }
 0x61c   : > { %v2789_v45 = vsub.f32 %v14461_v15, %v2759_v30  ;;  %v2757_v13 = vpop.xlane.xlu1 %2756 }
 0x61d   : > { %v2788_v17 = vsub.f32 %v14464_v7, %v2757_v13 }
 0x61e   : > { %v2806_v10 = vmul.f32 1.442695, %v2789_v45 }
 0x61f   : > { %v2804_v8 = vmul.f32 1.442695, %v2788_v17  ;;  %v14528_v63 = vpop.permute.xlu0 %12482 }
 0x620   : > { %12695 = vpow2.f32 %v2806_v10  ;;  %v2763_v34 = vpop.xlane.xlu1 %2762  ;;  %16754 = vst [vmem:[#allocation62_spill] sm:$0xff] %v14528_v63 }
 0x621   : > { %12697 = vpow2.f32 %v2804_v8  ;;  %v2791_v7 = vsub.f32 %v14469_v29, %v2763_v34 }
 0x623   : > { %v2810_v8 = vmul.f32 1.442695, %v2791_v7 }
 0x624   : > { %v2767_v15 = vpop.xlane.xlu1 %2766 }
 0x625   : > { %v2793_v45 = vsub.f32 %v14473_v58, %v2767_v15 }
 0x627   : > { %v2814_v44 = vmul.f32 1.442695, %v2793_v45 }
 0x628   : > { %v2771_v30 = vpop.xlane.xlu1 %2770 }
 0x629   : > { %v2795_v21 = vsub.f32 %v14477_v59, %v2771_v30 }
 0x62a   : > { %v14520_v5 = vpop.eup %12695 }
 0x62b   : > { %v14522_v43 = vpop.eup %12697  ;;  %2838 = vadd.xlane.f32.xlu1 %v14520_v5  ;;  %v2818_v6 = vmul.f32 1.442695, %v2795_v21 }
 0x62c   : > { %2836 = vadd.xlane.f32.xlu0 %v14522_v43  ;;  %v2775_v17 = vpop.xlane.xlu1 %2774 }
 0x62d   : > { %v2797_v58 = vsub.f32 %v14481_v26, %v2775_v17 }
 0x642   : > { %12492 = vrot.lane.b32.xlu0 %v16753_v20, %s13493_s26  ;;  %v2779_v20 = vpop.xlane.xlu1 %2778 }
 0x643   : > { %v2799_v21 = vsub.f32 %v14485_v32, %v2779_v20 }
 0x645   : > { %v2826_v30 = vmul.f32 1.442695, %v2799_v21  ;;  %v12480_v21 = vunpack.i.h.bf16 %v14516_v22 }
 0x650   : > { %v2761_v13 = vpop.xlane.xlu0 %2760 }
 0x651   : > { %v2790_v10 = vsub.f32 %v2742_v0, %v2761_v13  ;;  %v2783_v0 = vpop.xlane.xlu1 %2782 }
 0x653   : > { %v2808_v36 = vmul.f32 1.442695, %v2790_v10 }
 0x654   : > { %v2765_v48 = vpop.xlane.xlu0 %2764 }
 0x655   : > { %12699 = vpow2.f32 %v2808_v36  ;;  %v2792_v25 = vsub.f32 %v2744_v38, %v2765_v48  ;;  %v2822_v36 = vmul.f32 1.442695, %v2797_v58  ;;  %v2801_v38 = vsub.f32 %v14491_v28, %v2783_v0 }
 0x656   : > { %12701 = vpow2.f32 %v2810_v8 }
 0x657   : > { %v2812_v33 = vmul.f32 1.442695, %v2792_v25  ;;  %12703 = vpow2.f32 %v2814_v44  ;;  %v2830_v26 = vmul.f32 1.442695, %v2801_v38 }
 0x658   : > { %v2769_v63 = vpop.xlane.xlu0 %2768 }
 0x659   : > { %12705 = vpow2.f32 %v2812_v33  ;;  %v2794_v29 = vsub.f32 %v2746_v62, %v2769_v63 }
 0x65a   : > { %12707 = vpow2.f32 %v2818_v6 }
 0x65b   : > { %v2816_v15 = vmul.f32 1.442695, %v2794_v29 }
 0x65c   : > { %v2773_v34 = vpop.xlane.xlu0 %2772 }
 0x65d   : > { %12709 = vpow2.f32 %v2816_v15  ;;  %v2796_v33 = vsub.f32 %v14504_v51, %v2773_v34  ;;  %v2787_v51 = vpop.xlane.xlu1 %2786 }
 0x65e   : > { %12711 = vpow2.f32 %v2822_v36  ;;  %v2803_v13 = vsub.f32 %v14495_v3, %v2787_v51  ;;  %v16756_v51 = vld [vmem:[#allocation39_spill] sm:$0xff] }
 0x65f   : > { %v14534_v7 = vpop.eup %12699  ;;  %v2820_v28 = vmul.f32 1.442695, %v2796_v33 }
 0x660   : > { %v14536_v45 = vpop.eup %12701  ;;  %v2777_v59 = vpop.xlane.xlu0 %2776  ;;  %2840 = vadd.xlane.f32.xlu1 %v14534_v7 }
 0x661   : > { %v2798_v63 = vsub.f32 %v2750_v46, %v2777_v59  ;;  %2842 = vadd.xlane.f32.xlu0 %v14536_v45  ;;  %v14542_v62 = vpop.eup %12703  ;;  %v12488_v38 = vpop.permute.xlu1 %12487 }
 0x663   : > { %v14544_v6 = vpop.eup %12705  ;;  %v2824_v44 = vmul.f32 1.442695, %v2798_v63 }
 0x664   : > { %v2781_v25 = vpop.xlane.xlu0 %2780  ;;  %2846 = vadd.xlane.f32.xlu1 %v14542_v62  ;;  %v14550_v46 = vpop.eup %12707 }
 0x665   : > { %12713 = vpow2.f32 %v2824_v44  ;;  %v2800_v48 = vsub.f32 %v14509_v56, %v2781_v25  ;;  %2844 = vadd.xlane.f32.xlu0 %v14544_v6  ;;  %v2834_v56 = vmul.f32 1.442695, %v2803_v13  ;;  %v16758_v13 = vld [vmem:[#allocation40_spill] sm:$0xff] }
 0x666   : > { %12715 = vpow2.f32 %v2830_v26  ;;  %v12479_v26 = vunpack.i.l.bf16 %v14516_v22  ;;  %v16757_v22 = vld [vmem:[#allocation62_spill] sm:$0xff] }
 0x667   : > { %12717 = vpow2.f32 %v2820_v28  ;;  %v2828_v20 = vmul.f32 1.442695, %v2800_v48  ;;  %v14554_v17 = vpop.eup %12709 }
 0x668   : > { %2850 = vadd.xlane.f32.xlu1 %v14550_v46  ;;  %v2785_v32 = vpop.xlane.xlu0 %2784  ;;  %12719 = vpow2.f32 %v2826_v30  ;;  %v14558_v8 = vpop.eup %12711  ;;  %v11585_v48 = vpack.c.bf16 %v12480_v21, %v12479_v26  ;;  %v12484_v30 = vunpack.i.l.bf16 %v16757_v22 }
 0x669   : > { %12721 = vpow2.f32 %v2828_v20  ;;  %v2802_v10 = vsub.f32 %v14513_v52, %v2785_v32  ;;  %v12489_v20 = vunpack.i.l.bf16 %v12488_v38 }
 0x66a   : > { %12723 = vpow2.f32 %v2834_v56 }
 0x66b   : > { %v2832_v3 = vmul.f32 1.442695, %v2802_v10 }
 0x66c   : > { %2848 = vadd.xlane.f32.xlu1 %v14554_v17 }
 0x66d   : > { %12725 = vpow2.f32 %v2832_v3 }
 0x66f   : > { %v14560_v29 = vpop.eup %12713 }
 0x670   : > { %2854 = vadd.xlane.f32.xlu1 %v14558_v8  ;;  %2856 = vadd.xlane.f32.xlu0 %v14560_v29  ;;  %v14564_v58 = vpop.eup %12715 }
 0x671   : > { %v14566_v34 = vpop.eup %12717 }
 0x672   : > { %v14570_v52 = vpop.eup %12719 }
 0x673   : > { %v14572_v0 = vpop.eup %12721 }
 0x674   : > { %2852 = vadd.xlane.f32.xlu1 %v14566_v34  ;;  %2862 = vadd.xlane.f32.xlu0 %v14564_v58  ;;  %v14576_v15 = vpop.eup %12723 }
 0x677   : > { %v14579_v36 = vpop.eup %12725 }
 0x678   : > { %2858 = vadd.xlane.f32.xlu1 %v14570_v52  ;;  %2860 = vadd.xlane.f32.xlu0 %v14572_v0 }
 0x67c   : > { %2866 = vadd.xlane.f32.xlu1 %v14576_v15 }
 0x680   : > { %2864 = vadd.xlane.f32.xlu1 %v14579_v36 }
 0x68e   : > { %12502 = vrot.lane.b32.xlu0 %v14017_v60, %s13493_s26 }
 0x691   : > { %12497 = vrot.lane.b32.xlu1 %v14007_v53, %s13493_s26 }
 0x692   : > { %12507 = vrot.lane.b32.xlu0 %v14027_v2, %s13493_s26  ;;  %s5107_s26 = scalar_lea.vmem %s13585_s6, %s13851_s25  ;;  %s9537_s25 = sshll.u32 %s13430_s28, 6 }
 0x695   : > { %3113 = vrot.lane.b32.xlu1 %v13963_v16, %s13494_s0 }
 0x696   : > { %3109 = vrot.lane.b32.xlu0 %v13951_v11, %s13494_s0 }
 0x699   : > { %3117 = vrot.lane.b32.xlu1 %v13973_v27, %s13494_s0 }
 0x69a   : > { %3111 = vrot.lane.b32.xlu0 %v13949_v9, %s13494_s0 }
 0x69d   : > { %3121 = vrot.lane.b32.xlu1 %v13981_v35, %s13494_s0 }
 0x69e   : > { %3115 = vrot.lane.b32.xlu0 %v13959_v14, %s13494_s0 }
 0x6a1   : > { %3125 = vrot.lane.b32.xlu1 %v13991_v42, %s13494_s0 }
 0x6a2   : > { %3119 = vrot.lane.b32.xlu0 %v13969_v23, %s13494_s0 }
 0x6a5   : > { %3129 = vrot.lane.b32.xlu1 %v14001_v49, %s13494_s0 }
 0x6a6   : > { %3123 = vrot.lane.b32.xlu0 %v13979_v31, %s13494_s0 }
 0x6a9   : > { %3133 = vrot.lane.b32.xlu1 %v14011_v57, %s13494_s0 }
 0x6aa   : > { %3127 = vrot.lane.b32.xlu0 %v13989_v39, %s13494_s0 }
 0x6ad   : > { %3137 = vrot.lane.b32.xlu1 %v14021_v1, %s13494_s0 }
 0x6ae   : > { %3131 = vrot.lane.b32.xlu0 %v13999_v47, %s13494_s0 }
 0x6b1   : > { %12517 = vrot.lane.b32.xlu1 %v14144_v4, %s13494_s0 }
 0x6b2   : > { %3135 = vrot.lane.b32.xlu0 %v14009_v54, %s13494_s0 }
 0x6b5   : > { %12522 = vrot.lane.b32.xlu1 %v14148_v55, %s13494_s0 }
 0x6b6   : > { %3139 = vrot.lane.b32.xlu0 %v14019_v61, %s13494_s0 }
 0x6b8   : > { %v2839_v59 = vpop.xlane.xlu1 %2838 }
 0x6b9   : > { %12727 = vrcp.f32 %v2839_v59  ;;  %12527 = vrot.lane.b32.xlu1 %v14152_v19, %s13494_s0  ;;  %v2837_v33 = vpop.xlane.xlu0 %2836 }
 0x6ba   : > { %12729 = vrcp.f32 %v2837_v33  ;;  %12512 = vrot.lane.b32.xlu0 %v14140_v50, %s13494_s0 }
 0x6bd   : > { %12537 = vrot.lane.b32.xlu1 %v14161_v40, %s13494_s0  ;;  %v12493_v56 = vpop.permute.xlu0 %12492 }
 0x6be   : > { %12532 = vrot.lane.b32.xlu0 %v14157_v18, %s13494_s0  ;;  %v12495_v10 = vunpack.i.h.bf16 %v12493_v56  ;;  %v12494_v3 = vunpack.i.l.bf16 %v12493_v56 }
 0x6c0   : > { %v11603_v59 = vpack.c.bf16 %v12495_v10, %v12494_v3 }
 0x6c1   : > { %12552 = vrot.lane.b32.xlu1 %v13957_v12, %s13495_s22 }
 0x6c2   : > { %12542 = vrot.lane.b32.xlu0 %v14167_v41, %s13494_s0 }
 0x6c3   : > { %v12728_v63 = vpop.eup %12727 }
 0x6c4   : > { %v12730_v44 = vpop.eup %12729  ;;  %v2871_v28 = vmul.f32 %v12728_v63, %v14520_v5 }
 0x6c5   : > { %v2869_v25 = vmul.f32 %v12730_v44, %v14522_v43  ;;  %v12485_v43 = vunpack.i.h.bf16 %v16757_v22 }
 0x6c6   : > { %12547 = vrot.lane.b32.xlu0 %v14177_v24, %s13494_s0  ;;  %s15583_s0 = scalar_lea.vmem %s13595_s20, %s9537_s25 }
 0x6c7   : > { %10587 = vmatprep.mubr.f32.mxu0 %v2869_v25  ;;  %v11591_v5 = vpack.c.bf16 %v12485_v43, %v12484_v30 }
 0x6c8   : > { %10588 = vmatmul.mubr.f32.vlgmr.msra.gmra.mrb[32].mxu0 %v2871_v28 }
 0x6c9   : > { %11584 = vmatpush3.bf16.xpose.msk.msra.mxu0 %vm14040_vm3, %v14423_v37  ;;  %v12490_v37 = vunpack.i.h.bf16 %v12488_v38 }
 0x6ca   : > { %11587 = vmatprep.subr.msk.bf16.mxu0 %vm14040_vm3, %v11585_v48  ;;  %12557 = vrot.lane.b32.xlu0 %v16756_v51, %s13495_s22 }
 0x6cb   : > { %v11597_v32 = vpack.c.bf16 %v12490_v37, %v12489_v20 }
 0x6ce   : > { %12562 = vrot.lane.b32.xlu0 %v16758_v13, %s13495_s22 }
 0x6d1   : > { %11590 = vmatpush3.bf16.xpose.msk.msra.mxu0 %vm14040_vm3, %v11585_v48 }
 0x6d2   : > { %11593 = vmatprep.subr.msk.bf16.mxu0 %vm14040_vm3, %v11591_v5 }
 0x6d9   : > { %11596 = vmatpush3.bf16.xpose.msk.msra.mxu0 %vm14040_vm3, %v11591_v5 }
 0x6da   : > { %11599 = vmatprep.subr.msk.bf16.mxu0 %vm14040_vm3, %v11597_v32 }
 0x6e1   : > { %11602 = vmatpush3.bf16.xpose.msk.msra.mxu0 %vm14040_vm3, %v11597_v32 }
 0x6e2   : > { %11605 = vmatprep.subr.msk.bf16.mxu0 %vm14040_vm3, %v11603_v59 }
 0x6e9   : > { %11608 = vmatpush3.bf16.xpose.msk.msra.mxu0 %vm14040_vm3, %v11603_v59 }
 0x6ed   : > { %v2841_v38 = vpop.xlane.xlu1 %2840 }
 0x6ee   : > { %12731 = vrcp.f32 %v2841_v38  ;;  %v2843_v33 = vpop.xlane.xlu0 %2842 }
 0x6ef   : > { %12733 = vrcp.f32 %v2843_v33 }
 0x6f1   : > { %v2847_v63 = vpop.xlane.xlu1 %2846 }
 0x6f2   : > { %12735 = vrcp.f32 %v2847_v63  ;;  %v2845_v44 = vpop.xlane.xlu0 %2844 }
 0x6f3   : > { %12737 = vrcp.f32 %v2845_v44 }
 0x6f5   : > { %v2851_v21 = vpop.xlane.xlu1 %2850 }
 0x6f6   : > { %12739 = vrcp.f32 %v2851_v21 }
 0x6f8   : > { %v12732_v26 = vpop.eup %12731 }
 0x6f9   : > { %v12734_v25 = vpop.eup %12733  ;;  %v2849_v28 = vpop.xlane.xlu1 %2848  ;;  %v2873_v48 = vmul.f32 %v12732_v26, %v14534_v7 }
 0x6fa   : > { %12741 = vrcp.f32 %v2849_v28  ;;  %v2875_v51 = vmul.f32 %v12734_v25, %v14536_v45 }
 0x6fb   : > { %10590 = vmatprep.mubr.f32.mxu0 %v2873_v48 }
 0x6fc   : > { %v12736_v22 = vpop.eup %12735  ;;  %10591 = vmatmul.mubr.f32.gmra.mrb[34].mxu0 %v2875_v51 }
 0x6fd   : > { %v12738_v43 = vpop.eup %12737  ;;  %v2855_v30 = vpop.xlane.xlu1 %2854  ;;  %v2879_v37 = vmul.f32 %v12736_v22, %v14542_v62 }
 0x6fe   : > { %v2857_v13 = vpop.xlane.xlu0 %2856  ;;  %v2877_v5 = vmul.f32 %v12738_v43, %v14544_v6  ;;  %12743 = vrcp.f32 %v2855_v30 }
 0x6ff   : > { %12745 = vrcp.f32 %v2857_v13 }
 0x700   : > { %10593 = vmatprep.mubr.f32.mxu0 %v2877_v5  ;;  %v12740_v7 = vpop.eup %12739 }
 0x701   : > { %v2853_v20 = vpop.xlane.xlu1 %2852  ;;  %10594 = vmatmul.mubr.f32.gmra.mrb[36].mxu0 %v2879_v37  ;;  %v2883_v59 = vmul.f32 %v12740_v7, %v14550_v46 }
 0x702   : > { %v2863_v32 = vpop.xlane.xlu0 %2862  ;;  %12747 = vrcp.f32 %v2853_v20 }
 0x704   : > { %v12742_v56 = vpop.eup %12741 }
 0x705   : > { %v2859_v45 = vpop.xlane.xlu1 %2858  ;;  %v2881_v3 = vmul.f32 %v12742_v56, %v14554_v17 }
 0x706   : > { %v2861_v10 = vpop.xlane.xlu0 %2860  ;;  %12749 = vrcp.f32 %v2859_v45 }
 0x707   : > { %12751 = vrcp.f32 %v2861_v10  ;;  %10596 = vmatprep.mubr.f32.mxu0 %v2881_v3 }
 0x708   : > { %10597 = vmatmul.mubr.f32.gmra.mrb[38].mxu0 %v2883_v59  ;;  %12753 = vrcp.f32 %v2863_v32  ;;  %v12744_v38 = vpop.eup %12743 }
 0x709   : > { %v2867_v62 = vpop.xlane.xlu1 %2866  ;;  %v12746_v33 = vpop.eup %12745  ;;  %v2887_v17 = vmul.f32 %v12744_v38, %v14558_v8 }
 0x70a   : > { %v12503_v6 = vpop.permute.xlu0 %12502  ;;  %12755 = vrcp.f32 %v2867_v62  ;;  %v2889_v46 = vmul.f32 %v12746_v33, %v14560_v29 }
 0x70b   : > { %v12505_v43 = vunpack.i.h.bf16 %v12503_v6  ;;  %v12504_v30 = vunpack.i.l.bf16 %v12503_v6 }
 0x70c   : > { %v12748_v63 = vpop.eup %12747 }
 0x70d   : > { %v2865_v44 = vpop.xlane.xlu1 %2864  ;;  %v2885_v26 = vmul.f32 %v12748_v63, %v14566_v34  ;;  %v11615_v32 = vpack.c.bf16 %v12505_v43, %v12504_v30 }
 0x70e   : > { %v12508_v21 = vpop.permute.xlu0 %12507  ;;  %12757 = vrcp.f32 %v2865_v44 }
 0x70f   : > { %10599 = vmatprep.mubr.f32.mxu0 %v2885_v26  ;;  %v12510_v3 = vunpack.i.h.bf16 %v12508_v21  ;;  %v12509_v59 = vunpack.i.l.bf16 %v12508_v21 }
 0x710   : > { %v12750_v25 = vpop.eup %12749  ;;  %10600 = vmatmul.mubr.f32.gmra.mrb[40].mxu0 %v2887_v17 }
 0x711   : > { %v12752_v28 = vpop.eup %12751  ;;  %v12498_v48 = vpop.permute.xlu1 %12497  ;;  %10602 = vmatprep.mubr.f32.mxu0 %v2889_v46  ;;  %v2891_v22 = vmul.f32 %v12750_v25, %v14570_v52  ;;  %v11621_v38 = vpack.c.bf16 %v12510_v3, %v12509_v59 }
 0x712   : > { %v3110_v51 = vpop.permute.xlu0 %3109  ;;  %v12500_v13 = vunpack.i.h.bf16 %v12498_v48  ;;  %v12499_v5 = vunpack.i.l.bf16 %v12498_v48  ;;  %v12754_v37 = vpop.eup %12753  ;;  %v2893_v34 = vmul.f32 %v12752_v28, %v14572_v0 }
 0x713   : > { %v2895_v7 = vmul.f32 %v12754_v37, %v14564_v58 }
 0x714   : > { %v11609_v20 = vpack.c.bf16 %v12500_v13, %v12499_v5  ;;  %10603 = vmatmul.mubr.f32.gmra.mrb[42].mxu0 %v2891_v22  ;;  %v12756_v56 = vpop.eup %12755 }
 0x715   : > { %v3114_v8 = vpop.permute.xlu1 %3113  ;;  %10605 = vmatprep.mubr.f32.mxu0 %v2893_v34  ;;  %v2899_v62 = vmul.f32 %v12756_v56, %v14576_v15 }
 0x716   : > { %v3112_v29 = vpop.permute.xlu0 %3111  ;;  %11611 = vmatprep.subr.msk.bf16.mxu0 %vm14040_vm3, %v11609_v20 }
 0x717   : > { %11614 = vmatpush3.bf16.xpose.msk.msra.mxu0 %vm14040_vm3, %v11609_v20 }
 0x718   : > { %v12758_v52 = vpop.eup %12757  ;;  %10606 = vmatmul.mubr.f32.gmra.mrb[44].mxu0 %v2895_v7  ;;  %11617 = vmatprep.subr.msk.bf16.mxu0 %vm14040_vm3, %v11615_v32 }
 0x719   : > { %v3118_v0 = vpop.permute.xlu1 %3117  ;;  %v2897_v10 = vmul.f32 %v12758_v52, %v14579_v36 }
 0x71a   : > { %v3116_v45 = vpop.permute.xlu0 %3115 }
 0x71b   : > { %10608 = vmatprep.mubr.f32.mxu0 %v2897_v10 }
 0x71c   : > { %10609 = vmatmul.mubr.f32.gmra.mrb[46].mxu0 %v2899_v62 }
 0x71d   : > { %v3122_v58 = vpop.permute.xlu1 %3121  ;;  %10643 = vmatprep.mubr.msk.f32.mxu0 %vm1920_vm2, %v3110_v51 }
 0x71e   : > { %v3120_v6 = vpop.permute.xlu0 %3119 }
 0x71f   : > { %11620 = vmatpush3.bf16.xpose.msk.msra.mxu0 %vm14040_vm3, %v11615_v32 }
 0x720   : > { %11623 = vmatprep.subr.msk.bf16.mxu0 %vm14040_vm3, %v11621_v38 }
 0x721   : > { %v3126_v33 = vpop.permute.xlu1 %3125 }
 0x722   : > { %v3124_v63 = vpop.permute.xlu0 %3123 }
 0x725   : > { %v3130_v36 = vpop.permute.xlu1 %3129 }
 0x726   : > { %v3128_v44 = vpop.permute.xlu0 %3127 }
 0x727   : > { %11626 = vmatpush3.bf16.xpose.msk.msra.mxu0 %vm14040_vm3, %v11621_v38 }
 0x729   : > { %v3134_v15 = vpop.permute.xlu1 %3133 }
 0x72a   : > { %v3132_v21 = vpop.permute.xlu0 %3131 }
 0x72d   : > { %v3138_v26 = vpop.permute.xlu1 %3137 }
 0x72e   : > { %v3136_v17 = vpop.permute.xlu0 %3135  ;;  %10644 = vmatmul.mubr.msk.f32.vlgmr.msra.gmra.mrb[48].mxu0 %vm1920_vm2, %v3112_v29 }
 0x72f   : > { %10646 = vmatprep.mubr.msk.f32.mxu0 %vm1920_vm2, %v3114_v8 }
 0x731   : > { %v12518_v46 = vpop.permute.xlu1 %12517 }
 0x732   : > { %v3140_v25 = vpop.permute.xlu0 %3139  ;;  %10647 = vmatmul.mubr.msk.f32.gmra.mrb[50].mxu0 %vm1920_vm2, %v3116_v45  ;;  %v12520_v51 = vunpack.i.h.bf16 %v12518_v46  ;;  %v12519_v22 = vunpack.i.l.bf16 %v12518_v46 }
 0x733   : > { %10649 = vmatprep.mubr.msk.f32.mxu0 %vm1920_vm2, %v3118_v0 }
 0x734   : > { %v11631_v34 = vpack.c.bf16 %v12520_v51, %v12519_v22 }
 0x735   : > { %v12523_v28 = vpop.permute.xlu1 %12522 }
 0x736   : > { %v12513_v48 = vpop.permute.xlu0 %12512  ;;  %10650 = vmatmul.mubr.msk.f32.gmra.mrb[52].mxu0 %vm1920_vm2, %v3120_v6  ;;  %v12525_v5 = vunpack.i.h.bf16 %v12523_v28  ;;  %v12524_v37 = vunpack.i.l.bf16 %v12523_v28 }
 0x737   : > { %v12515_v43 = vunpack.i.h.bf16 %v12513_v48  ;;  %v12514_v30 = vunpack.i.l.bf16 %v12513_v48  ;;  %10652 = vmatprep.mubr.msk.f32.mxu0 %vm1920_vm2, %v3122_v58 }
 0x738   : > { %v11635_v32 = vpack.c.bf16 %v12525_v5, %v12524_v37 }
 0x739   : > { %v11627_v13 = vpack.c.bf16 %v12515_v43, %v12514_v30  ;;  %v12528_v20 = vpop.permute.xlu1 %12527 }
 0x73a   : > { %10653 = vmatmul.mubr.msk.f32.gmra.mrb[54].mxu0 %vm1920_vm2, %v3124_v63  ;;  %v12530_v8 = vunpack.i.h.bf16 %v12528_v20  ;;  %v12529_v29 = vunpack.i.l.bf16 %v12528_v20  ;;  %v12533_v7 = vpop.permute.xlu0 %12532 }
 0x73b   : > { %11628 = vmatprep.subr.bf16.mxu1 %v11627_v13  ;;  %10655 = vmatprep.mubr.msk.f32.mxu0 %vm1920_vm2, %v3126_v33  ;;  %v12535_v56 = vunpack.i.h.bf16 %v12533_v7  ;;  %v12534_v52 = vunpack.i.l.bf16 %v12533_v7 }
 0x73c   : > { %11630 = vmatpush3.bf16.msra.mxu1 %v11627_v13  ;;  %v11639_v0 = vpack.c.bf16 %v12530_v8, %v12529_v29 }
 0x73d   : > { %11632 = vmatprep.subr.bf16.mxu1 %v11631_v34  ;;  %v12538_v45 = vpop.permute.xlu1 %12537  ;;  %v11643_v62 = vpack.c.bf16 %v12535_v56, %v12534_v52 }
 0x73e   : > { %10656 = vmatmul.mubr.msk.f32.gmra.mrb[56].mxu0 %vm1920_vm2, %v3128_v44  ;;  %v12543_v10 = vpop.permute.xlu0 %12542  ;;  %v12540_v3 = vunpack.i.h.bf16 %v12538_v45  ;;  %v12539_v59 = vunpack.i.l.bf16 %v12538_v45 }
 0x73f   : > { %10658 = vmatprep.mubr.msk.f32.mxu0 %vm1920_vm2, %v3130_v36  ;;  %v12545_v58 = vunpack.i.h.bf16 %v12543_v10  ;;  %v12544_v6 = vunpack.i.l.bf16 %v12543_v10  ;;  %v16775_v10 = vld [vmem:[#allocation44_spill] sm:$0xff] }
 0x740   : > { %11634 = vmatpush3.bf16.msra.mxu1 %v11631_v34  ;;  %v11647_v38 = vpack.c.bf16 %v12540_v3, %v12539_v59 }
 0x741   : > { %11636 = vmatprep.subr.bf16.mxu1 %v11635_v32  ;;  %v11651_v44 = vpack.c.bf16 %v12545_v58, %v12544_v6 }
 0x742   : > { %10659 = vmatmul.mubr.msk.f32.gmra.mrb[58].mxu0 %vm1920_vm2, %v3132_v21  ;;  %v12548_v33 = vpop.permute.xlu0 %12547 }
 0x743   : > { %10661 = vmatprep.mubr.msk.f32.mxu0 %vm1920_vm2, %v3134_v15  ;;  %v12550_v63 = vunpack.i.h.bf16 %v12548_v33  ;;  %v12549_v36 = vunpack.i.l.bf16 %v12548_v33  ;;  %v12553_v15 = vpop.permute.xlu1 %12552 }
 0x744   : > { %11638 = vmatpush3.bf16.msra.mxu1 %v11635_v32  ;;  %v12555_v21 = vunpack.i.h.bf16 %v12553_v15 }
 0x745   : > { %11640 = vmatprep.subr.bf16.mxu1 %v11639_v0  ;;  %v11655_v46 = vpack.c.bf16 %v12550_v63, %v12549_v36 }
 0x746   : > { %10662 = vmatmul.mubr.msk.f32.gmra.mrb[60].mxu0 %vm1920_vm2, %v3136_v17  ;;  %v12554_v17 = vunpack.i.l.bf16 %v12553_v15 }
 0x747   : > { %10664 = vmatprep.mubr.msk.f32.mxu0 %vm1920_vm2, %v3138_v26 }
 0x748   : > { %11642 = vmatpush3.bf16.msra.mxu1 %v11639_v0  ;;  %v14709_v26 = vpack.c.bf16 %v12555_v21, %v12554_v17 }
 0x749   : > { %11644 = vmatprep.subr.bf16.mxu1 %v11643_v62 }
 0x74a   : > { %10665 = vmatmul.mubr.msk.f32.gmra.mrb[62].mxu0 %vm1920_vm2, %v3140_v25 }
 0x74c   : > { %11646 = vmatpush3.bf16.msra.mxu1 %v11643_v62 }
 0x74d   : > { %11648 = vmatprep.subr.bf16.mxu1 %v11647_v38 }
 0x750   : > { %11650 = vmatpush3.bf16.msra.mxu1 %v11647_v38 }
 0x751   : > { %11652 = vmatprep.subr.bf16.mxu1 %v11651_v44 }
 0x754   : > { %11654 = vmatpush3.bf16.msra.mxu1 %v11651_v44 }
 0x755   : > { %11656 = vmatprep.subr.bf16.mxu1 %v11655_v46 }
 0x758   : > { %11658 = vmatpush3.bf16.msra.mxu1 %v11655_v46 }
 0x759   : > { %11661 = vmatprep.subr.msk.bf16.mxu1 %vm14040_vm3, %v14709_v26 }
 0x79b   : > { %v14714_v25 = vpop.f32.mrb[32].mxu0 }
 0x79c   : > { %16759 = vst [vmem:[#allocation43_spill] sm:$0xff] %v14714_v25  ;;  %v14716_v28 = vpop.f32.mrb[33].mxu0 }
 0x79d   : > { %16760 = vst [vmem:[#allocation39_spill] sm:$0xff] %v14716_v28 }
 0x7cf   : > { %v14718_v48 = vpop.f32.mrb[34].mxu0 }
 0x7d0   : > { %16761 = vst [vmem:[#allocation62_spill] sm:$0xff] %v14718_v48  ;;  %v14720_v51 = vpop.f32.mrb[35].mxu0 }
 0x7d1   : > { %16762 = vst [vmem:[#allocation40_spill] sm:$0xff] %v14720_v51 }
 0x7d4   : > { %v14722_v22 = vpop.f32.mrb[36].mxu0 }
 0x7d5   : > { %16763 = vst [vmem:[#allocation63_spill] sm:$0xff] %v14722_v22  ;;  %v14724_v43 = vpop.f32.mrb[37].mxu0 }
 0x7d6   : > { %16764 = vst [vmem:[#allocation64_spill] sm:$0xff] %v14724_v43 }
 0x7db   : > { %v14726_v30 = vpop.f32.mrb[38].mxu0 }
 0x7dc   : > { %16765 = vst [vmem:[#allocation65_spill] sm:$0xff] %v14726_v30  ;;  %v14728_v13 = vpop.f32.mrb[39].mxu0 }
 0x7dd   : > { %16766 = vst [vmem:[#allocation66_spill] sm:$0xff] %v14728_v13 }
 0x7e3   : > { %v14730_v5 = vpop.f32.mrb[40].mxu0 }
 0x7e4   : > { %16767 = vst [vmem:[#allocation67_spill] sm:$0xff] %v14730_v5  ;;  %v14732_v37 = vpop.f32.mrb[41].mxu0 }
 0x7e5   : > { %16768 = vst [vmem:[#allocation68_spill] sm:$0xff] %v14732_v37 }
 0x7e7   : > { %v14734_v34 = vpop.f32.mrb[42].mxu0 }
 0x7e8   : > { %16769 = vst [vmem:[#allocation69_spill] sm:$0xff] %v14734_v34  ;;  %v14736_v20 = vpop.f32.mrb[43].mxu0 }
 0x7e9   : > { %16770 = vst [vmem:[#allocation70_spill] sm:$0xff] %v14736_v20 }
 0x7eb   : > { %v14738_v8 = vpop.f32.mrb[44].mxu0 }
 0x7ec   : > { %16771 = vst [vmem:[#allocation71_spill] sm:$0xff] %v14738_v8  ;;  %v14740_v29 = vpop.f32.mrb[45].mxu0 }
 0x7ed   : > { %16772 = vst [vmem:[#allocation72_spill] sm:$0xff] %v14740_v29 }
 0x7ef   : > { %v14742_v32 = vpop.f32.mrb[46].mxu0 }
 0x7f0   : > { %16773 = vst [vmem:[#allocation73_spill] sm:$0xff] %v14742_v32  ;;  %v14744_v7 = vpop.f32.mrb[47].mxu0 }
 0x7f1   : > { %16774 = vst [vmem:[#allocation74_spill] sm:$0xff] %v14744_v7 }
 0x801   : > { %v10645_v56 = vpop.f32.mrb[48].mxu0 }
 0x802   : > { %v3383_v52 = vmul.f32 0.35355338, %v10645_v56  ;;  %v3303_v0 = vpop.f32.mrb[49].mxu0 }
 0x803   : > { %v3382_v45 = vmul.f32 0.35355338, %v3303_v0 }
 0x804   : > { %v14747_v3 = vadd.f32 %v3383_v52, %v16775_v10 }
 0x805   : > { %v14750_v59 = vadd.f32 %v3382_v45, %v16775_v10  ;;  %v10648_v62 = vpop.f32.mrb[50].mxu0 }
 0x806   : > { %3416 = vmax.xlane.f32.xlu0 %v14747_v3  ;;  %v3313_v58 = vpop.f32.mrb[51].mxu0 }
 0x807   : > { %v3384_v6 = vmul.f32 0.35355338, %v3313_v58  ;;  %3414 = vmax.xlane.f32.xlu1 %v14750_v59 }
 0x809   : > { %v14755_v38 = vadd.f32 %v3384_v6, %v16775_v10  ;;  %v10651_v33 = vpop.f32.mrb[52].mxu0 }
 0x80a   : > { %v3323_v63 = vpop.f32.mrb[53].mxu0  ;;  %v3387_v29 = vmul.f32 0.35355338, %v10651_v33 }
 0x80b   : > { %v3386_v36 = vmul.f32 0.35355338, %v3323_v63  ;;  %3418 = vmax.xlane.f32.xlu0 %v14755_v38 }
 0x80d   : > { %v14759_v44 = vadd.f32 %v3386_v36, %v16775_v10  ;;  %v10654_v15 = vpop.f32.mrb[54].mxu0  ;;  %v16776_v36 = vld [vmem:[#allocation41_spill] sm:$0xff] }
 0x80e   : > { %v3333_v21 = vpop.f32.mrb[55].mxu0  ;;  %v3389_v5 = vmul.f32 0.35355338, %v10654_v15 }
 0x80f   : > { %v3388_v17 = vmul.f32 0.35355338, %v3333_v21  ;;  %3422 = vmax.xlane.f32.xlu0 %v14759_v44 }
 0x811   : > { %v14763_v46 = vadd.f32 %v3388_v17, %v16775_v10  ;;  %v10657_v56 = vpop.f32.mrb[56].mxu0 }
 0x812   : > { %v3343_v52 = vpop.f32.mrb[57].mxu0  ;;  %v3391_v20 = vmul.f32 0.35355338, %v10657_v56 }
 0x813   : > { %v3390_v0 = vmul.f32 0.35355338, %v3343_v52  ;;  %3426 = vmax.xlane.f32.xlu0 %v14763_v46 }
 0x815   : > { %v14767_v45 = vadd.f32 %v3390_v0, %v16775_v10  ;;  %v10660_v58 = vpop.f32.mrb[58].mxu0 }
 0x816   : > { %v3353_v6 = vpop.f32.mrb[59].mxu0  ;;  %v3393_v30 = vmul.f32 0.35355338, %v10660_v58 }
 0x817   : > { %v3392_v63 = vmul.f32 0.35355338, %v3353_v6  ;;  %3430 = vmax.xlane.f32.xlu0 %v14767_v45 }
 0x818   : > { %12567 = vrot.lane.b32.xlu1 %v16776_v36, %s13495_s22  ;;  %v16777_v36 = vld [vmem:[#allocation42_spill] sm:$0xff] }
 0x819   : > { %v14773_v21 = vadd.f32 %v3392_v63, %v16775_v10  ;;  %v10663_v17 = vpop.f32.mrb[60].mxu0  ;;  %v3385_v63 = vmul.f32 0.35355338, %v10648_v62  ;;  %v14794_v62 = vadd.f32 %v3393_v30, %v16775_v10 }
 0x81a   : > { %v3363_v32 = vpop.f32.mrb[61].mxu0 }
 0x81b   : > { %v3394_v8 = vmul.f32 0.35355338, %v3363_v32  ;;  %3434 = vmax.xlane.f32.xlu0 %v14773_v21  ;;  %v3401_v32 = vadd.f32 %v3385_v63, %v16775_v10  ;;  %v3395_v63 = vmul.f32 0.35355338, %v10663_v17 }
 0x81d   : > { %v14777_v52 = vadd.f32 %v3394_v8, %v16775_v10  ;;  %v10666_v0 = vpop.f32.mrb[62].mxu0  ;;  %v3403_v8 = vadd.f32 %v3387_v29, %v16775_v10  ;;  %v14798_v29 = vadd.f32 %v3395_v63, %v16775_v10 }
 0x81e   : > { %v3373_v7 = vpop.f32.mrb[63].mxu0  ;;  %v3397_v33 = vmul.f32 0.35355338, %v10666_v0 }
 0x81f   : > { %v3396_v34 = vmul.f32 0.35355338, %v3373_v7  ;;  %3438 = vmax.xlane.f32.xlu0 %v14777_v52  ;;  %v3405_v7 = vadd.f32 %v3389_v5, %v16775_v10 }
 0x820   : > { %v14802_v5 = vadd.f32 %v3397_v33, %v16775_v10 }
 0x821   : > { %v14781_v6 = vadd.f32 %v3396_v34, %v16775_v10  ;;  %v14790_v34 = vadd.f32 %v3391_v20, %v16775_v10  ;;  %v14805_v20 = vpop.permute.xlu0 %12557 }
 0x823   : > { %3442 = vmax.xlane.f32.xlu0 %v14781_v6 }
 0x825   : > { %v14807_v15 = vpop.permute.xlu0 %12562 }
 0x839   : > { %12572 = vrot.lane.b32.xlu0 %v16777_v36, %s13495_s22 }
 0x83c   : > { %3420 = vmax.xlane.f32.xlu1 %v3401_v32 }
 0x840   : > { %3424 = vmax.xlane.f32.xlu1 %v3403_v8 }
 0x844   : > { %3428 = vmax.xlane.f32.xlu1 %v3405_v7 }
 0x848   : > { %3432 = vmax.xlane.f32.xlu1 %v14790_v34 }
 0x84c   : > { %3436 = vmax.xlane.f32.xlu1 %v14794_v62 }
 0x850   : > { %3440 = vmax.xlane.f32.xlu1 %v14798_v29 }
 0x854   : > { %3444 = vmax.xlane.f32.xlu1 %v14802_v5 }
 0x893   : > { %v3417_v30 = vpop.xlane.xlu0 %3416 }
 0x894   : > { %v3447_v56 = vsub.f32 %v14747_v3, %v3417_v30  ;;  %v3415_v58 = vpop.xlane.xlu1 %3414 }
 0x895   : > { %v3446_v17 = vsub.f32 %v14750_v59, %v3415_v58 }
 0x896   : > { %v3464_v36 = vmul.f32 1.442695, %v3447_v56 }
 0x897   : > { %v3462_v63 = vmul.f32 1.442695, %v3446_v17 }
 0x898   : > { %12759 = vpow2.f32 %v3464_v36  ;;  %v3419_v37 = vpop.xlane.xlu0 %3418  ;;  %v14821_v56 = vpop.permute.xlu1 %12567 }
 0x899   : > { %12761 = vpow2.f32 %v3462_v63  ;;  %v3448_v58 = vsub.f32 %v14755_v38, %v3419_v37 }
 0x89b   : > { %v3466_v17 = vmul.f32 1.442695, %v3448_v58 }
 0x89c   : > { %v3423_v3 = vpop.xlane.xlu0 %3422 }
 0x89d   : > { %v3450_v36 = vsub.f32 %v14759_v44, %v3423_v3  ;;  %12763 = vpow2.f32 %v3466_v17 }
 0x89f   : > { %v3470_v48 = vmul.f32 1.442695, %v3450_v36 }
 0x8a0   : > { %v3427_v59 = vpop.xlane.xlu0 %3426 }
 0x8a1   : > { %v3452_v37 = vsub.f32 %v14763_v46, %v3427_v59 }
 0x8a2   : > { %v14811_v0 = vpop.eup %12759 }
 0x8a3   : > { %v14813_v33 = vpop.eup %12761  ;;  %3496 = vadd.xlane.f32.xlu1 %v14811_v0 }
 0x8a4   : > { %3494 = vadd.xlane.f32.xlu0 %v14813_v33  ;;  %v3431_v30 = vpop.xlane.xlu0 %3430 }
 0x8a7   : > { %v14828_v58 = vpop.eup %12763 }
 0x8a8   : > { %v3435_v22 = vpop.xlane.xlu0 %3434 }
 0x8b4   : > { %12577 = vrot.lane.b32.xlu1 %v14007_v53, %s13495_s22  ;;  %v3456_v53 = vsub.f32 %v14773_v21, %v3435_v22 }
 0x8b6   : > { %v3482_v28 = vmul.f32 1.442695, %v3456_v53 }
 0x8ba   : > { %12582 = vrot.lane.b32.xlu0 %v14017_v60, %s13495_s22 }
 0x8c9   : > { %v3421_v63 = vpop.xlane.xlu1 %3420 }
 0x8ca   : > { %v3449_v13 = vsub.f32 %v3401_v32, %v3421_v63  ;;  %v3474_v32 = vmul.f32 1.442695, %v3452_v37 }
 0x8cc   : > { %v3468_v43 = vmul.f32 1.442695, %v3449_v13 }
 0x8cd   : > { %v3425_v51 = vpop.xlane.xlu1 %3424 }
 0x8ce   : > { %12765 = vpow2.f32 %v3468_v43  ;;  %v3451_v60 = vsub.f32 %v3403_v8, %v3425_v51 }
 0x8cf   : > { %12767 = vpow2.f32 %v3470_v48  ;;  %v3454_v48 = vsub.f32 %v14767_v45, %v3431_v30 }
 0x8d0   : > { %v3472_v25 = vmul.f32 1.442695, %v3451_v60 }
 0x8d1   : > { %v3429_v24 = vpop.xlane.xlu1 %3428  ;;  %v3478_v46 = vmul.f32 1.442695, %v3454_v48 }
 0x8d2   : > { %12769 = vpow2.f32 %v3472_v25  ;;  %v3453_v38 = vsub.f32 %v3405_v7, %v3429_v24  ;;  %v3439_v24 = vpop.xlane.xlu0 %3438 }
 0x8d3   : > { %12771 = vpow2.f32 %v3482_v28  ;;  %v3458_v21 = vsub.f32 %v14777_v52, %v3439_v24 }
 0x8d4   : > { %v3476_v44 = vmul.f32 1.442695, %v3453_v38 }
 0x8d5   : > { %v3433_v3 = vpop.xlane.xlu1 %3432  ;;  %v3486_v17 = vmul.f32 1.442695, %v3458_v21 }
 0x8d6   : > { %12773 = vpow2.f32 %v3476_v44  ;;  %v3455_v13 = vsub.f32 %v14790_v34, %v3433_v3  ;;  %v3443_v53 = vpop.xlane.xlu0 %3442 }
 0x8d7   : > { %12775 = vpow2.f32 %v3474_v32 }
 0x8d8   : > { %v14830_v22 = vpop.eup %12765  ;;  %3498 = vadd.xlane.f32.xlu1 %v14828_v58  ;;  %v3480_v25 = vmul.f32 1.442695, %v3455_v13 }
 0x8d9   : > { %v3437_v51 = vpop.xlane.xlu1 %3436  ;;  %3500 = vadd.xlane.f32.xlu0 %v14830_v22  ;;  %v14835_v28 = vpop.eup %12767 }
 0x8da   : > { %12777 = vpow2.f32 %v3480_v25  ;;  %v3457_v45 = vsub.f32 %v14794_v62, %v3437_v51 }
 0x8db   : > { %12779 = vpow2.f32 %v3478_v46 }
 0x8dc   : > { %v14837_v43 = vpop.eup %12769  ;;  %v3484_v36 = vmul.f32 1.442695, %v3457_v45 }
 0x8dd   : > { %v3441_v8 = vpop.xlane.xlu1 %3440  ;;  %3504 = vadd.xlane.f32.xlu1 %v14837_v43  ;;  %3502 = vadd.xlane.f32.xlu0 %v14835_v28  ;;  %v14844_v34 = vpop.eup %12771 }
 0x8de   : > { %v3459_v7 = vsub.f32 %v14798_v29, %v3441_v8  ;;  %v3460_v29 = vsub.f32 %v14781_v6, %v3443_v53 }
 0x8e0   : > { %v14846_v59 = vpop.eup %12773  ;;  %v3488_v30 = vmul.f32 1.442695, %v3459_v7  ;;  %v3490_v38 = vmul.f32 1.442695, %v3460_v29 }
 0x8e1   : > { %3508 = vadd.xlane.f32.xlu1 %v14846_v59  ;;  %v3445_v52 = vpop.xlane.xlu1 %3444  ;;  %3514 = vadd.xlane.f32.xlu0 %v14844_v34  ;;  %v14851_v62 = vpop.eup %12775 }
 0x8e2   : > { %12781 = vpow2.f32 %v3488_v30  ;;  %v3461_v63 = vsub.f32 %v14802_v5, %v3445_v52 }
 0x8e3   : > { %12783 = vpow2.f32 %v3486_v17 }
 0x8e4   : > { %12785 = vpow2.f32 %v3484_v36  ;;  %v3492_v60 = vmul.f32 1.442695, %v3461_v63  ;;  %v14855_v37 = vpop.eup %12777 }
 0x8e5   : > { %3506 = vadd.xlane.f32.xlu1 %v14851_v62  ;;  %v14858_v44 = vpop.eup %12779 }
 0x8e6   : > { %12787 = vpow2.f32 %v3492_v60 }
 0x8e7   : > { %12789 = vpow2.f32 %v3490_v38 }
 0x8e9   : > { %3512 = vadd.xlane.f32.xlu1 %v14855_v37 }
 0x8ec   : > { %v14860_v3 = vpop.eup %12781 }
 0x8ed   : > { %3510 = vadd.xlane.f32.xlu1 %v14858_v44  ;;  %3520 = vadd.xlane.f32.xlu0 %v14860_v3  ;;  %v14864_v5 = vpop.eup %12783 }
 0x8ee   : > { %v14866_v6 = vpop.eup %12785 }
 0x8f0   : > { %v14870_v32 = vpop.eup %12787 }
 0x8f1   : > { %3516 = vadd.xlane.f32.xlu1 %v14866_v6  ;;  %3518 = vadd.xlane.f32.xlu0 %v14864_v5  ;;  %v14873_v13 = vpop.eup %12789 }
 0x8f5   : > { %3524 = vadd.xlane.f32.xlu1 %v14870_v32 }
 0x8f9   : > { %3522 = vadd.xlane.f32.xlu1 %v14873_v13 }
 0x907   : > { %12587 = vrot.lane.b32.xlu0 %v14027_v2, %s13495_s22  ;;  %s4850_s22 = scalar_lea.vmem %s13575_s24, %s13430_s28 }
 0x90a   : > { %3755 = vrot.lane.b32.xlu1 %v13963_v16, %s13496_s29 }
 0x90b   : > { %3751 = vrot.lane.b32.xlu0 %v13951_v11, %s13496_s29 }
 0x90e   : > { %3759 = vrot.lane.b32.xlu1 %v13973_v27, %s13496_s29  ;;  %v12560_v27 = vunpack.i.h.bf16 %v14805_v20 }
 0x90f   : > { %3753 = vrot.lane.b32.xlu0 %v13949_v9, %s13496_s29  ;;  %v12573_v9 = vpop.permute.xlu0 %12572 }
 0x910   : > { %v12575_v2 = vunpack.i.h.bf16 %v12573_v9 }
 0x912   : > { %3763 = vrot.lane.b32.xlu1 %v13981_v35, %s13496_s29 }
 0x913   : > { %3757 = vrot.lane.b32.xlu0 %v13959_v14, %s13496_s29 }
 0x916   : > { %3767 = vrot.lane.b32.xlu1 %v13991_v42, %s13496_s29 }
 0x917   : > { %3761 = vrot.lane.b32.xlu0 %v13969_v23, %s13496_s29 }
 0x91a   : > { %3771 = vrot.lane.b32.xlu1 %v14001_v49, %s13496_s29  ;;  %v12564_v49 = vunpack.i.l.bf16 %v14807_v15 }
 0x91b   : > { %3765 = vrot.lane.b32.xlu0 %v13979_v31, %s13496_s29  ;;  %v12559_v31 = vunpack.i.l.bf16 %v14805_v20 }
 0x91d   : > { %v11665_v42 = vpack.c.bf16 %v12560_v27, %v12559_v31 }
 0x91e   : > { %3775 = vrot.lane.b32.xlu1 %v14011_v57, %s13496_s29  ;;  %v12570_v57 = vunpack.i.h.bf16 %v14821_v56 }
 0x91f   : > { %3769 = vrot.lane.b32.xlu0 %v13989_v39, %s13496_s29 }
 0x922   : > { %3779 = vrot.lane.b32.xlu1 %v14021_v1, %s13496_s29 }
 0x923   : > { %3773 = vrot.lane.b32.xlu0 %v13999_v47, %s13496_s29  ;;  %v12565_v47 = vunpack.i.h.bf16 %v14807_v15 }
 0x926   : > { %12597 = vrot.lane.b32.xlu1 %v14144_v4, %s13496_s29 }
 0x927   : > { %3777 = vrot.lane.b32.xlu0 %v14009_v54, %s13496_s29  ;;  %v11671_v54 = vpack.c.bf16 %v12565_v47, %v12564_v49 }
 0x92a   : > { %12607 = vrot.lane.b32.xlu1 %v14152_v19, %s13496_s29 }
 0x92b   : > { %3781 = vrot.lane.b32.xlu0 %v14019_v61, %s13496_s29  ;;  %v12569_v61 = vunpack.i.l.bf16 %v14821_v56 }
 0x92d   : > { %v11677_v1 = vpack.c.bf16 %v12570_v57, %v12569_v61 }
 0x92f   : > { %12592 = vrot.lane.b32.xlu0 %v14140_v50, %s13496_s29  ;;  %v12574_v50 = vunpack.i.l.bf16 %v12573_v9 }
 0x930   : > { %v3497_v11 = vpop.xlane.xlu1 %3496 }
 0x931   : > { %12791 = vrcp.f32 %v3497_v11  ;;  %v3495_v14 = vpop.xlane.xlu0 %3494  ;;  %v11683_v4 = vpack.c.bf16 %v12575_v2, %v12574_v50 }
 0x932   : > { %12793 = vrcp.f32 %v3495_v14 }
 0x933   : > { %12602 = vrot.lane.b32.xlu0 %v14148_v55, %s13496_s29 }
 0x934   : > { %v12578_v55 = vpop.permute.xlu1 %12577 }
 0x935   : > { %v12580_v19 = vunpack.i.h.bf16 %v12578_v55  ;;  %v12583_v20 = vpop.permute.xlu0 %12582 }
 0x936   : > { %v12585_v15 = vunpack.i.h.bf16 %v12583_v20 }
 0x937   : > { %12612 = vrot.lane.b32.xlu0 %v14157_v18, %s13496_s29  ;;  %v12579_v18 = vunpack.i.l.bf16 %v12578_v55 }
 0x93b   : > { %v12792_v16 = vpop.eup %12791 }
 0x93c   : > { %v12794_v23 = vpop.eup %12793  ;;  %v3529_v39 = vmul.f32 %v12792_v16, %v14811_v0  ;;  %v12584_v0 = vunpack.i.l.bf16 %v12583_v20 }
 0x93d   : > { %v3527_v35 = vmul.f32 %v12794_v23, %v14813_v33 }
 0x93e   : > { %v11695_v48 = vpack.c.bf16 %v12585_v15, %v12584_v0 }
 0x93f   : > { %10699 = vmatprep.mubr.f32.mxu1 %v3527_v35 }
 0x940   : > { %10700 = vmatmul.mubr.f32.vlgmr.msra.gmra.mrb[48].mxu1 %v3529_v39 }
 0x941   : > { %11664 = vmatpush3.bf16.xpose.msk.msra.mxu1 %vm14040_vm3, %v14709_v26  ;;  %v11689_v26 = vpack.c.bf16 %v12580_v19, %v12579_v18 }
 0x942   : > { %11667 = vmatprep.subr.msk.bf16.mxu1 %vm14040_vm3, %v11665_v42 }
 0x949   : > { %11670 = vmatpush3.bf16.xpose.msk.msra.mxu1 %vm14040_vm3, %v11665_v42 }
 0x94a   : > { %11673 = vmatprep.subr.msk.bf16.mxu1 %vm14040_vm3, %v11671_v54 }
 0x951   : > { %11676 = vmatpush3.bf16.xpose.msk.msra.mxu1 %vm14040_vm3, %v11671_v54 }
 0x952   : > { %11679 = vmatprep.subr.msk.bf16.mxu1 %vm14040_vm3, %v11677_v1 }
 0x959   : > { %11682 = vmatpush3.bf16.xpose.msk.msra.mxu1 %vm14040_vm3, %v11677_v1 }
 0x95a   : > { %11685 = vmatprep.subr.msk.bf16.mxu1 %vm14040_vm3, %v11683_v4 }
 0x961   : > { %11688 = vmatpush3.bf16.xpose.msk.msra.mxu1 %vm14040_vm3, %v11683_v4 }
 0x962   : > { %11691 = vmatprep.subr.msk.bf16.mxu1 %vm14040_vm3, %v11689_v26 }
 0x965   : > { %v3499_v33 = vpop.xlane.xlu1 %3498 }
 0x966   : > { %12795 = vrcp.f32 %v3499_v33  ;;  %v3501_v56 = vpop.xlane.xlu0 %3500 }
 0x967   : > { %12797 = vrcp.f32 %v3501_v56 }
 0x969   : > { %11694 = vmatpush3.bf16.xpose.msk.msra.mxu1 %vm14040_vm3, %v11689_v26 }
 0x96a   : > { %11697 = vmatprep.subr.msk.bf16.mxu1 %vm14040_vm3, %v11695_v48  ;;  %v3505_v51 = vpop.xlane.xlu1 %3504  ;;  %v3503_v24 = vpop.xlane.xlu0 %3502 }
 0x96b   : > { %12799 = vrcp.f32 %v3505_v51 }
 0x96c   : > { %12801 = vrcp.f32 %v3503_v24 }
 0x96e   : > { %v3509_v25 = vpop.xlane.xlu1 %3508  ;;  %v3515_v52 = vpop.xlane.xlu0 %3514 }
 0x96f   : > { %12803 = vrcp.f32 %v3509_v25 }
 0x970   : > { %v12796_v46 = vpop.eup %12795 }
 0x971   : > { %v12798_v21 = vpop.eup %12797  ;;  %11700 = vmatpush3.bf16.xpose.msk.msra.mxu1 %vm14040_vm3, %v11695_v48  ;;  %v3531_v8 = vmul.f32 %v12796_v46, %v14828_v58 }
 0x972   : > { %v3507_v45 = vpop.xlane.xlu1 %3506  ;;  %v3533_v7 = vmul.f32 %v12798_v21, %v14830_v22 }
 0x973   : > { %12805 = vrcp.f32 %v3507_v45  ;;  %10702 = vmatprep.mubr.f32.mxu1 %v3531_v8 }
 0x974   : > { %10703 = vmatmul.mubr.f32.gmra.mrb[50].mxu1 %v3533_v7  ;;  %12807 = vrcp.f32 %v3515_v52 }
 0x975   : > { %v12800_v30 = vpop.eup %12799 }
 0x976   : > { %v12802_v17 = vpop.eup %12801  ;;  %v3513_v36 = vpop.xlane.xlu1 %3512  ;;  %v3537_v63 = vmul.f32 %v12800_v30, %v14837_v43 }
 0x977   : > { %v3535_v53 = vmul.f32 %v12802_v17, %v14835_v28  ;;  %12809 = vrcp.f32 %v3513_v36 }
 0x979   : > { %10705 = vmatprep.mubr.f32.mxu1 %v3535_v53  ;;  %v12804_v60 = vpop.eup %12803 }
 0x97a   : > { %10706 = vmatmul.mubr.f32.gmra.mrb[52].mxu1 %v3537_v63  ;;  %v3511_v58 = vpop.xlane.xlu1 %3510  ;;  %v3521_v29 = vpop.xlane.xlu0 %3520  ;;  %v3541_v14 = vmul.f32 %v12804_v60, %v14846_v59 }
 0x97b   : > { %12811 = vrcp.f32 %v3511_v58 }
 0x97d   : > { %v12806_v22 = vpop.eup %12805 }
 0x97e   : > { %v3517_v38 = vpop.xlane.xlu1 %3516  ;;  %v3519_v9 = vpop.xlane.xlu0 %3518  ;;  %v3539_v11 = vmul.f32 %v12806_v22, %v14851_v62 }
 0x97f   : > { %12813 = vrcp.f32 %v3517_v38  ;;  %v12808_v16 = vpop.eup %12807 }
 0x980   : > { %12815 = vrcp.f32 %v3519_v9  ;;  %10708 = vmatprep.mubr.f32.mxu1 %v3539_v11  ;;  %v3547_v49 = vmul.f32 %v12808_v16, %v14844_v34 }
 0x981   : > { %10709 = vmatmul.mubr.f32.gmra.mrb[54].mxu1 %v3541_v14  ;;  %12817 = vrcp.f32 %v3521_v29  ;;  %v12810_v31 = vpop.eup %12809 }
 0x982   : > { %v3525_v28 = vpop.xlane.xlu1 %3524  ;;  %v12588_v43 = vpop.permute.xlu0 %12587  ;;  %v3545_v59 = vmul.f32 %v12810_v31, %v14855_v37 }
 0x983   : > { %v12590_v23 = vunpack.i.h.bf16 %v12588_v43  ;;  %v12589_v27 = vunpack.i.l.bf16 %v12588_v43  ;;  %12819 = vrcp.f32 %v3525_v28 }
 0x985   : > { %v12812_v35 = vpop.eup %12811  ;;  %v11701_v39 = vpack.c.bf16 %v12590_v23, %v12589_v27 }
 0x986   : > { %v3523_v42 = vpop.xlane.xlu1 %3522  ;;  %v3752_v47 = vpop.permute.xlu0 %3751  ;;  %v3543_v62 = vmul.f32 %v12812_v35, %v14858_v44 }
 0x987   : > { %12821 = vrcp.f32 %v3523_v42  ;;  %11703 = vmatprep.subr.msk.bf16.mxu1 %vm14040_vm3, %v11701_v39 }
 0x988   : > { %10711 = vmatprep.mubr.f32.mxu1 %v3543_v62  ;;  %11706 = vmatpush3.bf16.xpose.msk.msra.mxu1 %vm14040_vm3, %v11701_v39 }
 0x989   : > { %v12814_v54 = vpop.eup %12813  ;;  %10712 = vmatmul.mubr.f32.gmra.mrb[56].mxu1 %v3545_v59 }
 0x98a   : > { %v12816_v57 = vpop.eup %12815  ;;  %v3756_v61 = vpop.permute.xlu1 %3755  ;;  %10714 = vmatprep.mubr.f32.mxu1 %v3547_v49  ;;  %v3549_v44 = vmul.f32 %v12814_v54, %v14866_v6 }
 0x98b   : > { %v3754_v1 = vpop.permute.xlu0 %3753  ;;  %v12818_v2 = vpop.eup %12817  ;;  %v3551_v50 = vmul.f32 %v12816_v57, %v14864_v5 }
 0x98c   : > { %v3553_v12 = vmul.f32 %v12818_v2, %v14860_v3 }
 0x98d   : > { %10715 = vmatmul.mubr.f32.gmra.mrb[58].mxu1 %v3549_v44  ;;  %v12820_v55 = vpop.eup %12819 }
 0x98e   : > { %v3760_v4 = vpop.permute.xlu1 %3759  ;;  %10717 = vmatprep.mubr.f32.mxu1 %v3551_v50  ;;  %v3557_v20 = vmul.f32 %v12820_v55, %v14870_v32 }
 0x98f   : > { %v3758_v37 = vpop.permute.xlu0 %3757 }
 0x991   : > { %v12822_v19 = vpop.eup %12821  ;;  %10718 = vmatmul.mubr.f32.gmra.mrb[60].mxu1 %v3553_v12 }
 0x992   : > { %v3764_v34 = vpop.permute.xlu1 %3763  ;;  %v3555_v26 = vmul.f32 %v12822_v19, %v14873_v13 }
 0x993   : > { %v3762_v18 = vpop.permute.xlu0 %3761 }
 0x994   : > { %10720 = vmatprep.mubr.f32.mxu1 %v3555_v26 }
 0x995   : > { %10721 = vmatmul.mubr.f32.gmra.mrb[62].mxu1 %v3557_v20 }
 0x996   : > { %v3768_v6 = vpop.permute.xlu1 %3767  ;;  %10755 = vmatprep.mubr.msk.f32.mxu1 %vm1920_vm2, %v3752_v47 }
 0x997   : > { %v3766_v5 = vpop.permute.xlu0 %3765 }
 0x999   : > { %10756 = vmatmul.mubr.msk.f32.vlgmr.msra.gmra.mrb[64].mxu1 %vm1920_vm2, %v3754_v1 }
 0x99a   : > { %v3772_v15 = vpop.permute.xlu1 %3771  ;;  %10758 = vmatprep.mubr.msk.f32.mxu1 %vm1920_vm2, %v3756_v61 }
 0x99b   : > { %v3770_v0 = vpop.permute.xlu0 %3769 }
 0x99d   : > { %10759 = vmatmul.mubr.msk.f32.gmra.mrb[66].mxu1 %vm1920_vm2, %v3758_v37 }
 0x99e   : > { %v3776_v3 = vpop.permute.xlu1 %3775  ;;  %10761 = vmatprep.mubr.msk.f32.mxu1 %vm1920_vm2, %v3760_v4 }
 0x99f   : > { %v3774_v33 = vpop.permute.xlu0 %3773 }
 0x9a1   : > { %10762 = vmatmul.mubr.msk.f32.gmra.mrb[68].mxu1 %vm1920_vm2, %v3762_v18 }
 0x9a2   : > { %v3780_v32 = vpop.permute.xlu1 %3779  ;;  %10764 = vmatprep.mubr.msk.f32.mxu1 %vm1920_vm2, %v3764_v34 }
 0x9a3   : > { %v3778_v13 = vpop.permute.xlu0 %3777 }
 0x9a5   : > { %10765 = vmatmul.mubr.msk.f32.gmra.mrb[70].mxu1 %vm1920_vm2, %v3766_v5 }
 0x9a6   : > { %10767 = vmatprep.mubr.msk.f32.mxu1 %vm1920_vm2, %v3768_v6  ;;  %v12598_v48 = vpop.permute.xlu1 %12597 }
 0x9a7   : > { %v3782_v56 = vpop.permute.xlu0 %3781  ;;  %v12600_v24 = vunpack.i.h.bf16 %v12598_v48  ;;  %v12599_v25 = vunpack.i.l.bf16 %v12598_v48 }
 0x9a9   : > { %10768 = vmatmul.mubr.msk.f32.gmra.mrb[72].mxu1 %vm1920_vm2, %v3770_v0  ;;  %v11711_v7 = vpack.c.bf16 %v12600_v24, %v12599_v25 }
 0x9aa   : > { %10770 = vmatprep.mubr.msk.f32.mxu1 %vm1920_vm2, %v3772_v15  ;;  %v12608_v52 = vpop.permute.xlu1 %12607 }
 0x9ab   : > { %v12593_v51 = vpop.permute.xlu0 %12592  ;;  %v12610_v36 = vunpack.i.h.bf16 %v12608_v52  ;;  %v12609_v63 = vunpack.i.l.bf16 %v12608_v52 }
 0x9ac   : > { %v12595_v46 = vunpack.i.h.bf16 %v12593_v51  ;;  %v12594_v21 = vunpack.i.l.bf16 %v12593_v51 }
 0x9ad   : > { %10771 = vmatmul.mubr.msk.f32.gmra.mrb[74].mxu1 %vm1920_vm2, %v3774_v33  ;;  %v11719_v29 = vpack.c.bf16 %v12610_v36, %v12609_v63 }
 0x9ae   : > { %v11707_v8 = vpack.c.bf16 %v12595_v46, %v12594_v21  ;;  %10773 = vmatprep.mubr.msk.f32.mxu1 %vm1920_vm2, %v3776_v3 }
 0x9af   : > { %v12603_v45 = vpop.permute.xlu0 %12602 }
 0x9b0   : > { %v12605_v30 = vunpack.i.h.bf16 %v12603_v45  ;;  %v12604_v17 = vunpack.i.l.bf16 %v12603_v45  ;;  %11708 = vmatprep.subr.bf16.mxu0 %v11707_v8  ;;  %12211 = vmatprep.subr.bf16.mxu1 %v11707_v8 }
 0x9b1   : > { %11710 = vmatpush3.bf16.msra.mxu0 %v11707_v8  ;;  %12219 = vmatpush3.bf16.msra.mxu1 %v11707_v8 }
 0x9b2   : > { %10774 = vmatmul.mubr.msk.f32.gmra.mrb[76].mxu1 %vm1920_vm2, %v3778_v13  ;;  %11712 = vmatprep.subr.bf16.mxu0 %v11711_v7  ;;  %v11715_v53 = vpack.c.bf16 %v12605_v30, %v12604_v17 }
 0x9b3   : > { %12212 = vmatprep.subr.bf16.mxu1 %v11711_v7  ;;  %10776 = vmatprep.mubr.msk.f32.mxu1 %vm1920_vm2, %v3780_v32  ;;  %v12613_v58 = vpop.permute.xlu0 %12612 }
 0x9b4   : > { %v12615_v60 = vunpack.i.h.bf16 %v12613_v58  ;;  %v12614_v22 = vunpack.i.l.bf16 %v12613_v58 }
 0x9b5   : > { %11714 = vmatpush3.bf16.msra.mxu0 %v11711_v7  ;;  %12220 = vmatpush3.bf16.msra.mxu1 %v11711_v7 }
 0x9b6   : > { %10777 = vmatmul.mubr.msk.f32.gmra.mrb[78].mxu1 %vm1920_vm2, %v3782_v56  ;;  %11716 = vmatprep.subr.bf16.mxu0 %v11715_v53  ;;  %v11723_v38 = vpack.c.bf16 %v12615_v60, %v12614_v22 }
 0x9b7   : > { %12213 = vmatprep.subr.bf16.mxu1 %v11715_v53 }
 0x9b9   : > { %11718 = vmatpush3.bf16.msra.mxu0 %v11715_v53  ;;  %12221 = vmatpush3.bf16.msra.mxu1 %v11715_v53 }
 0x9ba   : > { %11720 = vmatprep.subr.bf16.mxu0 %v11719_v29  ;;  %12214 = vmatprep.subr.bf16.mxu1 %v11719_v29 }
 0x9bd   : > { %11722 = vmatpush3.bf16.msra.mxu0 %v11719_v29  ;;  %12222 = vmatpush3.bf16.msra.mxu1 %v11719_v29 }
 0x9be   : > { %11724 = vmatprep.subr.bf16.mxu0 %v11723_v38  ;;  %12215 = vmatprep.subr.bf16.mxu1 %v11723_v38 }
 0x9c1   : > { %11726 = vmatpush3.bf16.msra.mxu0 %v11723_v38  ;;  %12223 = vmatpush3.bf16.msra.mxu1 %v11723_v38 }
 0xa13   : > { %v14989_v9 = vpop.f32.mrb[48].mxu1 }
 0xa14   : > { %v14991_v11 = vpop.f32.mrb[49].mxu1 }
 0xa47   : > { %v14993_v14 = vpop.f32.mrb[50].mxu1 }
 0xa48   : > { %v14995_v28 = vpop.f32.mrb[51].mxu1 }
 0xa4d   : > { %v14997_v43 = vpop.f32.mrb[52].mxu1 }
 0xa4e   : > { %v14999_v16 = vpop.f32.mrb[53].mxu1 }
 0xa54   : > { %v15001_v23 = vpop.f32.mrb[54].mxu1 }
 0xa55   : > { %v15003_v27 = vpop.f32.mrb[55].mxu1 }
 0xa5c   : > { %v15005_v31 = vpop.f32.mrb[56].mxu1 }
 0xa5d   : > { %v15007_v35 = vpop.f32.mrb[57].mxu1 }
 0xa60   : > { %v15009_v39 = vpop.f32.mrb[58].mxu1 }
 0xa61   : > { %v15011_v42 = vpop.f32.mrb[59].mxu1 }
 0xa64   : > { %v15013_v47 = vpop.f32.mrb[60].mxu1 }
 0xa65   : > { %v15015_v62 = vpop.f32.mrb[61].mxu1 }
 0xa68   : > { %v15017_v59 = vpop.f32.mrb[62].mxu1 }
 0xa69   : > { %v15019_v49 = vpop.f32.mrb[63].mxu1 }
 0xa6c   : > { %v10757_v54 = vpop.f32.mrb[64].mxu1 }
 0xa6d   : > { %v4025_v57 = vmul.f32 0.35355338, %v10757_v54  ;;  %v3945_v61 = vpop.f32.mrb[65].mxu1 }
 0xa6e   : > { %v4024_v1 = vmul.f32 0.35355338, %v3945_v61 }
 0xa6f   : > { %v15022_v44 = vadd.f32 %v4025_v57, %v16775_v10 }
 0xa70   : > { %v15025_v2 = vadd.f32 %v4024_v1, %v16775_v10  ;;  %v10760_v50 = vpop.f32.mrb[66].mxu1 }
 0xa71   : > { %v4027_v4 = vmul.f32 0.35355338, %v10760_v50  ;;  %4058 = vmax.xlane.f32.xlu0 %v15022_v44  ;;  %v3955_v37 = vpop.f32.mrb[67].mxu1 }
 0xa72   : > { %v4026_v12 = vmul.f32 0.35355338, %v3955_v37  ;;  %4056 = vmax.xlane.f32.xlu1 %v15025_v2 }
 0xa73   : > { %v15030_v55 = vadd.f32 %v4027_v4, %v16775_v10 }
 0xa74   : > { %v15033_v19 = vadd.f32 %v4026_v12, %v16775_v10  ;;  %v10763_v34 = vpop.f32.mrb[68].mxu1 }
 0xa75   : > { %v4029_v18 = vmul.f32 0.35355338, %v10763_v34  ;;  %v3965_v26 = vpop.f32.mrb[69].mxu1 }
 0xa76   : > { %v4028_v20 = vmul.f32 0.35355338, %v3965_v26  ;;  %4062 = vmax.xlane.f32.xlu1 %v15030_v55  ;;  %4060 = vmax.xlane.f32.xlu0 %v15033_v19 }
 0xa77   : > { %v15038_v6 = vadd.f32 %v4029_v18, %v16775_v10 }
 0xa78   : > { %v15041_v5 = vadd.f32 %v4028_v20, %v16775_v10  ;;  %v10766_v15 = vpop.f32.mrb[70].mxu1 }
 0xa79   : > { %v4031_v0 = vmul.f32 0.35355338, %v10766_v15  ;;  %v3975_v3 = vpop.f32.mrb[71].mxu1 }
 0xa7a   : > { %v4030_v33 = vmul.f32 0.35355338, %v3975_v3  ;;  %4066 = vmax.xlane.f32.xlu1 %v15038_v6  ;;  %4064 = vmax.xlane.f32.xlu0 %v15041_v5 }
 0xa7b   : > { %v15046_v32 = vadd.f32 %v4031_v0, %v16775_v10 }
 0xa7c   : > { %v15049_v13 = vadd.f32 %v4030_v33, %v16775_v10  ;;  %v10769_v56 = vpop.f32.mrb[72].mxu1 }
 0xa7d   : > { %v4033_v48 = vmul.f32 0.35355338, %v10769_v56  ;;  %v3985_v51 = vpop.f32.mrb[73].mxu1 }
 0xa7e   : > { %v4032_v24 = vmul.f32 0.35355338, %v3985_v51  ;;  %4070 = vmax.xlane.f32.xlu1 %v15046_v32  ;;  %4068 = vmax.xlane.f32.xlu0 %v15049_v13 }
 0xa7f   : > { %v15054_v25 = vadd.f32 %v4033_v48, %v16775_v10 }
 0xa80   : > { %v15057_v46 = vadd.f32 %v4032_v24, %v16775_v10  ;;  %v10772_v21 = vpop.f32.mrb[74].mxu1 }
 0xa81   : > { %v4035_v8 = vmul.f32 0.35355338, %v10772_v21  ;;  %v3995_v45 = vpop.f32.mrb[75].mxu1 }
 0xa82   : > { %v4034_v7 = vmul.f32 0.35355338, %v3995_v45  ;;  %4074 = vmax.xlane.f32.xlu1 %v15054_v25  ;;  %4072 = vmax.xlane.f32.xlu0 %v15057_v46 }
 0xa83   : > { %v15062_v30 = vadd.f32 %v4035_v8, %v16775_v10 }
 0xa84   : > { %v15065_v17 = vadd.f32 %v4034_v7, %v16775_v10 }
 0xa85   : > { %v10775_v52 = vpop.f32.mrb[76].mxu1 }
 0xa86   : > { %v4037_v36 = vmul.f32 0.35355338, %v10775_v52  ;;  %v4005_v63 = vpop.f32.mrb[77].mxu1  ;;  %4078 = vmax.xlane.f32.xlu1 %v15062_v30  ;;  %4076 = vmax.xlane.f32.xlu0 %v15065_v17 }
 0xa87   : > { %v4036_v53 = vmul.f32 0.35355338, %v4005_v63 }
 0xa88   : > { %v15070_v58 = vadd.f32 %v4037_v36, %v16775_v10 }
 0xa89   : > { %v15073_v29 = vadd.f32 %v4036_v53, %v16775_v10  ;;  %v10778_v60 = vpop.f32.mrb[78].mxu1 }
 0xa8a   : > { %v4039_v22 = vmul.f32 0.35355338, %v10778_v60  ;;  %v4015_v38 = vpop.f32.mrb[79].mxu1  ;;  %4082 = vmax.xlane.f32.xlu1 %v15070_v58 }
 0xa8b   : > { %v4038_v54 = vmul.f32 0.35355338, %v4015_v38  ;;  %4080 = vmax.xlane.f32.xlu0 %v15073_v29 }
 0xa8c   : > { %v15078_v57 = vadd.f32 %v4039_v22, %v16775_v10 }
 0xa8d   : > { %v15081_v61 = vadd.f32 %v4038_v54, %v16775_v10 }
 0xa8e   : > { %4086 = vmax.xlane.f32.xlu1 %v15078_v57 }
 0xa8f   : > { %4084 = vmax.xlane.f32.xlu0 %v15081_v61 }
 0xa9f   : > { %12617 = vrot.lane.b32.xlu1 %v14161_v40, %s13496_s29 }
 0xaa5   : > { %12622 = vrot.lane.b32.xlu0 %v14167_v41, %s13496_s29 }
 0xafe   : > { %v4059_v1 = vpop.xlane.xlu0 %4058 }
 0xaff   : > { %v4089_v50 = vsub.f32 %v15022_v44, %v4059_v1  ;;  %v4057_v4 = vpop.xlane.xlu1 %4056 }
 0xb00   : > { %v4088_v37 = vsub.f32 %v15025_v2, %v4057_v4 }
 0xb01   : > { %v4106_v12 = vmul.f32 1.442695, %v4089_v50 }
 0xb02   : > { %v4104_v34 = vmul.f32 1.442695, %v4088_v37 }
 0xb03   : > { %12823 = vpow2.f32 %v4106_v12  ;;  %v4063_v10 = vpop.xlane.xlu1 %4062  ;;  %v4061_v18 = vpop.xlane.xlu0 %4060 }
 0xb04   : > { %12825 = vpow2.f32 %v4104_v34  ;;  %v4091_v26 = vsub.f32 %v15030_v55, %v4063_v10  ;;  %v4090_v20 = vsub.f32 %v15033_v19, %v4061_v18 }
 0xb06   : > { %v4110_v40 = vmul.f32 1.442695, %v4091_v26  ;;  %v4108_v41 = vmul.f32 1.442695, %v4090_v20 }
 0xb07   : > { %v4067_v15 = vpop.xlane.xlu1 %4066  ;;  %v4065_v0 = vpop.xlane.xlu0 %4064 }
 0xb08   : > { %12827 = vpow2.f32 %v4110_v40  ;;  %v4093_v44 = vsub.f32 %v15038_v6, %v4067_v15  ;;  %v4092_v3 = vsub.f32 %v15041_v5, %v4065_v0 }
 0xb09   : > { %12829 = vpow2.f32 %v4108_v41 }
 0xb0a   : > { %v4112_v2 = vmul.f32 1.442695, %v4092_v3  ;;  %v4114_v48 = vmul.f32 1.442695, %v4093_v44 }
 0xb0b   : > { %v4071_v33 = vpop.xlane.xlu1 %4070  ;;  %v4069_v56 = vpop.xlane.xlu0 %4068 }
 0xb0c   : > { %v4095_v51 = vsub.f32 %v15046_v32, %v4071_v33  ;;  %12831 = vpow2.f32 %v4112_v2  ;;  %v4094_v5 = vsub.f32 %v15049_v13, %v4069_v56 }
 0xb0d   : > { %v15096_v24 = vpop.eup %12823  ;;  %12833 = vpow2.f32 %v4114_v48 }
 0xb0e   : > { %v15098_v55 = vpop.eup %12825  ;;  %4138 = vadd.xlane.f32.xlu0 %v15096_v24  ;;  %v4118_v6 = vmul.f32 1.442695, %v4095_v51  ;;  %v4116_v36 = vmul.f32 1.442695, %v4094_v5 }
 0xb0f   : > { %v4075_v19 = vpop.xlane.xlu1 %4074  ;;  %v4073_v21 = vpop.xlane.xlu0 %4072  ;;  %4136 = vadd.xlane.f32.xlu1 %v15098_v55 }
 0xb10   : > { %v4096_v8 = vsub.f32 %v15057_v46, %v4073_v21  ;;  %12835 = vpow2.f32 %v4118_v6  ;;  %v4097_v63 = vsub.f32 %v15054_v25, %v4075_v19 }
 0xb12   : > { %v15104_v45 = vpop.eup %12827  ;;  %v4120_v32 = vmul.f32 1.442695, %v4096_v8  ;;  %v4122_v38 = vmul.f32 1.442695, %v4097_v63  ;;  %v16779_v8 = vld [vmem:[#allocation39_spill] sm:$0xff]  ;;  %v16786_v63 = vld [vmem:[#allocation68_spill] sm:$0xff] }
 0xb13   : > { %v4079_v7 = vpop.xlane.xlu1 %4078  ;;  %v4077_v52 = vpop.xlane.xlu0 %4076  ;;  %4142 = vadd.xlane.f32.xlu1 %v15104_v45 }
 0xb14   : > { %12837 = vpow2.f32 %v4120_v32  ;;  %v15108_v53 = vpop.eup %12829  ;;  %v4099_v13 = vsub.f32 %v15062_v30, %v4079_v7  ;;  %v4098_v25 = vsub.f32 %v15065_v17, %v4077_v52  ;;  %v16780_v32 = vld [vmem:[#allocation43_spill] sm:$0xff]  ;;  %v16781_v52 = vld [vmem:[#allocation40_spill] sm:$0xff] }
 0xb15   : > { %12839 = vpow2.f32 %v4116_v36  ;;  %v16783_v36 = vld [vmem:[#allocation64_spill] sm:$0xff] }
 0xb16   : > { %v15110_v60 = vpop.eup %12831  ;;  %v4126_v1 = vmul.f32 1.442695, %v4099_v13  ;;  %12841 = vpow2.f32 %v4122_v38  ;;  %v4124_v12 = vmul.f32 1.442695, %v4098_v25 }
 0xb17   : > { %v4083_v22 = vpop.xlane.xlu1 %4082  ;;  %4140 = vadd.xlane.f32.xlu1 %v15108_v53  ;;  %4144 = vadd.xlane.f32.xlu0 %v15110_v60  ;;  %v15115_v54 = vpop.eup %12833 }
 0xb18   : > { %v4081_v46 = vpop.xlane.xlu0 %4080  ;;  %12843 = vpow2.f32 %v4126_v1  ;;  %v4101_v6 = vsub.f32 %v15070_v58, %v4083_v22  ;;  %v16782_v58 = vld [vmem:[#allocation62_spill] sm:$0xff] }
 0xb19   : > { %v4100_v18 = vsub.f32 %v15073_v29, %v4081_v46  ;;  %12845 = vpow2.f32 %v4124_v12 }
 0xb1a   : > { %v15119_v37 = vpop.eup %12835  ;;  %v4130_v5 = vmul.f32 1.442695, %v4101_v6 }
 0xb1b   : > { %4146 = vadd.xlane.f32.xlu1 %v15115_v54  ;;  %v4087_v50 = vpop.xlane.xlu1 %4086  ;;  %v4128_v41 = vmul.f32 1.442695, %v4100_v18 }
 0xb1c   : > { %v4085_v4 = vpop.xlane.xlu0 %4084  ;;  %v4103_v2 = vsub.f32 %v15078_v57, %v4087_v50  ;;  %v16778_v57 = vld [vmem:[#allocation45_spill] sm:$0xff] }
 0xb1d   : > { %v4102_v44 = vsub.f32 %v15081_v61, %v4085_v4  ;;  %12847 = vpow2.f32 %v4128_v41 }
 0xb1e   : > { %v15121_v30 = vpop.eup %12837  ;;  %v4134_v61 = vmul.f32 1.442695, %v4103_v2 }
 0xb1f   : > { %4150 = vadd.xlane.f32.xlu1 %v15119_v37  ;;  %v12618_v34 = vpop.permute.xlu1 %12617  ;;  %4152 = vadd.xlane.f32.xlu0 %v15121_v30  ;;  %v15126_v15 = vpop.eup %12839  ;;  %v4132_v33 = vmul.f32 1.442695, %v4102_v44 }
 0xb20   : > { %v12623_v10 = vpop.permute.xlu0 %12622  ;;  %v12620_v26 = vunpack.i.h.bf16 %v12618_v34  ;;  %v12619_v20 = vunpack.i.l.bf16 %v12618_v34  ;;  %v15130_v29 = vpop.eup %12841 }
 0xb21   : > { %v12625_v17 = vunpack.i.h.bf16 %v12623_v10  ;;  %v12624_v40 = vunpack.i.l.bf16 %v12623_v10  ;;  %12849 = vpow2.f32 %v4132_v33 }
 0xb22   : > { %v11727_v0 = vpack.c.bf16 %v12620_v26, %v12619_v20  ;;  %v15134_v56 = vpop.eup %12843  ;;  %12851 = vpow2.f32 %v4134_v61 }
 0xb23   : > { %4148 = vadd.xlane.f32.xlu1 %v15126_v15  ;;  %v11731_v3 = vpack.c.bf16 %v12625_v17, %v12624_v40  ;;  %v15137_v48 = vpop.eup %12845  ;;  %12853 = vpow2.f32 %v4130_v5 }
 0xb24   : > { %11728 = vmatprep.subr.bf16.mxu0 %v11727_v0  ;;  %12216 = vmatprep.subr.bf16.mxu1 %v11727_v0 }
 0xb25   : > { %11730 = vmatpush3.bf16.msra.mxu0 %v11727_v0  ;;  %12224 = vmatpush3.bf16.msra.mxu1 %v11727_v0 }
 0xb26   : > { %11732 = vmatprep.subr.bf16.mxu0 %v11731_v3  ;;  %12217 = vmatprep.subr.bf16.mxu1 %v11731_v3 }
 0xb27   : > { %4154 = vadd.xlane.f32.xlu1 %v15130_v29  ;;  %v15140_v51 = vpop.eup %12847 }
 0xb29   : > { %11734 = vmatpush3.bf16.msra.mxu0 %v11731_v3  ;;  %12225 = vmatpush3.bf16.msra.mxu1 %v11731_v3 }
 0xb2b   : > { %4158 = vadd.xlane.f32.xlu1 %v15134_v56  ;;  %v15143_v19 = vpop.eup %12849 }
 0xb2c   : > { %v15148_v21 = vpop.eup %12851 }
 0xb2d   : > { %v15156_v7 = vpop.eup %12853 }
 0xb2f   : > { %4156 = vadd.xlane.f32.xlu1 %v15137_v48 }
 0xb33   : > { %4160 = vadd.xlane.f32.xlu1 %v15140_v51 }
 0xb35   : > { %12627 = vrot.lane.b32.xlu0 %v16778_v57, %s13496_s29  ;;  %s4852_s29 = scalar_lea.vmem %s13580_s30, %s13430_s28 }
 0xb37   : > { %4164 = vadd.xlane.f32.xlu1 %v15143_v19 }
 0xb3b   : > { %4166 = vadd.xlane.f32.xlu1 %v15148_v21 }
 0xb4c   : > { %4409 = vrot.lane.b32.xlu1 %v16779_v8, %s13497_s4 }
 0xb50   : > { %4411 = vrot.lane.b32.xlu1 %v16780_v32, %s13497_s4 }
 0xb54   : > { %4475 = vrot.lane.b32.xlu1 %v14989_v9, %s13498_s1  ;;  %4162 = vadd.xlane.f32.xlu0 %v15156_v7  ;;  %v16784_v9 = vld [vmem:[#allocation66_spill] sm:$0xff] }
 0xb58   : > { %4413 = vrot.lane.b32.xlu1 %v16781_v52, %s13497_s4 }
 0xb5c   : > { %4415 = vrot.lane.b32.xlu1 %v16782_v58, %s13497_s4 }
 0xb60   : > { %4477 = vrot.lane.b32.xlu1 %v14995_v28, %s13498_s1  ;;  %v16785_v28 = vld [vmem:[#allocation63_spill] sm:$0xff] }
 0xb64   : > { %4417 = vrot.lane.b32.xlu1 %v16783_v36, %s13497_s4 }
 0xb68   : > { %4481 = vrot.lane.b32.xlu1 %v14999_v16, %s13498_s1  ;;  %v16789_v16 = vld [vmem:[#allocation67_spill] sm:$0xff] }
 0xb6a   : > { %4473 = vrot.lane.b32.xlu0 %v14991_v11, %s13498_s1  ;;  %v16787_v11 = vld [vmem:[#allocation65_spill] sm:$0xff] }
 0xb6c   : > { %4421 = vrot.lane.b32.xlu1 %v16784_v9, %s13497_s4 }
 0xb6e   : > { %4479 = vrot.lane.b32.xlu0 %v14993_v14, %s13498_s1  ;;  %v16788_v14 = vld [vmem:[#allocation70_spill] sm:$0xff] }
 0xb70   : > { %4485 = vrot.lane.b32.xlu1 %v15003_v27, %s13498_s1  ;;  %v16791_v27 = vld [vmem:[#allocation69_spill] sm:$0xff] }
 0xb72   : > { %4419 = vrot.lane.b32.xlu0 %v16785_v28, %s13497_s4 }
 0xb74   : > { %4425 = vrot.lane.b32.xlu1 %v16786_v63, %s13497_s4 }
 0xb76   : > { %4483 = vrot.lane.b32.xlu0 %v14997_v43, %s13498_s1  ;;  %v16790_v43 = vld [vmem:[#allocation72_spill] sm:$0xff] }
 0xb78   : > { %4489 = vrot.lane.b32.xlu1 %v15007_v35, %s13498_s1  ;;  %v16793_v35 = vld [vmem:[#allocation71_spill] sm:$0xff] }
 0xb7a   : > { %4423 = vrot.lane.b32.xlu0 %v16787_v11, %s13497_s4 }
 0xb7c   : > { %4429 = vrot.lane.b32.xlu1 %v16788_v14, %s13497_s4 }
 0xb7e   : > { %4487 = vrot.lane.b32.xlu0 %v15001_v23, %s13498_s1  ;;  %v16792_v23 = vld [vmem:[#allocation74_spill] sm:$0xff] }
 0xb80   : > { %4493 = vrot.lane.b32.xlu1 %v15011_v42, %s13498_s1 }
 0xb82   : > { %4427 = vrot.lane.b32.xlu0 %v16789_v16, %s13497_s4 }
 0xb84   : > { %4433 = vrot.lane.b32.xlu1 %v16790_v43, %s13497_s4 }
 0xb86   : > { %4491 = vrot.lane.b32.xlu0 %v15005_v31, %s13498_s1  ;;  %v16794_v31 = vld [vmem:[#allocation73_spill] sm:$0xff] }
 0xb88   : > { %4497 = vrot.lane.b32.xlu1 %v15015_v62, %s13498_s1 }
 0xb8a   : > { %4431 = vrot.lane.b32.xlu0 %v16791_v27, %s13497_s4 }
 0xb8c   : > { %4437 = vrot.lane.b32.xlu1 %v16792_v23, %s13497_s4 }
 0xb8e   : > { %4495 = vrot.lane.b32.xlu0 %v15009_v39, %s13498_s1 }
 0xb90   : > { %4501 = vrot.lane.b32.xlu1 %v15019_v49, %s13498_s1 }
 0xb92   : > { %4435 = vrot.lane.b32.xlu0 %v16793_v35, %s13497_s4 }
 0xb96   : > { %4499 = vrot.lane.b32.xlu0 %v15013_v47, %s13498_s1 }
 0xb9a   : > { %4439 = vrot.lane.b32.xlu0 %v16794_v31, %s13497_s4  ;;  %s16811_s4 = sld [smem:[#allocation9_spill]] }
 0xb9b   : > { %v4139_v39 = vpop.xlane.xlu0 %4138 }
 0xb9c   : > { %v4137_v42 = vpop.xlane.xlu1 %4136 }
 0xb9d   : > { %12855 = vrcp.f32 %v4137_v42 }
 0xb9e   : > { %4503 = vrot.lane.b32.xlu0 %v15017_v59, %s13498_s1  ;;  %12857 = vrcp.f32 %v4139_v39 }
 0xba0   : > { %v4143_v62 = vpop.xlane.xlu1 %4142  ;;  %s5112_s1 = scalar_lea.vmem %s16811_s4, %s13430_s28 }
 0xba4   : > { %v4141_v13 = vpop.xlane.xlu1 %4140  ;;  %v4145_v38 = vpop.xlane.xlu0 %4144 }
 0xba5   : > { %12859 = vrcp.f32 %v4141_v13 }
 0xba7   : > { %v12856_v22 = vpop.eup %12855 }
 0xba8   : > { %v4147_v46 = vpop.xlane.xlu1 %4146  ;;  %v4169_v49 = vmul.f32 %v12856_v22, %v15098_v55  ;;  %v12858_v10 = vpop.eup %12857 }
 0xba9   : > { %v4171_v20 = vmul.f32 %v12858_v10, %v15096_v24 }
 0xbaa   : > { %10811 = vmatprep.mubr.f32.mxu0 %v4169_v49 }
 0xbac   : > { %v4151_v47 = vpop.xlane.xlu1 %4150  ;;  %v4153_v1 = vpop.xlane.xlu0 %4152 }
 0xbad   : > { %12861 = vrcp.f32 %v4153_v1 }
 0xbae   : > { %12863 = vrcp.f32 %v4143_v62 }
 0xbaf   : > { %12865 = vrcp.f32 %v4145_v38  ;;  %v12860_v55 = vpop.eup %12859 }
 0xbb0   : > { %v4149_v25 = vpop.xlane.xlu1 %4148  ;;  %v12628_v50 = vpop.permute.xlu0 %12627  ;;  %12867 = vrcp.f32 %v4147_v46  ;;  %v4173_v40 = vmul.f32 %v12860_v55, %v15108_v53  ;;  %v16795_v46 = vld [vmem:[#allocation59_spill] sm:$0xff] }
 0xbb1   : > { %v12630_v4 = vunpack.i.h.bf16 %v12628_v50  ;;  %v12629_v59 = vunpack.i.l.bf16 %v12628_v50  ;;  %12869 = vrcp.f32 %v4149_v25  ;;  %v1866_v25 = vld [vmem:[%s1865_s10] sm:$0xff]  ;;  %v1867_v50 = vld [vmem:[%s1865_s10 + $0x8] sm:$0xff] }
 0xbb3   : > { %v11735_v12 = vpack.c.bf16 %v12630_v4, %v12629_v59  ;;  %v11739_v4 = vpack.c.bf16 %v1867_v50, %v1866_v25  ;;  %v1868_v59 = vld [vmem:[%s1865_s10 + $0x10] sm:$0xff] }
 0xbb4   : > { %v4155_v34 = vpop.xlane.xlu1 %4154 }
 0xbb5   : > { %12871 = vrcp.f32 %v4155_v34  ;;  %11736 = vmatprep.subr.bf16.mxu0 %v11735_v12  ;;  %12218 = vmatprep.subr.bf16.mxu1 %v11735_v12 }
 0xbb6   : > { %12873 = vrcp.f32 %v4151_v47  ;;  %11738 = vmatpush3.bf16.msra.mxu0 %v11735_v12  ;;  %12226 = vmatpush3.bf16.msra.mxu1 %v11735_v12  ;;  %v1869_v12 = vld [vmem:[%s1865_s10 + $0x18] sm:$0xff]  ;;  %s16812_s10 = sld [smem:[#allocation10_spill]] }
 0xbb7   : > { %v12862_v18 = vpop.eup %12861  ;;  %11740 = vmatprep.subr.bf16.mxu0 %v11739_v4  ;;  %v11743_v34 = vpack.c.bf16 %v1869_v12, %v1868_v59 }
 0xbb8   : > { %v4159_v26 = vpop.xlane.xlu1 %4158  ;;  %v12864_v17 = vpop.eup %12863  ;;  %v4185_v0 = vmul.f32 %v12862_v18, %v15121_v30 }
 0xbb9   : > { %v12866_v41 = vpop.eup %12865  ;;  %10812 = vmatmul.mubr.f32.vlgmr.msra.gmra.mrb[64].mxu0 %v4171_v20  ;;  %12875 = vrcp.f32 %v4159_v26  ;;  %v4175_v3 = vmul.f32 %v12864_v17, %v15104_v45 }
 0xbba   : > { %10814 = vmatprep.mubr.f32.mxu0 %v4173_v40  ;;  %10823 = vmatprep.mubr.f32.mxu1 %v4185_v0  ;;  %v12868_v2 = vpop.eup %12867  ;;  %v4177_v33 = vmul.f32 %v12866_v41, %v15110_v60 }
 0xbbb   : > { %v12870_v61 = vpop.eup %12869  ;;  %v4179_v53 = vmul.f32 %v12868_v2, %v15115_v54  ;;  %11742 = vmatpush3.bf16.msra.mxu0 %v11739_v4 }
 0xbbc   : > { %v4157_v44 = vpop.xlane.xlu1 %4156  ;;  %v4181_v5 = vmul.f32 %v12870_v61, %v15126_v15  ;;  %11744 = vmatprep.subr.bf16.mxu0 %v11743_v34 }
 0xbbd   : > { %12877 = vrcp.f32 %v4157_v44  ;;  %10815 = vmatmul.mubr.f32.gmra.mrb[66].mxu0 %v4175_v3 }
 0xbbe   : > { %10817 = vmatprep.mubr.f32.mxu0 %v4177_v33 }
 0xbbf   : > { %v12872_v24 = vpop.eup %12871  ;;  %11746 = vmatpush3.bf16.msra.mxu0 %v11743_v34 }
 0xbc0   : > { %v4161_v57 = vpop.xlane.xlu1 %4160  ;;  %v4187_v30 = vmul.f32 %v12872_v24, %v15130_v29  ;;  %v12874_v6 = vpop.eup %12873 }
 0xbc1   : > { %12879 = vrcp.f32 %v4161_v57  ;;  %10818 = vmatmul.mubr.f32.gmra.mrb[68].mxu0 %v4179_v53  ;;  %v4183_v8 = vmul.f32 %v12874_v6, %v15119_v37 }
 0xbc2   : > { %10824 = vmatmul.mubr.f32.vlgmr.msra.gmra.mrb[80].mxu1 %v4187_v30  ;;  %10820 = vmatprep.mubr.f32.mxu0 %v4181_v5 }
 0xbc3   : > { %v12876_v60 = vpop.eup %12875 }
 0xbc4   : > { %v4165_v45 = vpop.xlane.xlu1 %4164  ;;  %v4191_v54 = vmul.f32 %v12876_v60, %v15134_v56 }
 0xbc5   : > { %10821 = vmatmul.mubr.f32.gmra.mrb[70].mxu0 %v4183_v8  ;;  %12881 = vrcp.f32 %v4165_v45 }
 0xbc7   : > { %v12878_v32 = vpop.eup %12877 }
 0xbc8   : > { %v4167_v52 = vpop.xlane.xlu1 %4166  ;;  %v4189_v58 = vmul.f32 %v12878_v32, %v15137_v48 }
 0xbca   : > { %10826 = vmatprep.mubr.f32.mxu1 %v4189_v58 }
 0xbcb   : > { %v12880_v29 = vpop.eup %12879  ;;  %10827 = vmatmul.mubr.f32.gmra.mrb[82].mxu1 %v4191_v54 }
 0xbcc   : > { %v15231_v36 = vpop.permute.xlu1 %4409  ;;  %v4193_v15 = vmul.f32 %v12880_v29, %v15140_v51 }
 0xbce   : > { %10829 = vmatprep.mubr.f32.mxu1 %v4193_v15 }
 0xbcf   : > { %v12882_v51 = vpop.eup %12881 }
 0xbd0   : > { %v15234_v9 = vpop.permute.xlu1 %4411  ;;  %v4197_v35 = vmul.f32 %v12882_v51, %v15143_v19 }
 0xbd4   : > { %v15236_v28 = vpop.permute.xlu1 %4475 }
 0xbd8   : > { %v15238_v37 = vpop.permute.xlu1 %4413 }
 0xbdc   : > { %v15240_v63 = vpop.permute.xlu1 %4415 }
 0xbe0   : > { %v15242_v11 = vpop.permute.xlu1 %4477 }
 0xbe1   : > { %v4163_v56 = vpop.xlane.xlu0 %4162 }
 0xbe2   : > { %12883 = vrcp.f32 %v4163_v56 }
 0xbe3   : > { %12885 = vrcp.f32 %v4167_v52 }
 0xbe4   : > { %v15244_v48 = vpop.permute.xlu1 %4417 }
 0xbe5   : > { %v4474_v33 = vpop.permute.xlu0 %4473 }
 0xbe8   : > { %v15246_v14 = vpop.permute.xlu1 %4481 }
 0xbe9   : > { %v4480_v61 = vpop.permute.xlu0 %4479 }
 0xbec   : > { %v15248_v16 = vpop.permute.xlu1 %4421  ;;  %v12884_v43 = vpop.eup %12883 }
 0xbed   : > { %v4195_v27 = vmul.f32 %v12884_v43, %v15156_v7  ;;  %v12886_v23 = vpop.eup %12885  ;;  %v4420_v24 = vpop.permute.xlu0 %4419 }
 0xbee   : > { %v4199_v42 = vmul.f32 %v12886_v23, %v15148_v21  ;;  %v16796_v21 = vld [vmem:[#allocation61_spill] sm:$0xff] }
 0xbef   : > { %10830 = vmatmul.mubr.f32.gmra.mrb[84].mxu1 %v4195_v27  ;;  %v16797_v27 = vld [vmem:[#allocation47_spill] sm:$0xff] }
 0xbf0   : > { %v15252_v31 = vpop.permute.xlu1 %4485  ;;  %10832 = vmatprep.mubr.f32.mxu1 %v4197_v35  ;;  %v4585_v23 = vsel %vm1920_vm2, %v16797_v27, %v15231_v36  ;;  %v16798_v35 = vld [vmem:[#allocation46_spill] sm:$0xff]  ;;  %v16799_v36 = vld [vmem:[#allocation49_spill] sm:$0xff] }
 0xbf1   : > { %v4484_v53 = vpop.permute.xlu0 %4483  ;;  %v4587_v25 = vsel %vm1920_vm2, %v16799_v36, %v15238_v37  ;;  %v16801_v37 = vld [vmem:[#allocation51_spill] sm:$0xff]  ;;  %v16807_v27 = vld [vmem:[#allocation57_spill] sm:$0xff]  ;;  %v16810_v36 = vld [vmem:[#allocation60_spill] sm:$0xff] }
 0xbf2   : > { %v4604_v4 = vsel %vm4601_vm4, %v4587_v25, %v15242_v11  ;;  %v16802_v11 = vld [vmem:[#allocation50_spill] sm:$0xff] }
 0xbf3   : > { %10833 = vmatmul.mubr.f32.gmra.mrb[86].mxu1 %v4199_v42  ;;  %v4586_v42 = vsel %vm1920_vm2, %v16798_v35, %v15234_v9  ;;  %v16800_v9 = vld [vmem:[#allocation48_spill] sm:$0xff] }
 0xbf4   : > { %v15255_v62 = vpop.permute.xlu1 %4425  ;;  %v4588_v50 = vsel %vm1920_vm2, %v16800_v9, %v15240_v63 }
 0xbf5   : > { %v4424_v45 = vpop.permute.xlu0 %4423  ;;  %v4605_v12 = vsel %vm4601_vm4, %v4588_v50, %v4480_v61 }
 0xbf8   : > { %v15257_v13 = vpop.permute.xlu1 %4489 }
 0xbf9   : > { %v4488_v8 = vpop.permute.xlu0 %4487 }
 0xbfc   : > { %v15259_v39 = vpop.permute.xlu1 %4429 }
 0xbfd   : > { %v4428_v60 = vpop.permute.xlu0 %4427 }
 0xc00   : > { %v15261_v22 = vpop.permute.xlu1 %4493 }
 0xc01   : > { %v4492_v32 = vpop.permute.xlu0 %4491 }
 0xc04   : > { %v4434_v7 = vpop.permute.xlu1 %4433 }
 0xc05   : > { %v4597_v19 = vsel %vm1920_vm2, %v16795_v46, %v4434_v7  ;;  %v4432_v52 = vpop.permute.xlu0 %4431  ;;  %v4602_v7 = vsel %vm4601_vm4, %v4585_v23, %v4474_v33 }
 0xc08   : > { %v4498_v49 = vpop.permute.xlu1 %4497 }
 0xc09   : > { %v15266_v38 = vsel %vm4601_vm4, %v4597_v19, %v4498_v49  ;;  %v15290_v58 = vpop.permute.xlu0 %4495  ;;  %v4603_v49 = vsel %vm4601_vm4, %v4586_v42, %v15236_v28 }
 0xc0c   : > { %v4438_v47 = vpop.permute.xlu1 %4437 }
 0xc0d   : > { %v15270_v1 = vsel %vm1920_vm2, %v16796_v21, %v4438_v47  ;;  %v15292_v54 = vpop.permute.xlu0 %4435 }
 0xc10   : > { %v15298_v56 = vpop.permute.xlu1 %4501 }
 0xc11   : > { %v15294_v29 = vpop.permute.xlu0 %4499 }
 0xc15   : > { %v15296_v15 = vpop.permute.xlu0 %4439 }
 0xc16   : > { %v4600_v25 = vsel %vm1920_vm2, %v16810_v36, %v15296_v15 }
 0xc19   : > { %v15300_v51 = vpop.permute.xlu0 %4503 }
 0xc8c   : > { %v10813_v10 = vpop.f32.mrb[64].mxu0 }
 0xc8d   : > { %4539 = vrot.lane.b32.xlu1 %v10813_v10, %s13499_s16  ;;  %v4314_v55 = vpop.f32.mrb[65].mxu0 }
 0xc90   : > { %v10816_v18 = vpop.f32.mrb[66].mxu0 }
 0xc91   : > { %4537 = vrot.lane.b32.xlu1 %v4314_v55, %s13499_s16  ;;  %4543 = vrot.lane.b32.xlu0 %v10816_v18, %s13499_s16  ;;  %v4324_v26 = vpop.f32.mrb[67].mxu0  ;;  %v4589_v55 = vsel %vm1920_vm2, %v16801_v37, %v15244_v48  ;;  %v4590_v18 = vsel %vm1920_vm2, %v16802_v11, %v4420_v24  ;;  %v16803_v48 = vld [vmem:[#allocation53_spill] sm:$0xff] }
 0xc92   : > { %v4606_v63 = vsel %vm4601_vm4, %v4589_v55, %v15246_v14 }
 0xc94   : > { %v10819_v20 = vpop.f32.mrb[68].mxu0 }
 0xc95   : > { %v10825_v17 = vpop.f32.mrb[80].mxu1  ;;  %4541 = vrot.lane.b32.xlu1 %v4324_v26, %s13499_s16  ;;  %4547 = vrot.lane.b32.xlu0 %v10819_v20, %s13499_s16  ;;  %v4334_v40 = vpop.f32.mrb[69].mxu0 }
 0xc96   : > { %v4354_v0 = vpop.f32.mrb[81].mxu1 }
 0xc98   : > { %v10822_v41 = vpop.f32.mrb[70].mxu0 }
 0xc99   : > { %4545 = vrot.lane.b32.xlu1 %v4334_v40, %s13499_s16  ;;  %4551 = vrot.lane.b32.xlu0 %v10822_v41, %s13499_s16  ;;  %v4344_v44 = vpop.f32.mrb[71].mxu0  ;;  %v4591_v41 = vsel %vm1920_vm2, %v16803_v48, %v15248_v16  ;;  %v16805_v16 = vld [vmem:[#allocation55_spill] sm:$0xff] }
 0xc9a   : > { %v4608_v14 = vsel %vm4601_vm4, %v4591_v41, %v15252_v31 }
 0xc9d   : > { %4555 = vrot.lane.b32.xlu0 %v10825_v17, %s13499_s16  ;;  %4549 = vrot.lane.b32.xlu1 %v4344_v44, %s13499_s16  ;;  %v4607_v17 = vsel %vm4601_vm4, %v4590_v18, %v4484_v53  ;;  %v16804_v44 = vld [vmem:[#allocation52_spill] sm:$0xff]  ;;  %v4593_v53 = vsel %vm1920_vm2, %v16805_v16, %v15255_v62  ;;  %v4595_v62 = vsel %vm1920_vm2, %v16807_v27, %v15259_v39 }
 0xc9e   : > { %v10828_v3 = vpop.f32.mrb[82].mxu1  ;;  %v4610_v31 = vsel %vm4601_vm4, %v4593_v53, %v15257_v13  ;;  %v4612_v13 = vsel %vm4601_vm4, %v4595_v62, %v15261_v22 }
 0xc9f   : > { %v4364_v2 = vpop.f32.mrb[83].mxu1 }
 0xca1   : > { %4559 = vrot.lane.b32.xlu0 %v10828_v3, %s13499_s16  ;;  %4553 = vrot.lane.b32.xlu1 %v4354_v0, %s13499_s16  ;;  %v4592_v3 = vsel %vm1920_vm2, %v16804_v44, %v4424_v45 }
 0xca2   : > { %v4609_v33 = vsel %vm4601_vm4, %v4592_v3, %v4488_v8  ;;  %v12955_v3 = vld [vmem:[#allocation2 + $0x20] sm:$0xff] }
 0xca5   : > { %4557 = vrot.lane.b32.xlu1 %v4364_v2, %s13499_s16 }
 0xcc2   : > { %v10831_v57 = vpop.f32.mrb[84].mxu1 }
 0xcc3   : > { %v4374_v30 = vpop.f32.mrb[85].mxu1  ;;  %4563 = vrot.lane.b32.xlu0 %v10831_v57, %s13499_s16 }
 0xcc4   : > { %4561 = vrot.lane.b32.xlu1 %v4374_v30, %s13499_s16  ;;  %v16806_v30 = vld [vmem:[#allocation54_spill] sm:$0xff] }
 0xcc6   : > { %v10834_v6 = vpop.f32.mrb[86].mxu1 }
 0xcc7   : > { %v4384_v5 = vpop.f32.mrb[87].mxu1  ;;  %4567 = vrot.lane.b32.xlu0 %v10834_v6, %s13499_s16  ;;  %v4594_v6 = vsel %vm1920_vm2, %v16806_v30, %v4428_v60  ;;  %v16808_v60 = vld [vmem:[#allocation56_spill] sm:$0xff] }
 0xcc8   : > { %4565 = vrot.lane.b32.xlu1 %v4384_v5, %s13499_s16  ;;  %v4611_v45 = vsel %vm4601_vm4, %v4594_v6, %v4492_v32  ;;  %v4596_v35 = vsel %vm1920_vm2, %v16808_v60, %v4432_v52  ;;  %v12957_v6 = vld [vmem:[#allocation2 + $0x30] sm:$0xff]  ;;  %s5339_s16 = scalar_lea.vmem %s16812_s10, %s13430_s28 }
 0xcc9   : > { %v4613_v42 = vsel %vm4601_vm4, %v4596_v35, %v15290_v58  ;;  %v12959_v35 = vld [vmem:[#allocation2 + $0x40] sm:$0xff] }
 0xcff   : > { %v4540_v43 = vpop.permute.xlu1 %4539 }
 0xd00   : > { %v4620_v21 = vsel %vm4618_vm5, %v4603_v49, %v4540_v43 }
 0xd03   : > { %v4538_v46 = vpop.permute.xlu1 %4537  ;;  %v4544_v19 = vpop.permute.xlu0 %4543 }
 0xd04   : > { %v4619_v47 = vsel %vm4618_vm5, %v4602_v7, %v4538_v46  ;;  %v4622_v10 = vsel %vm4618_vm5, %v4605_v12, %v4544_v19  ;;  %v16809_v19 = vld [vmem:[#allocation58_spill] sm:$0xff] }
 0xd05   : > { %10843 = vmatprep.mubr.msk.f32.mxu0 %vm1459_vm1, %v4619_v47  ;;  %v4598_v22 = vsel %vm1920_vm2, %v16809_v19, %v15292_v54  ;;  %v4616_v54 = vsel %vm4601_vm4, %v15270_v1, %v15298_v56 }
 0xd06   : > { %10844 = vmatmul.mubr.msk.f32.vlgmr.msra.gmra.mrb[72].mxu0 %vm1459_vm1, %v4620_v21  ;;  %v4615_v49 = vsel %vm4601_vm4, %v4598_v22, %v15294_v29  ;;  %v4617_v29 = vsel %vm4601_vm4, %v4600_v25, %v15300_v51  ;;  %v12952_v51 = vld [vmem:[#allocation2] sm:$0xff] }
 0xd07   : > { %v4542_v28 = vpop.permute.xlu1 %4541  ;;  %v4548_v59 = vpop.permute.xlu0 %4547 }
 0xd08   : > { %v4621_v34 = vsel %vm4618_vm5, %v4604_v4, %v4542_v28  ;;  %v4624_v0 = vsel %vm4618_vm5, %v4607_v17, %v4548_v59  ;;  %v15401_v4 = vld [vmem:[%s1870_s18] ss:$0 sm:$0xff]  ;;  %v12951_v59 = vld [vmem:[#allocation2 + $0x8] sm:$0xff]  ;;  %s16813_s18 = sld [smem:[#allocation11_spill]] }
 0xd09   : > { %10846 = vmatprep.mubr.msk.f32.mxu0 %vm1459_vm1, %v4621_v34 }
 0xd0a   : > { %10847 = vmatmul.mubr.msk.f32.gmra.mrb[74].mxu0 %vm1459_vm1, %v4622_v10 }
 0xd0b   : > { %v4546_v26 = vpop.permute.xlu1 %4545  ;;  %v4552_v20 = vpop.permute.xlu0 %4551 }
 0xd0c   : > { %v4623_v40 = vsel %vm4618_vm5, %v4606_v63, %v4546_v26  ;;  %v4626_v57 = vsel %vm4618_vm5, %v4609_v33, %v4552_v20  ;;  %v12953_v26 = vld [vmem:[#allocation2 + $0x10] sm:$0xff] }
 0xd0d   : > { %10849 = vmatprep.mubr.msk.f32.mxu0 %vm1459_vm1, %v4623_v40 }
 0xd0e   : > { %10850 = vmatmul.mubr.msk.f32.gmra.mrb[76].mxu0 %vm1459_vm1, %v4624_v0  ;;  %v12954_v0 = vld [vmem:[#allocation2 + $0x18] sm:$0xff]  ;;  %s5557_s25 = scalar_lea.vmem %s16813_s18, %s13430_s28 }
 0xd0f   : > { %v4550_v2 = vpop.permute.xlu1 %4549  ;;  %v4556_v61 = vpop.permute.xlu0 %4555 }
 0xd10   : > { %v4625_v24 = vsel %vm4618_vm5, %v4608_v14, %v4550_v2  ;;  %v4628_v43 = vsel %vm4618_vm5, %v4611_v45, %v4556_v61 }
 0xd11   : > { %10852 = vmatprep.mubr.msk.f32.mxu0 %vm1459_vm1, %v4625_v24 }
 0xd12   : > { %10853 = vmatmul.mubr.msk.f32.gmra.mrb[78].mxu0 %vm1459_vm1, %v4626_v57  ;;  %v12956_v57 = vld [vmem:[#allocation2 + $0x28] sm:$0xff] }
 0xd13   : > { %v4554_v5 = vpop.permute.xlu1 %4553  ;;  %v4560_v23 = vpop.permute.xlu0 %4559 }
 0xd14   : > { %v4627_v8 = vsel %vm4618_vm5, %v4610_v31, %v4554_v5  ;;  %v4630_v46 = vsel %vm4618_vm5, %v4613_v42, %v4560_v23 }
 0xd15   : > { %10855 = vmatprep.mubr.msk.f32.mxu0 %vm1459_vm1, %v4627_v8  ;;  %v12958_v8 = vld [vmem:[#allocation2 + $0x38] sm:$0xff] }
 0xd16   : > { %10856 = vmatmul.mubr.msk.f32.gmra.mrb[80].mxu0 %vm1459_vm1, %v4628_v43 }
 0xd17   : > { %v4558_v32 = vpop.permute.xlu1 %4557 }
 0xd18   : > { %v4629_v7 = vsel %vm4618_vm5, %v4612_v13, %v4558_v32 }
 0xd19   : > { %10858 = vmatprep.mubr.msk.f32.mxu0 %vm1459_vm1, %v4629_v7 }
 0xd1a   : > { %10859 = vmatmul.mubr.msk.f32.gmra.mrb[82].mxu0 %vm1459_vm1, %v4630_v46 }
 0xd35   : > { %v4564_v39 = vpop.permute.xlu0 %4563 }
 0xd36   : > { %v4562_v52 = vpop.permute.xlu1 %4561  ;;  %v4632_v47 = vsel %vm4618_vm5, %v4615_v49, %v4564_v39  ;;  %v12960_v39 = vld [vmem:[#allocation2 + $0x48] sm:$0xff] }
 0xd37   : > { %v4631_v58 = vsel %vm4618_vm5, %v15266_v38, %v4562_v52 }
 0xd38   : > { %10861 = vmatprep.mubr.msk.f32.mxu0 %vm1459_vm1, %v4631_v58  ;;  %v12961_v58 = vld [vmem:[#allocation2 + $0x50] sm:$0xff] }
 0xd39   : > { %v4568_v21 = vpop.permute.xlu0 %4567  ;;  %10862 = vmatmul.mubr.msk.f32.gmra.mrb[84].mxu0 %vm1459_vm1, %v4632_v47 }
 0xd3a   : > { %v4566_v9 = vpop.permute.xlu1 %4565  ;;  %v4634_v50 = vsel %vm4618_vm5, %v4617_v29, %v4568_v21  ;;  %v12962_v21 = vld [vmem:[#allocation2 + $0x58] sm:$0xff] }
 0xd3b   : > { %v4633_v38 = vsel %vm4618_vm5, %v4616_v54, %v4566_v9 }
 0xd3c   : > { %10864 = vmatprep.mubr.msk.f32.mxu0 %vm1459_vm1, %v4633_v38 }
 0xd3d   : > { %10865 = vmatmul.mubr.msk.f32.gmra.mrb[86].mxu0 %vm1459_vm1, %v4634_v50 }
 0xdd9   : > { %v10845_v1 = vpop.f32.mrb[72].mxu0 }
 0xdda   : > { %v4761_v56 = vadd.f32 %v10845_v1, %v15401_v4  ;;  %v4755_v28 = vpop.f32.mrb[73].mxu0 }
 0xddb   : > { %v4756_v15 = vadd.f32 %v15401_v4, %v4755_v28 }
 0xddc   : > { %v15405_v12 = vadd.f32 %v12951_v59, %v4761_v56  ;;  %v12963_v56 = vld [vmem:[#allocation2 + $0x68] sm:$0xff] }
 0xddd   : > { %v15407_v34 = vadd.f32 %v12952_v51, %v4756_v15  ;;  %v10848_v10 = vpop.f32.mrb[74].mxu0  ;;  %v12964_v15 = vld [vmem:[#allocation2 + $0x60] sm:$0xff] }
 0xdde   : > { %v4765_v37 = vpop.f32.mrb[75].mxu0  ;;  %v4857_v55 = vsel %vm1459_vm1, %v15405_v12, 0.0  ;;  %v4771_v63 = vadd.f32 %v10848_v10, %v15401_v4 }
 0xddf   : > { %v4766_v11 = vadd.f32 %v15401_v4, %v4765_v37  ;;  %4858 = vadd.xlane.f32.xlu0 %v4857_v55  ;;  %v4854_v18 = vsel %vm1459_vm1, %v15407_v34, 0.0 }
 0xde0   : > { %4855 = vadd.xlane.f32.xlu1 %v4854_v18  ;;  %v15417_v48 = vadd.f32 %v12954_v0, %v4771_v63  ;;  %v12965_v18 = vld [vmem:[#allocation2 + $0x78] sm:$0xff] }
 0xde1   : > { %v15415_v20 = vadd.f32 %v12953_v26, %v4766_v11  ;;  %v10851_v17 = vpop.f32.mrb[76].mxu0 }
 0xde2   : > { %v4775_v40 = vpop.f32.mrb[77].mxu0  ;;  %v4781_v41 = vadd.f32 %v10851_v17, %v15401_v4  ;;  %v4863_v31 = vsel %vm1459_vm1, %v15417_v48, 0.0  ;;  %v12966_v17 = vld [vmem:[#allocation2 + $0x70] sm:$0xff] }
 0xde3   : > { %v4776_v14 = vadd.f32 %v15401_v4, %v4775_v40  ;;  %v4860_v44 = vsel %vm1459_vm1, %v15415_v20, 0.0 }
 0xde4   : > { %4861 = vadd.xlane.f32.xlu0 %v4860_v44  ;;  %v15426_v16 = vadd.f32 %v12956_v57, %v4781_v41 }
 0xde5   : > { %v15423_v2 = vadd.f32 %v12955_v3, %v4776_v14  ;;  %v10854_v33 = vpop.f32.mrb[78].mxu0 }
 0xde6   : > { %v4791_v61 = vadd.f32 %v10854_v33, %v15401_v4  ;;  %v4785_v24 = vpop.f32.mrb[79].mxu0  ;;  %v4869_v13 = vsel %vm1459_vm1, %v15426_v16, 0.0 }
 0xde7   : > { %v4786_v53 = vadd.f32 %v15401_v4, %v4785_v24  ;;  %v4866_v30 = vsel %vm1459_vm1, %v15423_v2, 0.0 }
 0xde8   : > { %4864 = vadd.xlane.f32.xlu0 %v4863_v31  ;;  %4867 = vadd.xlane.f32.xlu1 %v4866_v30  ;;  %v15435_v43 = vadd.f32 %v12958_v8, %v4791_v61 }
 0xde9   : > { %v15433_v5 = vadd.f32 %v12957_v6, %v4786_v53  ;;  %v10857_v45 = vpop.f32.mrb[80].mxu0 }
 0xdea   : > { %v4795_v27 = vpop.f32.mrb[81].mxu0  ;;  %v4801_v62 = vadd.f32 %v10857_v45, %v15401_v4  ;;  %v4875_v46 = vsel %vm1459_vm1, %v15435_v43, 0.0 }
 0xdeb   : > { %v4796_v23 = vadd.f32 %v15401_v4, %v4795_v27  ;;  %v4872_v60 = vsel %vm1459_vm1, %v15433_v5, 0.0 }
 0xdec   : > { %4870 = vadd.xlane.f32.xlu0 %v4869_v13  ;;  %4873 = vadd.xlane.f32.xlu1 %v4872_v60  ;;  %v15447_v19 = vadd.f32 %v12960_v39, %v4801_v62 }
 0xded   : > { %v15443_v32 = vadd.f32 %v12959_v35, %v4796_v23  ;;  %v10860_v42 = vpop.f32.mrb[82].mxu0 }
 0xdee   : > { %v4805_v7 = vpop.f32.mrb[83].mxu0  ;;  %v4811_v22 = vadd.f32 %v10860_v42, %v15401_v4  ;;  %v4881_v36 = vsel %vm1459_vm1, %v15447_v19, 0.0 }
 0xdef   : > { %v4806_v52 = vadd.f32 %v15401_v4, %v4805_v7  ;;  %v4878_v49 = vsel %vm1459_vm1, %v15443_v32, 0.0 }
 0xdf0   : > { %4876 = vadd.xlane.f32.xlu0 %v4875_v46  ;;  %4879 = vadd.xlane.f32.xlu1 %v4878_v49  ;;  %v15455_v54 = vadd.f32 %v12962_v21, %v4811_v22 }
 0xdf1   : > { %v15453_v47 = vadd.f32 %v12961_v58, %v4806_v52 }
 0xdf2   : > { %v4887_v9 = vsel %vm1459_vm1, %v15455_v54, 0.0 }
 0xdf3   : > { %v4884_v25 = vsel %vm1459_vm1, %v15453_v47, 0.0 }
 0xdf4   : > { %4882 = vadd.xlane.f32.xlu0 %v4881_v36  ;;  %4885 = vadd.xlane.f32.xlu1 %v4884_v25 }
 0xdf8   : > { %4888 = vadd.xlane.f32.xlu0 %v4887_v9 }
 0xe0c   : > { %v10863_v29 = vpop.f32.mrb[84].mxu0 }
 0xe0d   : > { %v4821_v38 = vadd.f32 %v10863_v29, %v15401_v4  ;;  %v4815_v50 = vpop.f32.mrb[85].mxu0 }
 0xe0e   : > { %v4816_v1 = vadd.f32 %v15401_v4, %v4815_v50 }
 0xe0f   : > { %v15465_v28 = vadd.f32 %v12963_v56, %v4821_v38 }
 0xe10   : > { %v15467_v59 = vadd.f32 %v12964_v15, %v4816_v1  ;;  %v10866_v51 = vpop.f32.mrb[86].mxu0 }
 0xe11   : > { %v4831_v10 = vadd.f32 %v10866_v51, %v15401_v4  ;;  %v4825_v37 = vpop.f32.mrb[87].mxu0  ;;  %v4893_v55 = vsel %vm1459_vm1, %v15465_v28, 0.0 }
 0xe12   : > { %v4826_v63 = vadd.f32 %v15401_v4, %v4825_v37  ;;  %4894 = vadd.xlane.f32.xlu0 %v4893_v55  ;;  %v4890_v11 = vsel %vm1459_vm1, %v15467_v59, 0.0 }
 0xe13   : > { %v15475_v26 = vadd.f32 %v12965_v18, %v4831_v10  ;;  %4891 = vadd.xlane.f32.xlu1 %v4890_v11 }
 0xe14   : > { %v15477_v40 = vadd.f32 %v12966_v17, %v4826_v63 }
 0xe15   : > { %v4899_v0 = vsel %vm1459_vm1, %v15475_v26, 0.0 }
 0xe16   : > { %4900 = vadd.xlane.f32.xlu0 %v4899_v0  ;;  %v4896_v41 = vsel %vm1459_vm1, %v15477_v40, 0.0 }
 0xe17   : > { %4897 = vadd.xlane.f32.xlu1 %v4896_v41 }
 0xe6c   : > { %v4859_v4 = vpop.xlane.xlu0 %4858 }
 0xe6d   : > { %v4904_v14 = vmul.f32 0.03125, %v4859_v4  ;;  %v4856_v44 = vpop.xlane.xlu1 %4855 }
 0xe6e   : > { %v4903_v3 = vmul.f32 0.03125, %v4856_v44  ;;  %v5109_v44 = vld [vmem:[%s5107_s26 + $0x8] sm:$0xff] }
 0xe6f   : > { %v15484_v33 = vsub.f32 %v15405_v12, %v4904_v14  ;;  %v5108_v14 = vld [vmem:[%s5107_s26] sm:$0xff] }
 0xe70   : > { %v15487_v61 = vsub.f32 %v15407_v34, %v4903_v3  ;;  %v11747_v3 = vpack.c.bf16 %v5109_v44, %v5108_v14 }
 0xe71   : > { %v4862_v24 = vpop.xlane.xlu0 %4861  ;;  %v4936_v57 = vmul.f32 %v15484_v33, %v15484_v33 }
 0xe72   : > { %v4905_v53 = vmul.f32 0.03125, %v4862_v24  ;;  %v4935_v31 = vmul.f32 %v15487_v61, %v15487_v61  ;;  %11748 = vmatprep.subr.bf16.mxu1 %v11747_v3  ;;  %v5111_v24 = vld [vmem:[%s5107_s26 + $0x18] sm:$0xff] }
 0xe73   : > { %v4954_v30 = vsel %vm1459_vm1, %v4936_v57, 0.0  ;;  %11750 = vmatpush3.bf16.msra.mxu1 %v11747_v3 }
 0xe74   : > { %v15495_v6 = vsub.f32 %v15415_v20, %v4905_v53  ;;  %4955 = vadd.xlane.f32.xlu0 %v4954_v30  ;;  %v4951_v12 = vsel %vm1459_vm1, %v4935_v31, 0.0 }
 0xe75   : > { %v4865_v45 = vpop.xlane.xlu0 %4864  ;;  %4952 = vadd.xlane.f32.xlu1 %v4951_v12  ;;  %v4868_v34 = vpop.xlane.xlu1 %4867 }
 0xe76   : > { %v4906_v8 = vmul.f32 0.03125, %v4865_v45  ;;  %v4907_v27 = vmul.f32 0.03125, %v4868_v34  ;;  %v4937_v62 = vmul.f32 %v15495_v6, %v15495_v6 }
 0xe78   : > { %v15501_v23 = vsub.f32 %v15417_v48, %v4906_v8  ;;  %v15504_v13 = vsub.f32 %v15423_v2, %v4907_v27  ;;  %v4957_v20 = vsel %vm1459_vm1, %v4937_v62, 0.0 }
 0xe79   : > { %v4871_v60 = vpop.xlane.xlu0 %4870  ;;  %4958 = vadd.xlane.f32.xlu1 %v4957_v20  ;;  %v4874_v35 = vpop.xlane.xlu1 %4873 }
 0xe7a   : > { %v4908_v42 = vmul.f32 0.03125, %v4871_v60  ;;  %v4909_v7 = vmul.f32 0.03125, %v4874_v35  ;;  %v4938_v46 = vmul.f32 %v15501_v23, %v15501_v23  ;;  %v4939_v39 = vmul.f32 %v15504_v13, %v15504_v13 }
 0xe7c   : > { %v15512_v22 = vsub.f32 %v15426_v16, %v4908_v42  ;;  %v15515_v48 = vsub.f32 %v15433_v5, %v4909_v7  ;;  %v4960_v2 = vsel %vm1459_vm1, %v4938_v46, 0.0  ;;  %v4963_v52 = vsel %vm1459_vm1, %v4939_v39, 0.0 }
 0xe7d   : > { %4961 = vadd.xlane.f32.xlu0 %v4960_v2  ;;  %v4877_v49 = vpop.xlane.xlu0 %4876  ;;  %4964 = vadd.xlane.f32.xlu1 %v4963_v52  ;;  %v4880_v58 = vpop.xlane.xlu1 %4879  ;;  %v5332_v52 = vld [vmem:[%s15583_s0 + $0x8] sm:$0xff] }
 0xe7e   : > { %v4910_v21 = vmul.f32 0.03125, %v4877_v49  ;;  %v4911_v36 = vmul.f32 0.03125, %v4880_v58  ;;  %v4940_v25 = vmul.f32 %v15512_v22, %v15512_v22  ;;  %v4941_v16 = vmul.f32 %v15515_v48, %v15515_v48  ;;  %v5333_v49 = vld [vmem:[%s15583_s0 + $0x10] sm:$0xff] }
 0xe80   : > { %v15524_v9 = vsub.f32 %v15435_v43, %v4910_v21  ;;  %v15527_v5 = vsub.f32 %v15443_v32, %v4911_v36  ;;  %v4966_v29 = vsel %vm1459_vm1, %v4940_v25, 0.0  ;;  %v4969_v38 = vsel %vm1459_vm1, %v4941_v16, 0.0  ;;  %v5334_v21 = vld [vmem:[%s15583_s0 + $0x18] sm:$0xff]  ;;  %v5335_v25 = vld [vmem:[%s15583_s0 + $0x20] sm:$0xff]  ;;  %v5336_v16 = vld [vmem:[%s15583_s0 + $0x28] sm:$0xff] }
 0xe81   : > { %4967 = vadd.xlane.f32.xlu0 %v4966_v29  ;;  %v4883_v50 = vpop.xlane.xlu0 %4882  ;;  %4970 = vadd.xlane.f32.xlu1 %v4969_v38  ;;  %v4886_v1 = vpop.xlane.xlu1 %4885  ;;  %v11759_v36 = vpack.c.bf16 %v5334_v21, %v5333_v49  ;;  %v11763_v29 = vpack.c.bf16 %v5336_v16, %v5335_v25 }
 0xe82   : > { %v4912_v56 = vmul.f32 0.03125, %v4883_v50  ;;  %v4913_v15 = vmul.f32 0.03125, %v4886_v1  ;;  %v4942_v51 = vmul.f32 %v15524_v9, %v15524_v9  ;;  %v4943_v43 = vmul.f32 %v15527_v5, %v15527_v5 }
 0xe84   : > { %v15536_v10 = vsub.f32 %v15447_v19, %v4912_v56  ;;  %v15539_v32 = vsub.f32 %v15453_v47, %v4913_v15  ;;  %v4972_v37 = vsel %vm1459_vm1, %v4942_v51, 0.0  ;;  %v4975_v55 = vsel %vm1459_vm1, %v4943_v43, 0.0 }
 0xe85   : > { %4973 = vadd.xlane.f32.xlu0 %v4972_v37  ;;  %v4889_v63 = vpop.xlane.xlu0 %4888  ;;  %4976 = vadd.xlane.f32.xlu1 %v4975_v55 }
 0xe86   : > { %v4914_v11 = vmul.f32 0.03125, %v4889_v63  ;;  %v4944_v18 = vmul.f32 %v15536_v10, %v15536_v10  ;;  %v4945_v19 = vmul.f32 %v15539_v32, %v15539_v32 }
 0xe88   : > { %v15548_v17 = vsub.f32 %v15455_v54, %v4914_v11  ;;  %v4978_v47 = vsel %vm1459_vm1, %v4944_v18, 0.0  ;;  %v4981_v0 = vsel %vm1459_vm1, %v4945_v19, 0.0  ;;  %v5110_v54 = vld [vmem:[%s5107_s26 + $0x10] sm:$0xff]  ;;  %s16814_s26 = sld [smem:[#allocation12_spill]] }
 0xe89   : > { %4979 = vadd.xlane.f32.xlu0 %v4978_v47  ;;  %4982 = vadd.xlane.f32.xlu1 %v4981_v0  ;;  %v11751_v57 = vpack.c.bf16 %v5111_v24, %v5110_v54  ;;  %v15593_v54 = vld [vmem:[%s4850_s22] ss:$0 sm:$0xff] }
 0xe8a   : > { %v4946_v41 = vmul.f32 %v15548_v17, %v15548_v17 }
 0xe8b   : > { %11752 = vmatprep.subr.bf16.mxu1 %v11751_v57 }
 0xe8c   : > { %v4984_v4 = vsel %vm1459_vm1, %v4946_v41, 0.0  ;;  %11754 = vmatpush3.bf16.msra.mxu1 %v11751_v57 }
 0xe8d   : > { %4985 = vadd.xlane.f32.xlu0 %v4984_v4 }
 0xe9f   : > { %v4895_v53 = vpop.xlane.xlu0 %4894 }
 0xea0   : > { %v4916_v31 = vmul.f32 0.03125, %v4895_v53  ;;  %v4892_v30 = vpop.xlane.xlu1 %4891 }
 0xea1   : > { %v4915_v12 = vmul.f32 0.03125, %v4892_v30 }
 0xea2   : > { %v15558_v45 = vsub.f32 %v15465_v28, %v4916_v31 }
 0xea3   : > { %v15561_v34 = vsub.f32 %v15467_v59, %v4915_v12  ;;  %v4901_v8 = vpop.xlane.xlu0 %4900 }
 0xea4   : > { %v4918_v27 = vmul.f32 0.03125, %v4901_v8  ;;  %v4898_v62 = vpop.xlane.xlu1 %4897  ;;  %v4948_v20 = vmul.f32 %v15558_v45, %v15558_v45 }
 0xea5   : > { %v4917_v60 = vmul.f32 0.03125, %v4898_v62  ;;  %v4947_v35 = vmul.f32 %v15561_v34, %v15561_v34 }
 0xea6   : > { %v15568_v42 = vsub.f32 %v15475_v26, %v4918_v27  ;;  %v4990_v28 = vsel %vm1459_vm1, %v4948_v20, 0.0  ;;  %v15599_v27 = vld [vmem:[%s4852_s29] ss:$0 sm:$0xff] }
 0xea7   : > { %v15572_v59 = vsub.f32 %v15477_v40, %v4917_v60  ;;  %4991 = vadd.xlane.f32.xlu0 %v4990_v28  ;;  %v4987_v7 = vsel %vm1459_vm1, %v4947_v35, 0.0  ;;  %v5331_v40 = vld [vmem:[%s15583_s0] sm:$0xff] }
 0xea8   : > { %4988 = vadd.xlane.f32.xlu1 %v4987_v7  ;;  %v4950_v46 = vmul.f32 %v15568_v42, %v15568_v42  ;;  %v11755_v58 = vpack.c.bf16 %v5332_v52, %v5331_v40 }
 0xea9   : > { %v4949_v39 = vmul.f32 %v15572_v59, %v15572_v59 }
 0xeaa   : > { %v4996_v2 = vsel %vm1459_vm1, %v4950_v46, 0.0  ;;  %11756 = vmatprep.subr.bf16.mxu0 %v11755_v58 }
 0xeab   : > { %4997 = vadd.xlane.f32.xlu0 %v4996_v2  ;;  %v4993_v26 = vsel %vm1459_vm1, %v4949_v39, 0.0  ;;  %11758 = vmatpush3.bf16.msra.mxu0 %v11755_v58 }
 0xeac   : > { %4994 = vadd.xlane.f32.xlu1 %v4993_v26  ;;  %11760 = vmatprep.subr.bf16.mxu0 %v11759_v36 }
 0xeaf   : > { %11762 = vmatpush3.bf16.msra.mxu0 %v11759_v36 }
 0xeb0   : > { %11764 = vmatprep.subr.bf16.mxu0 %v11763_v29 }
 0xeb3   : > { %11766 = vmatpush3.bf16.msra.mxu0 %v11763_v29 }
 0xf01   : > { %v4956_v38 = vpop.xlane.xlu0 %4955 }
 0xf02   : > { %v5000_v50 = vmul.f32 0.03125, %v4956_v38  ;;  %v4953_v1 = vpop.xlane.xlu1 %4952 }
 0xf03   : > { %v4999_v56 = vmul.f32 0.03125, %v4953_v1 }
 0xf04   : > { %v5016_v15 = vadd.f32 1e-05, %v5000_v50 }
 0xf05   : > { %v5015_v51 = vadd.f32 1e-05, %v4999_v56 }
 0xf06   : > { %12887 = vrsqrt.f32 %v5016_v15  ;;  %v4959_v43 = vpop.xlane.xlu1 %4958 }
 0xf07   : > { %12889 = vrsqrt.f32 %v5015_v51  ;;  %v5001_v37 = vmul.f32 0.03125, %v4959_v43 }
 0xf09   : > { %v5017_v55 = vadd.f32 1e-05, %v5001_v37 }
 0xf0a   : > { %v4962_v63 = vpop.xlane.xlu0 %4961  ;;  %v4965_v11 = vpop.xlane.xlu1 %4964 }
 0xf0b   : > { %12891 = vrsqrt.f32 %v5017_v55  ;;  %v5002_v18 = vmul.f32 0.03125, %v4962_v63  ;;  %v5003_v19 = vmul.f32 0.03125, %v4965_v11 }
 0xf0d   : > { %v5018_v47 = vadd.f32 1e-05, %v5002_v18  ;;  %v5019_v0 = vadd.f32 1e-05, %v5003_v19 }
 0xf0e   : > { %v4968_v41 = vpop.xlane.xlu0 %4967  ;;  %v4971_v4 = vpop.xlane.xlu1 %4970 }
 0xf0f   : > { %12893 = vrsqrt.f32 %v5018_v47  ;;  %v5004_v14 = vmul.f32 0.03125, %v4968_v41  ;;  %v5005_v44 = vmul.f32 0.03125, %v4971_v4 }
 0xf10   : > { %v12888_v3 = vpop.eup %12887  ;;  %12895 = vrsqrt.f32 %v5019_v0 }
 0xf11   : > { %v12890_v24 = vpop.eup %12889  ;;  %v5048_v57 = vmul.f32 %v12888_v3, %v15484_v33  ;;  %v5020_v53 = vadd.f32 1e-05, %v5004_v14  ;;  %v5021_v31 = vadd.f32 1e-05, %v5005_v44 }
 0xf12   : > { %v4974_v30 = vpop.xlane.xlu0 %4973  ;;  %v4977_v12 = vpop.xlane.xlu1 %4976  ;;  %v5047_v8 = vmul.f32 %v12890_v24, %v15487_v61 }
 0xf13   : > { %v5070_v62 = vmul.f32 %v15593_v54, %v5048_v57  ;;  %12897 = vrsqrt.f32 %v5020_v53  ;;  %v5006_v20 = vmul.f32 0.03125, %v4974_v30  ;;  %v5007_v60 = vmul.f32 0.03125, %v4977_v12 }
 0xf14   : > { %12899 = vrsqrt.f32 %v5021_v31  ;;  %v5069_v35 = vmul.f32 %v15593_v54, %v5047_v8 }
 0xf15   : > { %v12892_v28 = vpop.eup %12891  ;;  %v5022_v7 = vadd.f32 1e-05, %v5006_v20  ;;  %v5023_v46 = vadd.f32 1e-05, %v5007_v60  ;;  %v15608_v26 = vadd.f32 %v15599_v27, %v5070_v62 }
 0xf16   : > { %v4980_v33 = vpop.xlane.xlu0 %4979  ;;  %v4983_v39 = vpop.xlane.xlu1 %4982  ;;  %v15604_v2 = vadd.f32 %v15599_v27, %v5069_v35  ;;  %v5049_v61 = vmul.f32 %v12892_v28, %v15495_v6 }
 0xf17   : > { %12901 = vrsqrt.f32 %v5022_v7  ;;  %v5008_v40 = vmul.f32 0.03125, %v4980_v33  ;;  %v5009_v52 = vmul.f32 0.03125, %v4983_v39 }
 0xf18   : > { %12903 = vrsqrt.f32 %v5023_v46  ;;  %10875 = vmatprep.mubr.msk.f32.mxu1 %vm1459_vm1, %v15604_v2  ;;  %v5071_v49 = vmul.f32 %v15593_v54, %v5049_v61 }
 0xf19   : > { %v12894_v58 = vpop.eup %12893  ;;  %v5024_v21 = vadd.f32 1e-05, %v5008_v40  ;;  %v5025_v36 = vadd.f32 1e-05, %v5009_v52  ;;  %10876 = vmatmul.mubr.msk.f32.vlgmr.msra.gmra.mrb[88].mxu1 %vm1459_vm1, %v15608_v26 }
 0xf1a   : > { %v12896_v25 = vpop.eup %12895  ;;  %v4986_v6 = vpop.xlane.xlu0 %4985  ;;  %v15616_v16 = vadd.f32 %v15599_v27, %v5071_v49  ;;  %v5050_v29 = vmul.f32 %v12894_v58, %v15501_v23 }
 0xf1b   : > { %12905 = vrsqrt.f32 %v5024_v21  ;;  %v5010_v38 = vmul.f32 0.03125, %v4986_v6  ;;  %v5051_v50 = vmul.f32 %v12896_v25, %v15504_v13 }
 0xf1c   : > { %12907 = vrsqrt.f32 %v5025_v36  ;;  %10878 = vmatprep.mubr.msk.f32.mxu1 %vm1459_vm1, %v15616_v16  ;;  %v5072_v1 = vmul.f32 %v15593_v54, %v5050_v29 }
 0xf1d   : > { %v12898_v56 = vpop.eup %12897  ;;  %v5026_v15 = vadd.f32 1e-05, %v5010_v38  ;;  %v5073_v51 = vmul.f32 %v15593_v54, %v5051_v50 }
 0xf1e   : > { %v12900_v43 = vpop.eup %12899  ;;  %v15625_v37 = vadd.f32 %v15599_v27, %v5072_v1  ;;  %v5052_v23 = vmul.f32 %v12898_v56, %v15512_v22 }
 0xf1f   : > { %12909 = vrsqrt.f32 %v5026_v15  ;;  %v15629_v55 = vadd.f32 %v15599_v27, %v5073_v51  ;;  %v5053_v13 = vmul.f32 %v12900_v43, %v15515_v48  ;;  %v5338_v51 = vld [vmem:[%s15583_s0 + $0x38] sm:$0xff] }
 0xf20   : > { %10879 = vmatmul.mubr.msk.f32.gmra.mrb[90].mxu1 %vm1459_vm1, %v15625_v37  ;;  %v5074_v63 = vmul.f32 %v15593_v54, %v5052_v23 }
 0xf21   : > { %v12902_v11 = vpop.eup %12901  ;;  %10881 = vmatprep.mubr.msk.f32.mxu1 %vm1459_vm1, %v15629_v55  ;;  %v5075_v18 = vmul.f32 %v15593_v54, %v5053_v13 }
 0xf22   : > { %v12904_v19 = vpop.eup %12903  ;;  %v15639_v22 = vadd.f32 %v15599_v27, %v5074_v63  ;;  %v5054_v47 = vmul.f32 %v12902_v11, %v15524_v9 }
 0xf23   : > { %v15643_v0 = vadd.f32 %v15599_v27, %v5075_v18  ;;  %v5055_v48 = vmul.f32 %v12904_v19, %v15527_v5 }
 0xf24   : > { %10882 = vmatmul.mubr.msk.f32.gmra.mrb[92].mxu1 %vm1459_vm1, %v15639_v22  ;;  %v5076_v41 = vmul.f32 %v15593_v54, %v5054_v47 }
 0xf25   : > { %v12906_v4 = vpop.eup %12905  ;;  %10884 = vmatprep.mubr.msk.f32.mxu1 %vm1459_vm1, %v15643_v0  ;;  %v5077_v14 = vmul.f32 %v15593_v54, %v5055_v48 }
 0xf26   : > { %v12908_v44 = vpop.eup %12907  ;;  %v15653_v3 = vadd.f32 %v15599_v27, %v5076_v41  ;;  %v5056_v9 = vmul.f32 %v12906_v4, %v15536_v10 }
 0xf27   : > { %v15657_v24 = vadd.f32 %v15599_v27, %v5077_v14  ;;  %v5057_v5 = vmul.f32 %v12908_v44, %v15539_v32 }
 0xf28   : > { %10885 = vmatmul.mubr.msk.f32.gmra.mrb[94].mxu1 %vm1459_vm1, %v15653_v3  ;;  %v5078_v57 = vmul.f32 %v15593_v54, %v5056_v9 }
 0xf29   : > { %v12910_v53 = vpop.eup %12909  ;;  %10887 = vmatprep.mubr.msk.f32.mxu1 %vm1459_vm1, %v15657_v24  ;;  %v5079_v31 = vmul.f32 %v15593_v54, %v5057_v5 }
 0xf2a   : > { %v15667_v30 = vadd.f32 %v15599_v27, %v5078_v57  ;;  %v5058_v10 = vmul.f32 %v12910_v53, %v15548_v17 }
 0xf2b   : > { %v15671_v12 = vadd.f32 %v15599_v27, %v5079_v31 }
 0xf2c   : > { %10888 = vmatmul.mubr.msk.f32.gmra.mrb[96].mxu1 %vm1459_vm1, %v15667_v30  ;;  %v5080_v32 = vmul.f32 %v15593_v54, %v5058_v10 }
 0xf2d   : > { %10890 = vmatprep.mubr.msk.f32.mxu1 %vm1459_vm1, %v15671_v12 }
 0xf2e   : > { %v15679_v8 = vadd.f32 %v15599_v27, %v5080_v32 }
 0xf30   : > { %10891 = vmatmul.mubr.msk.f32.gmra.mrb[98].mxu1 %vm1459_vm1, %v15679_v8 }
 0xf34   : > { %v4992_v62 = vpop.xlane.xlu0 %4991 }
 0xf35   : > { %v5012_v20 = vmul.f32 0.03125, %v4992_v62  ;;  %v4989_v17 = vpop.xlane.xlu1 %4988 }
 0xf36   : > { %v5011_v60 = vmul.f32 0.03125, %v4989_v17 }
 0xf37   : > { %v5028_v35 = vadd.f32 1e-05, %v5012_v20 }
 0xf38   : > { %v5027_v28 = vadd.f32 1e-05, %v5011_v60  ;;  %v4998_v7 = vpop.xlane.xlu0 %4997 }
 0xf39   : > { %12911 = vrsqrt.f32 %v5028_v35  ;;  %v5014_v46 = vmul.f32 0.03125, %v4998_v7  ;;  %v4995_v33 = vpop.xlane.xlu1 %4994 }
 0xf3a   : > { %12913 = vrsqrt.f32 %v5027_v28  ;;  %v5013_v39 = vmul.f32 0.03125, %v4995_v33 }
 0xf3b   : > { %v5030_v61 = vadd.f32 1e-05, %v5014_v46 }
 0xf3c   : > { %v5029_v40 = vadd.f32 1e-05, %v5013_v39 }
 0xf3d   : > { %12915 = vrsqrt.f32 %v5030_v61 }
 0xf3e   : > { %12917 = vrsqrt.f32 %v5029_v40 }
 0xf43   : > { %v12912_v52 = vpop.eup %12911 }
 0xf44   : > { %v12914_v49 = vpop.eup %12913  ;;  %v5060_v58 = vmul.f32 %v12912_v52, %v15558_v45 }
 0xf45   : > { %v5059_v21 = vmul.f32 %v12914_v49, %v15561_v34 }
 0xf46   : > { %v5082_v36 = vmul.f32 %v15593_v54, %v5060_v58 }
 0xf47   : > { %v12916_v25 = vpop.eup %12915  ;;  %v5081_v6 = vmul.f32 %v15593_v54, %v5059_v21 }
 0xf48   : > { %v12918_v29 = vpop.eup %12917  ;;  %v5062_v38 = vmul.f32 %v12916_v25, %v15568_v42  ;;  %v15693_v45 = vadd.f32 %v15599_v27, %v5082_v36 }
 0xf49   : > { %v15689_v50 = vadd.f32 %v15599_v27, %v5081_v6  ;;  %v5061_v1 = vmul.f32 %v12918_v29, %v15572_v59  ;;  %v5337_v59 = vld [vmem:[%s15583_s0 + $0x30] sm:$0xff]  ;;  %s5559_s0 = scalar_lea.vmem %s16814_s26, %s13430_s28 }
 0xf4a   : > { %v5084_v34 = vmul.f32 %v15593_v54, %v5062_v38  ;;  %v11767_v43 = vpack.c.bf16 %v5338_v51, %v5337_v59 }
 0xf4b   : > { %10893 = vmatprep.mubr.msk.f32.mxu1 %vm1459_vm1, %v15689_v50  ;;  %v5083_v56 = vmul.f32 %v15593_v54, %v5061_v1  ;;  %v9520_v54 = vld [vmem:[%s5112_s1] ss:$0 sm:$0xff] }
 0xf4c   : > { %10894 = vmatmul.mubr.msk.f32.gmra.mrb[100].mxu1 %vm1459_vm1, %v15693_v45  ;;  %v15705_v15 = vadd.f32 %v15599_v27, %v5084_v34  ;;  %11768 = vmatprep.subr.bf16.mxu0 %v11767_v43 }
 0xf4d   : > { %v15702_v42 = vadd.f32 %v15599_v27, %v5083_v56  ;;  %11770 = vmatpush3.bf16.msra.mxu0 %v11767_v43 }
 0xf4f   : > { %10896 = vmatprep.mubr.msk.f32.mxu1 %vm1459_vm1, %v15702_v42 }
 0xf50   : > { %10897 = vmatmul.mubr.msk.f32.gmra.mrb[102].mxu1 %vm1459_vm1, %v15705_v15 }
 0xfec   : > { %v10877_v23 = vpop.f32.mrb[88].mxu1 }
 0xfed   : > { %v5240_v13 = vadd.f32 %v10877_v23, %v9520_v54  ;;  %v5234_v63 = vpop.f32.mrb[89].mxu1 }
 0xfee   : > { %v5235_v11 = vadd.f32 %v9520_v54, %v5234_v63 }
 0xfef   : > { %v5314_v18 = vmax.f32 %v5240_v13, 0.0  ;;  %v15733_v13 = vld [vmem:[%s5339_s16] ss:$0 sm:$0xff] }
 0xff0   : > { %v5313_v27 = vmax.f32 %v5235_v11, 0.0 }
 0xff2   : > { %10915 = vmatprep.mubr.msk.f32.mxu0 %vm5347_vm6, %v5313_v27 }
 0xff3   : > { %v10880_v19 = vpop.f32.mrb[90].mxu1  ;;  %10916 = vmatmul.mubr.msk.f32.vlgmr.msra.gmra.mrb[88].mxu0 %vm5347_vm6, %v5314_v18 }
 0xff4   : > { %v5250_v47 = vadd.f32 %v10880_v19, %v9520_v54  ;;  %v5244_v48 = vpop.f32.mrb[91].mxu1 }
 0xff5   : > { %v5245_v41 = vadd.f32 %v9520_v54, %v5244_v48 }
 0xff6   : > { %v5316_v44 = vmax.f32 %v5250_v47, 0.0 }
 0xff7   : > { %v5315_v4 = vmax.f32 %v5245_v41, 0.0  ;;  %v10883_v14 = vpop.f32.mrb[92].mxu1 }
 0xff8   : > { %v5260_v9 = vadd.f32 %v10883_v14, %v9520_v54  ;;  %v5254_v5 = vpop.f32.mrb[93].mxu1 }
 0xff9   : > { %v5255_v57 = vadd.f32 %v9520_v54, %v5254_v5  ;;  %10918 = vmatprep.mubr.msk.f32.mxu0 %vm5347_vm6, %v5315_v4 }
 0xffa   : > { %10919 = vmatmul.mubr.msk.f32.gmra.mrb[90].mxu0 %vm5347_vm6, %v5316_v44  ;;  %v5318_v10 = vmax.f32 %v5260_v9, 0.0 }
 0xffb   : > { %v5317_v53 = vmax.f32 %v5255_v57, 0.0  ;;  %v10886_v31 = vpop.f32.mrb[94].mxu1 }
 0xffc   : > { %v5270_v32 = vadd.f32 %v10886_v31, %v9520_v54  ;;  %v5264_v62 = vpop.f32.mrb[95].mxu1 }
 0xffd   : > { %v5265_v20 = vadd.f32 %v9520_v54, %v5264_v62  ;;  %10921 = vmatprep.mubr.msk.f32.mxu0 %vm5347_vm6, %v5317_v53 }
 0xffe   : > { %10922 = vmatmul.mubr.msk.f32.gmra.mrb[92].mxu0 %vm5347_vm6, %v5318_v10  ;;  %v5320_v35 = vmax.f32 %v5270_v32, 0.0 }
 0xfff   : > { %v5319_v17 = vmax.f32 %v5265_v20, 0.0  ;;  %v10889_v60 = vpop.f32.mrb[96].mxu1 }
0x1000   : > { %v5280_v28 = vadd.f32 %v10889_v60, %v9520_v54  ;;  %v5274_v7 = vpop.f32.mrb[97].mxu1 }
0x1001   : > { %v5275_v46 = vadd.f32 %v9520_v54, %v5274_v7  ;;  %10924 = vmatprep.mubr.msk.f32.mxu0 %vm5347_vm6, %v5319_v17 }
0x1002   : > { %10925 = vmatmul.mubr.msk.f32.gmra.mrb[94].mxu0 %vm5347_vm6, %v5320_v35  ;;  %v5322_v61 = vmax.f32 %v5280_v28, 0.0 }
0x1003   : > { %v5321_v33 = vmax.f32 %v5275_v46, 0.0  ;;  %v10892_v39 = vpop.f32.mrb[98].mxu1 }
0x1004   : > { %v5290_v40 = vadd.f32 %v10892_v39, %v9520_v54  ;;  %v5284_v52 = vpop.f32.mrb[99].mxu1 }
0x1005   : > { %v5285_v49 = vadd.f32 %v9520_v54, %v5284_v52  ;;  %10927 = vmatprep.mubr.msk.f32.mxu0 %vm5347_vm6, %v5321_v33 }
0x1006   : > { %10928 = vmatmul.mubr.msk.f32.gmra.mrb[96].mxu0 %vm5347_vm6, %v5322_v61  ;;  %v5324_v21 = vmax.f32 %v5290_v40, 0.0 }
0x1007   : > { %v5323_v58 = vmax.f32 %v5285_v49, 0.0 }
0x1009   : > { %10930 = vmatprep.mubr.msk.f32.mxu0 %vm5347_vm6, %v5323_v58 }
0x100a   : > { %10931 = vmatmul.mubr.msk.f32.gmra.mrb[98].mxu0 %vm5347_vm6, %v5324_v21 }
0x101f   : > { %v10895_v36 = vpop.f32.mrb[100].mxu1 }
0x1020   : > { %v5300_v25 = vadd.f32 %v10895_v36, %v9520_v54  ;;  %v5294_v6 = vpop.f32.mrb[101].mxu1 }
0x1021   : > { %v5295_v29 = vadd.f32 %v9520_v54, %v5294_v6 }
0x1022   : > { %v5326_v34 = vmax.f32 %v5300_v25, 0.0 }
0x1023   : > { %v5325_v38 = vmax.f32 %v5295_v29, 0.0  ;;  %v10898_v1 = vpop.f32.mrb[102].mxu1 }
0x1024   : > { %v5310_v56 = vadd.f32 %v10898_v1, %v9520_v54  ;;  %v5304_v59 = vpop.f32.mrb[103].mxu1 }
0x1025   : > { %v5305_v51 = vadd.f32 %v9520_v54, %v5304_v59  ;;  %10933 = vmatprep.mubr.msk.f32.mxu0 %vm5347_vm6, %v5325_v38 }
0x1026   : > { %10934 = vmatmul.mubr.msk.f32.gmra.mrb[100].mxu0 %vm5347_vm6, %v5326_v34  ;;  %v5328_v23 = vmax.f32 %v5310_v56, 0.0 }
0x1027   : > { %v5327_v43 = vmax.f32 %v5305_v51, 0.0 }
0x1029   : > { %10936 = vmatprep.mubr.msk.f32.mxu0 %vm5347_vm6, %v5327_v43 }
0x102a   : > { %10937 = vmatmul.mubr.msk.f32.gmra.mrb[102].mxu0 %vm5347_vm6, %v5328_v23 }
0x10c6   : > { %v10917_v63 = vpop.f32.mrb[88].mxu0 }
0x10c7   : > { %v5468_v11 = vadd.f32 %v10917_v63, %v15733_v13  ;;  %v5462_v27 = vpop.f32.mrb[89].mxu0 }
0x10c8   : > { %v5463_v18 = vadd.f32 %v15733_v13, %v5462_v27 }
0x10c9   : > { %v15738_v54 = vadd.f32 %v5468_v11, %v15608_v26 }
0x10ca   : > { %v15741_v19 = vadd.f32 %v5463_v18, %v15604_v2 }
0x10cb   : > { %v5564_v47 = vsel %vm1459_vm1, %v15738_v54, 0.0 }
0x10cc   : > { %5565 = vadd.xlane.f32.xlu0 %v5564_v47  ;;  %v5561_v48 = vsel %vm1459_vm1, %v15741_v19, 0.0 }
0x10cd   : > { %5562 = vadd.xlane.f32.xlu1 %v5561_v48  ;;  %v10920_v41 = vpop.f32.mrb[90].mxu0 }
0x10ce   : > { %v5478_v4 = vadd.f32 %v10920_v41, %v15733_v13  ;;  %v5472_v14 = vpop.f32.mrb[91].mxu0 }
0x10cf   : > { %v5473_v44 = vadd.f32 %v15733_v13, %v5472_v14 }
0x10d0   : > { %v15750_v26 = vadd.f32 %v5478_v4, %v15625_v37 }
0x10d1   : > { %v15753_v2 = vadd.f32 %v5473_v44, %v15616_v16  ;;  %v10923_v9 = vpop.f32.mrb[92].mxu0 }
0x10d2   : > { %v5488_v5 = vadd.f32 %v10923_v9, %v15733_v13  ;;  %v5482_v57 = vpop.f32.mrb[93].mxu0  ;;  %v5570_v53 = vsel %vm1459_vm1, %v15750_v26, 0.0 }
0x10d3   : > { %v5483_v31 = vadd.f32 %v15733_v13, %v5482_v57  ;;  %5571 = vadd.xlane.f32.xlu0 %v5570_v53  ;;  %v5567_v10 = vsel %vm1459_vm1, %v15753_v2, 0.0 }
0x10d4   : > { %v15762_v32 = vadd.f32 %v5488_v5, %v15639_v22  ;;  %5568 = vadd.xlane.f32.xlu1 %v5567_v10 }
0x10d5   : > { %v15765_v16 = vadd.f32 %v5483_v31, %v15629_v55  ;;  %v10926_v37 = vpop.f32.mrb[94].mxu0 }
0x10d6   : > { %v5498_v62 = vadd.f32 %v10926_v37, %v15733_v13  ;;  %v5492_v20 = vpop.f32.mrb[95].mxu0  ;;  %v5576_v17 = vsel %vm1459_vm1, %v15762_v32, 0.0 }
0x10d7   : > { %v5493_v60 = vadd.f32 %v15733_v13, %v5492_v20  ;;  %5577 = vadd.xlane.f32.xlu0 %v5576_v17  ;;  %v5573_v35 = vsel %vm1459_vm1, %v15765_v16, 0.0 }
0x10d8   : > { %v15774_v22 = vadd.f32 %v5498_v62, %v15653_v3  ;;  %5574 = vadd.xlane.f32.xlu1 %v5573_v35 }
0x10d9   : > { %v15777_v55 = vadd.f32 %v5493_v60, %v15643_v0  ;;  %v10929_v28 = vpop.f32.mrb[96].mxu0 }
0x10da   : > { %v5508_v7 = vadd.f32 %v10929_v28, %v15733_v13  ;;  %v5502_v46 = vpop.f32.mrb[97].mxu0  ;;  %v5582_v33 = vsel %vm1459_vm1, %v15774_v22, 0.0 }
0x10db   : > { %v5503_v39 = vadd.f32 %v15733_v13, %v5502_v46  ;;  %5583 = vadd.xlane.f32.xlu0 %v5582_v33  ;;  %v5579_v61 = vsel %vm1459_vm1, %v15777_v55, 0.0 }
0x10dc   : > { %v15786_v3 = vadd.f32 %v5508_v7, %v15667_v30  ;;  %5580 = vadd.xlane.f32.xlu1 %v5579_v61 }
0x10dd   : > { %v15789_v0 = vadd.f32 %v5503_v39, %v15657_v24  ;;  %v10932_v40 = vpop.f32.mrb[98].mxu0 }
0x10de   : > { %v5518_v52 = vadd.f32 %v10932_v40, %v15733_v13  ;;  %v5512_v49 = vpop.f32.mrb[99].mxu0  ;;  %v5588_v58 = vsel %vm1459_vm1, %v15786_v3, 0.0 }
0x10df   : > { %v5513_v21 = vadd.f32 %v15733_v13, %v5512_v49  ;;  %5589 = vadd.xlane.f32.xlu0 %v5588_v58  ;;  %v5585_v36 = vsel %vm1459_vm1, %v15789_v0, 0.0 }
0x10e0   : > { %v15798_v30 = vadd.f32 %v5518_v52, %v15679_v8  ;;  %5586 = vadd.xlane.f32.xlu1 %v5585_v36 }
0x10e1   : > { %v15801_v24 = vadd.f32 %v5513_v21, %v15671_v12 }
0x10e2   : > { %v5594_v25 = vsel %vm1459_vm1, %v15798_v30, 0.0 }
0x10e3   : > { %5595 = vadd.xlane.f32.xlu0 %v5594_v25  ;;  %v5591_v6 = vsel %vm1459_vm1, %v15801_v24, 0.0 }
0x10e4   : > { %5592 = vadd.xlane.f32.xlu1 %v5591_v6 }
0x10f9   : > { %v10935_v29 = vpop.f32.mrb[100].mxu0 }
0x10fa   : > { %v5528_v38 = vadd.f32 %v10935_v29, %v15733_v13  ;;  %v5522_v1 = vpop.f32.mrb[101].mxu0 }
0x10fb   : > { %v5523_v34 = vadd.f32 %v15733_v13, %v5522_v1 }
0x10fc   : > { %v15810_v8 = vadd.f32 %v5528_v38, %v15693_v45 }
0x10fd   : > { %v15813_v12 = vadd.f32 %v5523_v34, %v15689_v50  ;;  %v10938_v56 = vpop.f32.mrb[102].mxu0 }
0x10fe   : > { %v5538_v59 = vadd.f32 %v10938_v56, %v15733_v13  ;;  %v5532_v51 = vpop.f32.mrb[103].mxu0  ;;  %v5600_v43 = vsel %vm1459_vm1, %v15810_v8, 0.0 }
0x10ff   : > { %v5533_v23 = vadd.f32 %v15733_v13, %v5532_v51  ;;  %5601 = vadd.xlane.f32.xlu0 %v5600_v43  ;;  %v5597_v63 = vsel %vm1459_vm1, %v15813_v12, 0.0 }
0x1100   : > { %v15822_v11 = vadd.f32 %v5538_v59, %v15705_v15  ;;  %5598 = vadd.xlane.f32.xlu1 %v5597_v63 }
0x1101   : > { %v15825_v50 = vadd.f32 %v5533_v23, %v15702_v42 }
0x1102   : > { %v5606_v45 = vsel %vm1459_vm1, %v15822_v11, 0.0 }
0x1103   : > { %5607 = vadd.xlane.f32.xlu0 %v5606_v45  ;;  %v5603_v27 = vsel %vm1459_vm1, %v15825_v50, 0.0 }
0x1104   : > { %5604 = vadd.xlane.f32.xlu1 %v5603_v27 }
0x1159   : > { %v5566_v13 = vpop.xlane.xlu0 %5565 }
0x115a   : > { %v5610_v18 = vmul.f32 0.03125, %v5566_v13  ;;  %v5563_v47 = vpop.xlane.xlu1 %5562 }
0x115b   : > { %v5609_v48 = vmul.f32 0.03125, %v5563_v47 }
0x115c   : > { %v15832_v41 = vsub.f32 %v15738_v54, %v5610_v18 }
0x115d   : > { %v15835_v15 = vsub.f32 %v15741_v19, %v5609_v48 }
0x115e   : > { %v5642_v42 = vmul.f32 %v15832_v41, %v15832_v41 }
0x115f   : > { %v5641_v4 = vmul.f32 %v15835_v15, %v15835_v15 }
0x1160   : > { %v5572_v14 = vpop.xlane.xlu0 %5571  ;;  %v5660_v44 = vsel %vm1459_vm1, %v5642_v42, 0.0 }
0x1161   : > { %v5612_v9 = vmul.f32 0.03125, %v5572_v14  ;;  %5661 = vadd.xlane.f32.xlu0 %v5660_v44  ;;  %v5569_v5 = vpop.xlane.xlu1 %5568  ;;  %v5657_v57 = vsel %vm1459_vm1, %v5641_v4, 0.0 }
0x1162   : > { %v5611_v53 = vmul.f32 0.03125, %v5569_v5  ;;  %5658 = vadd.xlane.f32.xlu1 %v5657_v57 }
0x1163   : > { %v15844_v54 = vsub.f32 %v15750_v26, %v5612_v9 }
0x1164   : > { %v15847_v19 = vsub.f32 %v15753_v2, %v5611_v53  ;;  %v5578_v31 = vpop.xlane.xlu0 %5577 }
0x1165   : > { %v5614_v10 = vmul.f32 0.03125, %v5578_v31  ;;  %v5575_v37 = vpop.xlane.xlu1 %5574  ;;  %v5644_v62 = vmul.f32 %v15844_v54, %v15844_v54 }
0x1166   : > { %v5613_v20 = vmul.f32 0.03125, %v5575_v37  ;;  %v5643_v17 = vmul.f32 %v15847_v19, %v15847_v19 }
0x1167   : > { %v15854_v60 = vsub.f32 %v15762_v32, %v5614_v10  ;;  %v5666_v35 = vsel %vm1459_vm1, %v5644_v62, 0.0 }
0x1168   : > { %v15858_v26 = vsub.f32 %v15765_v16, %v5613_v20  ;;  %v5584_v2 = vpop.xlane.xlu0 %5583  ;;  %5667 = vadd.xlane.f32.xlu0 %v5666_v35  ;;  %v5663_v28 = vsel %vm1459_vm1, %v5643_v17, 0.0 }
0x1169   : > { %v5616_v7 = vmul.f32 0.03125, %v5584_v2  ;;  %5664 = vadd.xlane.f32.xlu1 %v5663_v28  ;;  %v5581_v46 = vpop.xlane.xlu1 %5580  ;;  %v5646_v33 = vmul.f32 %v15854_v60, %v15854_v60 }
0x116a   : > { %v5615_v39 = vmul.f32 0.03125, %v5581_v46  ;;  %v5645_v32 = vmul.f32 %v15858_v26, %v15858_v26 }
0x116b   : > { %v15866_v61 = vsub.f32 %v15774_v22, %v5616_v7  ;;  %v5672_v16 = vsel %vm1459_vm1, %v5646_v33, 0.0 }
0x116c   : > { %v15870_v40 = vsub.f32 %v15777_v55, %v5615_v39  ;;  %v5590_v52 = vpop.xlane.xlu0 %5589  ;;  %5673 = vadd.xlane.f32.xlu0 %v5672_v16  ;;  %v5669_v49 = vsel %vm1459_vm1, %v5645_v32, 0.0 }
0x116d   : > { %v5618_v58 = vmul.f32 0.03125, %v5590_v52  ;;  %5670 = vadd.xlane.f32.xlu1 %v5669_v49  ;;  %v5587_v21 = vpop.xlane.xlu1 %5586  ;;  %v5648_v36 = vmul.f32 %v15866_v61, %v15866_v61 }
0x116e   : > { %v5617_v25 = vmul.f32 0.03125, %v5587_v21  ;;  %v5647_v22 = vmul.f32 %v15870_v40, %v15870_v40 }
0x116f   : > { %v15878_v6 = vsub.f32 %v15786_v3, %v5618_v58  ;;  %v5678_v55 = vsel %vm1459_vm1, %v5648_v36, 0.0 }
0x1170   : > { %v15882_v29 = vsub.f32 %v15789_v0, %v5617_v25  ;;  %v5596_v38 = vpop.xlane.xlu0 %5595  ;;  %5679 = vadd.xlane.f32.xlu0 %v5678_v55  ;;  %v5675_v1 = vsel %vm1459_vm1, %v5647_v22, 0.0  ;;  %v15931_v55 = vld [vmem:[%s5557_s25] ss:$0 sm:$0xff] }
0x1171   : > { %v5620_v34 = vmul.f32 0.03125, %v5596_v38  ;;  %5676 = vadd.xlane.f32.xlu1 %v5675_v1  ;;  %v5593_v56 = vpop.xlane.xlu1 %5592  ;;  %v5650_v59 = vmul.f32 %v15878_v6, %v15878_v6 }
0x1172   : > { %v5619_v51 = vmul.f32 0.03125, %v5593_v56  ;;  %v5649_v3 = vmul.f32 %v15882_v29, %v15882_v29 }
0x1173   : > { %v15890_v43 = vsub.f32 %v15798_v30, %v5620_v34  ;;  %v5684_v0 = vsel %vm1459_vm1, %v5650_v59, 0.0 }
0x1174   : > { %v15894_v23 = vsub.f32 %v15801_v24, %v5619_v51  ;;  %5685 = vadd.xlane.f32.xlu0 %v5684_v0  ;;  %v5681_v63 = vsel %vm1459_vm1, %v5649_v3, 0.0  ;;  %v15934_v3 = vld [vmem:[%s5559_s0] ss:$0 sm:$0xff] }
0x1175   : > { %5682 = vadd.xlane.f32.xlu1 %v5681_v63  ;;  %v5652_v45 = vmul.f32 %v15890_v43, %v15890_v43 }
0x1176   : > { %v5651_v27 = vmul.f32 %v15894_v23, %v15894_v23 }
0x1177   : > { %v5690_v13 = vsel %vm1459_vm1, %v5652_v45, 0.0 }
0x1178   : > { %5691 = vadd.xlane.f32.xlu0 %v5690_v13  ;;  %v5687_v30 = vsel %vm1459_vm1, %v5651_v27, 0.0 }
0x1179   : > { %5688 = vadd.xlane.f32.xlu1 %v5687_v30 }
0x118c   : > { %v5602_v18 = vpop.xlane.xlu0 %5601 }
0x118d   : > { %v5622_v47 = vmul.f32 0.03125, %v5602_v18  ;;  %v5599_v24 = vpop.xlane.xlu1 %5598 }
0x118e   : > { %v5621_v48 = vmul.f32 0.03125, %v5599_v24 }
0x118f   : > { %v15904_v42 = vsub.f32 %v15810_v8, %v5622_v47 }
0x1190   : > { %v15907_v4 = vsub.f32 %v15813_v12, %v5621_v48  ;;  %v5608_v14 = vpop.xlane.xlu0 %5607 }
0x1191   : > { %v5624_v44 = vmul.f32 0.03125, %v5608_v14  ;;  %v5605_v9 = vpop.xlane.xlu1 %5604  ;;  %v5654_v5 = vmul.f32 %v15904_v42, %v15904_v42 }
0x1192   : > { %v5623_v57 = vmul.f32 0.03125, %v5605_v9  ;;  %v5653_v53 = vmul.f32 %v15907_v4, %v15907_v4 }
0x1193   : > { %v15914_v31 = vsub.f32 %v15822_v11, %v5624_v44  ;;  %v5696_v10 = vsel %vm1459_vm1, %v5654_v5, 0.0 }
0x1194   : > { %v15918_v8 = vsub.f32 %v15825_v50, %v5623_v57  ;;  %5697 = vadd.xlane.f32.xlu0 %v5696_v10  ;;  %v5693_v12 = vsel %vm1459_vm1, %v5653_v53, 0.0 }
0x1195   : > { %5694 = vadd.xlane.f32.xlu1 %v5693_v12  ;;  %v5656_v37 = vmul.f32 %v15914_v31, %v15914_v31 }
0x1196   : > { %v5655_v62 = vmul.f32 %v15918_v8, %v15918_v8 }
0x1197   : > { %v5702_v20 = vsel %vm1459_vm1, %v5656_v37, 0.0 }
0x1198   : > { %5703 = vadd.xlane.f32.xlu0 %v5702_v20  ;;  %v5699_v11 = vsel %vm1459_vm1, %v5655_v62, 0.0 }
0x1199   : > { %5700 = vadd.xlane.f32.xlu1 %v5699_v11 }
0x11ee   : > { %v5662_v50 = vpop.xlane.xlu0 %5661 }
0x11ef   : > { %v5706_v17 = vmul.f32 0.03125, %v5662_v50  ;;  %v5659_v35 = vpop.xlane.xlu1 %5658 }
0x11f0   : > { %v5705_v2 = vmul.f32 0.03125, %v5659_v35 }
0x11f1   : > { %v5722_v28 = vadd.f32 1e-05, %v5706_v17 }
0x11f2   : > { %v5721_v7 = vadd.f32 1e-05, %v5705_v2 }
0x11f3   : > { %12919 = vrsqrt.f32 %v5722_v28 }
0x11f4   : > { %12921 = vrsqrt.f32 %v5721_v7 }
0x11f5   : > { %v5668_v46 = vpop.xlane.xlu0 %5667 }
0x11f6   : > { %v5708_v33 = vmul.f32 0.03125, %v5668_v46  ;;  %v5665_v39 = vpop.xlane.xlu1 %5664 }
0x11f7   : > { %v5707_v32 = vmul.f32 0.03125, %v5665_v39 }
0x11f8   : > { %v5724_v16 = vadd.f32 1e-05, %v5708_v33 }
0x11f9   : > { %v5723_v52 = vadd.f32 1e-05, %v5707_v32  ;;  %v5674_v49 = vpop.xlane.xlu0 %5673 }
0x11fa   : > { %12923 = vrsqrt.f32 %v5724_v16  ;;  %v5710_v58 = vmul.f32 0.03125, %v5674_v49  ;;  %v5671_v21 = vpop.xlane.xlu1 %5670 }
0x11fb   : > { %12925 = vrsqrt.f32 %v5723_v52  ;;  %v5709_v36 = vmul.f32 0.03125, %v5671_v21 }
0x11fc   : > { %v5726_v25 = vadd.f32 1e-05, %v5710_v58 }
0x11fd   : > { %v12920_v22 = vpop.eup %12919  ;;  %v5725_v38 = vadd.f32 1e-05, %v5709_v36  ;;  %v5680_v1 = vpop.xlane.xlu0 %5679 }
0x11fe   : > { %v12922_v34 = vpop.eup %12921  ;;  %v5754_v56 = vmul.f32 %v12920_v22, %v15832_v41  ;;  %12927 = vrsqrt.f32 %v5726_v25  ;;  %v5712_v59 = vmul.f32 0.03125, %v5680_v1  ;;  %v5677_v51 = vpop.xlane.xlu1 %5676 }
0x11ff   : > { %v5753_v0 = vmul.f32 %v12922_v34, %v15835_v15  ;;  %12929 = vrsqrt.f32 %v5725_v38  ;;  %v5711_v63 = vmul.f32 0.03125, %v5677_v51 }
0x1200   : > { %v5776_v45 = vmul.f32 %v15931_v55, %v5754_v56  ;;  %v5728_v27 = vadd.f32 1e-05, %v5712_v59 }
0x1201   : > { %v5775_v13 = vmul.f32 %v15931_v55, %v5753_v0  ;;  %v5727_v30 = vadd.f32 1e-05, %v5711_v63  ;;  %v5686_v18 = vpop.xlane.xlu0 %5685 }
0x1202   : > { %v5798_v47 = vadd.f32 %v15934_v3, %v5776_v45  ;;  %12931 = vrsqrt.f32 %v5728_v27  ;;  %v5714_v41 = vmul.f32 0.03125, %v5686_v18  ;;  %v5683_v24 = vpop.xlane.xlu1 %5682 }
0x1203   : > { %v5797_v48 = vadd.f32 %v15934_v3, %v5775_v13  ;;  %12933 = vrsqrt.f32 %v5727_v30  ;;  %v5713_v14 = vmul.f32 0.03125, %v5683_v24 }
0x1204   : > { %v12924_v44 = vpop.eup %12923  ;;  %5814 = vst.msk [vmem:[#allocation2 + $0x8] sm:$0xff] %vm1459_vm1, %v5798_v47  ;;  %v5730_v15 = vadd.f32 1e-05, %v5714_v41 }
0x1205   : > { %v12926_v9 = vpop.eup %12925  ;;  %5813 = vst.msk [vmem:[#allocation2] sm:$0xff] %vm1459_vm1, %v5797_v48  ;;  %v5756_v5 = vmul.f32 %v12924_v44, %v15844_v54  ;;  %v5729_v57 = vadd.f32 1e-05, %v5713_v14  ;;  %v5692_v53 = vpop.xlane.xlu0 %5691 }
0x1206   : > { %v5755_v10 = vmul.f32 %v12926_v9, %v15847_v19  ;;  %12935 = vrsqrt.f32 %v5730_v15  ;;  %v5716_v12 = vmul.f32 0.03125, %v5692_v53  ;;  %v5689_v37 = vpop.xlane.xlu1 %5688 }
0x1207   : > { %v5778_v62 = vmul.f32 %v15931_v55, %v5756_v5  ;;  %12937 = vrsqrt.f32 %v5729_v57  ;;  %v5715_v20 = vmul.f32 0.03125, %v5689_v37 }
0x1208   : > { %v12928_v11 = vpop.eup %12927  ;;  %v5777_v50 = vmul.f32 %v15931_v55, %v5755_v10  ;;  %v5732_v17 = vadd.f32 1e-05, %v5716_v12 }
0x1209   : > { %v12930_v35 = vpop.eup %12929  ;;  %v5800_v2 = vadd.f32 %v15934_v3, %v5778_v62  ;;  %v5758_v54 = vmul.f32 %v12928_v11, %v15854_v60  ;;  %v5731_v28 = vadd.f32 1e-05, %v5715_v20 }
0x120a   : > { %v5799_v7 = vadd.f32 %v15934_v3, %v5777_v50  ;;  %v5757_v19 = vmul.f32 %v12930_v35, %v15858_v26  ;;  %12939 = vrsqrt.f32 %v5732_v17 }
0x120b   : > { %5816 = vst.msk [vmem:[#allocation2 + $0x18] sm:$0xff] %vm1459_vm1, %v5800_v2  ;;  %v5780_v46 = vmul.f32 %v15931_v55, %v5758_v54  ;;  %12941 = vrsqrt.f32 %v5731_v28 }
0x120c   : > { %v12932_v33 = vpop.eup %12931  ;;  %5815 = vst.msk [vmem:[#allocation2 + $0x10] sm:$0xff] %vm1459_vm1, %v5799_v7  ;;  %v5779_v39 = vmul.f32 %v15931_v55, %v5757_v19 }
0x120d   : > { %v12934_v32 = vpop.eup %12933  ;;  %v5802_v16 = vadd.f32 %v15934_v3, %v5780_v46  ;;  %v5760_v60 = vmul.f32 %v12932_v33, %v15866_v61 }
0x120e   : > { %v5801_v52 = vadd.f32 %v15934_v3, %v5779_v39  ;;  %v5759_v26 = vmul.f32 %v12934_v32, %v15870_v40 }
0x120f   : > { %5818 = vst.msk [vmem:[#allocation2 + $0x28] sm:$0xff] %vm1459_vm1, %v5802_v16  ;;  %v5782_v49 = vmul.f32 %v15931_v55, %v5760_v60 }
0x1210   : > { %v12936_v58 = vpop.eup %12935  ;;  %5817 = vst.msk [vmem:[#allocation2 + $0x20] sm:$0xff] %vm1459_vm1, %v5801_v52  ;;  %v5781_v21 = vmul.f32 %v15931_v55, %v5759_v26 }
0x1211   : > { %v12938_v36 = vpop.eup %12937  ;;  %v5804_v25 = vadd.f32 %v15934_v3, %v5782_v49  ;;  %v5762_v22 = vmul.f32 %v12936_v58, %v15878_v6 }
0x1212   : > { %v5803_v61 = vadd.f32 %v15934_v3, %v5781_v21  ;;  %v5761_v38 = vmul.f32 %v12938_v36, %v15882_v29 }
0x1213   : > { %5820 = vst.msk [vmem:[#allocation2 + $0x38] sm:$0xff] %vm1459_vm1, %v5804_v25  ;;  %v5784_v40 = vmul.f32 %v15931_v55, %v5762_v22 }
0x1214   : > { %v12940_v1 = vpop.eup %12939  ;;  %5819 = vst.msk [vmem:[#allocation2 + $0x30] sm:$0xff] %vm1459_vm1, %v5803_v61  ;;  %v5783_v34 = vmul.f32 %v15931_v55, %v5761_v38 }
0x1215   : > { %v12942_v56 = vpop.eup %12941  ;;  %v5806_v59 = vadd.f32 %v15934_v3, %v5784_v40  ;;  %v5764_v51 = vmul.f32 %v12940_v1, %v15890_v43 }
0x1216   : > { %v5805_v6 = vadd.f32 %v15934_v3, %v5783_v34  ;;  %v5763_v0 = vmul.f32 %v12942_v56, %v15894_v23 }
0x1217   : > { %5822 = vst.msk [vmem:[#allocation2 + $0x48] sm:$0xff] %vm1459_vm1, %v5806_v59  ;;  %v5786_v29 = vmul.f32 %v15931_v55, %v5764_v51 }
0x1218   : > { %5821 = vst.msk [vmem:[#allocation2 + $0x40] sm:$0xff] %vm1459_vm1, %v5805_v6  ;;  %v5785_v63 = vmul.f32 %v15931_v55, %v5763_v0 }
0x1219   : > { %v5808_v45 = vadd.f32 %v15934_v3, %v5786_v29 }
0x121a   : > { %v5807_v27 = vadd.f32 %v15934_v3, %v5785_v63 }
0x121b   : > { %5824 = vst.msk [vmem:[#allocation2 + $0x58] sm:$0xff] %vm1459_vm1, %v5808_v45 }
0x121c   : > { %5823 = vst.msk [vmem:[#allocation2 + $0x50] sm:$0xff] %vm1459_vm1, %v5807_v27 }
0x1221   : > { %v5698_v43 = vpop.xlane.xlu0 %5697 }
0x1222   : > { %v5718_v13 = vmul.f32 0.03125, %v5698_v43  ;;  %v5695_v30 = vpop.xlane.xlu1 %5694 }
0x1223   : > { %v5717_v23 = vmul.f32 0.03125, %v5695_v30 }
0x1224   : > { %v5734_v18 = vadd.f32 1e-05, %v5718_v13 }
0x1225   : > { %v5733_v47 = vadd.f32 1e-05, %v5717_v23  ;;  %v5704_v41 = vpop.xlane.xlu0 %5703 }
0x1226   : > { %12943 = vrsqrt.f32 %v5734_v18  ;;  %v5720_v24 = vmul.f32 0.03125, %v5704_v41  ;;  %v5701_v48 = vpop.xlane.xlu1 %5700 }
0x1227   : > { %12945 = vrsqrt.f32 %v5733_v47  ;;  %v5719_v14 = vmul.f32 0.03125, %v5701_v48 }
0x1228   : > { %v5736_v44 = vadd.f32 1e-05, %v5720_v24 }
0x1229   : > { %v5735_v15 = vadd.f32 1e-05, %v5719_v14 }
0x122a   : > { %12947 = vrsqrt.f32 %v5736_v44 }
0x122b   : > { %12949 = vrsqrt.f32 %v5735_v15 }
0x1230   : > { %v12944_v9 = vpop.eup %12943 }
0x1231   : > { %v12946_v5 = vpop.eup %12945  ;;  %v5766_v57 = vmul.f32 %v12944_v9, %v15904_v42 }
0x1232   : > { %v5765_v53 = vmul.f32 %v12946_v5, %v15907_v4 }
0x1233   : > { %v5788_v10 = vmul.f32 %v15931_v55, %v5766_v57 }
0x1234   : > { %v12948_v12 = vpop.eup %12947  ;;  %v5787_v37 = vmul.f32 %v15931_v55, %v5765_v53 }
0x1235   : > { %v12950_v62 = vpop.eup %12949  ;;  %v5810_v20 = vadd.f32 %v15934_v3, %v5788_v10  ;;  %v5768_v11 = vmul.f32 %v12948_v12, %v15914_v31 }
0x1236   : > { %v5809_v50 = vadd.f32 %v15934_v3, %v5787_v37  ;;  %v5767_v17 = vmul.f32 %v12950_v62, %v15918_v8 }
0x1237   : > { %5826 = vst.msk [vmem:[#allocation2 + $0x68] sm:$0xff] %vm1459_vm1, %v5810_v20  ;;  %v5790_v42 = vmul.f32 %v15931_v55, %v5768_v11 }
0x1238   : > { %5825 = vst.msk [vmem:[#allocation2 + $0x60] sm:$0xff] %vm1459_vm1, %v5809_v50  ;;  %v5789_v4 = vmul.f32 %v15931_v55, %v5767_v17 }
0x1239   : > { %v5812_v35 = vadd.f32 %v15934_v3, %v5790_v42 }
0x123a   : > { %v5811_v2 = vadd.f32 %v15934_v3, %v5789_v4 }
0x123b   : > { %5828 = vst.msk [vmem:[#allocation2 + $0x78] sm:$0xff] %vm1459_vm1, %v5812_v35 }
0x123c   : > { %5827 = vst.msk [vmem:[#allocation2 + $0x70] sm:$0xff] %vm1459_vm1, %v5811_v2 }
0x123d PF: > { %p9557_p12 = scmp.ne.s32.totalorder %s13430_s28, 2 }
0x123e   : > { %s16815_s22 = sld [smem:[#allocation7_spill]] (!%p9557_p12)  ;;  %vm5835_vm7 = vcmask (!%p9557_p12), 261120   ;;  %v5833_v28 = vld [vmem:[%s13805_s15] sm:$0xff] (!%p9557_p12)  ;;  %v5834_v7 = vld [vmem:[%s13805_s15 + $0x8] sm:$0xff] (!%p9557_p12)  ;;  %v9558_v39 = vld [vmem:[#allocation4] ss:$0 sm:$0xff] (!%p9557_p12) }
0x123f   : > { %5832 = sbr.rel (%p9557_p12) target bundleno = 4929 (0x1341), region = 192  ;;  %5836 = vst.msk [vmem:[#allocation3] sm:$0xff] (!%p9557_p12), %vm5835_vm7, %v5833_v28  ;;  %5837 = vst.msk [vmem:[#allocation3 + $0x8] sm:$0xff] (!%p9557_p12), %vm5835_vm7, %v5834_v7  ;;  %v5838_v46 = vld [vmem:[%s13808_s7] sm:$0xff] (!%p9557_p12)  ;;  %v5839_v33 = vld [vmem:[%s13808_s7 + $0x8] sm:$0xff] (!%p9557_p12)  ;;  %vm5944_vm8 = vcmask (!%p9557_p12), 15360  }
0x1240   : > { %10947 = vmatprep.mubr.msk.f32.mxu0 (!%p9557_p12), %vm5835_vm7, %v5838_v46 }
0x1244   : > { %v5840_v31 = vld [vmem:[%s16815_s22] sm:$0xff] (!%p9557_p12)  ;;  %v5841_v8 = vld [vmem:[%s16815_s22 + $0x8] sm:$0xff] (!%p9557_p12)  ;;  %v5842_v55 = vld [vmem:[%s16815_s22 + $0x10] sm:$0xff] (!%p9557_p12) }
0x1245   : > { %v11771_v3 = vpack.c.bf16 (!%p9557_p12), %v5841_v8, %v5840_v31  ;;  %v5843_v54 = vld [vmem:[%s16815_s22 + $0x18] sm:$0xff] (!%p9557_p12) }
0x1246   : > { %v11775_v19 = vpack.c.bf16 %v5843_v54, %v5842_v55 }
0x1247   : > { %11772 = vmatprep.subr.bf16.mxu0 %v11771_v3 }
0x1248   : > { %11774 = vmatpush3.bf16.msra.mxu0 %v11771_v3 }
0x1249   : > { %11776 = vmatprep.subr.bf16.mxu0 %v11775_v19 }
0x124c   : > { %11778 = vmatpush3.bf16.msra.mxu0 %v11775_v19 }
0x124f   : > { %10948 = vmatmul.mubr.msk.f32.vlgmr.msra.gmra.mrb[0].mxu0 %vm5835_vm7, %v5839_v33 }
0x1322   : > { %v10949_v32 = vpop.f32.mrb[0].mxu0 }
0x1323   : > { %v5929_v16 = vadd.f32 %v10949_v32, %v9558_v39  ;;  %v5923_v60 = vpop.f32.mrb[1].mxu0 }
0x1324   : > { %v5924_v52 = vadd.f32 %v9558_v39, %v5923_v60 }
0x1325   : > { %v9562_v26 = vmul.f32 -1.442695, %v5929_v16 }
0x1326   : > { %v9561_v49 = vmul.f32 -1.442695, %v5924_v52 }
0x1327   : > { %12967 = vpow2.f32 %v9562_v26 }
0x1328   : > { %12969 = vpow2.f32 %v9561_v49 }
0x1331   : > { %v12968_v58 = vpop.eup %12967 }
0x1332   : > { %v12970_v21 = vpop.eup %12969  ;;  %v5939_v36 = vadd.f32 1.0, %v12968_v58 }
0x1333   : > { %v5938_v25 = vadd.f32 1.0, %v12970_v21 }
0x1334   : > { %12971 = vrcp.f32 %v5939_v36 }
0x1335   : > { %12973 = vrcp.f32 %v5938_v25 }
0x133e   : > { %v12972_v22 = vpop.eup %12971 }
0x133f   : > { %v12974_v61 = vpop.eup %12973  ;;  %5946 = vst.msk [vmem:[%s13811_s2 + $0x8] sm:$0xff] %vm5944_vm8, %v12972_v22 }
0x1340   : > { %5945 = vst.msk [vmem:[%s13811_s2] sm:$0xff] %vm5944_vm8, %v12974_v61 }
0x1341 PF: > { %p9563_p13 = scmp.lt.s32.totalorder %s13430_s28, 2 }
0x1342   : > { %s16816_s15 = sld [smem:[#allocation38_spill]] (!%p9563_p13)  ;;  %s16817_s29 = sld [smem:[#allocation13_spill]] (!%p9563_p13)  ;;  %v16014_v38 = vld [vmem:[#allocation3] sm:$0xff] (!%p9563_p13)  ;;  %vm6000_vm9 = vcmask (!%p9563_p13), 261120   ;;  %v16027_v45 = vld [vmem:[#allocation3 + $0x8] sm:$0xff] (!%p9563_p13)  ;;  %vm6195_vm10 = vcmask (!%p9563_p13), 64512   ;;  %v5972_v31 = vlaneseq (!%p9563_p13) }
0x1343   : > { %5950 = sbr.rel (%p9563_p13) target bundleno = 11938 (0x2ea2), region = 196  ;;  %v16017_v40 = vld [vmem:[%s13808_s7] sm:$0xff] (!%p9563_p13)  ;;  %10969 = vmatprep.mubr.msk.f32.mxu1 (!%p9563_p13), %vm6000_vm9, %v16014_v38  ;;  %s13500_s28 = smov (!%p9563_p13), 64   ;;  %v16030_v27 = vld [vmem:[%s13808_s7 + $0x8] sm:$0xff] (!%p9563_p13)  ;;  %vm16061_vm11 = vmpackc.low (!%p9563_p13), %vm6195_vm10, %vm6195_vm10  ;;  %v13504_v3 = vmov (!%p9563_p13), 0.0   ;;  %vm6283_vm13 = vcmask (!%p9563_p13), 130048  }
0x1344   : > { %v5992_v1 = vadd.f32 (!%p9563_p13), %v16017_v40, %v16014_v38  ;;  %v5993_v43 = vadd.f32 (!%p9563_p13), %v16030_v27, %v16027_v45  ;;  %s16818_s2 = sld [smem:[#allocation14_spill]] (!%p9563_p13)  ;;  %s13501_s10 = smov (!%p9563_p13), 120   ;;  %v5973_v8 = vand.u32 (!%p9563_p13), 127, %v5972_v31  ;;  %vm7029_vm14 = vcmask (!%p9563_p13), 195584  }
0x1345   : > { %s13502_s16 = smov (!%p9563_p13), 96   ;;  %s13503_s18 = smov (!%p9563_p13), 88   ;;  %vm8906_vm15 = vcmask (!%p9563_p13), 523264  }
0x1346   : > { %10958 = vmatprep.mubr.msk.f32.mxu0 (!%p9563_p13), %vm6000_vm9, %v5992_v1  ;;  %vm5974_vm12 = vcmp.ge.s32.totalorder (!%p9563_p13), %v5973_v8, 10  ;;  %s13505_s26 = smov (!%p9563_p13), 112   ;;  %s13506_s25 = smov (!%p9563_p13), 80  }
0x1347   : > { %v16077_v54 = vsel (!%p9563_p13), %vm5974_vm12, -1e+09, %v13504_v3  ;;  %s13507_s0 = smov (!%p9563_p13), 72  }
0x1348   : > { %s16012_s4 = sshll.u32 (!%p9563_p13), %s16816_s15, 5 }
0x1349   : > { %s5985_s1 = scalar_lea.vmem (!%p9563_p13), %s16817_s29, %s16012_s4  ;;  %s13508_s29 = smov (!%p9563_p13), 104  }
0x134a   : > { %v5986_v34 = vld [vmem:[%s5985_s1] sm:$0xff]  ;;  %v5987_v56 = vld [vmem:[%s5985_s1 + $0x8] sm:$0xff]  ;;  %v5988_v59 = vld [vmem:[%s5985_s1 + $0x10] sm:$0xff]  ;;  %s5990_s7 = scalar_lea.vmem %s16818_s2, %s16816_s15  ;;  %s16821_s2 = sld [smem:[#allocation15_spill]] }
0x134b   : > { %v11779_v51 = vpack.c.bf16 %v5987_v56, %v5986_v34  ;;  %v5989_v6 = vld [vmem:[%s5985_s1 + $0x18] sm:$0xff]  ;;  %v12975_v0 = vpack.i.bf16 %v5987_v56, %v5986_v34  ;;  %v9566_v14 = vld [vmem:[%s5990_s7] ss:$0 sm:$0xff]  ;;  %s16679_s1 = smov 8  }
0x134c   : > { %v11783_v29 = vpack.c.bf16 %v5989_v6, %v5988_v59  ;;  %v12980_v63 = vpack.i.bf16 %v5989_v6, %v5988_v59 }
0x134d   : > { %11780 = vmatprep.subr.bf16.mxu0 %v11779_v51  ;;  %12976 = vrot.lane.b32.xlu0 %v12975_v0, %s13500_s28 }
0x134e   : > { %11782 = vmatpush3.bf16.msra.mxu0 %v11779_v51 }
0x134f   : > { %11784 = vmatprep.subr.bf16.mxu0 %v11783_v29 }
0x1350   : > { %s6182_s7 = scalar_lea.vmem %s16821_s2, %s16012_s4  ;;  %s16823_s2 = sld [smem:[#allocation21_spill]] }
0x1351   : > { %12981 = vrot.lane.b32.xlu0 %v12980_v63, %s13500_s28 }
0x1352   : > { %11786 = vmatpush3.bf16.msra.mxu0 %v11783_v29 }
0x1355   : > { %10959 = vmatmul.mubr.msk.f32.vlgmr.msra.gmra.mrb[0].mxu0 %vm6000_vm9, %v5993_v43 }
0x13bf   : > { %v12977_v13 = vpop.permute.xlu0 %12976 }
0x13c0   : > { %v12979_v30 = vunpack.i.h.bf16 %v12977_v13  ;;  %v12978_v23 = vunpack.i.l.bf16 %v12977_v13 }
0x13c2   : > { %v11787_v18 = vpack.c.bf16 %v12979_v30, %v12978_v23 }
0x13c3   : > { %v12982_v47 = vpop.permute.xlu0 %12981 }
0x13c4   : > { %v12984_v41 = vunpack.i.h.bf16 %v12982_v47  ;;  %v12983_v24 = vunpack.i.l.bf16 %v12982_v47  ;;  %11788 = vmatprep.subr.bf16.mxu1 %v11787_v18 }
0x13c5   : > { %11790 = vmatpush3.bf16.msra.mxu1 %v11787_v18 }
0x13c6   : > { %v11791_v48 = vpack.c.bf16 %v12984_v41, %v12983_v24 }
0x13c8   : > { %11792 = vmatprep.subr.bf16.mxu1 %v11791_v48 }
0x13c9   : > { %11794 = vmatpush3.bf16.msra.mxu1 %v11791_v48 }
0x13cc   : > { %10970 = vmatmul.mubr.msk.f32.vlgmr.msra.gmra.mrb[0].mxu1 %vm6000_vm9, %v16027_v45 }
0x1428   : > { %v10960_v44 = vpop.f32.mrb[0].mxu0 }
0x1429   : > { %v16040_v15 = vadd.f32 %v10960_v44, %v9566_v14  ;;  %v6073_v9 = vpop.f32.mrb[1].mxu0 }
0x142a   : > { %v16042_v5 = vadd.f32 %v9566_v14, %v6073_v9 }
0x142c   : > { %6387 = vrot.lane.b32.xlu0 %v16042_v5, %s13501_s10  ;;  %10976 = vmatprep.mubr.msk.f32.mxu0 %vm6195_vm10, %v16042_v5  ;;  %v16050_v57 = vpack.i.bf16 %v16040_v15, %v16042_v5 }
0x142e   : > { %12986 = vrot.lane.b32.xlu1 %v16050_v57, %s13502_s16 }
0x1432   : > { %12991 = vrot.lane.b32.xlu1 %v16050_v57, %s13503_s18 }
0x1436   : > { %6389 = vrot.lane.b32.xlu1 %v16040_v15, %s13501_s10 }
0x149e   : > { %v6388_v53 = vpop.permute.xlu0 %6387 }
0x149f   : > { %10990 = vmatprep.mubr.msk.f32.mxu1 %vm6195_vm10, %v6388_v53  ;;  %v10971_v10 = vpop.f32.mrb[0].mxu1 }
0x14a0   : > { %v12987_v12 = vpop.permute.xlu1 %12986  ;;  %v6173_v37 = vpop.f32.mrb[1].mxu1 }
0x14a1   : > { %v12989_v62 = vunpack.i.h.bf16 %v12987_v12  ;;  %v12988_v20 = vunpack.i.l.bf16 %v12987_v12 }
0x14a3   : > { %v11795_v50 = vpack.c.bf16 %v12989_v62, %v12988_v20 }
0x14a4   : > { %v12992_v17 = vpop.permute.xlu1 %12991 }
0x14a5   : > { %v12994_v42 = vunpack.i.h.bf16 %v12992_v17  ;;  %v12993_v4 = vunpack.i.l.bf16 %v12992_v17  ;;  %11797 = vmatprep.subr.msk.bf16.mxu0 %vm16061_vm11, %v11795_v50 }
0x14a6   : > { %11800 = vmatpush3.bf16.xpose.msk.msra.mxu0 %vm16061_vm11, %v11795_v50 }
0x14a7   : > { %v11805_v35 = vpack.c.bf16 %v12994_v42, %v12993_v4 }
0x14a8   : > { %v6390_v2 = vpop.permute.xlu1 %6389 }
0x14a9   : > { %11807 = vmatprep.subr.msk.bf16.mxu1 %vm16061_vm11, %v11805_v35 }
0x14aa   : > { %11810 = vmatpush3.bf16.xpose.msk.msra.mxu1 %vm16061_vm11, %v11805_v35 }
0x14ad   : > { %10977 = vmatmul.mubr.msk.f32.vlgmr.msra.gmra.mrb[2].mxu0 %vm6195_vm10, %v16040_v15 }
0x14b1   : > { %10991 = vmatmul.mubr.msk.f32.vlgmr.msra.gmra.mrb[2].mxu1 %vm6195_vm10, %v6390_v2 }
0x1580   : > { %v10978_v55 = vpop.f32.mrb[2].mxu0 }
0x1581   : > { %v6280_v28 = vmul.f32 0.35355338, %v10978_v55  ;;  %v6270_v7 = vpop.f32.mrb[3].mxu0 }
0x1582   : > { %v6279_v19 = vmul.f32 0.35355338, %v6270_v7 }
0x1583   : > { %v6282_v46 = vadd.f32 %v6280_v28, %v16077_v54 }
0x1584   : > { %v10992_v33 = vpop.f32.mrb[2].mxu1  ;;  %v6281_v39 = vadd.f32 %v6279_v19, %v16077_v54 }
0x1585   : > { %v6469_v32 = vpop.f32.mrb[3].mxu1  ;;  %v6287_v16 = vsel %vm6283_vm13, %v6282_v46, -inf  ;;  %v6479_v60 = vmul.f32 0.35355338, %v10992_v33 }
0x1586   : > { %v6478_v52 = vmul.f32 0.35355338, %v6469_v32  ;;  %6288 = vmax.xlane.f32.xlu1 %v6287_v16  ;;  %v6284_v26 = vsel %vm6283_vm13, %v6281_v39, -inf }
0x1587   : > { %6285 = vmax.xlane.f32.xlu0 %v6284_v26  ;;  %v6481_v21 = vadd.f32 %v6479_v60, %v16077_v54 }
0x1588   : > { %v6480_v49 = vadd.f32 %v6478_v52, %v16077_v54 }
0x1589   : > { %v6485_v36 = vsel %vm6283_vm13, %v6481_v21, -inf }
0x158a   : > { %v6482_v58 = vsel %vm6283_vm13, %v6480_v49, -inf }
0x158b   : > { %6483 = vmax.xlane.f32.xlu0 %v6482_v58 }
0x158f   : > { %6486 = vmax.xlane.f32.xlu0 %v6485_v36 }
0x1597   : > { %6098 = vrot.lane.b32.xlu1 %v9566_v14, %s13500_s28  ;;  %s16677_s28 = smov 16  }
0x1613   : > { %v6289_v25 = vpop.xlane.xlu1 %6288 }
0x1614   : > { %v6291_v22 = vsub.f32 %v6282_v46, %v6289_v25  ;;  %v6286_v61 = vpop.xlane.xlu0 %6285 }
0x1615   : > { %v6290_v29 = vsub.f32 %v6281_v39, %v6286_v61 }
0x1616   : > { %v6294_v1 = vmul.f32 1.442695, %v6291_v22 }
0x1617   : > { %v6099_v34 = vpop.permute.xlu1 %6098  ;;  %v6292_v13 = vmul.f32 1.442695, %v6290_v29 }
0x1618   : > { %13300 = vpow2.f32 %v6294_v1  ;;  %v6174_v56 = vadd.f32 %v6173_v37, %v6099_v34  ;;  %v6179_v59 = vadd.f32 %v10971_v10, %v6099_v34  ;;  %v6484_v51 = vpop.xlane.xlu0 %6483 }
0x1619   : > { %v6488_v30 = vsub.f32 %v6480_v49, %v6484_v51 }
0x161a   : > { %v16088_v6 = vpack.i.bf16 %v6179_v59, %v6174_v56  ;;  %v11801_v0 = vpack.c.bf16 %v6179_v59, %v6174_v56 }
0x161b   : > { %v6490_v47 = vmul.f32 1.442695, %v6488_v30 }
0x161c   : > { %12996 = vrot.lane.b32.xlu1 %v16088_v6, %s13501_s10  ;;  %11802 = vmatprep.subr.bf16.mxu0 %v11801_v0  ;;  %v6487_v63 = vpop.xlane.xlu0 %6486 }
0x161d   : > { %v6489_v43 = vsub.f32 %v6481_v21, %v6487_v63  ;;  %11804 = vmatpush3.bf16.msra.mxu0 %v11801_v0 }
0x161f   : > { %v6492_v23 = vmul.f32 1.442695, %v6489_v43 }
0x1620   : > { %6593 = vrot.lane.b32.xlu1 %v16042_v5, %s13505_s26 }
0x1621   : > { %13302 = vpow2.f32 %v6492_v23 }
0x1622   : > { %v13301_v18 = vpop.eup %13300  ;;  %13304 = vpow2.f32 %v6292_v13 }
0x1623   : > { %v6299_v41 = vsel %vm6283_vm13, %v13301_v18, 0.0  ;;  %13306 = vpow2.f32 %v6490_v47 }
0x1624   : > { %6595 = vrot.lane.b32.xlu1 %v16040_v15, %s13505_s26  ;;  %6300 = vadd.xlane.f32.xlu0 %v6299_v41 }
0x162b   : > { %v13303_v24 = vpop.eup %13302 }
0x162c   : > { %v6497_v48 = vsel %vm6283_vm13, %v13303_v24, 0.0  ;;  %v13305_v14 = vpop.eup %13304 }
0x162d   : > { %6498 = vadd.xlane.f32.xlu0 %v6497_v48  ;;  %v6296_v44 = vsel %vm6283_vm13, %v13305_v14, 0.0  ;;  %v13307_v9 = vpop.eup %13306 }
0x162e   : > { %v6494_v53 = vsel %vm6283_vm13, %v13307_v9, 0.0 }
0x1631   : > { %6297 = vadd.xlane.f32.xlu0 %v6296_v44 }
0x1635   : > { %6495 = vadd.xlane.f32.xlu0 %v6494_v53 }
0x164b   : > { %13001 = vrot.lane.b32.xlu0 %v16050_v57, %s13506_s25 }
0x168e   : > { %v12997_v10 = vpop.permute.xlu1 %12996 }
0x168f   : > { %v12999_v12 = vunpack.i.h.bf16 %v12997_v10  ;;  %v12998_v37 = vunpack.i.l.bf16 %v12997_v10 }
0x1691   : > { %v11811_v62 = vpack.c.bf16 %v12999_v12, %v12998_v37 }
0x1692   : > { %v6594_v32 = vpop.permute.xlu1 %6593 }
0x1693   : > { %11812 = vmatprep.subr.bf16.mxu0 %v11811_v62 }
0x1696   : > { %v6596_v16 = vpop.permute.xlu1 %6595 }
0x16b1   : > { %v6301_v20 = vpop.xlane.xlu0 %6300 }
0x16b2   : > { %13308 = vrcp.f32 %v6301_v20 }
0x16ba   : > { %v6499_v50 = vpop.xlane.xlu0 %6498 }
0x16bc   : > { %v13309_v35 = vpop.eup %13308 }
0x16bd   : > { %v6305_v28 = vmul.f32 %v13309_v35, %v13301_v18 }
0x16be   : > { %v6298_v17 = vpop.xlane.xlu0 %6297 }
0x16bf   : > { %13310 = vrcp.f32 %v6298_v17 }
0x16c0   : > { %13312 = vrcp.f32 %v6499_v50 }
0x16c2   : > { %v6496_v42 = vpop.xlane.xlu0 %6495 }
0x16c3   : > { %13314 = vrcp.f32 %v6496_v42 }
0x16c6   : > { %v13002_v4 = vpop.permute.xlu0 %13001 }
0x16c7   : > { %v13004_v8 = vunpack.i.h.bf16 %v13002_v4  ;;  %v13003_v55 = vunpack.i.l.bf16 %v13002_v4 }
0x16c9   : > { %v13311_v2 = vpop.eup %13310  ;;  %v11815_v46 = vpack.c.bf16 %v13004_v8, %v13003_v55 }
0x16ca   : > { %v6303_v3 = vmul.f32 %v13311_v2, %v13305_v14  ;;  %v13313_v7 = vpop.eup %13312 }
0x16cb   : > { %v6503_v39 = vmul.f32 %v13313_v7, %v13303_v24 }
0x16cc   : > { %10983 = vmatprep.mubr.msk.f32.mxu0 %vm6283_vm13, %v6303_v3 }
0x16cd   : > { %v13315_v19 = vpop.eup %13314  ;;  %10984 = vmatmul.mubr.msk.f32.vlgmr.msra.gmra.mrb[4].mxu0 %vm6283_vm13, %v6305_v28 }
0x16ce   : > { %11814 = vmatpush3.bf16.msra.mxu0 %v11811_v62  ;;  %v6501_v33 = vmul.f32 %v13315_v19, %v13307_v9 }
0x16cf   : > { %11817 = vmatprep.subr.msk.bf16.mxu0 %vm16061_vm11, %v11815_v46 }
0x16d0   : > { %10997 = vmatprep.mubr.msk.f32.mxu0 %vm6283_vm13, %v6501_v33 }
0x16d1   : > { %10998 = vmatmul.mubr.msk.f32.vlgmr.msra.gmra.mrb[6].mxu0 %vm6283_vm13, %v6503_v39 }
0x16d2   : > { %11004 = vmatprep.mubr.msk.f32.mxu0 %vm6195_vm10, %v6594_v32 }
0x16d7   : > { %11820 = vmatpush3.bf16.xpose.msk.msra.mxu0 %vm16061_vm11, %v11815_v46 }
0x16de   : > { %11005 = vmatmul.mubr.msk.f32.vlgmr.msra.gmra.mrb[8].mxu0 %vm6195_vm10, %v6596_v16 }
0x17a0   : > { %v16112_v60 = vpop.f32.mrb[4].mxu0 }
0x17a1   : > { %v16114_v52 = vpop.f32.mrb[5].mxu0 }
0x17a4   : > { %v16116_v26 = vpop.f32.mrb[6].mxu0 }
0x17a5   : > { %v16118_v49 = vpop.f32.mrb[7].mxu0 }
0x17b1   : > { %v11006_v58 = vpop.f32.mrb[8].mxu0 }
0x17b2   : > { %v6685_v21 = vmul.f32 0.35355338, %v11006_v58  ;;  %v6675_v36 = vpop.f32.mrb[9].mxu0 }
0x17b3   : > { %v6684_v25 = vmul.f32 0.35355338, %v6675_v36 }
0x17b4   : > { %v6687_v22 = vadd.f32 %v6685_v21, %v16077_v54 }
0x17b5   : > { %v6686_v61 = vadd.f32 %v6684_v25, %v16077_v54 }
0x17b6   : > { %v6691_v1 = vsel %vm6283_vm13, %v6687_v22, -inf }
0x17b7   : > { %6692 = vmax.xlane.f32.xlu0 %v6691_v1  ;;  %v6688_v34 = vsel %vm6283_vm13, %v6686_v61, -inf }
0x17b8   : > { %6689 = vmax.xlane.f32.xlu1 %v6688_v34 }
0x17c9   : > { %13011 = vrot.lane.b32.xlu1 %v16050_v57, %s13507_s0 }
0x17cd   : > { %13006 = vrot.lane.b32.xlu0 %v16088_v6, %s13505_s26 }
0x17d1   : > { %6799 = vrot.lane.b32.xlu0 %v16040_v15, %s13508_s29 }
0x1844   : > { %v6693_v56 = vpop.xlane.xlu0 %6692 }
0x1845   : > { %v6695_v59 = vsub.f32 %v6687_v22, %v6693_v56  ;;  %v6690_v51 = vpop.xlane.xlu1 %6689  ;;  %v6183_v56 = vld [vmem:[%s6182_s7] sm:$0xff] }
0x1846   : > { %v6694_v0 = vsub.f32 %v6686_v61, %v6690_v51  ;;  %v6185_v51 = vld [vmem:[%s6182_s7 + $0x10] sm:$0xff] }
0x1847   : > { %v6698_v29 = vmul.f32 1.442695, %v6695_v59  ;;  %v6184_v59 = vld [vmem:[%s6182_s7 + $0x8] sm:$0xff] }
0x1848   : > { %v6696_v63 = vmul.f32 1.442695, %v6694_v0  ;;  %v13007_v43 = vpop.permute.xlu0 %13006  ;;  %v11835_v0 = vpack.c.bf16 %v6184_v59, %v6183_v56  ;;  %v5971_v56 = vld [vmem:[#allocation2 + $0x78] sm:$0xff] }
0x1849   : > { %13316 = vpow2.f32 %v6698_v29  ;;  %v13009_v13 = vunpack.i.h.bf16 %v13007_v43  ;;  %v13008_v30 = vunpack.i.l.bf16 %v13007_v43  ;;  %v13012_v23 = vpop.permute.xlu1 %13011  ;;  %v6186_v29 = vld [vmem:[%s6182_s7 + $0x18] sm:$0xff] }
0x184a   : > { %v13014_v18 = vunpack.i.h.bf16 %v13012_v23  ;;  %v13013_v57 = vunpack.i.l.bf16 %v13012_v23  ;;  %13318 = vpow2.f32 %v6696_v63  ;;  %v11839_v63 = vpack.c.bf16 %v6186_v29, %v6185_v51 }
0x184b   : > { %v11821_v47 = vpack.c.bf16 %v13009_v13, %v13008_v30 }
0x184c   : > { %v11825_v41 = vpack.c.bf16 %v13014_v18, %v13013_v57  ;;  %v6800_v20 = vpop.permute.xlu0 %6799 }
0x184d   : > { %11822 = vmatprep.subr.bf16.mxu1 %v11821_v47 }
0x184e   : > { %11824 = vmatpush3.bf16.msra.mxu1 %v11821_v47 }
0x184f   : > { %11827 = vmatprep.subr.msk.bf16.mxu1 %vm16061_vm11, %v11825_v41 }
0x1853   : > { %v13317_v15 = vpop.eup %13316 }
0x1854   : > { %v6703_v24 = vsel %vm6283_vm13, %v13317_v15, 0.0  ;;  %v13319_v48 = vpop.eup %13318 }
0x1855   : > { %6704 = vadd.xlane.f32.xlu1 %v6703_v24  ;;  %v6700_v14 = vsel %vm6283_vm13, %v13319_v48, 0.0 }
0x1859   : > { %6701 = vadd.xlane.f32.xlu1 %v6700_v14 }
0x186a   : > { %6797 = vrot.lane.b32.xlu1 %v16042_v5, %s13508_s29 }
0x18e2   : > { %v6705_v44 = vpop.xlane.xlu1 %6704 }
0x18e3   : > { %13320 = vrcp.f32 %v6705_v44 }
0x18e6   : > { %v6702_v9 = vpop.xlane.xlu1 %6701 }
0x18e7   : > { %13322 = vrcp.f32 %v6702_v9 }
0x18ea   : > { %v6798_v62 = vpop.permute.xlu1 %6797 }
0x18ed   : > { %v13321_v53 = vpop.eup %13320 }
0x18ee   : > { %v6709_v37 = vmul.f32 %v13321_v53, %v13317_v15 }
0x18f1   : > { %v13323_v10 = vpop.eup %13322 }
0x18f2   : > { %v6707_v12 = vmul.f32 %v13323_v10, %v13319_v48 }
0x18f4   : > { %11011 = vmatprep.mubr.msk.f32.mxu1 %vm6283_vm13, %v6707_v12 }
0x18f5   : > { %11012 = vmatmul.mubr.msk.f32.vlgmr.msra.gmra.mrb[4].mxu1 %vm6283_vm13, %v6709_v37 }
0x18f6   : > { %11830 = vmatpush3.bf16.xpose.msk.msra.mxu1 %vm16061_vm11, %v11825_v41  ;;  %11018 = vmatprep.mubr.msk.f32.mxu1 %vm6195_vm10, %v6798_v62 }
0x18fd   : > { %11019 = vmatmul.mubr.msk.f32.vlgmr.msra.gmra.mrb[6].mxu1 %vm6195_vm10, %v6800_v20 }
0x19c8   : > { %v11013_v5 = vpop.f32.mrb[4].mxu1 }
0x19c9   : > { %v6788_v50 = vpop.f32.mrb[5].mxu1 }
0x19d0   : > { %v11020_v17 = vpop.f32.mrb[6].mxu1 }
0x19d1   : > { %v6889_v42 = vmul.f32 0.35355338, %v11020_v17  ;;  %v6879_v4 = vpop.f32.mrb[7].mxu1 }
0x19d2   : > { %v6888_v35 = vmul.f32 0.35355338, %v6879_v4 }
0x19d3   : > { %v6891_v2 = vadd.f32 %v6889_v42, %v16077_v54 }
0x19d4   : > { %v6890_v8 = vadd.f32 %v6888_v35, %v16077_v54 }
0x19d5   : > { %v6895_v55 = vsel %vm6283_vm13, %v6891_v2, -inf }
0x19d6   : > { %6896 = vmax.xlane.f32.xlu0 %v6895_v55  ;;  %v6892_v3 = vsel %vm6283_vm13, %v6890_v8, -inf  ;;  %v5959_v55 = vld [vmem:[#allocation2 + $0x18] sm:$0xff] }
0x19d7   : > { %6893 = vmax.xlane.f32.xlu1 %v6892_v3  ;;  %v5960_v3 = vld [vmem:[#allocation2 + $0x20] sm:$0xff] }
0x1a63   : > { %v6897_v28 = vpop.xlane.xlu0 %6896 }
0x1a64   : > { %v6899_v7 = vsub.f32 %v6891_v2, %v6897_v28  ;;  %v6894_v19 = vpop.xlane.xlu1 %6893  ;;  %v5961_v28 = vld [vmem:[#allocation2 + $0x28] sm:$0xff] }
0x1a65   : > { %v6898_v46 = vsub.f32 %v6890_v8, %v6894_v19  ;;  %v5963_v19 = vld [vmem:[#allocation2 + $0x38] sm:$0xff] }
0x1a66   : > { %v6902_v33 = vmul.f32 1.442695, %v6899_v7  ;;  %v5962_v7 = vld [vmem:[#allocation2 + $0x30] sm:$0xff] }
0x1a67   : > { %v6900_v39 = vmul.f32 1.442695, %v6898_v46  ;;  %v5964_v46 = vld [vmem:[#allocation2 + $0x40] sm:$0xff] }
0x1a68   : > { %13324 = vpow2.f32 %v6902_v33  ;;  %v5965_v33 = vld [vmem:[#allocation2 + $0x48] sm:$0xff] }
0x1a69   : > { %13326 = vpow2.f32 %v6900_v39  ;;  %v5966_v39 = vld [vmem:[#allocation2 + $0x50] sm:$0xff] }
0x1a72   : > { %v13325_v32 = vpop.eup %13324 }
0x1a73   : > { %v13327_v16 = vpop.eup %13326  ;;  %v6907_v58 = vsel %vm6283_vm13, %v13325_v32, 0.0 }
0x1a74   : > { %6908 = vadd.xlane.f32.xlu1 %v6907_v58  ;;  %v6904_v54 = vsel %vm6283_vm13, %v13327_v16, 0.0 }
0x1a75   : > { %6905 = vadd.xlane.f32.xlu0 %v6904_v54 }
0x1a85   : > { %7003 = vrot.lane.b32.xlu1 %v16118_v49, %s16679_s1 }
0x1a89   : > { %7005 = vrot.lane.b32.xlu1 %v16116_v26, %s16679_s1  ;;  %s16822_s1 = sld [smem:[#allocation16_spill]] }
0x1a8b   : > { %13016 = vrot.lane.b32.xlu0 %v16088_v6, %s13508_s29 }
0x1a8d   : > { %7013 = vrot.lane.b32.xlu1 %v11013_v5, %s16677_s28 }
0x1a8f   : > { %7011 = vrot.lane.b32.xlu0 %v6788_v50, %s16677_s28  ;;  %s16681_s28 = smov 24   ;;  %s6187_s7 = scalar_lea.vmem %s16822_s1, %s16816_s15  ;;  %v5956_v50 = vld [vmem:[#allocation2] sm:$0xff] }
0x1a90   : > { %s16824_s1 = sld [smem:[#allocation19_spill]] }
0x1b01   : > { %v6909_v21 = vpop.xlane.xlu1 %6908 }
0x1b02   : > { %13328 = vrcp.f32 %v6909_v21  ;;  %v6906_v36 = vpop.xlane.xlu0 %6905 }
0x1b03   : > { %13330 = vrcp.f32 %v6906_v36 }
0x1b05   : > { %v7004_v30 = vpop.permute.xlu1 %7003 }
0x1b06   : > { %v13017_v25 = vpop.permute.xlu0 %13016  ;;  %v7025_v47 = vsel %vm6195_vm10, %v16114_v52, %v7004_v30  ;;  %v9595_v52 = vld [vmem:[%s6187_s7] ss:$0 sm:$0xff] }
0x1b07   : > { %v13019_v22 = vunpack.i.h.bf16 %v13017_v25  ;;  %v13018_v49 = vunpack.i.l.bf16 %v13017_v25 }
0x1b09   : > { %v11831_v61 = vpack.c.bf16 %v13019_v22, %v13018_v49  ;;  %v7006_v23 = vpop.permute.xlu1 %7005 }
0x1b0a   : > { %v7012_v57 = vpop.permute.xlu0 %7011  ;;  %v7026_v15 = vsel %vm6195_vm10, %v16112_v60, %v7006_v23 }
0x1b0b   : > { %11832 = vmatprep.subr.bf16.mxu0 %v11831_v61  ;;  %v7027_v24 = vsel %vm6283_vm13, %v7025_v47, %v7012_v57 }
0x1b0c   : > { %v13329_v26 = vpop.eup %13328  ;;  %11834 = vmatpush3.bf16.msra.mxu0 %v11831_v61 }
0x1b0d   : > { %v13331_v1 = vpop.eup %13330  ;;  %v6913_v34 = vmul.f32 %v13329_v26, %v13325_v32  ;;  %11836 = vmatprep.subr.bf16.mxu0 %v11835_v0  ;;  %v7014_v18 = vpop.permute.xlu1 %7013  ;;  %v5967_v26 = vld [vmem:[#allocation2 + $0x58] sm:$0xff] }
0x1b0e   : > { %v6911_v6 = vmul.f32 %v13331_v1, %v13327_v16  ;;  %v7028_v14 = vsel %vm6283_vm13, %v7026_v15, %v7014_v18  ;;  %v5968_v1 = vld [vmem:[#allocation2 + $0x60] sm:$0xff] }
0x1b10   : > { %11025 = vmatprep.mubr.msk.f32.mxu0 %vm6283_vm13, %v6911_v6  ;;  %v5969_v6 = vld [vmem:[#allocation2 + $0x68] sm:$0xff] }
0x1b11   : > { %11026 = vmatmul.mubr.msk.f32.vlgmr.msra.gmra.mrb[10].mxu0 %vm6283_vm13, %v6913_v34  ;;  %v5970_v34 = vld [vmem:[#allocation2 + $0x70] sm:$0xff] }
0x1b12   : > { %11838 = vmatpush3.bf16.msra.mxu0 %v11835_v0 }
0x1b13   : > { %11840 = vmatprep.subr.bf16.mxu0 %v11839_v63 }
0x1b16   : > { %11842 = vmatpush3.bf16.msra.mxu0 %v11839_v63 }
0x1be4   : > { %v11027_v43 = vpop.f32.mrb[10].mxu0 }
0x1be5   : > { %7021 = vrot.lane.b32.xlu1 %v11027_v43, %s16681_s28  ;;  %v6992_v13 = vpop.f32.mrb[11].mxu0 }
0x1be6   : > { %7019 = vrot.lane.b32.xlu0 %v6992_v13, %s16681_s28  ;;  %s7264_s28 = scalar_lea.vmem %s16823_s2, %s16012_s4  ;;  %s7170_s2 = scalar_lea.vmem %s16824_s1, %s16012_s4 }
0x1be7   : > { %v7265_v17 = vld [vmem:[%s7264_s28] sm:$0xff]  ;;  %v7266_v42 = vld [vmem:[%s7264_s28 + $0x8] sm:$0xff]  ;;  %v7267_v4 = vld [vmem:[%s7264_s28 + $0x10] sm:$0xff]  ;;  %s16826_s1 = sld [smem:[#allocation17_spill]] }
0x1be8   : > { %v11851_v35 = vpack.c.bf16 %v7266_v42, %v7265_v17  ;;  %v7268_v2 = vld [vmem:[%s7264_s28 + $0x18] sm:$0xff]  ;;  %s16825_s28 = sld [smem:[#allocation22_spill]]  ;;  %v7171_v59 = vld [vmem:[%s7170_s2] sm:$0xff]  ;;  %v7172_v51 = vld [vmem:[%s7170_s2 + $0x8] sm:$0xff] }
0x1be9   : > { %v11855_v8 = vpack.c.bf16 %v7268_v2, %v7267_v4  ;;  %v11843_v0 = vpack.c.bf16 %v7172_v51, %v7171_v59  ;;  %v7173_v29 = vld [vmem:[%s7170_s2 + $0x10] sm:$0xff]  ;;  %v7174_v63 = vld [vmem:[%s7170_s2 + $0x18] sm:$0xff] }
0x1bea   : > { %11852 = vmatprep.subr.bf16.mxu0 %v11851_v35  ;;  %v11847_v43 = vpack.c.bf16 %v7174_v63, %v7173_v29 }
0x1beb   : > { %11844 = vmatprep.subr.bf16.mxu1 %v11843_v0 }
0x1bec   : > { %11846 = vmatpush3.bf16.msra.mxu1 %v11843_v0 }
0x1bed   : > { %11848 = vmatprep.subr.bf16.mxu1 %v11847_v43  ;;  %s7121_s2 = scalar_lea.vmem %s16826_s1, %s16816_s15  ;;  %s16828_s1 = sld [smem:[#allocation20_spill]] }
0x1bee   : > { %s7269_s7 = scalar_lea.vmem %s16825_s28, %s16816_s15  ;;  %s16827_s28 = sld [smem:[#allocation18_spill]] }
0x1bef   : > { %v16202_v13 = vld [vmem:[%s7269_s7] ss:$0 sm:$0xff] }
0x1bf0   : > { %11850 = vmatpush3.bf16.msra.mxu1 %v11847_v43 }
0x1bf4   : > { %s7123_s7 = scalar_lea.vmem %s16827_s28, %s16816_s15  ;;  %s7175_s28 = scalar_lea.vmem %s16828_s1, %s16816_s15 }
0x1bf5   : > { %v9599_v17 = vld [vmem:[%s7123_s7] ss:$0 sm:$0xff]  ;;  %s9700_s1 = sshll.u32 %s16816_s15, 6 }
0x1c57   : > { %v7022_v41 = vpop.permute.xlu1 %7021 }
0x1c58   : > { %v7020_v48 = vpop.permute.xlu0 %7019  ;;  %v7031_v9 = vsel %vm7029_vm14, %v7028_v14, %v7022_v41 }
0x1c59   : > { %v7030_v44 = vsel %vm7029_vm14, %v7027_v24, %v7020_v48 }
0x1c5a   : > { %11036 = vmatprep.mubr.msk.f32.mxu0 %vm6000_vm9, %v7030_v44 }
0x1c5b   : > { %11037 = vmatmul.mubr.msk.f32.vlgmr.msra.gmra.mrb[12].mxu0 %vm6000_vm9, %v7031_v9 }
0x1c5c   : > { %11058 = vmatprep.mubr.msk.f32.mxu0 %vm6000_vm9, %v5956_v50  ;;  %11854 = vmatpush3.bf16.msra.mxu0 %v11851_v35 }
0x1c5d   : > { %11856 = vmatprep.subr.bf16.mxu0 %v11855_v8 }
0x1c60   : > { %11858 = vmatpush3.bf16.msra.mxu0 %v11855_v8 }
0x1d2e   : > { %v11038_v53 = vpop.f32.mrb[12].mxu0 }
0x1d2f   : > { %v7116_v10 = vadd.f32 %v11038_v53, %v9595_v52  ;;  %v7110_v60 = vpop.f32.mrb[13].mxu0 }
0x1d30   : > { %v7111_v12 = vadd.f32 %v9595_v52, %v7110_v60 }
0x1d31   : > { %v7120_v37 = vadd.f32 %v7116_v10, %v16027_v45  ;;  %v5958_v45 = vld [vmem:[#allocation2 + $0x10] sm:$0xff] }
0x1d32   : > { %v7119_v62 = vadd.f32 %v7111_v12, %v16014_v38  ;;  %v5957_v38 = vld [vmem:[#allocation2 + $0x8] sm:$0xff] }
0x1d33   : > { %v7128_v20 = vsel %vm6000_vm9, %v7120_v37, 0.0  ;;  %11059 = vmatmul.mubr.msk.f32.vlgmr.msra.gmra.mrb[14].mxu0 %vm6000_vm9, %v5957_v38 }
0x1d34   : > { %7129 = vadd.xlane.f32.xlu1 %v7128_v20  ;;  %v7125_v5 = vsel %vm6000_vm9, %v7119_v62, 0.0  ;;  %11061 = vmatprep.mubr.msk.f32.mxu0 %vm6000_vm9, %v5958_v45 }
0x1d35   : > { %7126 = vadd.xlane.f32.xlu0 %v7125_v5  ;;  %v9598_v5 = vld [vmem:[%s7121_s2] ss:$0 sm:$0xff]  ;;  %s16835_s2 = sld [smem:[#allocation29_spill]] }
0x1d37   : > { %11062 = vmatmul.mubr.msk.f32.gmra.mrb[16].mxu0 %vm6000_vm9, %v5959_v55 }
0x1d38   : > { %11064 = vmatprep.mubr.msk.f32.mxu0 %vm6000_vm9, %v5960_v3 }
0x1d3b   : > { %11065 = vmatmul.mubr.msk.f32.gmra.mrb[18].mxu0 %vm6000_vm9, %v5961_v28 }
0x1d3c   : > { %11067 = vmatprep.mubr.msk.f32.mxu0 %vm6000_vm9, %v5962_v7 }
0x1d3f   : > { %11068 = vmatmul.mubr.msk.f32.gmra.mrb[20].mxu0 %vm6000_vm9, %v5963_v19 }
0x1d40   : > { %11070 = vmatprep.mubr.msk.f32.mxu0 %vm6000_vm9, %v5964_v46 }
0x1d43   : > { %11071 = vmatmul.mubr.msk.f32.gmra.mrb[22].mxu0 %vm6000_vm9, %v5965_v33 }
0x1d44   : > { %11073 = vmatprep.mubr.msk.f32.mxu0 %vm6000_vm9, %v5966_v39 }
0x1d47   : > { %11074 = vmatmul.mubr.msk.f32.gmra.mrb[24].mxu0 %vm6000_vm9, %v5967_v26 }
0x1d48   : > { %11076 = vmatprep.mubr.msk.f32.mxu0 %vm6000_vm9, %v5968_v1 }
0x1d4b   : > { %11077 = vmatmul.mubr.msk.f32.gmra.mrb[26].mxu0 %vm6000_vm9, %v5969_v6 }
0x1d4c   : > { %11079 = vmatprep.mubr.msk.f32.mxu0 %vm6000_vm9, %v5970_v34 }
0x1d4f   : > { %11080 = vmatmul.mubr.msk.f32.gmra.mrb[28].mxu0 %vm6000_vm9, %v5971_v56 }
0x1dc1   : > { %v7130_v32 = vpop.xlane.xlu1 %7129 }
0x1dc2   : > { %v7133_v16 = vmul.f32 0.03125, %v7130_v32  ;;  %v7127_v58 = vpop.xlane.xlu0 %7126 }
0x1dc3   : > { %v7132_v54 = vmul.f32 0.03125, %v7127_v58 }
0x1dc4   : > { %v7135_v21 = vsub.f32 %v7120_v37, %v7133_v16 }
0x1dc5   : > { %v7134_v36 = vsub.f32 %v7119_v62, %v7132_v54 }
0x1dc6   : > { %v7137_v49 = vmul.f32 %v7135_v21, %v7135_v21 }
0x1dc7   : > { %v7136_v25 = vmul.f32 %v7134_v36, %v7134_v36 }
0x1dc8   : > { %v7141_v61 = vsel %vm6000_vm9, %v7137_v49, 0.0 }
0x1dc9   : > { %v7138_v22 = vsel %vm6000_vm9, %v7136_v25, 0.0 }
0x1dca   : > { %7139 = vadd.xlane.f32.xlu0 %v7138_v22 }
0x1dce   : > { %7142 = vadd.xlane.f32.xlu0 %v7141_v61 }
0x1e06   : > { %v11060_v30 = vpop.f32.mrb[14].mxu0 }
0x1e07   : > { %v16205_v23 = vadd.f32 %v11060_v30, %v16202_v13  ;;  %v7391_v18 = vpop.f32.mrb[15].mxu0  ;;  %v9600_v30 = vld [vmem:[%s7175_s28] ss:$0 sm:$0xff]  ;;  %s16600_s28 = scalar_lea.vmem %s16835_s2, %s9700_s1  ;;  %s16841_s2 = sld [smem:[#allocation32_spill]] }
0x1e08   : > { %v16208_v57 = vadd.f32 %v16202_v13, %v7391_v18 }
0x1e0a   : > { %v11859_v47 = vpack.c.bf16 %v16205_v23, %v16208_v57  ;;  %v11063_v41 = vpop.f32.mrb[16].mxu0 }
0x1e0b   : > { %v7401_v15 = vpop.f32.mrb[17].mxu0  ;;  %v16223_v45 = vadd.f32 %v11063_v41, %v16202_v13 }
0x1e0c   : > { %11861 = vmatprep.subr.msk.bf16.mxu1 %vm16061_vm11, %v11859_v47  ;;  %v16226_v55 = vadd.f32 %v16202_v13, %v7401_v15 }
0x1e0d   : > { %s8992_s1 = scalar_lea.vmem %s16841_s2, %s16816_s15 }
0x1e0e   : > { %v11066_v24 = vpop.f32.mrb[18].mxu0  ;;  %v11865_v7 = vpack.c.bf16 %v16223_v45, %v16226_v55 }
0x1e0f   : > { %v7411_v48 = vpop.f32.mrb[19].mxu0 }
0x1e10   : > { %v16244_v19 = vadd.f32 %v16202_v13, %v7411_v48 }
0x1e12   : > { %v11069_v14 = vpop.f32.mrb[20].mxu0 }
0x1e13   : > { %v7421_v44 = vpop.f32.mrb[21].mxu0  ;;  %v7427_v46 = vadd.f32 %v11069_v14, %v16202_v13 }
0x1e14   : > { %v7422_v33 = vadd.f32 %v16202_v13, %v7421_v44 }
0x1e16   : > { %v11072_v9 = vpop.f32.mrb[22].mxu0  ;;  %v11877_v39 = vpack.c.bf16 %v7427_v46, %v7422_v33 }
0x1e17   : > { %v7431_v52 = vpop.f32.mrb[23].mxu0  ;;  %v7437_v32 = vadd.f32 %v11072_v9, %v16202_v13 }
0x1e18   : > { %v7432_v16 = vadd.f32 %v16202_v13, %v7431_v52 }
0x1e1a   : > { %v11883_v58 = vpack.c.bf16 %v7437_v32, %v7432_v16  ;;  %v11075_v54 = vpop.f32.mrb[24].mxu0 }
0x1e57   : > { %v7140_v53 = vpop.xlane.xlu0 %7139 }
0x1e58   : > { %v7144_v10 = vmul.f32 0.03125, %v7140_v53 }
0x1e5a   : > { %v7146_v60 = vadd.f32 1e-05, %v7144_v10 }
0x1e5b   : > { %v7143_v12 = vpop.xlane.xlu0 %7142 }
0x1e5c   : > { %13332 = vrsqrt.f32 %v7146_v60  ;;  %v7145_v37 = vmul.f32 0.03125, %v7143_v12 }
0x1e5e   : > { %v7147_v62 = vadd.f32 1e-05, %v7145_v37  ;;  %v16308_v37 = vpack.i.bf16 %v16205_v23, %v16208_v57  ;;  %v16326_v23 = vpack.i.bf16 %v7437_v32, %v7432_v16 }
0x1e60   : > { %13334 = vrsqrt.f32 %v7147_v62 }
0x1e66   : > { %v13333_v20 = vpop.eup %13332 }
0x1e67   : > { %v7150_v50 = vmul.f32 %v13333_v20, %v7134_v36  ;;  %v7441_v36 = vpop.f32.mrb[25].mxu0  ;;  %v16324_v20 = vpack.i.bf16 %v7427_v46, %v7422_v33 }
0x1e68   : > { %v7442_v25 = vadd.f32 %v16202_v13, %v7441_v36  ;;  %v11078_v61 = vpop.f32.mrb[26].mxu0 }
0x1e69   : > { %v7158_v42 = vmul.f32 %v9598_v5, %v7150_v50  ;;  %v7457_v26 = vadd.f32 %v11078_v61, %v16202_v13  ;;  %v7451_v1 = vpop.f32.mrb[27].mxu0 }
0x1e6a   : > { %v13335_v4 = vpop.eup %13334  ;;  %v7452_v6 = vadd.f32 %v16202_v13, %v7451_v1  ;;  %v11081_v59 = vpop.f32.mrb[28].mxu0 }
0x1e6b   : > { %v7151_v35 = vmul.f32 %v13335_v4, %v7135_v21  ;;  %v16218_v2 = vadd.f32 %v9599_v17, %v7158_v42  ;;  %v7447_v21 = vadd.f32 %v11075_v54, %v16202_v13  ;;  %v7467_v51 = vadd.f32 %v11081_v59, %v16202_v13  ;;  %v7461_v0 = vpop.f32.mrb[29].mxu0 }
0x1e6c   : > { %v11895_v34 = vpack.c.bf16 %v7457_v26, %v7452_v6  ;;  %v16276_v56 = vpack.i.bf16 %v7457_v26, %v7452_v6  ;;  %v7462_v29 = vadd.f32 %v16202_v13, %v7461_v0 }
0x1e6d   : > { %v7159_v8 = vmul.f32 %v9598_v5, %v7151_v35  ;;  %v7168_v38 = vadd.f32 %v16218_v2, %v16017_v40  ;;  %v16241_v40 = vadd.f32 %v11066_v24, %v16202_v13  ;;  %v11889_v22 = vpack.c.bf16 %v7447_v21, %v7442_v25  ;;  %v5976_v24 = vld [vmem:[%s13796_s23] sm:$0x1]  ;;  %s16829_s23 = smov 8  }
0x1e6e   : > { %v16268_v49 = vpack.i.bf16 %v7447_v21, %v7442_v25  ;;  %v11901_v63 = vpack.c.bf16 %v7467_v51, %v7462_v29  ;;  %v16284_v43 = vpack.i.bf16 %v7467_v51, %v7462_v29  ;;  %v5980_v13 = vshrl.u32 %v5972_v31, 7 }
0x1e6f   : > { %v16228_v3 = vadd.f32 %v9599_v17, %v7159_v8  ;;  %11047 = vmatprep.mubr.msk.f32.mxu1 %vm6000_vm9, %v7168_v38  ;;  %v5977_v48 = vmul.f32 -1e+09, %v5976_v24  ;;  %v16314_v31 = vpack.i.bf16 %v16223_v45, %v16226_v55  ;;  %v16318_v62 = vpack.i.bf16 %v16241_v40, %v16244_v19 }
0x1e70   : > { %v5981_v14 = vsub.s32 0, %v5980_v13 }
0x1e71   : > { %v7169_v28 = vadd.f32 %v16228_v3, %v16030_v27  ;;  %v11871_v27 = vpack.c.bf16 %v16241_v40, %v16244_v19 }
0x1e72   : > { %v16302_v44 = vrot.slane %v5977_v48, %v5981_v14 }
0x1e73   : > { %11048 = vmatmul.mubr.msk.f32.vlgmr.msra.gmra.mrb[8].mxu1 %vm6000_vm9, %v7169_v28 }
0x1e74   : > { %11864 = vmatpush3.bf16.xpose.msk.msra.mxu1 %vm16061_vm11, %v11859_v47 }
0x1e75   : > { %11867 = vmatprep.subr.msk.bf16.mxu1 %vm16061_vm11, %v11865_v7 }
0x1e7c   : > { %11870 = vmatpush3.bf16.xpose.msk.msra.mxu1 %vm16061_vm11, %v11865_v7 }
0x1e7d   : > { %11873 = vmatprep.subr.msk.bf16.mxu1 %vm16061_vm11, %v11871_v27 }
0x1e84   : > { %11876 = vmatpush3.bf16.xpose.msk.msra.mxu1 %vm16061_vm11, %v11871_v27 }
0x1e85   : > { %11879 = vmatprep.subr.msk.bf16.mxu1 %vm16061_vm11, %v11877_v39 }
0x1e8c   : > { %11882 = vmatpush3.bf16.xpose.msk.msra.mxu1 %vm16061_vm11, %v11877_v39 }
0x1e8d   : > { %11885 = vmatprep.subr.msk.bf16.mxu1 %vm16061_vm11, %v11883_v58 }
0x1e94   : > { %11888 = vmatpush3.bf16.xpose.msk.msra.mxu1 %vm16061_vm11, %v11883_v58 }
0x1e95   : > { %11891 = vmatprep.subr.msk.bf16.mxu1 %vm16061_vm11, %v11889_v22 }
0x1e9c   : > { %11894 = vmatpush3.bf16.xpose.msk.msra.mxu1 %vm16061_vm11, %v11889_v22 }
0x1e9d   : > { %11897 = vmatprep.subr.msk.bf16.mxu1 %vm16061_vm11, %v11895_v34 }
0x1ea4   : > { %11900 = vmatpush3.bf16.xpose.msk.msra.mxu1 %vm16061_vm11, %v11895_v34 }
0x1ea5   : > { %11903 = vmatprep.subr.msk.bf16.mxu1 %vm16061_vm11, %v11901_v63 }
0x1eac   : > { %11906 = vmatpush3.bf16.xpose.msk.msra.mxu1 %vm16061_vm11, %v11901_v63 }
0x1f46   : > { %v11049_v18 = vpop.f32.mrb[8].mxu1 }
0x1f47   : > { %v7255_v47 = vpop.f32.mrb[9].mxu1  ;;  %v16294_v15 = vadd.f32 %v11049_v18, %v9600_v30 }
0x1f48   : > { %v16292_v41 = vadd.f32 %v9600_v30, %v7255_v47 }
0x1f4a   : > { %11114 = vmatprep.mubr.msk.f32.mxu1 %vm6195_vm10, %v16292_v41 }
0x1f4b   : > { %11115 = vmatmul.mubr.msk.f32.vlgmr.msra.gmra.mrb[10].mxu1 %vm6195_vm10, %v16294_v15 }
0x201e   : > { %v11116_v9 = vpop.f32.mrb[10].mxu1 }
0x201f   : > { %v7607_v52 = vmul.f32 0.35355338, %v11116_v9  ;;  %v7597_v53 = vpop.f32.mrb[11].mxu1 }
0x2020   : > { %v7606_v10 = vmul.f32 0.35355338, %v7597_v53 }
0x2021   : > { %v7609_v60 = vadd.f32 %v7607_v52, %v16302_v44 }
0x2022   : > { %v7608_v12 = vadd.f32 %v7606_v10, %v16302_v44 }
0x2023   : > { %7612 = vmax.xlane.f32.xlu0 %v7609_v60 }
0x2024   : > { %7610 = vmax.xlane.f32.xlu1 %v7608_v12 }
0x2035   : > { %13021 = vrot.lane.b32.xlu1 %v16308_v37, %s13502_s16 }
0x2039   : > { %13026 = vrot.lane.b32.xlu0 %v16314_v31, %s13502_s16  ;;  %13031 = vrot.lane.b32.xlu1 %v16318_v62, %s13502_s16 }
0x203d   : > { %13036 = vrot.lane.b32.xlu0 %v16324_v20, %s13502_s16  ;;  %13041 = vrot.lane.b32.xlu1 %v16326_v23, %s13502_s16 }
0x2041   : > { %13046 = vrot.lane.b32.xlu0 %v16268_v49, %s13502_s16  ;;  %13051 = vrot.lane.b32.xlu1 %v16276_v56, %s13502_s16 }
0x2045   : > { %13056 = vrot.lane.b32.xlu1 %v16284_v43, %s13502_s16  ;;  %s16831_s16 = sld [smem:[#allocation23_spill]] }
0x20b0   : > { %v7613_v57 = vpop.xlane.xlu0 %7612 }
0x20b1   : > { %v7615_v5 = vsub.f32 %v7609_v60, %v7613_v57  ;;  %v7611_v50 = vpop.xlane.xlu1 %7610 }
0x20b2   : > { %v7614_v17 = vsub.f32 %v7608_v12, %v7611_v50 }
0x20b3   : > { %v7618_v42 = vmul.f32 1.442695, %v7615_v5 }
0x20b4   : > { %v7616_v4 = vmul.f32 1.442695, %v7614_v17  ;;  %v13027_v35 = vpop.permute.xlu0 %13026 }
0x20b5   : > { %13336 = vpow2.f32 %v7618_v42  ;;  %v13029_v8 = vunpack.i.h.bf16 %v13027_v35  ;;  %v13022_v38 = vpop.permute.xlu1 %13021  ;;  %v13028_v45 = vunpack.i.l.bf16 %v13027_v35 }
0x20b6   : > { %13338 = vpow2.f32 %v7616_v4  ;;  %v13024_v55 = vunpack.i.h.bf16 %v13022_v38  ;;  %v13023_v28 = vunpack.i.l.bf16 %v13022_v38 }
0x20b7   : > { %v11911_v19 = vpack.c.bf16 %v13029_v8, %v13028_v45 }
0x20b8   : > { %v11907_v7 = vpack.c.bf16 %v13024_v55, %v13023_v28  ;;  %v13037_v33 = vpop.permute.xlu0 %13036 }
0x20b9   : > { %v13032_v40 = vpop.permute.xlu1 %13031  ;;  %v13039_v39 = vunpack.i.h.bf16 %v13037_v33  ;;  %v13038_v32 = vunpack.i.l.bf16 %v13037_v33 }
0x20ba   : > { %v13034_v27 = vunpack.i.h.bf16 %v13032_v40  ;;  %v13033_v46 = vunpack.i.l.bf16 %v13032_v40  ;;  %11908 = vmatprep.subr.bf16.mxu0 %v11907_v7 }
0x20bb   : > { %11910 = vmatpush3.bf16.msra.mxu0 %v11907_v7  ;;  %v11919_v36 = vpack.c.bf16 %v13039_v39, %v13038_v32 }
0x20bc   : > { %11912 = vmatprep.subr.bf16.mxu0 %v11911_v19  ;;  %v11915_v16 = vpack.c.bf16 %v13034_v27, %v13033_v46  ;;  %v13047_v61 = vpop.permute.xlu0 %13046 }
0x20bd   : > { %v13042_v54 = vpop.permute.xlu1 %13041  ;;  %v13049_v1 = vunpack.i.h.bf16 %v13047_v61  ;;  %v13048_v6 = vunpack.i.l.bf16 %v13047_v61 }
0x20be   : > { %v13044_v25 = vunpack.i.h.bf16 %v13042_v54  ;;  %v13043_v22 = vunpack.i.l.bf16 %v13042_v54 }
0x20bf   : > { %v13337_v58 = vpop.eup %13336  ;;  %11914 = vmatpush3.bf16.msra.mxu0 %v11911_v19  ;;  %v11927_v59 = vpack.c.bf16 %v13049_v1, %v13048_v6 }
0x20c0   : > { %v13339_v21 = vpop.eup %13338  ;;  %7622 = vadd.xlane.f32.xlu0 %v13337_v58  ;;  %11916 = vmatprep.subr.bf16.mxu0 %v11915_v16  ;;  %v11923_v34 = vpack.c.bf16 %v13044_v25, %v13043_v22 }
0x20c1   : > { %7620 = vadd.xlane.f32.xlu1 %v13339_v21  ;;  %v13052_v26 = vpop.permute.xlu1 %13051 }
0x20c2   : > { %v13054_v51 = vunpack.i.h.bf16 %v13052_v26  ;;  %v13053_v0 = vunpack.i.l.bf16 %v13052_v26 }
0x20c3   : > { %11918 = vmatpush3.bf16.msra.mxu0 %v11915_v16 }
0x20c4   : > { %11920 = vmatprep.subr.bf16.mxu0 %v11919_v36  ;;  %v11931_v63 = vpack.c.bf16 %v13054_v51, %v13053_v0 }
0x20c5   : > { %v13057_v29 = vpop.permute.xlu1 %13056 }
0x20c6   : > { %v13059_v30 = vunpack.i.h.bf16 %v13057_v29  ;;  %v13058_v18 = vunpack.i.l.bf16 %v13057_v29 }
0x20c7   : > { %11922 = vmatpush3.bf16.msra.mxu0 %v11919_v36 }
0x20c8   : > { %11924 = vmatprep.subr.bf16.mxu0 %v11923_v34  ;;  %v11935_v47 = vpack.c.bf16 %v13059_v30, %v13058_v18 }
0x20cb   : > { %11926 = vmatpush3.bf16.msra.mxu0 %v11923_v34 }
0x20cc   : > { %11928 = vmatprep.subr.bf16.mxu0 %v11927_v59 }
0x20cf   : > { %11930 = vmatpush3.bf16.msra.mxu0 %v11927_v59 }
0x20d0   : > { %11932 = vmatprep.subr.bf16.mxu0 %v11931_v63 }
0x20d2   : > { %13066 = vrot.lane.b32.xlu1 %v16314_v31, %s13501_s10 }
0x20d3   : > { %11934 = vmatpush3.bf16.msra.mxu0 %v11931_v63 }
0x20d4   : > { %11936 = vmatprep.subr.bf16.mxu0 %v11935_v47 }
0x20d6   : > { %13061 = vrot.lane.b32.xlu0 %v16308_v37, %s13501_s10  ;;  %13076 = vrot.lane.b32.xlu1 %v16324_v20, %s13501_s10 }
0x20d7   : > { %11938 = vmatpush3.bf16.msra.mxu0 %v11935_v47 }
0x20da   : > { %13071 = vrot.lane.b32.xlu0 %v16318_v62, %s13501_s10  ;;  %13086 = vrot.lane.b32.xlu1 %v16268_v49, %s13501_s10 }
0x20de   : > { %13081 = vrot.lane.b32.xlu0 %v16326_v23, %s13501_s10  ;;  %13096 = vrot.lane.b32.xlu1 %v16284_v43, %s13501_s10 }
0x20e2   : > { %13091 = vrot.lane.b32.xlu0 %v16276_v56, %s13501_s10  ;;  %7753 = vrot.lane.b32.xlu1 %v16294_v15, %s13501_s10 }
0x20e6   : > { %7751 = vrot.lane.b32.xlu0 %v16292_v41, %s13501_s10  ;;  %s16830_s10 = smov 16  }
0x214d   : > { %v7623_v13 = vpop.xlane.xlu0 %7622 }
0x214e   : > { %13340 = vrcp.f32 %v7623_v13  ;;  %v7621_v24 = vpop.xlane.xlu1 %7620 }
0x214f   : > { %13342 = vrcp.f32 %v7621_v24 }
0x2151   : > { %v13062_v48 = vpop.permute.xlu0 %13061 }
0x2152   : > { %v13064_v14 = vunpack.i.h.bf16 %v13062_v48  ;;  %v13063_v9 = vunpack.i.l.bf16 %v13062_v48  ;;  %v13067_v10 = vpop.permute.xlu1 %13066 }
0x2153   : > { %v13069_v57 = vunpack.i.h.bf16 %v13067_v10  ;;  %v13068_v5 = vunpack.i.l.bf16 %v13067_v10 }
0x2154   : > { %v11939_v52 = vpack.c.bf16 %v13064_v14, %v13063_v9 }
0x2155   : > { %v13072_v53 = vpop.permute.xlu0 %13071  ;;  %v11945_v4 = vpack.c.bf16 %v13069_v57, %v13068_v5 }
0x2156   : > { %11941 = vmatprep.subr.msk.bf16.mxu0 %vm16061_vm11, %v11939_v52  ;;  %v13074_v8 = vunpack.i.h.bf16 %v13072_v53  ;;  %v13073_v38 = vunpack.i.l.bf16 %v13072_v53  ;;  %v13077_v28 = vpop.permute.xlu1 %13076 }
0x2157   : > { %v13079_v7 = vunpack.i.h.bf16 %v13077_v28  ;;  %v13078_v40 = vunpack.i.l.bf16 %v13077_v28 }
0x2158   : > { %v13341_v60 = vpop.eup %13340  ;;  %v11951_v55 = vpack.c.bf16 %v13074_v8, %v13073_v38 }
0x2159   : > { %v13343_v12 = vpop.eup %13342  ;;  %v13082_v50 = vpop.permute.xlu0 %13081  ;;  %v7627_v42 = vmul.f32 %v13341_v60, %v13337_v58  ;;  %v11957_v19 = vpack.c.bf16 %v13079_v7, %v13078_v40 }
0x215a   : > { %v7625_v17 = vmul.f32 %v13343_v12, %v13339_v21  ;;  %v13084_v27 = vunpack.i.h.bf16 %v13082_v50  ;;  %v13083_v46 = vunpack.i.l.bf16 %v13082_v50  ;;  %v13087_v39 = vpop.permute.xlu1 %13086 }
0x215b   : > { %v13089_v32 = vunpack.i.h.bf16 %v13087_v39  ;;  %v13088_v16 = vunpack.i.l.bf16 %v13087_v39 }
0x215c   : > { %11149 = vmatprep.mubr.f32.mxu0 %v7625_v17  ;;  %v11963_v33 = vpack.c.bf16 %v13084_v27, %v13083_v46 }
0x215d   : > { %v13092_v35 = vpop.permute.xlu0 %13091  ;;  %11150 = vmatmul.mubr.f32.vlgmr.msra.gmra.mrb[30].mxu0 %v7627_v42  ;;  %v11969_v58 = vpack.c.bf16 %v13089_v32, %v13088_v16 }
0x215e   : > { %11944 = vmatpush3.bf16.xpose.msk.msra.mxu0 %vm16061_vm11, %v11939_v52  ;;  %v13094_v54 = vunpack.i.h.bf16 %v13092_v35  ;;  %v13093_v21 = vunpack.i.l.bf16 %v13092_v35  ;;  %v13097_v25 = vpop.permute.xlu1 %13096 }
0x215f   : > { %11947 = vmatprep.subr.msk.bf16.mxu0 %vm16061_vm11, %v11945_v4  ;;  %v13099_v22 = vunpack.i.h.bf16 %v13097_v25  ;;  %v13098_v61 = vunpack.i.l.bf16 %v13097_v25 }
0x2160   : > { %v11975_v36 = vpack.c.bf16 %v13094_v54, %v13093_v21 }
0x2161   : > { %v7752_v45 = vpop.permute.xlu0 %7751  ;;  %v11981_v26 = vpack.c.bf16 %v13099_v22, %v13098_v61 }
0x2162   : > { %11184 = vmatprep.mubr.msk.f32.mxu0 %vm6195_vm10, %v7752_v45  ;;  %v7754_v1 = vpop.permute.xlu1 %7753 }
0x2166   : > { %11950 = vmatpush3.bf16.xpose.msk.msra.mxu0 %vm16061_vm11, %v11945_v4 }
0x2167   : > { %11953 = vmatprep.subr.msk.bf16.mxu0 %vm16061_vm11, %v11951_v55 }
0x216e   : > { %11956 = vmatpush3.bf16.xpose.msk.msra.mxu0 %vm16061_vm11, %v11951_v55 }
0x216f   : > { %11959 = vmatprep.subr.msk.bf16.mxu0 %vm16061_vm11, %v11957_v19 }
0x2176   : > { %11962 = vmatpush3.bf16.xpose.msk.msra.mxu0 %vm16061_vm11, %v11957_v19 }
0x2177   : > { %11965 = vmatprep.subr.msk.bf16.mxu0 %vm16061_vm11, %v11963_v33 }
0x217e   : > { %11968 = vmatpush3.bf16.xpose.msk.msra.mxu0 %vm16061_vm11, %v11963_v33 }
0x217f   : > { %11971 = vmatprep.subr.msk.bf16.mxu0 %vm16061_vm11, %v11969_v58 }
0x2186   : > { %11974 = vmatpush3.bf16.xpose.msk.msra.mxu0 %vm16061_vm11, %v11969_v58 }
0x2187   : > { %11977 = vmatprep.subr.msk.bf16.mxu0 %vm16061_vm11, %v11975_v36 }
0x218e   : > { %11980 = vmatpush3.bf16.xpose.msk.msra.mxu0 %vm16061_vm11, %v11975_v36 }
0x218f   : > { %11983 = vmatprep.subr.msk.bf16.mxu0 %vm16061_vm11, %v11981_v26 }
0x2196   : > { %11986 = vmatpush3.bf16.xpose.msk.msra.mxu0 %vm16061_vm11, %v11981_v26 }
0x219d   : > { %11185 = vmatmul.mubr.msk.f32.vlgmr.msra.gmra.mrb[32].mxu0 %vm6195_vm10, %v7754_v1 }
0x2230   : > { %v16392_v6 = vpop.f32.mrb[30].mxu0 }
0x2231   : > { %v16394_v34 = vpop.f32.mrb[31].mxu0 }
0x2270   : > { %v11186_v59 = vpop.f32.mrb[32].mxu0 }
0x2271   : > { %v7899_v51 = vmul.f32 0.35355338, %v11186_v59  ;;  %v7889_v0 = vpop.f32.mrb[33].mxu0 }
0x2272   : > { %v7898_v29 = vmul.f32 0.35355338, %v7889_v0 }
0x2273   : > { %v7901_v63 = vadd.f32 %v7899_v51, %v16302_v44 }
0x2274   : > { %v7900_v30 = vadd.f32 %v7898_v29, %v16302_v44 }
0x2275   : > { %7904 = vmax.xlane.f32.xlu1 %v7901_v63 }
0x2276   : > { %7902 = vmax.xlane.f32.xlu0 %v7900_v30 }
0x2286   : > { %13106 = vrot.lane.b32.xlu1 %v16314_v31, %s13503_s18 }
0x228a   : > { %13121 = vrot.lane.b32.xlu1 %v16326_v23, %s13503_s18 }
0x228c   : > { %13101 = vrot.lane.b32.xlu0 %v16308_v37, %s13503_s18 }
0x228e   : > { %13131 = vrot.lane.b32.xlu1 %v16276_v56, %s13503_s18 }
0x2290   : > { %13111 = vrot.lane.b32.xlu0 %v16318_v62, %s13503_s18 }
0x2292   : > { %13136 = vrot.lane.b32.xlu1 %v16284_v43, %s13503_s18 }
0x2294   : > { %13116 = vrot.lane.b32.xlu0 %v16324_v20, %s13503_s18 }
0x2298   : > { %13126 = vrot.lane.b32.xlu0 %v16268_v49, %s13503_s18  ;;  %s7470_s18 = scalar_lea.vmem %s16831_s16, %s16012_s4 }
0x2302   : > { %v7905_v18 = vpop.xlane.xlu1 %7904 }
0x2303   : > { %v7907_v47 = vsub.f32 %v7901_v63, %v7905_v18  ;;  %v7903_v13 = vpop.xlane.xlu0 %7902 }
0x2304   : > { %v7906_v24 = vsub.f32 %v7900_v30, %v7903_v13 }
0x2305   : > { %v7910_v48 = vmul.f32 1.442695, %v7907_v47 }
0x2306   : > { %v7908_v14 = vmul.f32 1.442695, %v7906_v24  ;;  %v13107_v9 = vpop.permute.xlu1 %13106 }
0x2307   : > { %13344 = vpow2.f32 %v7910_v48  ;;  %v13109_v52 = vunpack.i.h.bf16 %v13107_v9  ;;  %v13102_v53 = vpop.permute.xlu0 %13101  ;;  %v13108_v10 = vunpack.i.l.bf16 %v13107_v9 }
0x2308   : > { %13346 = vpow2.f32 %v7908_v14  ;;  %v13104_v60 = vunpack.i.h.bf16 %v13102_v53  ;;  %v13103_v12 = vunpack.i.l.bf16 %v13102_v53 }
0x2309   : > { %v11991_v50 = vpack.c.bf16 %v13109_v52, %v13108_v10 }
0x230a   : > { %v11987_v57 = vpack.c.bf16 %v13104_v60, %v13103_v12  ;;  %v13122_v55 = vpop.permute.xlu1 %13121 }
0x230b   : > { %v13112_v5 = vpop.permute.xlu0 %13111  ;;  %v13124_v7 = vunpack.i.h.bf16 %v13122_v55  ;;  %v13123_v40 = vunpack.i.l.bf16 %v13122_v55 }
0x230c   : > { %v13114_v17 = vunpack.i.h.bf16 %v13112_v5  ;;  %v13113_v42 = vunpack.i.l.bf16 %v13112_v5  ;;  %11988 = vmatprep.subr.bf16.mxu1 %v11987_v57 }
0x230d   : > { %11990 = vmatpush3.bf16.msra.mxu1 %v11987_v57  ;;  %v12003_v33 = vpack.c.bf16 %v13124_v7, %v13123_v40 }
0x230e   : > { %11992 = vmatprep.subr.bf16.mxu1 %v11991_v50  ;;  %v11995_v35 = vpack.c.bf16 %v13114_v17, %v13113_v42  ;;  %v13132_v46 = vpop.permute.xlu1 %13131 }
0x230f   : > { %v13117_v4 = vpop.permute.xlu0 %13116  ;;  %v13134_v16 = vunpack.i.h.bf16 %v13132_v46  ;;  %v13133_v58 = vunpack.i.l.bf16 %v13132_v46 }
0x2310   : > { %v13119_v8 = vunpack.i.h.bf16 %v13117_v4  ;;  %v13118_v38 = vunpack.i.l.bf16 %v13117_v4 }
0x2311   : > { %v13345_v45 = vpop.eup %13344  ;;  %11994 = vmatpush3.bf16.msra.mxu1 %v11991_v50  ;;  %v12011_v36 = vpack.c.bf16 %v13134_v16, %v13133_v58 }
0x2312   : > { %v13347_v28 = vpop.eup %13346  ;;  %7914 = vadd.xlane.f32.xlu0 %v13345_v45  ;;  %11996 = vmatprep.subr.bf16.mxu1 %v11995_v35  ;;  %v11999_v19 = vpack.c.bf16 %v13119_v8, %v13118_v38  ;;  %v13137_v21 = vpop.permute.xlu1 %13136 }
0x2313   : > { %7912 = vadd.xlane.f32.xlu1 %v13347_v28  ;;  %v13127_v27 = vpop.permute.xlu0 %13126  ;;  %v13139_v25 = vunpack.i.h.bf16 %v13137_v21  ;;  %v13138_v22 = vunpack.i.l.bf16 %v13137_v21 }
0x2314   : > { %v13129_v39 = vunpack.i.h.bf16 %v13127_v27  ;;  %v13128_v32 = vunpack.i.l.bf16 %v13127_v27 }
0x2315   : > { %11998 = vmatpush3.bf16.msra.mxu1 %v11995_v35  ;;  %v12015_v61 = vpack.c.bf16 %v13139_v25, %v13138_v22 }
0x2316   : > { %12000 = vmatprep.subr.bf16.mxu1 %v11999_v19  ;;  %v12007_v54 = vpack.c.bf16 %v13129_v39, %v13128_v32 }
0x2319   : > { %12002 = vmatpush3.bf16.msra.mxu1 %v11999_v19 }
0x231a   : > { %12004 = vmatprep.subr.bf16.mxu1 %v12003_v33 }
0x231d   : > { %12006 = vmatpush3.bf16.msra.mxu1 %v12003_v33 }
0x231e   : > { %12008 = vmatprep.subr.bf16.mxu1 %v12007_v54 }
0x2321   : > { %12010 = vmatpush3.bf16.msra.mxu1 %v12007_v54 }
0x2322   : > { %12012 = vmatprep.subr.bf16.mxu1 %v12011_v36 }
0x2324   : > { %13146 = vrot.lane.b32.xlu1 %v16314_v31, %s13505_s26 }
0x2325   : > { %12014 = vmatpush3.bf16.msra.mxu1 %v12011_v36 }
0x2326   : > { %12016 = vmatprep.subr.bf16.mxu1 %v12015_v61 }
0x2328   : > { %13141 = vrot.lane.b32.xlu0 %v16308_v37, %s13505_s26  ;;  %13156 = vrot.lane.b32.xlu1 %v16324_v20, %s13505_s26 }
0x2329   : > { %12018 = vmatpush3.bf16.msra.mxu1 %v12015_v61 }
0x232c   : > { %13151 = vrot.lane.b32.xlu0 %v16318_v62, %s13505_s26  ;;  %13166 = vrot.lane.b32.xlu1 %v16268_v49, %s13505_s26 }
0x2330   : > { %13161 = vrot.lane.b32.xlu0 %v16326_v23, %s13505_s26  ;;  %13176 = vrot.lane.b32.xlu1 %v16284_v43, %s13505_s26 }
0x2334   : > { %13171 = vrot.lane.b32.xlu0 %v16276_v56, %s13505_s26  ;;  %8045 = vrot.lane.b32.xlu1 %v16294_v15, %s13505_s26 }
0x2338   : > { %8043 = vrot.lane.b32.xlu0 %v16292_v41, %s13505_s26  ;;  %s16832_s26 = smov 24  }
0x239f   : > { %v7915_v26 = vpop.xlane.xlu0 %7914 }
0x23a0   : > { %13348 = vrcp.f32 %v7915_v26  ;;  %v7913_v1 = vpop.xlane.xlu1 %7912 }
0x23a1   : > { %13350 = vrcp.f32 %v7913_v1 }
0x23a3   : > { %v13142_v59 = vpop.permute.xlu0 %13141 }
0x23a4   : > { %v13144_v51 = vunpack.i.h.bf16 %v13142_v59  ;;  %v13143_v0 = vunpack.i.l.bf16 %v13142_v59  ;;  %v13147_v30 = vpop.permute.xlu1 %13146 }
0x23a5   : > { %v13149_v13 = vunpack.i.h.bf16 %v13147_v30  ;;  %v13148_v24 = vunpack.i.l.bf16 %v13147_v30 }
0x23a6   : > { %v12019_v29 = vpack.c.bf16 %v13144_v51, %v13143_v0 }
0x23a7   : > { %v13152_v63 = vpop.permute.xlu0 %13151  ;;  %v12025_v52 = vpack.c.bf16 %v13149_v13, %v13148_v24 }
0x23a8   : > { %12021 = vmatprep.subr.msk.bf16.mxu1 %vm16061_vm11, %v12019_v29  ;;  %v13154_v10 = vunpack.i.h.bf16 %v13152_v63  ;;  %v13153_v60 = vunpack.i.l.bf16 %v13152_v63  ;;  %v13157_v5 = vpop.permute.xlu1 %13156 }
0x23a9   : > { %v13159_v50 = vunpack.i.h.bf16 %v13157_v5  ;;  %v13158_v17 = vunpack.i.l.bf16 %v13157_v5 }
0x23aa   : > { %v13349_v18 = vpop.eup %13348  ;;  %v12031_v57 = vpack.c.bf16 %v13154_v10, %v13153_v60 }
0x23ab   : > { %v13351_v47 = vpop.eup %13350  ;;  %v13162_v48 = vpop.permute.xlu0 %13161  ;;  %v7919_v9 = vmul.f32 %v13349_v18, %v13345_v45  ;;  %v12037_v42 = vpack.c.bf16 %v13159_v50, %v13158_v17 }
0x23ac   : > { %v7917_v14 = vmul.f32 %v13351_v47, %v13347_v28  ;;  %v13164_v4 = vunpack.i.h.bf16 %v13162_v48  ;;  %v13163_v35 = vunpack.i.l.bf16 %v13162_v48  ;;  %v13167_v38 = vpop.permute.xlu1 %13166 }
0x23ad   : > { %v13169_v45 = vunpack.i.h.bf16 %v13167_v38  ;;  %v13168_v55 = vunpack.i.l.bf16 %v13167_v38 }
0x23ae   : > { %11219 = vmatprep.mubr.f32.mxu1 %v7917_v14  ;;  %v12043_v8 = vpack.c.bf16 %v13164_v4, %v13163_v35 }
0x23af   : > { %v13172_v53 = vpop.permute.xlu0 %13171  ;;  %11220 = vmatmul.mubr.f32.vlgmr.msra.gmra.mrb[12].mxu1 %v7919_v9  ;;  %v12049_v28 = vpack.c.bf16 %v13169_v45, %v13168_v55 }
0x23b0   : > { %12024 = vmatpush3.bf16.xpose.msk.msra.mxu1 %vm16061_vm11, %v12019_v29  ;;  %v13174_v7 = vunpack.i.h.bf16 %v13172_v53  ;;  %v13173_v40 = vunpack.i.l.bf16 %v13172_v53  ;;  %v13177_v27 = vpop.permute.xlu1 %13176 }
0x23b1   : > { %12027 = vmatprep.subr.msk.bf16.mxu1 %vm16061_vm11, %v12025_v52  ;;  %v13179_v46 = vunpack.i.h.bf16 %v13177_v27  ;;  %v13178_v33 = vunpack.i.l.bf16 %v13177_v27 }
0x23b2   : > { %v12055_v19 = vpack.c.bf16 %v13174_v7, %v13173_v40 }
0x23b3   : > { %v8044_v12 = vpop.permute.xlu0 %8043  ;;  %v12061_v39 = vpack.c.bf16 %v13179_v46, %v13178_v33 }
0x23b4   : > { %11254 = vmatprep.mubr.msk.f32.mxu1 %vm6195_vm10, %v8044_v12  ;;  %v8046_v32 = vpop.permute.xlu1 %8045 }
0x23b8   : > { %12030 = vmatpush3.bf16.xpose.msk.msra.mxu1 %vm16061_vm11, %v12025_v52 }
0x23b9   : > { %12033 = vmatprep.subr.msk.bf16.mxu1 %vm16061_vm11, %v12031_v57 }
0x23c0   : > { %12036 = vmatpush3.bf16.xpose.msk.msra.mxu1 %vm16061_vm11, %v12031_v57 }
0x23c1   : > { %12039 = vmatprep.subr.msk.bf16.mxu1 %vm16061_vm11, %v12037_v42 }
0x23c8   : > { %12042 = vmatpush3.bf16.xpose.msk.msra.mxu1 %vm16061_vm11, %v12037_v42 }
0x23c9   : > { %12045 = vmatprep.subr.msk.bf16.mxu1 %vm16061_vm11, %v12043_v8 }
0x23d0   : > { %12048 = vmatpush3.bf16.xpose.msk.msra.mxu1 %vm16061_vm11, %v12043_v8 }
0x23d1   : > { %12051 = vmatprep.subr.msk.bf16.mxu1 %vm16061_vm11, %v12049_v28 }
0x23d8   : > { %12054 = vmatpush3.bf16.xpose.msk.msra.mxu1 %vm16061_vm11, %v12049_v28 }
0x23d9   : > { %12057 = vmatprep.subr.msk.bf16.mxu1 %vm16061_vm11, %v12055_v19 }
0x23e0   : > { %12060 = vmatpush3.bf16.xpose.msk.msra.mxu1 %vm16061_vm11, %v12055_v19 }
0x23e1   : > { %12063 = vmatprep.subr.msk.bf16.mxu1 %vm16061_vm11, %v12061_v39 }
0x23e8   : > { %12066 = vmatpush3.bf16.xpose.msk.msra.mxu1 %vm16061_vm11, %v12061_v39 }
0x23ef   : > { %11255 = vmatmul.mubr.msk.f32.vlgmr.msra.gmra.mrb[14].mxu1 %vm6195_vm10, %v8046_v32 }
0x2482   : > { %v16468_v16 = vpop.f32.mrb[12].mxu1 }
0x2483   : > { %v16470_v58 = vpop.f32.mrb[13].mxu1 }
0x24c2   : > { %v11256_v54 = vpop.f32.mrb[14].mxu1 }
0x24c3   : > { %v8191_v21 = vmul.f32 0.35355338, %v11256_v54  ;;  %v8181_v36 = vpop.f32.mrb[15].mxu1 }
0x24c4   : > { %v8190_v25 = vmul.f32 0.35355338, %v8181_v36 }
0x24c5   : > { %v8193_v22 = vadd.f32 %v8191_v21, %v16302_v44 }
0x24c6   : > { %v8192_v61 = vadd.f32 %v8190_v25, %v16302_v44 }
0x24c7   : > { %8196 = vmax.xlane.f32.xlu1 %v8193_v22 }
0x24c8   : > { %8194 = vmax.xlane.f32.xlu0 %v8192_v61 }
0x24d8   : > { %13186 = vrot.lane.b32.xlu1 %v16314_v31, %s13506_s25 }
0x24dc   : > { %13201 = vrot.lane.b32.xlu1 %v16326_v23, %s13506_s25 }
0x24de   : > { %13181 = vrot.lane.b32.xlu0 %v16308_v37, %s13506_s25 }
0x24e0   : > { %13211 = vrot.lane.b32.xlu1 %v16276_v56, %s13506_s25 }
0x24e2   : > { %13191 = vrot.lane.b32.xlu0 %v16318_v62, %s13506_s25 }
0x24e4   : > { %13216 = vrot.lane.b32.xlu1 %v16284_v43, %s13506_s25 }
0x24e6   : > { %13196 = vrot.lane.b32.xlu0 %v16324_v20, %s13506_s25 }
0x24ea   : > { %13206 = vrot.lane.b32.xlu0 %v16268_v49, %s13506_s25  ;;  %s16833_s25 = sld [smem:[#allocation24_spill]] }
0x2554   : > { %v8197_v26 = vpop.xlane.xlu1 %8196 }
0x2555   : > { %v8199_v1 = vsub.f32 %v8193_v22, %v8197_v26  ;;  %v8195_v59 = vpop.xlane.xlu0 %8194 }
0x2556   : > { %v8198_v51 = vsub.f32 %v8192_v61, %v8195_v59 }
0x2557   : > { %v8202_v0 = vmul.f32 1.442695, %v8199_v1 }
0x2558   : > { %v8200_v29 = vmul.f32 1.442695, %v8198_v51  ;;  %v13187_v63 = vpop.permute.xlu1 %13186 }
0x2559   : > { %13352 = vpow2.f32 %v8202_v0  ;;  %v13189_v30 = vunpack.i.h.bf16 %v13187_v63  ;;  %v13182_v18 = vpop.permute.xlu0 %13181  ;;  %v13188_v47 = vunpack.i.l.bf16 %v13187_v63 }
0x255a   : > { %13354 = vpow2.f32 %v8200_v29  ;;  %v13184_v13 = vunpack.i.h.bf16 %v13182_v18  ;;  %v13183_v24 = vunpack.i.l.bf16 %v13182_v18 }
0x255b   : > { %v12071_v9 = vpack.c.bf16 %v13189_v30, %v13188_v47 }
0x255c   : > { %v12067_v48 = vpack.c.bf16 %v13184_v13, %v13183_v24  ;;  %v13202_v50 = vpop.permute.xlu1 %13201 }
0x255d   : > { %v13192_v14 = vpop.permute.xlu0 %13191  ;;  %v13204_v42 = vunpack.i.h.bf16 %v13202_v50  ;;  %v13203_v4 = vunpack.i.l.bf16 %v13202_v50 }
0x255e   : > { %v13194_v52 = vunpack.i.h.bf16 %v13192_v14  ;;  %v13193_v53 = vunpack.i.l.bf16 %v13192_v14  ;;  %12068 = vmatprep.subr.bf16.mxu0 %v12067_v48 }
0x255f   : > { %12070 = vmatpush3.bf16.msra.mxu0 %v12067_v48  ;;  %v12083_v45 = vpack.c.bf16 %v13204_v42, %v13203_v4 }
0x2560   : > { %12072 = vmatprep.subr.bf16.mxu0 %v12071_v9  ;;  %v12075_v60 = vpack.c.bf16 %v13194_v52, %v13193_v53  ;;  %v13212_v38 = vpop.permute.xlu1 %13211 }
0x2561   : > { %v13197_v10 = vpop.permute.xlu0 %13196  ;;  %v13214_v7 = vunpack.i.h.bf16 %v13212_v38  ;;  %v13213_v40 = vunpack.i.l.bf16 %v13212_v38 }
0x2562   : > { %v13199_v12 = vunpack.i.h.bf16 %v13197_v10  ;;  %v13198_v57 = vunpack.i.l.bf16 %v13197_v10 }
0x2563   : > { %v13353_v5 = vpop.eup %13352  ;;  %12074 = vmatpush3.bf16.msra.mxu0 %v12071_v9  ;;  %v12091_v46 = vpack.c.bf16 %v13214_v7, %v13213_v40 }
0x2564   : > { %v13355_v17 = vpop.eup %13354  ;;  %8206 = vadd.xlane.f32.xlu0 %v13353_v5  ;;  %12076 = vmatprep.subr.bf16.mxu0 %v12075_v60  ;;  %v12079_v35 = vpack.c.bf16 %v13199_v12, %v13198_v57  ;;  %v13217_v27 = vpop.permute.xlu1 %13216 }
0x2565   : > { %8204 = vadd.xlane.f32.xlu1 %v13355_v17  ;;  %v13207_v8 = vpop.permute.xlu0 %13206  ;;  %v13219_v33 = vunpack.i.h.bf16 %v13217_v27  ;;  %v13218_v39 = vunpack.i.l.bf16 %v13217_v27 }
0x2566   : > { %v13209_v55 = vunpack.i.h.bf16 %v13207_v8  ;;  %v13208_v28 = vunpack.i.l.bf16 %v13207_v8 }
0x2567   : > { %12078 = vmatpush3.bf16.msra.mxu0 %v12075_v60  ;;  %v12095_v32 = vpack.c.bf16 %v13219_v33, %v13218_v39 }
0x2568   : > { %12080 = vmatprep.subr.bf16.mxu0 %v12079_v35  ;;  %v12087_v19 = vpack.c.bf16 %v13209_v55, %v13208_v28 }
0x256b   : > { %12082 = vmatpush3.bf16.msra.mxu0 %v12079_v35 }
0x256c   : > { %12084 = vmatprep.subr.bf16.mxu0 %v12083_v45 }
0x256f   : > { %12086 = vmatpush3.bf16.msra.mxu0 %v12083_v45 }
0x2570   : > { %12088 = vmatprep.subr.bf16.mxu0 %v12087_v19 }
0x2573   : > { %12090 = vmatpush3.bf16.msra.mxu0 %v12087_v19 }
0x2574   : > { %12092 = vmatprep.subr.bf16.mxu0 %v12091_v46 }
0x2576   : > { %13226 = vrot.lane.b32.xlu1 %v16314_v31, %s13508_s29 }
0x2577   : > { %12094 = vmatpush3.bf16.msra.mxu0 %v12091_v46 }
0x2578   : > { %12096 = vmatprep.subr.bf16.mxu0 %v12095_v32 }
0x257a   : > { %13221 = vrot.lane.b32.xlu0 %v16308_v37, %s13508_s29  ;;  %13236 = vrot.lane.b32.xlu1 %v16324_v20, %s13508_s29 }
0x257b   : > { %12098 = vmatpush3.bf16.msra.mxu0 %v12095_v32 }
0x257e   : > { %13231 = vrot.lane.b32.xlu0 %v16318_v62, %s13508_s29  ;;  %13246 = vrot.lane.b32.xlu1 %v16268_v49, %s13508_s29 }
0x2582   : > { %13241 = vrot.lane.b32.xlu0 %v16326_v23, %s13508_s29  ;;  %13256 = vrot.lane.b32.xlu1 %v16284_v43, %s13508_s29 }
0x2586   : > { %13251 = vrot.lane.b32.xlu0 %v16276_v56, %s13508_s29  ;;  %8337 = vrot.lane.b32.xlu1 %v16294_v15, %s13508_s29 }
0x258a   : > { %8335 = vrot.lane.b32.xlu0 %v16292_v41, %s13508_s29  ;;  %s16834_s29 = sld [smem:[#allocation27_spill]] }
0x2590   : > { %s8792_s7 = scalar_lea.vmem %s16834_s29, %s16012_s4  ;;  %s16836_s4 = sld [smem:[#allocation25_spill]] }
0x2591   : > { %s16840_s29 = sld [smem:[#allocation31_spill]] }
0x25f1   : > { %v8207_v54 = vpop.xlane.xlu0 %8206 }
0x25f2   : > { %13356 = vrcp.f32 %v8207_v54  ;;  %v8205_v21 = vpop.xlane.xlu1 %8204 }
0x25f3   : > { %13358 = vrcp.f32 %v8205_v21 }
0x25f5   : > { %v13222_v36 = vpop.permute.xlu0 %13221 }
0x25f6   : > { %v13224_v25 = vunpack.i.h.bf16 %v13222_v36  ;;  %v13223_v22 = vunpack.i.l.bf16 %v13222_v36  ;;  %v13227_v1 = vpop.permute.xlu1 %13226 }
0x25f7   : > { %v13229_v0 = vunpack.i.h.bf16 %v13227_v1  ;;  %v13228_v15 = vunpack.i.l.bf16 %v13227_v1 }
0x25f8   : > { %v12099_v61 = vpack.c.bf16 %v13224_v25, %v13223_v22 }
0x25f9   : > { %v13232_v26 = vpop.permute.xlu0 %13231  ;;  %v12105_v30 = vpack.c.bf16 %v13229_v0, %v13228_v15 }
0x25fa   : > { %12101 = vmatprep.subr.msk.bf16.mxu0 %vm16061_vm11, %v12099_v61  ;;  %v13234_v47 = vunpack.i.h.bf16 %v13232_v26  ;;  %v13233_v13 = vunpack.i.l.bf16 %v13232_v26  ;;  %v13237_v14 = vpop.permute.xlu1 %13236 }
0x25fb   : > { %v13239_v9 = vunpack.i.h.bf16 %v13237_v14  ;;  %v13238_v52 = vunpack.i.l.bf16 %v13237_v14 }
0x25fc   : > { %v13357_v59 = vpop.eup %13356  ;;  %v12111_v48 = vpack.c.bf16 %v13234_v47, %v13233_v13 }
0x25fd   : > { %v13359_v51 = vpop.eup %13358  ;;  %v13242_v29 = vpop.permute.xlu0 %13241  ;;  %v8211_v41 = vmul.f32 %v13357_v59, %v13353_v5  ;;  %v12117_v53 = vpack.c.bf16 %v13239_v9, %v13238_v52 }
0x25fe   : > { %v8209_v63 = vmul.f32 %v13359_v51, %v13355_v17  ;;  %v13244_v10 = vunpack.i.h.bf16 %v13242_v29  ;;  %v13243_v60 = vunpack.i.l.bf16 %v13242_v29  ;;  %v13247_v57 = vpop.permute.xlu1 %13246 }
0x25ff   : > { %v13249_v5 = vunpack.i.h.bf16 %v13247_v57  ;;  %v13248_v50 = vunpack.i.l.bf16 %v13247_v57 }
0x2600   : > { %11289 = vmatprep.mubr.f32.mxu0 %v8209_v63  ;;  %v12123_v12 = vpack.c.bf16 %v13244_v10, %v13243_v60 }
0x2601   : > { %v13252_v18 = vpop.permute.xlu0 %13251  ;;  %11290 = vmatmul.mubr.f32.vlgmr.msra.gmra.mrb[34].mxu0 %v8211_v41  ;;  %v12129_v17 = vpack.c.bf16 %v13249_v5, %v13248_v50 }
0x2602   : > { %12104 = vmatpush3.bf16.xpose.msk.msra.mxu0 %vm16061_vm11, %v12099_v61  ;;  %v13254_v42 = vunpack.i.h.bf16 %v13252_v18  ;;  %v13253_v4 = vunpack.i.l.bf16 %v13252_v18  ;;  %v13257_v8 = vpop.permute.xlu1 %13256 }
0x2603   : > { %12107 = vmatprep.subr.msk.bf16.mxu0 %vm16061_vm11, %v12105_v30  ;;  %v13259_v38 = vunpack.i.h.bf16 %v13257_v8  ;;  %v13258_v45 = vunpack.i.l.bf16 %v13257_v8  ;;  %v7472_v8 = vld [vmem:[%s7470_s18 + $0x8] sm:$0xff] }
0x2604   : > { %v12135_v35 = vpack.c.bf16 %v13254_v42, %v13253_v4 }
0x2605   : > { %v8336_v24 = vpop.permute.xlu0 %8335  ;;  %v12141_v55 = vpack.c.bf16 %v13259_v38, %v13258_v45  ;;  %v7473_v38 = vld [vmem:[%s7470_s18 + $0x10] sm:$0xff] }
0x2606   : > { %11324 = vmatprep.mubr.msk.f32.mxu0 %vm6195_vm10, %v8336_v24  ;;  %v8338_v28 = vpop.permute.xlu1 %8337 }
0x260a   : > { %12110 = vmatpush3.bf16.xpose.msk.msra.mxu0 %vm16061_vm11, %v12105_v30 }
0x260b   : > { %12113 = vmatprep.subr.msk.bf16.mxu0 %vm16061_vm11, %v12111_v48 }
0x2612   : > { %12116 = vmatpush3.bf16.xpose.msk.msra.mxu0 %vm16061_vm11, %v12111_v48 }
0x2613   : > { %12119 = vmatprep.subr.msk.bf16.mxu0 %vm16061_vm11, %v12117_v53 }
0x261a   : > { %12122 = vmatpush3.bf16.xpose.msk.msra.mxu0 %vm16061_vm11, %v12117_v53 }
0x261b   : > { %12125 = vmatprep.subr.msk.bf16.mxu0 %vm16061_vm11, %v12123_v12 }
0x2622   : > { %12128 = vmatpush3.bf16.xpose.msk.msra.mxu0 %vm16061_vm11, %v12123_v12 }
0x2623   : > { %12131 = vmatprep.subr.msk.bf16.mxu0 %vm16061_vm11, %v12129_v17 }
0x262a   : > { %12134 = vmatpush3.bf16.xpose.msk.msra.mxu0 %vm16061_vm11, %v12129_v17 }
0x262b   : > { %12137 = vmatprep.subr.msk.bf16.mxu0 %vm16061_vm11, %v12135_v35 }
0x2632   : > { %12140 = vmatpush3.bf16.xpose.msk.msra.mxu0 %vm16061_vm11, %v12135_v35  ;;  %v7471_v35 = vld [vmem:[%s7470_s18] sm:$0xff] }
0x2633   : > { %12143 = vmatprep.subr.msk.bf16.mxu0 %vm16061_vm11, %v12141_v55  ;;  %v12179_v45 = vpack.c.bf16 %v7472_v8, %v7471_v35 }
0x263a   : > { %12146 = vmatpush3.bf16.xpose.msk.msra.mxu0 %vm16061_vm11, %v12141_v55  ;;  %v7474_v55 = vld [vmem:[%s7470_s18 + $0x18] sm:$0xff]  ;;  %s16838_s18 = sld [smem:[#allocation28_spill]] }
0x2641   : > { %11325 = vmatmul.mubr.msk.f32.vlgmr.msra.gmra.mrb[36].mxu0 %vm6195_vm10, %v8338_v28  ;;  %v12183_v28 = vpack.c.bf16 %v7474_v55, %v7473_v38 }
0x26d4   : > { %v16544_v7 = vpop.f32.mrb[34].mxu0 }
0x26d5   : > { %v16546_v40 = vpop.f32.mrb[35].mxu0 }
0x2714   : > { %v11326_v19 = vpop.f32.mrb[36].mxu0 }
0x2715   : > { %v8483_v27 = vmul.f32 0.35355338, %v11326_v19  ;;  %v8473_v46 = vpop.f32.mrb[37].mxu0 }
0x2716   : > { %v8482_v33 = vmul.f32 0.35355338, %v8473_v46 }
0x2717   : > { %v8485_v39 = vadd.f32 %v8483_v27, %v16302_v44 }
0x2718   : > { %v8484_v32 = vadd.f32 %v8482_v33, %v16302_v44 }
0x2719   : > { %8488 = vmax.xlane.f32.xlu1 %v8485_v39 }
0x271a   : > { %8486 = vmax.xlane.f32.xlu0 %v8484_v32 }
0x272a   : > { %13266 = vrot.lane.b32.xlu1 %v16314_v31, %s13507_s0 }
0x272e   : > { %13276 = vrot.lane.b32.xlu1 %v16324_v20, %s13507_s0 }
0x2730   : > { %13261 = vrot.lane.b32.xlu0 %v16308_v37, %s13507_s0 }
0x2732   : > { %13286 = vrot.lane.b32.xlu1 %v16268_v49, %s13507_s0 }
0x2734   : > { %13271 = vrot.lane.b32.xlu0 %v16318_v62, %s13507_s0 }
0x2738   : > { %13281 = vrot.lane.b32.xlu0 %v16326_v23, %s13507_s0 }
0x27a6   : > { %v8489_v11 = vpop.xlane.xlu1 %8488 }
0x27a7   : > { %v8491_v44 = vsub.f32 %v8485_v39, %v8489_v11  ;;  %v8487_v54 = vpop.xlane.xlu0 %8486 }
0x27a8   : > { %v8490_v21 = vsub.f32 %v8484_v32, %v8487_v54 }
0x27a9   : > { %v8494_v31 = vmul.f32 1.442695, %v8491_v44 }
0x27aa   : > { %v8492_v36 = vmul.f32 1.442695, %v8490_v21  ;;  %v13267_v25 = vpop.permute.xlu1 %13266 }
0x27ab   : > { %13360 = vpow2.f32 %v8494_v31  ;;  %v13269_v20 = vunpack.i.h.bf16 %v13267_v25  ;;  %v13262_v22 = vpop.permute.xlu0 %13261  ;;  %v13268_v37 = vunpack.i.l.bf16 %v13267_v25 }
0x27ac   : > { %13362 = vpow2.f32 %v8492_v36  ;;  %v13264_v61 = vunpack.i.h.bf16 %v13262_v22  ;;  %v13263_v49 = vunpack.i.l.bf16 %v13262_v22 }
0x27ad   : > { %v12151_v62 = vpack.c.bf16 %v13269_v20, %v13268_v37 }
0x27ae   : > { %v12147_v26 = vpack.c.bf16 %v13264_v61, %v13263_v49  ;;  %v13277_v23 = vpop.permute.xlu1 %13276 }
0x27af   : > { %v13272_v1 = vpop.permute.xlu0 %13271  ;;  %v13279_v0 = vunpack.i.h.bf16 %v13277_v23  ;;  %v13278_v15 = vunpack.i.l.bf16 %v13277_v23 }
0x27b0   : > { %v13274_v59 = vunpack.i.h.bf16 %v13272_v1  ;;  %v13273_v51 = vunpack.i.l.bf16 %v13272_v1  ;;  %12148 = vmatprep.subr.bf16.mxu1 %v12147_v26 }
0x27b1   : > { %12150 = vmatpush3.bf16.msra.mxu1 %v12147_v26  ;;  %v12159_v18 = vpack.c.bf16 %v13279_v0, %v13278_v15 }
0x27b2   : > { %12152 = vmatprep.subr.bf16.mxu1 %v12151_v62  ;;  %v12155_v29 = vpack.c.bf16 %v13274_v59, %v13273_v51  ;;  %v13287_v24 = vpop.permute.xlu1 %13286 }
0x27b3   : > { %v13282_v41 = vpop.permute.xlu0 %13281  ;;  %v13289_v48 = vunpack.i.h.bf16 %v13287_v24  ;;  %v13288_v14 = vunpack.i.l.bf16 %v13287_v24  ;;  %v8890_v24 = vld [vmem:[%s16600_s28] sm:$0xff] }
0x27b4   : > { %v13284_v47 = vunpack.i.h.bf16 %v13282_v41  ;;  %v13283_v13 = vunpack.i.l.bf16 %v13282_v41  ;;  %v8794_v41 = vld [vmem:[%s8792_s7 + $0x8] sm:$0xff] }
0x27b5   : > { %v13361_v63 = vpop.eup %13360  ;;  %12154 = vmatpush3.bf16.msra.mxu1 %v12151_v62  ;;  %v12167_v52 = vpack.c.bf16 %v13289_v48, %v13288_v14  ;;  %v8891_v48 = vld [vmem:[%s16600_s28 + $0x8] sm:$0xff]  ;;  %v8892_v14 = vld [vmem:[%s16600_s28 + $0x10] sm:$0xff] }
0x27b6   : > { %v13363_v30 = vpop.eup %13362  ;;  %8498 = vadd.xlane.f32.xlu1 %v13361_v63  ;;  %12156 = vmatprep.subr.bf16.mxu1 %v12155_v29  ;;  %v12163_v9 = vpack.c.bf16 %v13284_v47, %v13283_v13  ;;  %v8796_v47 = vld [vmem:[%s8792_s7 + $0x18] sm:$0xff] }
0x27b7   : > { %8496 = vadd.xlane.f32.xlu0 %v13363_v30 }
0x27b9   : > { %12158 = vmatpush3.bf16.msra.mxu1 %v12155_v29 }
0x27ba   : > { %12160 = vmatprep.subr.bf16.mxu1 %v12159_v18 }
0x27bd   : > { %12162 = vmatpush3.bf16.msra.mxu1 %v12159_v18  ;;  %v8795_v18 = vld [vmem:[%s8792_s7 + $0x10] sm:$0xff] }
0x27be   : > { %12164 = vmatprep.subr.bf16.mxu1 %v12163_v9  ;;  %v12191_v13 = vpack.c.bf16 %v8796_v47, %v8795_v18 }
0x27c1   : > { %12166 = vmatpush3.bf16.msra.mxu1 %v12163_v9  ;;  %v12195_v9 = vpack.c.bf16 %v8891_v48, %v8890_v24  ;;  %v9705_v24 = vld [vmem:[%s8992_s1] ss:$0 sm:$0xff] }
0x27c2   : > { %12168 = vmatprep.subr.bf16.mxu1 %v12167_v52 }
0x27c5   : > { %12170 = vmatpush3.bf16.msra.mxu1 %v12167_v52  ;;  %v8893_v52 = vld [vmem:[%s16600_s28 + $0x18] sm:$0xff] }
0x27c7   : > { %13296 = vrot.lane.b32.xlu1 %v16284_v43, %s13507_s0 }
0x27cb   : > { %8631 = vrot.lane.b32.xlu1 %v16468_v16, %s16829_s23 }
0x27cd   : > { %13291 = vrot.lane.b32.xlu0 %v16276_v56, %s13507_s0  ;;  %s7475_s0 = scalar_lea.vmem %s16833_s25, %s16816_s15  ;;  %s8797_s25 = scalar_lea.vmem %s16838_s18, %s16816_s15 }
0x27ce   : > { %v9692_v25 = vld [vmem:[%s7475_s0] ss:$0 sm:$0xff] }
0x27cf   : > { %8639 = vrot.lane.b32.xlu1 %v16544_v7, %s16830_s10 }
0x27d1   : > { %8629 = vrot.lane.b32.xlu0 %v16470_v58, %s16829_s23  ;;  %s16837_s23 = sld [smem:[#allocation26_spill]] }
0x27d5   : > { %8637 = vrot.lane.b32.xlu0 %v16546_v40, %s16830_s10  ;;  %s8746_s10 = scalar_lea.vmem %s16836_s4, %s16816_s15 }
0x27d7   : > { %s8748_s16 = scalar_lea.vmem %s16837_s23, %s16816_s15 }
0x2843   : > { %v8499_v53 = vpop.xlane.xlu1 %8498 }
0x2844   : > { %v8497_v10 = vpop.xlane.xlu0 %8496 }
0x2845   : > { %13364 = vrcp.f32 %v8497_v10  ;;  %v8894_v10 = vld [vmem:[%s16600_s28 + $0x20] sm:$0xff] }
0x2846   : > { %13366 = vrcp.f32 %v8499_v53  ;;  %v12199_v53 = vpack.c.bf16 %v8893_v52, %v8892_v14 }
0x2847   : > { %v13297_v43 = vpop.permute.xlu1 %13296 }
0x2848   : > { %v13292_v60 = vpop.permute.xlu0 %13291  ;;  %v13299_v12 = vunpack.i.h.bf16 %v13297_v43  ;;  %v13298_v16 = vunpack.i.l.bf16 %v13297_v43  ;;  %v8895_v43 = vld [vmem:[%s16600_s28 + $0x28] sm:$0xff] }
0x2849   : > { %v13294_v56 = vunpack.i.h.bf16 %v13292_v60  ;;  %v13293_v57 = vunpack.i.l.bf16 %v13292_v60  ;;  %v12203_v60 = vpack.c.bf16 %v8895_v43, %v8894_v10 }
0x284a   : > { %v12175_v50 = vpack.c.bf16 %v13299_v12, %v13298_v16 }
0x284b   : > { %v12171_v5 = vpack.c.bf16 %v13294_v56, %v13293_v57  ;;  %v8632_v19 = vpop.permute.xlu1 %8631 }
0x284c   : > { %v8630_v27 = vpop.permute.xlu0 %8629  ;;  %v8652_v11 = vsel %vm6195_vm10, %v16392_v6, %v8632_v19 }
0x284d   : > { %12172 = vmatprep.subr.bf16.mxu1 %v12171_v5  ;;  %v8651_v39 = vsel %vm6195_vm10, %v16394_v34, %v8630_v27  ;;  %v9697_v27 = vld [vmem:[%s8797_s25] ss:$0 sm:$0xff] }
0x284e   : > { %12174 = vmatpush3.bf16.msra.mxu1 %v12171_v5 }
0x284f   : > { %v13365_v58 = vpop.eup %13364  ;;  %12176 = vmatprep.subr.bf16.mxu1 %v12175_v50  ;;  %v8640_v46 = vpop.permute.xlu1 %8639 }
0x2850   : > { %v13367_v17 = vpop.eup %13366  ;;  %v8501_v42 = vmul.f32 %v13365_v58, %v13363_v30  ;;  %v8638_v33 = vpop.permute.xlu0 %8637  ;;  %v8654_v21 = vsel %vm6283_vm13, %v8652_v11, %v8640_v46 }
0x2851   : > { %v8503_v4 = vmul.f32 %v13367_v17, %v13361_v63  ;;  %v8653_v44 = vsel %vm6283_vm13, %v8651_v39, %v8638_v33  ;;  %v8793_v63 = vld [vmem:[%s8792_s7] sm:$0xff]  ;;  %s8990_s7 = scalar_lea.vmem %s16840_s29, %s16816_s15 }
0x2852   : > { %12178 = vmatpush3.bf16.msra.mxu1 %v12175_v50  ;;  %11359 = vmatprep.mubr.f32.mxu1 %v8501_v42  ;;  %v12187_v30 = vpack.c.bf16 %v8794_v41, %v8793_v63  ;;  %v9695_v17 = vld [vmem:[%s8746_s10] ss:$0 sm:$0xff] }
0x2853   : > { %12180 = vmatprep.subr.bf16.mxu1 %v12179_v45  ;;  %v9704_v18 = vld [vmem:[%s8990_s7] ss:$0 sm:$0xff] }
0x2854   : > { %12188 = vmatprep.subr.bf16.mxu0 %v12187_v30 }
0x2855   : > { %11360 = vmatmul.mubr.f32.vlgmr.msra.gmra.mrb[16].mxu1 %v8503_v4  ;;  %12190 = vmatpush3.bf16.msra.mxu0 %v12187_v30  ;;  %v9696_v4 = vld [vmem:[%s8748_s16] ss:$0 sm:$0xff] }
0x2856   : > { %12182 = vmatpush3.bf16.msra.mxu1 %v12179_v45  ;;  %12192 = vmatprep.subr.bf16.mxu0 %v12191_v13 }
0x2857   : > { %12184 = vmatprep.subr.bf16.mxu1 %v12183_v28 }
0x2859   : > { %12194 = vmatpush3.bf16.msra.mxu0 %v12191_v13 }
0x285a   : > { %12186 = vmatpush3.bf16.msra.mxu1 %v12183_v28 }
0x285b   : > { %12196 = vmatprep.subr.bf16.mxu1 %v12195_v9 }
0x2928   : > { %v11361_v7 = vpop.f32.mrb[16].mxu1 }
0x2929   : > { %8647 = vrot.lane.b32.xlu1 %v11361_v7, %s16832_s26  ;;  %v8618_v40 = vpop.f32.mrb[17].mxu1  ;;  %v8896_v7 = vld [vmem:[%s16600_s28 + $0x30] sm:$0xff] }
0x292a   : > { %8645 = vrot.lane.b32.xlu0 %v8618_v40, %s16832_s26  ;;  %s16839_s26 = sld [smem:[#allocation30_spill]]  ;;  %v8897_v40 = vld [vmem:[%s16600_s28 + $0x38] sm:$0xff] }
0x292b   : > { %v12207_v19 = vpack.c.bf16 %v8897_v40, %v8896_v7 }
0x2930   : > { %s8898_s0 = scalar_lea.vmem %s16839_s26, %s16816_s15 }
0x299b   : > { %v8648_v32 = vpop.permute.xlu1 %8647 }
0x299c   : > { %v8646_v54 = vpop.permute.xlu0 %8645  ;;  %v8656_v36 = vsel %vm7029_vm14, %v8654_v21, %v8648_v32 }
0x299d   : > { %v8655_v31 = vsel %vm7029_vm14, %v8653_v44, %v8646_v54  ;;  %v9701_v54 = vld [vmem:[%s8898_s0] ss:$0 sm:$0xff] }
0x299e   : > { %11370 = vmatprep.mubr.msk.f32.mxu1 %vm6000_vm9, %v8655_v31 }
0x299f   : > { %11371 = vmatmul.mubr.msk.f32.vlgmr.msra.gmra.mrb[18].mxu1 %vm6000_vm9, %v8656_v36 }
0x29a0   : > { %12198 = vmatpush3.bf16.msra.mxu1 %v12195_v9 }
0x29a1   : > { %12200 = vmatprep.subr.bf16.mxu1 %v12199_v53 }
0x29a4   : > { %12202 = vmatpush3.bf16.msra.mxu1 %v12199_v53 }
0x29a5   : > { %12204 = vmatprep.subr.bf16.mxu1 %v12203_v60 }
0x29a8   : > { %12206 = vmatpush3.bf16.msra.mxu1 %v12203_v60 }
0x29a9   : > { %12208 = vmatprep.subr.bf16.mxu1 %v12207_v19 }
0x29ac   : > { %12210 = vmatpush3.bf16.msra.mxu1 %v12207_v19 }
0x2a72   : > { %v11372_v34 = vpop.f32.mrb[18].mxu1 }
0x2a73   : > { %v8741_v20 = vadd.f32 %v11372_v34, %v9692_v25  ;;  %v8735_v22 = vpop.f32.mrb[19].mxu1 }
0x2a74   : > { %v8736_v37 = vadd.f32 %v9692_v25, %v8735_v22 }
0x2a75   : > { %v8745_v6 = vadd.f32 %v8741_v20, %v16228_v3 }
0x2a76   : > { %v8744_v61 = vadd.f32 %v8736_v37, %v16218_v2 }
0x2a77   : > { %v8753_v49 = vsel %vm6000_vm9, %v8745_v6, 0.0 }
0x2a78   : > { %8754 = vadd.xlane.f32.xlu1 %v8753_v49  ;;  %v8750_v26 = vsel %vm6000_vm9, %v8744_v61, 0.0 }
0x2a79   : > { %8751 = vadd.xlane.f32.xlu0 %v8750_v26 }
0x2b05   : > { %v8755_v1 = vpop.xlane.xlu1 %8754 }
0x2b06   : > { %v8757_v62 = vmul.f32 0.03125, %v8755_v1  ;;  %v8752_v59 = vpop.xlane.xlu0 %8751 }
0x2b07   : > { %v8756_v51 = vmul.f32 0.03125, %v8752_v59 }
0x2b08   : > { %v8759_v23 = vsub.f32 %v8745_v6, %v8757_v62 }
0x2b09   : > { %v8758_v0 = vsub.f32 %v8744_v61, %v8756_v51 }
0x2b0a   : > { %v8761_v3 = vmul.f32 %v8759_v23, %v8759_v23 }
0x2b0b   : > { %v8760_v15 = vmul.f32 %v8758_v0, %v8758_v0 }
0x2b0c   : > { %v8765_v2 = vsel %vm6000_vm9, %v8761_v3, 0.0 }
0x2b0d   : > { %v8762_v29 = vsel %vm6000_vm9, %v8760_v15, 0.0 }
0x2b0e   : > { %8763 = vadd.xlane.f32.xlu0 %v8762_v29 }
0x2b12   : > { %8766 = vadd.xlane.f32.xlu0 %v8765_v2 }
0x2b9b   : > { %v8764_v12 = vpop.xlane.xlu0 %8763 }
0x2b9c   : > { %v8768_v16 = vmul.f32 0.03125, %v8764_v12 }
0x2b9e   : > { %v8770_v56 = vadd.f32 1e-05, %v8768_v16 }
0x2b9f   : > { %v8767_v57 = vpop.xlane.xlu0 %8766 }
0x2ba0   : > { %13368 = vrsqrt.f32 %v8770_v56  ;;  %v8769_v5 = vmul.f32 0.03125, %v8767_v57 }
0x2ba2   : > { %v8771_v50 = vadd.f32 1e-05, %v8769_v5 }
0x2ba4   : > { %13370 = vrsqrt.f32 %v8771_v50 }
0x2baa   : > { %v13369_v58 = vpop.eup %13368 }
0x2bab   : > { %v8774_v42 = vmul.f32 %v13369_v58, %v8758_v0 }
0x2bad   : > { %v8782_v35 = vmul.f32 %v9695_v17, %v8774_v42 }
0x2bae   : > { %v13371_v8 = vpop.eup %13370 }
0x2baf   : > { %v8775_v38 = vmul.f32 %v13371_v8, %v8759_v23  ;;  %v8790_v45 = vadd.f32 %v9696_v4, %v8782_v35 }
0x2bb1   : > { %v8783_v55 = vmul.f32 %v9695_v17, %v8775_v38  ;;  %11381 = vmatprep.mubr.msk.f32.mxu0 %vm6000_vm9, %v8790_v45 }
0x2bb3   : > { %v8791_v28 = vadd.f32 %v9696_v4, %v8783_v55 }
0x2bb5   : > { %11382 = vmatmul.mubr.msk.f32.vlgmr.msra.gmra.mrb[38].mxu0 %vm6000_vm9, %v8791_v28 }
0x2c88   : > { %v11383_v46 = vpop.f32.mrb[38].mxu0 }
0x2c89   : > { %v8883_v33 = vadd.f32 %v11383_v46, %v9697_v27  ;;  %v8877_v39 = vpop.f32.mrb[39].mxu0 }
0x2c8a   : > { %v8878_v32 = vadd.f32 %v9697_v27, %v8877_v39 }
0x2c8b   : > { %v8887_v44 = vmax.f32 %v8883_v33, 0.0 }
0x2c8c   : > { %v8886_v11 = vmax.f32 %v8878_v32, 0.0 }
0x2c8e   : > { %11400 = vmatprep.mubr.msk.f32.mxu1 %vm8906_vm15, %v8886_v11 }
0x2c8f   : > { %11401 = vmatmul.mubr.msk.f32.vlgmr.msra.gmra.mrb[20].mxu1 %vm8906_vm15, %v8887_v44 }
0x2d62   : > { %v11402_v21 = vpop.f32.mrb[20].mxu1 }
0x2d63   : > { %v8985_v31 = vadd.f32 %v11402_v21, %v9701_v54  ;;  %v8979_v36 = vpop.f32.mrb[21].mxu1 }
0x2d64   : > { %v8980_v25 = vadd.f32 %v9701_v54, %v8979_v36 }
0x2d65   : > { %v8989_v34 = vadd.f32 %v8985_v31, %v8791_v28 }
0x2d66   : > { %v8988_v20 = vadd.f32 %v8980_v25, %v8790_v45 }
0x2d67   : > { %v8997_v22 = vsel %vm6000_vm9, %v8989_v34, 0.0 }
0x2d68   : > { %8998 = vadd.xlane.f32.xlu0 %v8997_v22  ;;  %v8994_v37 = vsel %vm6000_vm9, %v8988_v20, 0.0 }
0x2d69   : > { %8995 = vadd.xlane.f32.xlu1 %v8994_v37 }
0x2df5   : > { %v8999_v6 = vpop.xlane.xlu0 %8998 }
0x2df6   : > { %v9001_v61 = vmul.f32 0.03125, %v8999_v6  ;;  %v8996_v49 = vpop.xlane.xlu1 %8995 }
0x2df7   : > { %v9000_v26 = vmul.f32 0.03125, %v8996_v49 }
0x2df8   : > { %v9003_v1 = vsub.f32 %v8989_v34, %v9001_v61 }
0x2df9   : > { %v9002_v62 = vsub.f32 %v8988_v20, %v9000_v26 }
0x2dfa   : > { %v9005_v59 = vmul.f32 %v9003_v1, %v9003_v1 }
0x2dfb   : > { %v9004_v51 = vmul.f32 %v9002_v62, %v9002_v62 }
0x2dfc   : > { %v9009_v23 = vsel %vm6000_vm9, %v9005_v59, 0.0 }
0x2dfd   : > { %9010 = vadd.xlane.f32.xlu0 %v9009_v23  ;;  %v9006_v0 = vsel %vm6000_vm9, %v9004_v51, 0.0 }
0x2dfe   : > { %9007 = vadd.xlane.f32.xlu1 %v9006_v0 }
0x2e8a   : > { %v9011_v15 = vpop.xlane.xlu0 %9010 }
0x2e8b   : > { %v9013_v29 = vmul.f32 0.03125, %v9011_v15  ;;  %v9008_v3 = vpop.xlane.xlu1 %9007 }
0x2e8c   : > { %v9012_v2 = vmul.f32 0.03125, %v9008_v3 }
0x2e8d   : > { %v9015_v63 = vadd.f32 1e-05, %v9013_v29 }
0x2e8e   : > { %v9014_v41 = vadd.f32 1e-05, %v9012_v2 }
0x2e8f   : > { %13372 = vrsqrt.f32 %v9015_v63 }
0x2e90   : > { %13374 = vrsqrt.f32 %v9014_v41 }
0x2e99   : > { %v13373_v30 = vpop.eup %13372 }
0x2e9a   : > { %v13375_v47 = vpop.eup %13374  ;;  %v9019_v13 = vmul.f32 %v13373_v30, %v9003_v1 }
0x2e9b   : > { %v9018_v48 = vmul.f32 %v13375_v47, %v9002_v62 }
0x2e9c   : > { %v9027_v14 = vmul.f32 %v9704_v18, %v9019_v13 }
0x2e9d   : > { %v9026_v9 = vmul.f32 %v9704_v18, %v9018_v48 }
0x2e9e   : > { %v9035_v52 = vadd.f32 %v9705_v24, %v9027_v14 }
0x2e9f   : > { %v9034_v53 = vadd.f32 %v9705_v24, %v9026_v9 }
0x2ea0   : > { %9037 = vst.msk [vmem:[#allocation3 + $0x8] sm:$0xff] %vm6000_vm9, %v9035_v52  ;;  %9039 = vst.msk [vmem:[%s13814_s11 + $0x8] sm:$0xff] %vm6000_vm9, %v9035_v52 }
0x2ea1   : > { %9036 = vst.msk [vmem:[#allocation3] sm:$0xff] %vm6000_vm9, %v9034_v53  ;;  %9038 = vst.msk [vmem:[%s13814_s11] sm:$0xff] %vm6000_vm9, %v9034_v53 }
0x2ea2 PF: > { %s16842_s15 = sld [smem:[#allocation35_spill]]  ;;  %s16843_s28 = sld [smem:[#allocation33_spill]] }
0x2ea3   : > { %s16844_s1 = sld [smem:[#allocation34_spill]]  ;;  %s16845_s2 = sld [smem:[#allocation36_spill]] }
0x2ea4   : > { %s16846_s7 = sld [smem:[#allocation37_spill]] }
0x2ea8   : > { %s93_s10 = sadd.s32 1, %s16842_s15  }
0x2ea9   : > { %p90_p0 = scmp.ge.s32.totalorder %s93_s10, 10  }
0x2eab   :  { %92 = sbr.rel (!%p90_p0) target bundleno = 77 (0x4d), region = 323 }
0x2eb2   :  { %9094 = vsyncpa [#allocation5], 1 }
0x2eb3   :  { %9096 = vsyncpa [#allocation5 + $0x1], 1 }

</bundles_post_ra>
